<compile_context>
chip_gen: v5e
topology: v5e:2x2
jax: 0.10.0
libtpu: 0.0.40
codegen_flags: <defaults>
</compile_context>

<pallas_src>
import functools
import math

import jax
import jax.numpy as jnp
from jax import lax
from jax.experimental import pallas as pl
from jax.experimental.pallas import tpu as pltpu


def _mlp_kernel(*refs, layer_is_skip):
    """refs = (x_ref, z_ref, *param_refs, o_ref)."""
    x_ref, z_ref = refs[0], refs[1]
    o_ref = refs[-1]
    param_refs = refs[2:-1]

    y = x_ref[...].astype(jnp.float32)            # (TM, D_in)
    z = z_ref[...].astype(jnp.float32)            # (TM, D_skip)

    pi = 0
    for is_skip in layer_is_skip:
        if is_skip:
            w_y = param_refs[pi][...]             # (hidden, dout)
            w_z = param_refs[pi + 1][...]         # (skip,   dout)
            b = param_refs[pi + 2][...]           # (1,      dout)
            pi += 3
            acc = jnp.dot(y, w_y, preferred_element_type=jnp.float32,
                          precision=lax.Precision.HIGHEST)
            acc = acc + jnp.dot(z, w_z, preferred_element_type=jnp.float32,
                                precision=lax.Precision.HIGHEST)
        else:
            w = param_refs[pi][...]               # (din, dout)
            b = param_refs[pi + 1][...]           # (1,   dout)
            pi += 2
            acc = jnp.dot(y, w, preferred_element_type=jnp.float32,
                          precision=lax.Precision.HIGHEST)
        y = jnp.maximum(acc + b, 0.0)             # Linear + ReLU(inplace)
    o_ref[...] = y.astype(o_ref.dtype)


def mlp_with_input_skips(x, z, params, input_skips=(), *, tile_rows=512):
    """Pallas TPU forward of MLPWithInputSkips (mode='skip').

    params      : list of (w, b) per layer, w: (d_in_layer, d_out_layer), b: (d_out_layer,)
    input_skips : layer indices at which z is concatenated before the Linear.
    """
    assert tile_rows % 8 == 0, "tile_rows must be a multiple of 8"
    input_skips = set(input_skips)

    x = jnp.asarray(x, jnp.float32)
    z = jnp.asarray(z, jnp.float32)
    *batch_dims, d_in = x.shape
    d_skip = z.shape[-1]
    n = int(math.prod(batch_dims)) if batch_dims else 1
    x2 = x.reshape(n, d_in)
    z2 = z.reshape(n, d_skip)

    # Row tile: as large as possible (amortize ~0.35us/step overhead), multiple
    # of 8, never larger than the array.  Ragged last tile handled by Pallas —
    # no wrapper-side pad or output slice (extra HBM passes).
    tm = n if n <= tile_rows else tile_rows
    grid = (pl.cdiv(n, tm),)

    flat_inputs = [x2, z2]
    in_specs = [
        pl.BlockSpec((tm, d_in), lambda i: (i, 0)),
        pl.BlockSpec((tm, d_skip), lambda i: (i, 0)),
    ]
    layer_is_skip = []
    for li, (w, b) in enumerate(params):
        w = jnp.asarray(w, jnp.float32)
        dout = w.shape[1]
        b2 = jnp.asarray(b, jnp.float32).reshape(1, dout)   # 2-D bias (lane-major)
        if li in input_skips:
            # Pre-split the skip-layer weight -> no concat inside the kernel.
            h_in = w.shape[0] - d_skip
            w_y, w_z = w[:h_in], w[h_in:]
            flat_inputs += [w_y, w_z, b2]
            in_specs += [
                pl.BlockSpec(w_y.shape, lambda i: (0, 0)),
                pl.BlockSpec(w_z.shape, lambda i: (0, 0)),
                pl.BlockSpec(b2.shape, lambda i: (0, 0)),
            ]
            layer_is_skip.append(True)
        else:
            flat_inputs += [w, b2]
            in_specs += [
                pl.BlockSpec(w.shape, lambda i: (0, 0)),
                pl.BlockSpec(b2.shape, lambda i: (0, 0)),
            ]
            layer_is_skip.append(False)

    d_out = int(params[-1][0].shape[1])
    kernel = functools.partial(_mlp_kernel, layer_is_skip=tuple(layer_is_skip))

    out = pl.pallas_call(
        kernel,
        out_shape=jax.ShapeDtypeStruct((n, d_out), jnp.float32),
        grid_spec=pl.GridSpec(
            grid=grid,
            in_specs=in_specs,
            out_specs=pl.BlockSpec((tm, d_out), lambda i: (i, 0)),
        ),
        compiler_params=pltpu.CompilerParams(
            dimension_semantics=("parallel",),
        ),
    )(*flat_inputs)

    return out.reshape(*batch_dims, d_out)


def _reference(x, z, params, input_skips):
    """Pure-JAX replica of MLPWithInputSkips.forward (mode='skip')."""
    y = jnp.asarray(x, jnp.float32)
    z = jnp.asarray(z, jnp.float32)
    for li, (w, b) in enumerate(params):
        if li in input_skips:
            y = jnp.concatenate([y, z], axis=-1)
        y = jnp.matmul(y, w, precision=lax.Precision.HIGHEST) + b
        y = jnp.maximum(y, 0.0)
    return y


def _build_params(key, n_layers, input_dim, skip_dim, hidden_dim, input_skips):
    """Xavier-uniform weights + torch-default uniform biases (deterministic)."""
    params = []
    keys = jax.random.split(key, 2 * n_layers)
    skips = set(input_skips)
    for li in range(n_layers):
        if li == 0:
            din, dout = input_dim, hidden_dim
        elif li in skips:
            din, dout = hidden_dim + skip_dim, hidden_dim
        else:
            din, dout = hidden_dim, hidden_dim
        limit = math.sqrt(6.0 / (din + dout))                    # xavier_uniform_
        w = jax.random.uniform(keys[2 * li], (din, dout), jnp.float32,
                               minval=-limit, maxval=limit)
        bbound = 1.0 / math.sqrt(din)                            # torch Linear bias default
        b = jax.random.uniform(keys[2 * li + 1], (dout,), jnp.float32,
                               minval=-bbound, maxval=bbound)
        params.append((w, b))
    return params


if __name__ == "__main__":
    key = jax.random.PRNGKey(0)
    kp, kx, kz = jax.random.split(key, 3)

    # Small NeRF-style config: 4 layers, skip-connection of z at layer 2.
    n_layers = 4
    input_dim = 64
    skip_dim = 64
    hidden_dim = 128          # lane-dense output (multiple of 128)
    input_skips = (2,)

    params = _build_params(kp, n_layers, input_dim, skip_dim, hidden_dim, input_skips)

    x = jax.random.normal(kx, (2, 16, 16, input_dim), dtype=jnp.float32)
    z = jax.random.normal(kz, (2, 16, 16, skip_dim), dtype=jnp.float32)

    # 512 rows total; tile_rows=256 -> 2 parallel grid tiles (fills both v7x TCs).
    out = mlp_with_input_skips(x, z, params, input_skips, tile_rows=256)
    out = jax.block_until_ready(out)

    ref = _reference(x, z, params, set(input_skips))
    assert out.shape == ref.shape == (2, 16, 16, hidden_dim), out.shape
    assert jnp.allclose(out, ref, atol=1e-3, rtol=1e-3), "mismatch vs reference"

    print("KERNEL_OK")
</pallas_src>

<mosaic_0001>
module attributes {stable_mosaic.version = 11 : i64} {
  func.func @_mlp_kernel(%arg0: i32, %arg1: memref<256x64xf32, #tpu.memory_space<vmem>>, %arg2: memref<256x64xf32, #tpu.memory_space<vmem>>, %arg3: memref<64x128xf32, #tpu.memory_space<vmem>>, %arg4: memref<1x128xf32, #tpu.memory_space<vmem>>, %arg5: memref<128x128xf32, #tpu.memory_space<vmem>>, %arg6: memref<1x128xf32, #tpu.memory_space<vmem>>, %arg7: memref<128x128xf32, #tpu.memory_space<vmem>>, %arg8: memref<64x128xf32, #tpu.memory_space<vmem>>, %arg9: memref<1x128xf32, #tpu.memory_space<vmem>>, %arg10: memref<128x128xf32, #tpu.memory_space<vmem>>, %arg11: memref<1x128xf32, #tpu.memory_space<vmem>>, %arg12: memref<256x128xf32, #tpu.memory_space<vmem>>) attributes {dimension_semantics = [#tpu.dimension_semantics<parallel>], iteration_bounds = array<i64: 2>, scalar_prefetch = 0 : i64, scratch_operands = 0 : i64, tpu.core_type = #tpu.core_type<tc>, window_params = [{transform_indices = @transform_0, window_bounds = array<i64: 256, 64>}, {transform_indices = @transform_1, window_bounds = array<i64: 256, 64>}, {pipeline_mode = #tpu.pipeline_mode<synchronous>, transform_indices = @transform_2, window_bounds = array<i64: 64, 128>}, {pipeline_mode = #tpu.pipeline_mode<synchronous>, transform_indices = @transform_3, window_bounds = array<i64: 1, 128>}, {pipeline_mode = #tpu.pipeline_mode<synchronous>, transform_indices = @transform_4, window_bounds = array<i64: 128, 128>}, {pipeline_mode = #tpu.pipeline_mode<synchronous>, transform_indices = @transform_5, window_bounds = array<i64: 1, 128>}, {pipeline_mode = #tpu.pipeline_mode<synchronous>, transform_indices = @transform_6, window_bounds = array<i64: 128, 128>}, {pipeline_mode = #tpu.pipeline_mode<synchronous>, transform_indices = @transform_7, window_bounds = array<i64: 64, 128>}, {pipeline_mode = #tpu.pipeline_mode<synchronous>, transform_indices = @transform_8, window_bounds = array<i64: 1, 128>}, {pipeline_mode = #tpu.pipeline_mode<synchronous>, transform_indices = @transform_9, window_bounds = array<i64: 128, 128>}, {pipeline_mode = #tpu.pipeline_mode<synchronous>, transform_indices = @transform_10, window_bounds = array<i64: 1, 128>}, {transform_indices = @transform_11, window_bounds = array<i64: 256, 128>}]} {
    %c0 = arith.constant 0 : index
    %c0_0 = arith.constant 0 : index
    %0 = vector.load %arg1[%c0, %c0_0] : memref<256x64xf32, #tpu.memory_space<vmem>>, vector<256x64xf32>
    %c0_1 = arith.constant 0 : index
    %c0_2 = arith.constant 0 : index
    %1 = vector.load %arg2[%c0_1, %c0_2] : memref<256x64xf32, #tpu.memory_space<vmem>>, vector<256x64xf32>
    %c0_3 = arith.constant 0 : index
    %c0_4 = arith.constant 0 : index
    %2 = vector.load %arg3[%c0_3, %c0_4] : memref<64x128xf32, #tpu.memory_space<vmem>>, vector<64x128xf32>
    %c0_5 = arith.constant 0 : index
    %c0_6 = arith.constant 0 : index
    %3 = vector.load %arg4[%c0_5, %c0_6] : memref<1x128xf32, #tpu.memory_space<vmem>>, vector<1x128xf32>
    %cst = arith.constant dense<0.000000e+00> : vector<256x128xf32>
    %4 = tpu.matmul %0, %2, %cst {dimension_numbers = #tpu.dot_dimension_numbers<[1], [0], [0], [1], [0, 0, 1, 1], [], []>, precision = #tpu.contract_precision<fp32>} : vector<256x64xf32>, vector<64x128xf32>, vector<256x128xf32> -> vector<256x128xf32>
    %5 = vector.broadcast %3 : vector<1x128xf32> to vector<256x128xf32>
    %6 = arith.addf %4, %5 : vector<256x128xf32>
    %cst_7 = arith.constant 0.000000e+00 : f32
    %7 = vector.broadcast %cst_7 : f32 to vector<256x128xf32>
    %8 = arith.maximumf %6, %7 : vector<256x128xf32>
    %c0_8 = arith.constant 0 : index
    %c0_9 = arith.constant 0 : index
    %9 = vector.load %arg5[%c0_8, %c0_9] : memref<128x128xf32, #tpu.memory_space<vmem>>, vector<128x128xf32>
    %c0_10 = arith.constant 0 : index
    %c0_11 = arith.constant 0 : index
    %10 = vector.load %arg6[%c0_10, %c0_11] : memref<1x128xf32, #tpu.memory_space<vmem>>, vector<1x128xf32>
    %cst_12 = arith.constant dense<0.000000e+00> : vector<256x128xf32>
    %11 = tpu.matmul %8, %9, %cst_12 {dimension_numbers = #tpu.dot_dimension_numbers<[1], [0], [0], [1], [0, 0, 1, 1], [], []>, precision = #tpu.contract_precision<fp32>} : vector<256x128xf32>, vector<128x128xf32>, vector<256x128xf32> -> vector<256x128xf32>
    %12 = vector.broadcast %10 : vector<1x128xf32> to vector<256x128xf32>
    %13 = arith.addf %11, %12 : vector<256x128xf32>
    %cst_13 = arith.constant 0.000000e+00 : f32
    %14 = vector.broadcast %cst_13 : f32 to vector<256x128xf32>
    %15 = arith.maximumf %13, %14 : vector<256x128xf32>
    %c0_14 = arith.constant 0 : index
    %c0_15 = arith.constant 0 : index
    %16 = vector.load %arg7[%c0_14, %c0_15] : memref<128x128xf32, #tpu.memory_space<vmem>>, vector<128x128xf32>
    %c0_16 = arith.constant 0 : index
    %c0_17 = arith.constant 0 : index
    %17 = vector.load %arg8[%c0_16, %c0_17] : memref<64x128xf32, #tpu.memory_space<vmem>>, vector<64x128xf32>
    %c0_18 = arith.constant 0 : index
    %c0_19 = arith.constant 0 : index
    %18 = vector.load %arg9[%c0_18, %c0_19] : memref<1x128xf32, #tpu.memory_space<vmem>>, vector<1x128xf32>
    %cst_20 = arith.constant dense<0.000000e+00> : vector<256x128xf32>
    %19 = tpu.matmul %15, %16, %cst_20 {dimension_numbers = #tpu.dot_dimension_numbers<[1], [0], [0], [1], [0, 0, 1, 1], [], []>, precision = #tpu.contract_precision<fp32>} : vector<256x128xf32>, vector<128x128xf32>, vector<256x128xf32> -> vector<256x128xf32>
    %cst_21 = arith.constant dense<0.000000e+00> : vector<256x128xf32>
    %20 = tpu.matmul %1, %17, %cst_21 {dimension_numbers = #tpu.dot_dimension_numbers<[1], [0], [0], [1], [0, 0, 1, 1], [], []>, precision = #tpu.contract_precision<fp32>} : vector<256x64xf32>, vector<64x128xf32>, vector<256x128xf32> -> vector<256x128xf32>
    %21 = arith.addf %19, %20 : vector<256x128xf32>
    %22 = vector.broadcast %18 : vector<1x128xf32> to vector<256x128xf32>
    %23 = arith.addf %21, %22 : vector<256x128xf32>
    %cst_22 = arith.constant 0.000000e+00 : f32
    %24 = vector.broadcast %cst_22 : f32 to vector<256x128xf32>
    %25 = arith.maximumf %23, %24 : vector<256x128xf32>
    %c0_23 = arith.constant 0 : index
    %c0_24 = arith.constant 0 : index
    %26 = vector.load %arg10[%c0_23, %c0_24] : memref<128x128xf32, #tpu.memory_space<vmem>>, vector<128x128xf32>
    %c0_25 = arith.constant 0 : index
    %c0_26 = arith.constant 0 : index
    %27 = vector.load %arg11[%c0_25, %c0_26] : memref<1x128xf32, #tpu.memory_space<vmem>>, vector<1x128xf32>
    %cst_27 = arith.constant dense<0.000000e+00> : vector<256x128xf32>
    %28 = tpu.matmul %25, %26, %cst_27 {dimension_numbers = #tpu.dot_dimension_numbers<[1], [0], [0], [1], [0, 0, 1, 1], [], []>, precision = #tpu.contract_precision<fp32>} : vector<256x128xf32>, vector<128x128xf32>, vector<256x128xf32> -> vector<256x128xf32>
    %29 = vector.broadcast %27 : vector<1x128xf32> to vector<256x128xf32>
    %30 = arith.addf %28, %29 : vector<256x128xf32>
    %cst_28 = arith.constant 0.000000e+00 : f32
    %31 = vector.broadcast %cst_28 : f32 to vector<256x128xf32>
    %32 = arith.maximumf %30, %31 : vector<256x128xf32>
    %c0_29 = arith.constant 0 : index
    %c0_30 = arith.constant 0 : index
    %33 = vector.load %arg12[%c0_29, %c0_30] : memref<256x128xf32, #tpu.memory_space<vmem>>, vector<256x128xf32>
    tpu.vector_store %arg12[%c0_29, %c0_30], %32 {strides = array<i32>} : memref<256x128xf32, #tpu.memory_space<vmem>>, vector<256x128xf32>,
    return
  }
  func.func @transform_0(%arg0: i32) -> (i32, i32) {
    %c0_i32 = arith.constant 0 : i32
    %c0_i32_0 = arith.constant 0 : i32
    return %arg0, %c0_i32 : i32, i32
  }
  func.func @transform_1(%arg0: i32) -> (i32, i32) {
    %c0_i32 = arith.constant 0 : i32
    %c0_i32_0 = arith.constant 0 : i32
    return %arg0, %c0_i32 : i32, i32
  }
  func.func @transform_2(%arg0: i32) -> (i32, i32) {
    %c0_i32 = arith.constant 0 : i32
    %c0_i32_0 = arith.constant 0 : i32
    %c0_i32_1 = arith.constant 0 : i32
    return %c0_i32, %c0_i32_0 : i32, i32
  }
  func.func @transform_3(%arg0: i32) -> (i32, i32) {
    %c0_i32 = arith.constant 0 : i32
    %c0_i32_0 = arith.constant 0 : i32
    %c0_i32_1 = arith.constant 0 : i32
    return %c0_i32, %c0_i32_0 : i32, i32
  }
  func.func @transform_4(%arg0: i32) -> (i32, i32) {
    %c0_i32 = arith.constant 0 : i32
    %c0_i32_0 = arith.constant 0 : i32
    %c0_i32_1 = arith.constant 0 : i32
    return %c0_i32, %c0_i32_0 : i32, i32
  }
  func.func @transform_5(%arg0: i32) -> (i32, i32) {
    %c0_i32 = arith.constant 0 : i32
    %c0_i32_0 = arith.constant 0 : i32
    %c0_i32_1 = arith.constant 0 : i32
    return %c0_i32, %c0_i32_0 : i32, i32
  }
  func.func @transform_6(%arg0: i32) -> (i32, i32) {
    %c0_i32 = arith.constant 0 : i32
    %c0_i32_0 = arith.constant 0 : i32
    %c0_i32_1 = arith.constant 0 : i32
    return %c0_i32, %c0_i32_0 : i32, i32
  }
  func.func @transform_7(%arg0: i32) -> (i32, i32) {
    %c0_i32 = arith.constant 0 : i32
    %c0_i32_0 = arith.constant 0 : i32
    %c0_i32_1 = arith.constant 0 : i32
    return %c0_i32, %c0_i32_0 : i32, i32
  }
  func.func @transform_8(%arg0: i32) -> (i32, i32) {
    %c0_i32 = arith.constant 0 : i32
    %c0_i32_0 = arith.constant 0 : i32
    %c0_i32_1 = arith.constant 0 : i32
    return %c0_i32, %c0_i32_0 : i32, i32
  }
  func.func @transform_9(%arg0: i32) -> (i32, i32) {
    %c0_i32 = arith.constant 0 : i32
    %c0_i32_0 = arith.constant 0 : i32
    %c0_i32_1 = arith.constant 0 : i32
    return %c0_i32, %c0_i32_0 : i32, i32
  }
  func.func @transform_10(%arg0: i32) -> (i32, i32) {
    %c0_i32 = arith.constant 0 : i32
    %c0_i32_0 = arith.constant 0 : i32
    %c0_i32_1 = arith.constant 0 : i32
    return %c0_i32, %c0_i32_0 : i32, i32
  }
  func.func @transform_11(%arg0: i32) -> (i32, i32) {
    %c0_i32 = arith.constant 0 : i32
    %c0_i32_0 = arith.constant 0 : i32
    return %arg0, %c0_i32 : i32, i32
  }
}

</mosaic_0001>

<bundles_post_ra>
// kernel: tpu_custom_call.1
= control target key start
LH: loop header
LB: loop body
LE: loop exit
PB: predicated region body
PF: predicated region fallthrough
CT: control target
= control target key end

     0   :  { %s12392_s0 = inlined_call_operand.vmem [shape: f32[512,64], index: 0, kind: input, shape index: {}]   ;;  %s12393_s1 = inlined_call_operand.vmem [shape: f32[512,64], index: 1, kind: input, shape index: {}]   ;;  %s12394_s2 = inlined_call_operand.vmem [shape: f32[64,128], index: 2, kind: input, shape index: {}]   ;;  %s12395_s3 = inlined_call_operand.vmem [shape: f32[1,128], index: 3, kind: input, shape index: {}]   ;;  %s12396_s4 = inlined_call_operand.vmem [shape: f32[128,128], index: 4, kind: input, shape index: {}]   ;;  %s12397_s5 = inlined_call_operand.vmem [shape: f32[1,128], index: 5, kind: input, shape index: {}]   ;;  %s12398_s6 = inlined_call_operand.vmem [shape: f32[128,128], index: 6, kind: input, shape index: {}]   ;;  %s12399_s7 = inlined_call_operand.vmem [shape: f32[64,128], index: 7, kind: input, shape index: {}]   ;;  %s12400_s8 = inlined_call_operand.vmem [shape: f32[1,128], index: 8, kind: input, shape index: {}]   ;;  %s12401_s9 = inlined_call_operand.vmem [shape: f32[128,128], index: 9, kind: input, shape index: {}]   ;;  %s12402_s10 = inlined_call_operand.vmem [shape: f32[1,128], index: 10, kind: input, shape index: {}]   ;;  %s12403_s11 = inlined_call_operand.hbm [shape: f32[512,128], index: 11, kind: output, shape index: {}]  }
   0x1   :  { %12803 = sst [smem:[#allocation105_spill]] %s12392_s0 }
   0x2   :  { %16 = vsyncpa [#allocation3], 0 }
   0x3   :  { %18 = vsyncpa [#allocation3 + $0x1], 0  ;;  %s7536_s17 = smov 0   ;;  %s7538_s18 = smov 0  }
   0x4   :  { %s7540_s19 = smov 0   ;;  %s7542_s20 = smov 0  }
   0x5 LB: > { %s7557_s21 = sadd.s32 4294967295, %s7472_s20   ;;  %s7331_s22 = sadd.s32 4294967294, %s7472_s20   ;;  %s7472_s20 = sphi %s7542_s20, %s13571_s20   ;;  %s7468_s19 = sphi %s7540_s19, %s13570_s19   ;;  %s7464_s18 = sphi %s7538_s18, %s13569_s18   ;;  %s7460_s17 = sphi %s7536_s17, %s13568_s17  }
   0x6   : > { %s7561_s23 = sadd.s32 1, %s7472_s20   ;;  %s272_s24 = sadd.s32 1, %s7468_s19 }
   0x7   : > { %s269_s25 = ssub.s32 %s7472_s20, %s7561_s23  ;;  %p282_p0 = scmp.ne.s32.totalorder %s7468_s19, %s7464_s18 }
   0x8   : > { %p270_p1 = scmp.eq.s32.totalorder %s269_s25, 0  ;;  %p283_p2 = scmp.eq.s32.totalorder %s7557_s21, 1 }
   0x9   : > { %p288_p3 = scmp.ne.s32.totalorder %s7464_s18, %s7460_s17  ;;  %p289_p4 = scmp.eq.s32.totalorder %s7331_s22, 1 }
   0xa   : > { %s7572_s26 = scalar_select %p270_p1, %s7468_s19, %s272_s24  }
   0xb   : > { %p7574_p5 = por %p283_p2, %p282_p0  ;;  %p7578_p6 = por %p289_p4, %p288_p3 }
   0xc   : > { %p7334_p7 = scmp.ge.s32.totalorder %s7472_s20, 1  ;;  %p352_p8 = scmp.lt.s32.totalorder %s7472_s20, 3 }
   0xe   : > { %p353_p9 = pnand %p7334_p7, %p352_p8 }
  0x10   : > { %356 = sbr.rel (%p353_p9) target bundleno = 2244 (0x8c4), region = 64 }
  0x15   : > { %v481_v0 = vld [vmem:[%s12394_s2 + $0x38] sm:$0xff]  ;;  %v480_v1 = vld [vmem:[%s12394_s2 + $0x30] sm:$0xff]  ;;  %v479_v2 = vld [vmem:[%s12394_s2 + $0x28] sm:$0xff]  ;;  %s7336_s16 = sshll.u32 %s7557_s21, 5  ;;  %vm486_vm0 = vcmask 523264   ;;  %s12806_s0 = sld [smem:[#allocation105_spill]] }
  0x16   : > { %v7594_v3 = vand.u32 4294901760, %v481_v0  ;;  %v7596_v4 = vand.u32 4294901760, %v480_v1  ;;  %v7598_v5 = vand.u32 4294901760, %v479_v2  ;;  %v478_v6 = vld [vmem:[%s12394_s2 + $0x20] sm:$0xff]  ;;  %v477_v7 = vld [vmem:[%s12394_s2 + $0x18] sm:$0xff]  ;;  %v476_v8 = vld [vmem:[%s12394_s2 + $0x10] sm:$0xff] }
  0x17   : > { %v7609_v9 = vand.u32 4294901760, %v478_v6  ;;  %v7611_v10 = vand.u32 4294901760, %v477_v7  ;;  %v7613_v11 = vand.u32 4294901760, %v476_v8  ;;  %v475_v12 = vld [vmem:[%s12394_s2 + $0x8] sm:$0xff]  ;;  %v474_v13 = vld [vmem:[%s12394_s2] sm:$0xff]  ;;  %p398_p10 = scmp.lt.s32.totalorder %s7336_s16, 63 }
  0x18   : > { %592 = vmatpush.msra.mxu0 %v7594_v3  ;;  %7346 = vmatpush.msra.mxu2 %v7594_v3  ;;  %v7624_v14 = vsub.f32 %v481_v0, %v7594_v3  ;;  %v7627_v15 = vsub.f32 %v480_v1, %v7596_v4  ;;  %v7630_v16 = vsub.f32 %v479_v2, %v7598_v5  ;;  %v7632_v17 = vand.u32 4294901760, %v475_v12  ;;  %s7345_s22 = sshll.u32 %s7557_s21, 8 }
  0x19   : > { %v7635_v18 = vsub.f32 %v478_v6, %v7609_v9  ;;  %v7637_v19 = vand.u32 4294901760, %v474_v13  ;;  %s13573_s16 = smov (!%p398_p10, %s7336_s16), 63  ;;  %v7642_v20 = vsub.f32 %v477_v7, %v7611_v10  ;;  %v7645_v21 = vsub.f32 %v476_v8, %v7613_v11 }
  0x1a   : > { %594 = vmatpush.msra.mxu0 %v7596_v4  ;;  %7347 = vmatpush.msra.mxu2 %v7596_v4  ;;  %v874_v22 = vand.u32 4294901760, %v7624_v14  ;;  %v880_v23 = vand.u32 4294901760, %v7627_v15  ;;  %v886_v24 = vand.u32 4294901760, %v7630_v16  ;;  %s7337_s24 = sshll.u32 %s13573_s16, 3  ;;  %v7656_v27 = vsub.f32 %v475_v12, %v7632_v17  ;;  %s7253_s16 = scalar_lea.hbm %s12403_s11, %s7345_s22 }
  0x1b   : > { %v892_v25 = vand.u32 4294901760, %v7635_v18  ;;  %v898_v26 = vand.u32 4294901760, %v7642_v20  ;;  %s7674_s30 = scalar_lea.vmem %s12806_s0, %s7337_s24  ;;  %v904_v31 = vand.u32 4294901760, %v7645_v21  ;;  %v7680_v34 = vsub.f32 %v474_v13, %v7637_v19  ;;  %s9363_s29 = scalar_lea.vmem %s12393_s1, %s7337_s24 }
  0x1c   : > { %596 = vmatpush.msra.mxu0 %v7598_v5  ;;  %7348 = vmatpush.msra.mxu2 %v7598_v5  ;;  %v875_v28 = vsub.f32 %v7624_v14, %v874_v22  ;;  %v881_v29 = vsub.f32 %v7627_v15, %v880_v23  ;;  %v887_v30 = vsub.f32 %v7630_v16, %v886_v24  ;;  %v410_v32 = vld [vmem:[%s7674_s30] sm:$0xff]  ;;  %v411_v39 = vld [vmem:[%s7674_s30 + $0x8] sm:$0xff]  ;;  %v910_v43 = vand.u32 4294901760, %v7656_v27  ;;  %v412_v44 = vld [vmem:[%s7674_s30 + $0x10] sm:$0xff] }
  0x1d   : > { %v426_v33 = vld [vmem:[%s7674_s30 + $0x80] sm:$0xff]  ;;  %v893_v37 = vsub.f32 %v7635_v18, %v892_v25  ;;  %v488_v38 = vsel %vm486_vm0, %v410_v32, 0  ;;  %v427_v40 = vld [vmem:[%s7674_s30 + $0x88] sm:$0xff]  ;;  %v899_v47 = vsub.f32 %v7642_v20, %v898_v26  ;;  %v905_v48 = vsub.f32 %v7645_v21, %v904_v31  ;;  %v428_v49 = vld [vmem:[%s7674_s30 + $0x90] sm:$0xff] }
  0x1e   : > { %598 = vmatpush.msra.mxu0 %v7609_v9  ;;  %7349 = vmatpush.msra.mxu2 %v7609_v9  ;;  %v876_v35 = vand.u32 4294901760, %v875_v28  ;;  %v882_v36 = vand.u32 4294901760, %v881_v29  ;;  %v7690_v41 = vand.u32 4294901760, %v488_v38  ;;  %v536_v42 = vsel %vm486_vm0, %v426_v33, 0  ;;  %v413_v32 = vld [vmem:[%s7674_s30 + $0x18] sm:$0xff] }
  0x1f   : > { %v888_v45 = vand.u32 4294901760, %v887_v30  ;;  %v7695_v46 = vand.u32 4294901760, %v536_v42  ;;  %v916_v51 = vand.u32 4294901760, %v7680_v34  ;;  %v491_v52 = vsel %vm486_vm0, %v411_v39, 0 }
  0x20   : > { %877 = vmatpush.msra.mxu1 %v876_v35  ;;  %7354 = vmatpush.msra.mxu3 %v876_v35  ;;  %v7707_v50 = vsub.f32 %v488_v38, %v7690_v41  ;;  %v539_v53 = vsel %vm486_vm0, %v427_v40, 0  ;;  %v894_v54 = vand.u32 4294901760, %v893_v37  ;;  %v7715_v56 = vand.u32 4294901760, %v491_v52 }
  0x21   : > { %600 = vmatpush.msra.mxu0 %v7611_v10  ;;  %7350 = vmatpush.msra.mxu2 %v7611_v10  ;;  %v7713_v55 = vsub.f32 %v536_v42, %v7695_v46  ;;  %v494_v57 = vsel %vm486_vm0, %v412_v44, 0  ;;  %v7721_v59 = vand.u32 4294901760, %v539_v53  ;;  %v542_v60 = vsel %vm486_vm0, %v428_v49, 0 }
  0x22   : > { %883 = vmatpush.msra.mxu1 %v882_v36  ;;  %7355 = vmatpush.msra.mxu3 %v882_v36  ;;  %v12425_v58 = vand.u32 4294901760, %v7707_v50  ;;  %v900_v62 = vand.u32 4294901760, %v899_v47  ;;  %v911_v63 = vsub.f32 %v7656_v27, %v910_v43  ;;  %v7729_v0 = vsub.f32 %v491_v52, %v7715_v56  ;;  %v429_v36 = vld [vmem:[%s7674_s30 + $0x98] sm:$0xff] }
  0x23   : > { %602 = vmatpush.msra.mxu0 %v7613_v11  ;;  %7351 = vmatpush.msra.mxu2 %v7613_v11  ;;  %v12412_v61 = vand.u32 4294901760, %v7713_v55  ;;  %v906_v2 = vand.u32 4294901760, %v905_v48  ;;  %v7737_v6 = vsub.f32 %v539_v53, %v7721_v59  ;;  %v7739_v7 = vand.u32 4294901760, %v494_v57 }
  0x24   : > { %889 = vmatpush.msra.mxu1 %v888_v45  ;;  %7356 = vmatpush.msra.mxu3 %v888_v45  ;;  %v610_v1 = vsub.f32 %v7707_v50, %v12425_v58  ;;  %v917_v12 = vsub.f32 %v7680_v34, %v916_v51  ;;  %v12424_v13 = vand.u32 4294901760, %v7729_v0  ;;  %v7748_v28 = vand.u32 4294901760, %v542_v60 }
  0x25   : > { %604 = vmatpush.msra.mxu0 %v7632_v17  ;;  %7352 = vmatpush.msra.mxu2 %v7632_v17  ;;  %v738_v8 = vsub.f32 %v7713_v55, %v12412_v61  ;;  %v12410_v30 = vand.u32 4294901760, %v7737_v6  ;;  %v912_v35 = vand.u32 4294901760, %v911_v63  ;;  %v7760_v38 = vsub.f32 %v494_v57, %v7739_v7 }
  0x26   : > { %895 = vmatpush.msra.mxu1 %v894_v54  ;;  %7357 = vmatpush.msra.mxu3 %v894_v54  ;;  %v611_v29 = vand.u32 4294901760, %v610_v1  ;;  %v618_v37 = vsub.f32 %v7729_v0, %v12424_v13  ;;  %v918_v39 = vand.u32 4294901760, %v917_v12  ;;  %v7766_v42 = vsub.f32 %v542_v60, %v7748_v28 }
  0x27   : > { %606 = vmatpush.msra.mxu0 %v7637_v19  ;;  %7353 = vmatpush.msra.mxu2 %v7637_v19  ;;  %v739_v33 = vand.u32 4294901760, %v738_v8  ;;  %v746_v40 = vsub.f32 %v7737_v6, %v12410_v30  ;;  %v497_v44 = vsel %vm486_vm0, %v413_v32, 0  ;;  %v545_v45 = vsel %vm486_vm0, %v429_v36, 0 }
  0x28   : > { %901 = vmatpush.msra.mxu1 %v900_v62  ;;  %7358 = vmatpush.msra.mxu3 %v900_v62  ;;  %v619_v47 = vand.u32 4294901760, %v618_v37  ;;  %v12422_v48 = vand.u32 4294901760, %v7760_v38  ;;  %v7774_v49 = vand.u32 4294901760, %v497_v44  ;;  %v12409_v53 = vand.u32 4294901760, %v7766_v42 }
  0x29   : > { %612 = vmatmul.f32.vlgmr.msra.gmra.mxu0 %v611_v29  ;;  %1059 = vmatpush.msrb.mxu2 %v7624_v14  ;;  %v747_v52 = vand.u32 4294901760, %v746_v40  ;;  %v7778_v54 = vand.u32 4294901760, %v545_v45  ;;  %v414_v14 = vld [vmem:[%s7674_s30 + $0x20] sm:$0xff] }
  0x2a   : > { %740 = vmatmul.f32.vlgmr.msra.gmra.mxu2 %v739_v33  ;;  %907 = vmatpush.msra.mxu1 %v906_v2  ;;  %v626_v57 = vsub.f32 %v7760_v38, %v12422_v48  ;;  %v7792_v60 = vsub.f32 %v497_v44, %v7774_v49  ;;  %v500_v62 = vsel %vm486_vm0, %v414_v14, 0 }
  0x2b   : > { %7359 = vmatpush.msra.mxu3 %v906_v2  ;;  %1062 = vmatpush.msrb.mxu2 %v7627_v15  ;;  %v754_v15 = vsub.f32 %v7766_v42, %v12409_v53  ;;  %v7810_v8 = vand.u32 4294901760, %v500_v62 }
  0x2c   : > { %913 = vmatpush.msra.mxu1 %v912_v35  ;;  %1470 = vmatpush.msrb.mxu0 %v874_v22  ;;  %v430_v22 = vld [vmem:[%s7674_s30 + $0xa0] sm:$0xff]  ;;  %v627_v1 = vand.u32 4294901760, %v626_v57  ;;  %v12420_v2 = vand.u32 4294901760, %v7792_v60 }
  0x2d   : > { %7360 = vmatpush.msra.mxu3 %v912_v35  ;;  %1065 = vmatpush.msrb.mxu2 %v7630_v16  ;;  %v548_v63 = vsel %vm486_vm0, %v430_v22, 0  ;;  %v755_v16 = vand.u32 4294901760, %v754_v15  ;;  %v417_v22 = vld [vmem:[%s7674_s30 + $0x38] sm:$0xff] }
  0x2e   : > { %919 = vmatpush.msra.mxu1 %v918_v39  ;;  %1474 = vmatpush.msrb.mxu0 %v880_v23  ;;  %v7798_v23 = vsub.f32 %v545_v45, %v7778_v54  ;;  %v7815_v12 = vand.u32 4294901760, %v548_v63 }
  0x2f   : > { %7361 = vmatpush.msra.mxu3 %v918_v39  ;;  %921 = vmatmul.f32.vlgmr.msra.gmra.mxu1 %v7690_v41 }
  0x30   : > { %985 = vmatmul.f32.vlgmr.msra.gmra.mxu3 %v7695_v46  ;;  %1068 = vmatpush.msrb.mxu2 %v7635_v18  ;;  %v431_v18 = vld [vmem:[%s7674_s30 + $0xa8] sm:$0xff] }
  0x31   : > { %1251 = vmatpush.msrb.mxu3 %v7594_v3  ;;  %620 = vmatmul.f32.gmra.mxu0 %v619_v47  ;;  %v551_v32 = vsel %vm486_vm0, %v431_v18, 0 }
  0x32   : > { %748 = vmatmul.f32.gmra.mxu2 %v747_v52  ;;  %1478 = vmatpush.msrb.mxu0 %v886_v24  ;;  %v12408_v24 = vand.u32 4294901760, %v7798_v23  ;;  %v7853_v37 = vand.u32 4294901760, %v551_v32 }
  0x33   : > { %1253 = vmatpush.msrb.mxu3 %v7596_v4  ;;  %1071 = vmatpush.msrb.mxu2 %v7642_v20  ;;  %v7830_v20 = vsub.f32 %v500_v62, %v7810_v8  ;;  %v509_v62 = vsel %vm486_vm0, %v417_v22, 0 }
  0x34   : > { %1482 = vmatpush.msrb.mxu0 %v892_v25  ;;  %1637 = vmatpush.msrb.mxu1 %v7594_v3  ;;  %v415_v3 = vld [vmem:[%s7674_s30 + $0x28] sm:$0xff]  ;;  %v634_v25 = vsub.f32 %v7792_v60, %v12420_v2 }
  0x35   : > { %1255 = vmatpush.msrb.mxu3 %v7598_v5  ;;  %1074 = vmatpush.msrb.mxu2 %v7645_v21  ;;  %v503_v29 = vsel %vm486_vm0, %v415_v3, 0  ;;  %v12419_v35 = vand.u32 4294901760, %v7830_v20  ;;  %v7906_v3 = vand.u32 4294901760, %v509_v62 }
  0x36   : > { %1486 = vmatpush.msrb.mxu0 %v898_v26  ;;  %1639 = vmatpush.msrb.mxu1 %v7596_v4  ;;  %v762_v4 = vsub.f32 %v7798_v23, %v12408_v24  ;;  %v7837_v26 = vsub.f32 %v548_v63, %v7815_v12  ;;  %v635_v33 = vand.u32 4294901760, %v634_v25  ;;  %v7849_v36 = vand.u32 4294901760, %v503_v29 }
  0x37   : > { %925 = vmatmul.f32.gmra.mxu1 %v7715_v56  ;;  %1257 = vmatpush.msrb.mxu3 %v7609_v9 }
  0x38   : > { %989 = vmatmul.f32.gmra.mxu3 %v7721_v59  ;;  %1077 = vmatpush.msrb.mxu2 %v7656_v27  ;;  %v763_v21 = vand.u32 4294901760, %v762_v4  ;;  %v432_v27 = vld [vmem:[%s7674_s30 + $0xb0] sm:$0xff] }
  0x39   : > { %628 = vmatmul.f32.gmra.mxu0 %v627_v1  ;;  %1259 = vmatpush.msrb.mxu3 %v7611_v10  ;;  %v554_v39 = vsel %vm486_vm0, %v432_v27, 0 }
  0x3a   : > { %756 = vmatmul.f32.gmra.mxu2 %v755_v16  ;;  %1490 = vmatpush.msrb.mxu0 %v904_v31  ;;  %v12407_v31 = vand.u32 4294901760, %v7837_v26  ;;  %v7884_v14 = vand.u32 4294901760, %v554_v39 }
  0x3b   : > { %1261 = vmatpush.msrb.mxu3 %v7613_v11  ;;  %1080 = vmatpush.msrb.mxu2 %v7680_v34 }
  0x3c   : > { %1641 = vmatpush.msrb.mxu1 %v7598_v5  ;;  %1494 = vmatpush.msrb.mxu0 %v910_v43  ;;  %v416_v5 = vld [vmem:[%s7674_s30 + $0x30] sm:$0xff]  ;;  %v642_v43 = vsub.f32 %v7830_v20, %v12419_v35  ;;  %v770_v34 = vsub.f32 %v7837_v26, %v12407_v31  ;;  %v7901_v15 = vsub.f32 %v554_v39, %v7884_v14 }
  0x3d   : > { %1263 = vmatpush.msrb.mxu3 %v7632_v17 }
  0x3e   : > { %1643 = vmatpush.msrb.mxu1 %v7609_v9  ;;  %1498 = vmatpush.msrb.mxu0 %v916_v51  ;;  %v7868_v9 = vsub.f32 %v503_v29, %v7849_v36  ;;  %v7874_v51 = vsub.f32 %v551_v32, %v7853_v37  ;;  %v643_v40 = vand.u32 4294901760, %v642_v43  ;;  %v771_v47 = vand.u32 4294901760, %v770_v34  ;;  %v418_v29 = vld [vmem:[%s7674_s30 + $0x40] sm:$0xff] }
  0x3f   : > { %929 = vmatmul.f32.gmra.mxu1 %v7739_v7  ;;  %1265 = vmatpush.msrb.mxu3 %v7637_v19  ;;  %v12404_v25 = vand.u32 4294901760, %v7901_v15  ;;  %v434_v32 = vld [vmem:[%s7674_s30 + $0xc0] sm:$0xff]  ;;  %v512_v43 = vsel %vm486_vm0, %v418_v29, 0 }
  0x40   : > { %993 = vmatmul.f32.gmra.mxu3 %v7748_v28  ;;  %1645 = vmatpush.msrb.mxu1 %v7611_v10  ;;  %v506_v10 = vsel %vm486_vm0, %v416_v5, 0  ;;  %v12418_v44 = vand.u32 4294901760, %v7868_v9  ;;  %v12406_v52 = vand.u32 4294901760, %v7874_v51  ;;  %v560_v34 = vsel %vm486_vm0, %v434_v32, 0 }
  0x41   : > { %636 = vmatmul.f32.gmra.mxu0 %v635_v33  ;;  %v7881_v45 = vand.u32 4294901760, %v506_v10  ;;  %v786_v5 = vsub.f32 %v7901_v15, %v12404_v25 }
  0x42   : > { %764 = vmatmul.f32.gmra.mxu2 %v763_v21  ;;  %1647 = vmatpush.msrb.mxu1 %v7613_v11  ;;  %v433_v11 = vld [vmem:[%s7674_s30 + $0xb8] sm:$0xff]  ;;  %v7919_v21 = vsub.f32 %v509_v62, %v7906_v3 }
  0x43   : > { %v7895_v57 = vsub.f32 %v506_v10, %v7881_v45  ;;  %v557_v63 = vsel %vm486_vm0, %v433_v11, 0  ;;  %v7933_v11 = vand.u32 4294901760, %v560_v34 }
  0x44   : > { %1649 = vmatpush.msrb.mxu1 %v7632_v17  ;;  %v650_v17 = vsub.f32 %v7868_v9, %v12418_v44  ;;  %v7909_v4 = vand.u32 4294901760, %v557_v63  ;;  %v12414_v39 = vand.u32 4294901760, %v7919_v21 }
  0x45   : > { %v12416_v16 = vand.u32 4294901760, %v7895_v57  ;;  %12808 = vst [vmem:[#allocation6_spill] sm:$0xff] %v7933_v11 }
  0x46   : > { %1651 = vmatpush.msrb.mxu1 %v7637_v19  ;;  %v778_v19 = vsub.f32 %v7874_v51, %v12406_v52  ;;  %v651_v1 = vand.u32 4294901760, %v650_v17  ;;  %v7925_v27 = vsub.f32 %v557_v63, %v7909_v4  ;;  %v419_v17 = vld [vmem:[%s7674_s30 + $0x48] sm:$0xff]  ;;  %v666_v62 = vsub.f32 %v7919_v21, %v12414_v39 }
  0x47   : > { %933 = vmatmul.f32.gmra.mxu1 %v7774_v49  ;;  %v658_v33 = vsub.f32 %v7895_v57, %v12416_v16  ;;  %v515_v29 = vsel %vm486_vm0, %v419_v17, 0 }
  0x48   : > { %997 = vmatmul.f32.gmra.mxu3 %v7778_v54  ;;  %v779_v18 = vand.u32 4294901760, %v778_v19  ;;  %12807 = vst [vmem:[#allocation5_spill] sm:$0xff] %v7925_v27  ;;  %v12405_v22 = vand.u32 4294901760, %v7925_v27  ;;  %v435_v19 = vld [vmem:[%s7674_s30 + $0xc8] sm:$0xff] }
  0x49   : > { %644 = vmatmul.f32.gmra.mxu0 %v643_v40  ;;  %v659_v10 = vand.u32 4294901760, %v658_v33  ;;  %v7930_v40 = vand.u32 4294901760, %v512_v43  ;;  %v563_v32 = vsel %vm486_vm0, %v435_v19, 0  ;;  %v667_v33 = vand.u32 4294901760, %v666_v62 }
  0x4a   : > { %772 = vmatmul.f32.gmra.mxu2 %v771_v47  ;;  %v787_v47 = vand.u32 4294901760, %v786_v5 }
  0x4b   : > { %v7943_v63 = vsub.f32 %v512_v43, %v7930_v40 }
  0x4d   : > { %v12413_v5 = vand.u32 4294901760, %v7943_v63 }
  0x4f   : > { %937 = vmatmul.f32.gmra.mxu1 %v7810_v8  ;;  %v674_v17 = vsub.f32 %v7943_v63, %v12413_v5 }
  0x50   : > { %1001 = vmatmul.f32.gmra.mxu3 %v7815_v12 }
  0x51   : > { %652 = vmatmul.f32.gmra.mxu0 %v651_v1  ;;  %v794_v1 = vsub.f32 %v7925_v27, %v12405_v22  ;;  %v420_v22 = vld [vmem:[%s7674_s30 + $0x50] sm:$0xff]  ;;  %v675_v31 = vand.u32 4294901760, %v674_v17 }
  0x52   : > { %780 = vmatmul.f32.gmra.mxu2 %v779_v18  ;;  %v7949_v18 = vsub.f32 %v560_v34, %v7933_v11  ;;  %v436_v34 = vld [vmem:[%s7674_s30 + $0xd0] sm:$0xff]  ;;  %v518_v52 = vsel %vm486_vm0, %v420_v22, 0 }
  0x53   : > { %v795_v25 = vand.u32 4294901760, %v794_v1  ;;  %v7978_v53 = vand.u32 4294901760, %v518_v52 }
  0x54   : > { %12809 = vst [vmem:[#allocation7_spill] sm:$0xff] %v7949_v18  ;;  %v12411_v43 = vand.u32 4294901760, %v7949_v18 }
  0x56   : > { %v802_v62 = vsub.f32 %v7949_v18, %v12411_v43  ;;  %v421_v43 = vld [vmem:[%s7674_s30 + $0x58] sm:$0xff] }
  0x57   : > { %941 = vmatmul.f32.gmra.mxu1 %v7849_v36  ;;  %v521_v61 = vsel %vm486_vm0, %v421_v43, 0 }
  0x58   : > { %1005 = vmatmul.f32.gmra.mxu3 %v7853_v37  ;;  %v803_v30 = vand.u32 4294901760, %v802_v62 }
  0x59   : > { %660 = vmatmul.f32.gmra.mxu0 %v659_v10  ;;  %v7954_v10 = vand.u32 4294901760, %v515_v29 }
  0x5a   : > { %788 = vmatmul.f32.gmra.mxu2 %v787_v47  ;;  %v7957_v47 = vand.u32 4294901760, %v563_v32 }
  0x5b   : > { %v7967_v19 = vsub.f32 %v515_v29, %v7954_v10 }
  0x5c   : > { %12810 = vst [vmem:[#allocation8_spill] sm:$0xff] %v7957_v47  ;;  %v7973_v1 = vsub.f32 %v563_v32, %v7957_v47  ;;  %v437_v32 = vld [vmem:[%s7674_s30 + $0xd8] sm:$0xff] }
  0x5d   : > { %v12415_v24 = vand.u32 4294901760, %v7967_v19 }
  0x5e   : > { %12811 = vst [vmem:[#allocation9_spill] sm:$0xff] %v7973_v1  ;;  %v12417_v29 = vand.u32 4294901760, %v7973_v1 }
  0x5f   : > { %945 = vmatmul.f32.gmra.mxu1 %v7881_v45  ;;  %v682_v22 = vsub.f32 %v7967_v19, %v12415_v24  ;;  %v8002_v24 = vand.u32 4294901760, %v521_v61 }
  0x60   : > { %1009 = vmatmul.f32.gmra.mxu3 %v7884_v14  ;;  %v810_v17 = vsub.f32 %v7973_v1, %v12417_v29  ;;  %v422_v29 = vld [vmem:[%s7674_s30 + $0x60] sm:$0xff] }
  0x61   : > { %668 = vmatmul.f32.gmra.mxu0 %v667_v33  ;;  %v566_v33 = vsel %vm486_vm0, %v436_v34, 0  ;;  %v7991_v34 = vsub.f32 %v518_v52, %v7978_v53  ;;  %v683_v5 = vand.u32 4294901760, %v682_v22  ;;  %v524_v44 = vsel %vm486_vm0, %v422_v29, 0 }
  0x62   : > { %796 = vmatmul.f32.gmra.mxu2 %v795_v25  ;;  %v7981_v25 = vand.u32 4294901760, %v566_v33  ;;  %v811_v16 = vand.u32 4294901760, %v810_v17 }
  0x63   : > { %v12421_v39 = vand.u32 4294901760, %v7991_v34 }
  0x64   : > { %12812 = vst [vmem:[#allocation10_spill] sm:$0xff] %v7981_v25  ;;  %v7997_v62 = vsub.f32 %v566_v33, %v7981_v25  ;;  %v438_v33 = vld [vmem:[%s7674_s30 + $0xe0] sm:$0xff] }
  0x65   : > { %v690_v43 = vsub.f32 %v7991_v34, %v12421_v39  ;;  %v8026_v39 = vand.u32 4294901760, %v524_v44 }
  0x66   : > { %12813 = vst [vmem:[#allocation11_spill] sm:$0xff] %v7997_v62  ;;  %v12423_v52 = vand.u32 4294901760, %v7997_v62 }
  0x67   : > { %949 = vmatmul.f32.gmra.mxu1 %v7906_v3  ;;  %v691_v35 = vand.u32 4294901760, %v690_v43 }
  0x68   : > { %1013 = vmatmul.f32.gmra.mxu3 %v7909_v4  ;;  %v818_v22 = vsub.f32 %v7997_v62, %v12423_v52  ;;  %v423_v52 = vld [vmem:[%s7674_s30 + $0x68] sm:$0xff] }
  0x69   : > { %676 = vmatmul.f32.gmra.mxu0 %v675_v31  ;;  %v569_v31 = vsel %vm486_vm0, %v437_v32, 0  ;;  %v8015_v32 = vsub.f32 %v521_v61, %v8002_v24  ;;  %v527_v13 = vsel %vm486_vm0, %v423_v52, 0 }
  0x6a   : > { %804 = vmatmul.f32.gmra.mxu2 %v803_v30  ;;  %v8005_v30 = vand.u32 4294901760, %v569_v31  ;;  %v819_v48 = vand.u32 4294901760, %v818_v22 }
  0x6b   : > { %v12428_v2 = vand.u32 4294901760, %v8015_v32 }
  0x6c   : > { %12814 = vst [vmem:[#allocation12_spill] sm:$0xff] %v8005_v30  ;;  %v8021_v17 = vsub.f32 %v569_v31, %v8005_v30  ;;  %v439_v31 = vld [vmem:[%s7674_s30 + $0xe8] sm:$0xff] }
  0x6d   : > { %v698_v29 = vsub.f32 %v8015_v32, %v12428_v2  ;;  %v8050_v2 = vand.u32 4294901760, %v527_v13 }
  0x6e   : > { %12815 = vst [vmem:[#allocation13_spill] sm:$0xff] %v8021_v17  ;;  %v12431_v61 = vand.u32 4294901760, %v8021_v17 }
  0x6f   : > { %953 = vmatmul.f32.gmra.mxu1 %v7930_v40  ;;  %v699_v58 = vand.u32 4294901760, %v698_v29 }
  0x70   : > { %1017 = vmatmul.f32.gmra.mxu3 %v7933_v11  ;;  %v826_v43 = vsub.f32 %v8021_v17, %v12431_v61  ;;  %v424_v61 = vld [vmem:[%s7674_s30 + $0x70] sm:$0xff] }
  0x71   : > { %684 = vmatmul.f32.gmra.mxu0 %v683_v5  ;;  %v572_v5 = vsel %vm486_vm0, %v438_v33, 0  ;;  %v8039_v33 = vsub.f32 %v524_v44, %v8026_v39  ;;  %v530_v17 = vsel %vm486_vm0, %v424_v61, 0 }
  0x72   : > { %812 = vmatmul.f32.gmra.mxu2 %v811_v16  ;;  %v8029_v16 = vand.u32 4294901760, %v572_v5  ;;  %v827_v1 = vand.u32 4294901760, %v826_v43 }
  0x73   : > { %v12438_v62 = vand.u32 4294901760, %v8039_v33 }
  0x74   : > { %v8045_v22 = vsub.f32 %v572_v5, %v8029_v16  ;;  %v440_v5 = vld [vmem:[%s7674_s30 + $0xf0] sm:$0xff] }
  0x75   : > { %v706_v52 = vsub.f32 %v8039_v33, %v12438_v62  ;;  %v8074_v62 = vand.u32 4294901760, %v530_v17 }
  0x76   : > { %12816 = vst [vmem:[#allocation14_spill] sm:$0xff] %v8045_v22  ;;  %v12441_v44 = vand.u32 4294901760, %v8045_v22 }
  0x77   : > { %957 = vmatmul.f32.gmra.mxu1 %v7954_v10 }
  0x78   : > { %1021 = vmatmul.f32.gmra.mxu3 %v7957_v47  ;;  %v834_v29 = vsub.f32 %v8045_v22, %v12441_v44  ;;  %v425_v44 = vld [vmem:[%s7674_s30 + $0x78] sm:$0xff] }
  0x79   : > { %692 = vmatmul.f32.gmra.mxu0 %v691_v35  ;;  %v575_v35 = vsel %vm486_vm0, %v439_v31, 0  ;;  %v8063_v31 = vsub.f32 %v527_v13, %v8050_v2  ;;  %v533_v22 = vsel %vm486_vm0, %v425_v44, 0 }
  0x7a   : > { %820 = vmatmul.f32.gmra.mxu2 %v819_v48  ;;  %v8053_v48 = vand.u32 4294901760, %v575_v35  ;;  %v835_v18 = vand.u32 4294901760, %v834_v29  ;;  %v8098_v27 = vand.u32 4294901760, %v533_v22 }
  0x7b   : > { %v12450_v47 = vand.u32 4294901760, %v8063_v31 }
  0x7c   : > { %12817 = vst [vmem:[#allocation15_spill] sm:$0xff] %v8053_v48  ;;  %v8069_v43 = vsub.f32 %v575_v35, %v8053_v48  ;;  %v441_v35 = vld [vmem:[%s7674_s30 + $0xf8] sm:$0xff]  ;;  %s394_s30 = sand.u32 1, %s7464_s18  }
  0x7d   : > { %v714_v61 = vsub.f32 %v8063_v31, %v12450_v47  ;;  %s7335_s12 = sshll.u32 %s394_s30, 8  ;;  %s7242_s21 = scalar_lea.sflag [#allocation3], %s394_s30 }
  0x7e   : > { %12818 = vst [vmem:[#allocation16_spill] sm:$0xff] %v8069_v43  ;;  %v12451_v13 = vand.u32 4294901760, %v8069_v43  ;;  %s12173_s13 = scalar_lea.vmem [#allocation2], %s7335_s12  ;;  %s7256_s12 = sshll.u32 %s7253_s16, 4  ;;  %s7257_s12 = int_to_ptr.hbm [resolvable:$true] %s7256_s12 }
  0x7f   : > { %961 = vmatmul.f32.gmra.mxu1 %v7978_v53  ;;  %s7254_s24 = sshll.u32 %s12173_s13, 4  ;;  %s7424_s14 = sshra.s32 %s7257_s12, 4  ;;  %s7255_s24 = int_to_ptr.vmem [resolvable:$true] %s7254_s24  ;;  %s7425_s14 = int_to_ptr.hbm [resolvable:$true] %s7424_s14 }
  0x80   : > { %1025 = vmatmul.f32.gmra.mxu3 %v7981_v25  ;;  %v707_v25 = vand.u32 4294901760, %v706_v52  ;;  %v842_v52 = vsub.f32 %v8069_v43, %v12451_v13  ;;  %s7426_s15 = scalar_lea.hbm %s7425_s14, 256  ;;  %p7431_p0 = scmp.lt.s32.totalorder %s7425_s14, %s12403_s11 }
  0x81   : > { %700 = vmatmul.f32.gmra.mxu0 %v699_v58  ;;  %v578_v58 = vsel %vm486_vm0, %v440_v5, 0  ;;  %v8087_v5 = vsub.f32 %v530_v17, %v8074_v62  ;;  %p7427_p11 = scmp.ne.s32.totalorder %s7425_s14, %s7426_s15 }
  0x82   : > { %828 = vmatmul.f32.gmra.mxu2 %v827_v1  ;;  %v8077_v1 = vand.u32 4294901760, %v578_v58  ;;  %v843_v47 = vand.u32 4294901760, %v842_v52 }
  0x83   : > { %v12454_v11 = vand.u32 4294901760, %v8087_v5  ;;  %p7428_p12 = pnand %p7427_p11, %p7574_p5 }
  0x84   : > { %12819 = vst [vmem:[#allocation17_spill] sm:$0xff] %v8077_v1  ;;  %v8093_v29 = vsub.f32 %v578_v58, %v8077_v1  ;;  %v1828_v58 = vld [vmem:[%s12396_s4 + $0x78] sm:$0xff] }
  0x85   : > { %v8108_v44 = vand.u32 4294901760, %v1828_v58  ;;  %p7429_p13 = pneg %p7428_p12 }
  0x86   : > { %12820 = vst [vmem:[#allocation18_spill] sm:$0xff] %v8093_v29  ;;  %v12455_v17 = vand.u32 4294901760, %v8093_v29 }
  0x87   : > { %965 = vmatmul.f32.gmra.mxu1 %v8002_v24  ;;  %12822 = vst [vmem:[#allocation20_spill] sm:$0xff] %v8108_v44  ;;  %v8123_v43 = vsub.f32 %v1828_v58, %v8108_v44  ;;  %1834 = vmatpush.msra.mxu2 %v8108_v44 }
  0x88   : > { %1029 = vmatmul.f32.gmra.mxu3 %v8005_v30  ;;  %v581_v30 = vsel %vm486_vm0, %v441_v35, 0  ;;  %v722_v35 = vsub.f32 %v8087_v5, %v12454_v11  ;;  %v850_v52 = vsub.f32 %v8093_v29, %v12455_v17  ;;  %2557 = vmatpush.msra.mxu1 %v8108_v44 }
  0x89   : > { %708 = vmatmul.f32.gmra.mxu0 %v707_v25  ;;  %v715_v25 = vand.u32 4294901760, %v714_v61  ;;  %v8114_v61 = vsub.f32 %v533_v22, %v8098_v27 }
  0x8a   : > { %836 = vmatmul.f32.gmra.mxu2 %v835_v18  ;;  %v8101_v18 = vand.u32 4294901760, %v581_v30  ;;  %2349 = vmatpush.msra.mxu0 %v8123_v43  ;;  %v723_v22 = vand.u32 4294901760, %v722_v35  ;;  %v851_v11 = vand.u32 4294901760, %v850_v52 }
  0x8c   : > { %12821 = vst [vmem:[#allocation19_spill] sm:$0xff] %v8101_v18  ;;  %v8120_v13 = vsub.f32 %v581_v30, %v8101_v18 }
  0x8e   : > { %12823 = vst [vmem:[#allocation21_spill] sm:$0xff] %v8120_v13  ;;  %v12460_v17 = vand.u32 4294901760, %v8120_v13 }
  0x8f   : > { %969 = vmatmul.f32.gmra.mxu1 %v8026_v39 }
  0x90   : > { %1033 = vmatmul.f32.gmra.mxu3 %v8029_v16  ;;  %v858_v35 = vsub.f32 %v8120_v13, %v12460_v17 }
  0x91   : > { %716 = vmatmul.f32.gmra.mxu0 %v715_v25  ;;  %v12459_v25 = vand.u32 4294901760, %v8123_v43 }
  0x92   : > { %844 = vmatmul.f32.gmra.mxu2 %v843_v47  ;;  %v12462_v47 = vand.u32 4294901760, %v8114_v61  ;;  %v859_v44 = vand.u32 4294901760, %v858_v35 }
  0x93   : > { %v2125_v30 = vsub.f32 %v8123_v43, %v12459_v25  ;;  %v1827_v25 = vld [vmem:[%s12396_s4 + $0x70] sm:$0xff] }
  0x94   : > { %v730_v29 = vsub.f32 %v8114_v61, %v12462_v47 }
  0x95   : > { %v2126_v58 = vand.u32 4294901760, %v2125_v30 }
  0x96   : > { %v731_v52 = vand.u32 4294901760, %v730_v29 }
  0x97   : > { %973 = vmatmul.f32.gmra.mxu1 %v8050_v2  ;;  %2127 = vmatpush.msra.mxu3 %v2126_v58 }
  0x98   : > { %1037 = vmatmul.f32.gmra.mxu3 %v8053_v48 }
  0x99   : > { %724 = vmatmul.f32.gmra.mxu0 %v723_v22  ;;  %v8147_v22 = vand.u32 4294901760, %v1827_v25 }
  0x9a   : > { %852 = vmatmul.f32.gmra.mxu2 %v851_v11 }
  0x9b   : > { %12824 = vst [vmem:[#allocation22_spill] sm:$0xff] %v8147_v22  ;;  %v8150_v11 = vsub.f32 %v1827_v25, %v8147_v22  ;;  %2559 = vmatpush.msra.mxu1 %v8147_v22  ;;  %1836 = vmatpush.msra.mxu2 %v8147_v22  ;;  %v8168_v25 = vld [vmem:[%s12395_s3] ss:$0 sm:$0xff] }
  0x9d   : > { %12825 = vst [vmem:[#allocation23_spill] sm:$0xff] %v8150_v11  ;;  %v12461_v29 = vand.u32 4294901760, %v8150_v11  ;;  %2352 = vmatpush.msra.mxu0 %v8150_v11 }
  0x9f   : > { %977 = vmatmul.f32.gmra.mxu1 %v8074_v62  ;;  %v2131_v58 = vsub.f32 %v8150_v11, %v12461_v29 }
  0xa0   : > { %1041 = vmatmul.f32.gmra.mxu3 %v8077_v1 }
  0xa1   : > { %732 = vmatmul.f32.gmra.mxu0 %v731_v52 }
  0xa2   : > { %860 = vmatmul.f32.gmra.mxu2 %v859_v44  ;;  %v2132_v44 = vand.u32 4294901760, %v2131_v58  ;;  %v1826_v58 = vld [vmem:[%s12396_s4 + $0x68] sm:$0xff] }
  0xa3   : > { %v8181_v47 = vand.u32 4294901760, %v1826_v58 }
  0xa4   : > { %2133 = vmatpush.msra.mxu3 %v2132_v44  ;;  %v12826_v44 = vand.u32 4294901760, %v7707_v50 }
  0xa5   : > { %12827 = vst [vmem:[#allocation24_spill] sm:$0xff] %v8181_v47  ;;  %v8186_v13 = vsub.f32 %v1826_v58, %v8181_v47  ;;  %2561 = vmatpush.msra.mxu1 %v8181_v47  ;;  %1838 = vmatpush.msra.mxu2 %v8181_v47 }
  0xa6   : > { %v8156_v30 = vpop.f32.mrf.mxu0 }
  0xa7   : > { %981 = vmatmul.f32.gmra.mxu1 %v8098_v27  ;;  %12828 = vst [vmem:[#allocation25_spill] sm:$0xff] %v8186_v13  ;;  %2355 = vmatpush.msra.mxu0 %v8186_v13 }
  0xa8   : > { %1045 = vmatmul.f32.gmra.mxu3 %v8101_v18 }
  0xa9   : > { %1500 = vmatmul.f32.vlgmr.msrb.gmra.mxu0 %v7690_v41 }
  0xaa   : > { %1083 = vmatmul.f32.vlgmr.msrb.gmra.mxu2 %v7707_v50  ;;  %v12474_v50 = vand.u32 4294901760, %v8186_v13 }
  0xac   : > { %v8170_v35 = vpop.f32.mrf.mxu1  ;;  %v2137_v58 = vsub.f32 %v8186_v13, %v12474_v50 }
  0xad   : > { %v741_v52 = vpop.f32.mrf.mxu2 }
  0xae   : > { %v8172_v17 = vpop.f32.mrf.mxu0  ;;  %v742_v29 = vadd.f32 %v8168_v25, %v741_v52 }
  0xaf   : > { %1653 = vmatmul.f32.vlgmr.msrb.gmra.mxu1 %v7690_v41 }
  0xb0   : > { %1269 = vmatmul.f32.vlgmr.msrb.gmra.mxu3 %v12826_v44 }
  0xb1   : > { %1504 = vmatmul.f32.gmra.mxu0 %v7715_v56 }
  0xb2   : > { %1088 = vmatmul.f32.gmra.mxu2 %v7729_v0 }
  0xb3   : > { %v986_v41 = vpop.f32.mrf.mxu3 }
  0xb4   : > { %v8190_v18 = vadd.f32 %v986_v41, %v742_v29  ;;  %v8192_v52 = vpop.f32.mrf.mxu1  ;;  %v12830_v29 = vand.u32 4294901760, %v7729_v0  ;;  %v2138_v41 = vand.u32 4294901760, %v2137_v58 }
  0xb5   : > { %v749_v44 = vpop.f32.mrf.mxu2 }
  0xb6   : > { %12829 = vst [vmem:[#allocation26_spill] sm:$0xff] %v8190_v18  ;;  %v8196_v1 = vpop.f32.mrf.mxu0  ;;  %v750_v22 = vadd.f32 %v8168_v25, %v749_v44  ;;  %2139 = vmatpush.msra.mxu3 %v2138_v41  ;;  %v12832_v44 = vand.u32 4294901760, %v7760_v38 }
  0xb7   : > { %1657 = vmatmul.f32.gmra.mxu1 %v7715_v56  ;;  %v1825_v56 = vld [vmem:[%s12396_s4 + $0x60] sm:$0xff] }
  0xb8   : > { %1275 = vmatmul.f32.gmra.mxu3 %v12830_v29  ;;  %v8220_v58 = vand.u32 4294901760, %v1825_v56 }
  0xb9   : > { %1508 = vmatmul.f32.gmra.mxu0 %v7739_v7 }
  0xba   : > { %1093 = vmatmul.f32.gmra.mxu2 %v7760_v38  ;;  %12833 = vst [vmem:[#allocation28_spill] sm:$0xff] %v8220_v58  ;;  %2563 = vmatpush.msra.mxu1 %v8220_v58 }
  0xbb   : > { %v990_v18 = vpop.f32.mrf.mxu3  ;;  %1840 = vmatpush.msra.mxu2 %v8220_v58 }
  0xbc   : > { %v8207_v47 = vadd.f32 %v990_v18, %v750_v22  ;;  %v8209_v48 = vpop.f32.mrf.mxu1  ;;  %v8225_v18 = vsub.f32 %v1825_v56, %v8220_v58 }
  0xbd   : > { %v757_v11 = vpop.f32.mrf.mxu2 }
  0xbe   : > { %12831 = vst [vmem:[#allocation27_spill] sm:$0xff] %v8207_v47  ;;  %v8211_v50 = vpop.f32.mrf.mxu0  ;;  %v758_v0 = vadd.f32 %v8168_v25, %v757_v11  ;;  %v12477_v38 = vand.u32 4294901760, %v8225_v18  ;;  %2358 = vmatpush.msra.mxu0 %v8225_v18 }
  0xbf   : > { %1661 = vmatmul.f32.gmra.mxu1 %v7739_v7  ;;  %12834 = vst [vmem:[#allocation29_spill] sm:$0xff] %v8225_v18 }
  0xc0   : > { %1281 = vmatmul.f32.gmra.mxu3 %v12832_v44  ;;  %v2143_v56 = vsub.f32 %v8225_v18, %v12477_v38 }
  0xc1   : > { %1512 = vmatmul.f32.gmra.mxu0 %v7774_v49 }
  0xc2   : > { %1098 = vmatmul.f32.gmra.mxu2 %v7792_v60 }
  0xc3   : > { %v994_v7 = vpop.f32.mrf.mxu3 }
  0xc4   : > { %v8229_v22 = vadd.f32 %v994_v7, %v758_v0  ;;  %v8231_v11 = vpop.f32.mrf.mxu1  ;;  %v12836_v0 = vand.u32 4294901760, %v7792_v60  ;;  %v2144_v7 = vand.u32 4294901760, %v2143_v56 }
  0xc5   : > { %v765_v29 = vpop.f32.mrf.mxu2 }
  0xc6   : > { %12835 = vst [vmem:[#allocation30_spill] sm:$0xff] %v8229_v22  ;;  %v8235_v41 = vpop.f32.mrf.mxu0  ;;  %v766_v44 = vadd.f32 %v8168_v25, %v765_v29  ;;  %2145 = vmatpush.msra.mxu3 %v2144_v7  ;;  %v12838_v29 = vand.u32 4294901760, %v7830_v20 }
  0xc7   : > { %1665 = vmatmul.f32.gmra.mxu1 %v7774_v49  ;;  %v1824_v49 = vld [vmem:[%s12396_s4 + $0x58] sm:$0xff] }
  0xc8   : > { %1287 = vmatmul.f32.gmra.mxu3 %v12836_v0  ;;  %v8259_v56 = vand.u32 4294901760, %v1824_v49 }
  0xc9   : > { %1516 = vmatmul.f32.gmra.mxu0 %v7810_v8 }
  0xca   : > { %1103 = vmatmul.f32.gmra.mxu2 %v7830_v20  ;;  %12839 = vst [vmem:[#allocation32_spill] sm:$0xff] %v8259_v56  ;;  %2565 = vmatpush.msra.mxu1 %v8259_v56 }
  0xcb   : > { %v998_v22 = vpop.f32.mrf.mxu3  ;;  %1842 = vmatpush.msra.mxu2 %v8259_v56 }
  0xcc   : > { %v8246_v47 = vadd.f32 %v998_v22, %v766_v44  ;;  %v8248_v58 = vpop.f32.mrf.mxu1  ;;  %v8264_v22 = vsub.f32 %v1824_v49, %v8259_v56 }
  0xcd   : > { %v773_v13 = vpop.f32.mrf.mxu2 }
  0xce   : > { %12837 = vst [vmem:[#allocation31_spill] sm:$0xff] %v8246_v47  ;;  %v8250_v38 = vpop.f32.mrf.mxu0  ;;  %v774_v60 = vadd.f32 %v8168_v25, %v773_v13  ;;  %v12480_v20 = vand.u32 4294901760, %v8264_v22  ;;  %2361 = vmatpush.msra.mxu0 %v8264_v22 }
  0xcf   : > { %1669 = vmatmul.f32.gmra.mxu1 %v7810_v8  ;;  %12840 = vst [vmem:[#allocation33_spill] sm:$0xff] %v8264_v22 }
  0xd0   : > { %1293 = vmatmul.f32.gmra.mxu3 %v12838_v29  ;;  %v2149_v49 = vsub.f32 %v8264_v22, %v12480_v20 }
  0xd1   : > { %1520 = vmatmul.f32.gmra.mxu0 %v7849_v36 }
  0xd2   : > { %1108 = vmatmul.f32.gmra.mxu2 %v7868_v9 }
  0xd3   : > { %v1002_v8 = vpop.f32.mrf.mxu3 }
  0xd4   : > { %v8268_v44 = vadd.f32 %v1002_v8, %v774_v60  ;;  %v8270_v13 = vpop.f32.mrf.mxu1  ;;  %v12842_v60 = vand.u32 4294901760, %v7868_v9  ;;  %v2150_v8 = vand.u32 4294901760, %v2149_v49 }
  0xd5   : > { %v781_v0 = vpop.f32.mrf.mxu2 }
  0xd6   : > { %12841 = vst [vmem:[#allocation34_spill] sm:$0xff] %v8268_v44  ;;  %v8274_v7 = vpop.f32.mrf.mxu0  ;;  %v782_v29 = vadd.f32 %v8168_v25, %v781_v0  ;;  %2151 = vmatpush.msra.mxu3 %v2150_v8  ;;  %v12844_v0 = vand.u32 4294901760, %v7895_v57 }
  0xd7   : > { %1673 = vmatmul.f32.gmra.mxu1 %v7849_v36  ;;  %v1823_v36 = vld [vmem:[%s12396_s4 + $0x50] sm:$0xff] }
  0xd8   : > { %1299 = vmatmul.f32.gmra.mxu3 %v12842_v60  ;;  %v8298_v49 = vand.u32 4294901760, %v1823_v36 }
  0xd9   : > { %1524 = vmatmul.f32.gmra.mxu0 %v7881_v45 }
  0xda   : > { %1113 = vmatmul.f32.gmra.mxu2 %v7895_v57  ;;  %12845 = vst [vmem:[#allocation36_spill] sm:$0xff] %v8298_v49  ;;  %2567 = vmatpush.msra.mxu1 %v8298_v49 }
  0xdb   : > { %v1006_v44 = vpop.f32.mrf.mxu3  ;;  %1844 = vmatpush.msra.mxu2 %v8298_v49 }
  0xdc   : > { %v8285_v47 = vadd.f32 %v1006_v44, %v782_v29  ;;  %v8287_v56 = vpop.f32.mrf.mxu1  ;;  %v8303_v44 = vsub.f32 %v1823_v36, %v8298_v49 }
  0xdd   : > { %v789_v18 = vpop.f32.mrf.mxu2 }
  0xde   : > { %12843 = vst [vmem:[#allocation35_spill] sm:$0xff] %v8285_v47  ;;  %v8289_v20 = vpop.f32.mrf.mxu0  ;;  %v790_v9 = vadd.f32 %v8168_v25, %v789_v18  ;;  %v12483_v57 = vand.u32 4294901760, %v8303_v44  ;;  %2364 = vmatpush.msra.mxu0 %v8303_v44 }
  0xdf   : > { %1677 = vmatmul.f32.gmra.mxu1 %v7881_v45  ;;  %12846 = vst [vmem:[#allocation37_spill] sm:$0xff] %v8303_v44 }
  0xe0   : > { %1305 = vmatmul.f32.gmra.mxu3 %v12844_v0  ;;  %v2155_v36 = vsub.f32 %v8303_v44, %v12483_v57 }
  0xe1   : > { %1528 = vmatmul.f32.gmra.mxu0 %v7906_v3 }
  0xe2   : > { %1118 = vmatmul.f32.gmra.mxu2 %v7919_v21 }
  0xe3   : > { %v1010_v45 = vpop.f32.mrf.mxu3 }
  0xe4   : > { %v8307_v29 = vadd.f32 %v1010_v45, %v790_v9  ;;  %v8309_v18 = vpop.f32.mrf.mxu1  ;;  %v12848_v9 = vand.u32 4294901760, %v7919_v21  ;;  %v2156_v45 = vand.u32 4294901760, %v2155_v36 }
  0xe5   : > { %v797_v60 = vpop.f32.mrf.mxu2 }
  0xe6   : > { %12847 = vst [vmem:[#allocation38_spill] sm:$0xff] %v8307_v29  ;;  %v8313_v8 = vpop.f32.mrf.mxu0  ;;  %v798_v0 = vadd.f32 %v8168_v25, %v797_v60  ;;  %2157 = vmatpush.msra.mxu3 %v2156_v45  ;;  %v12850_v60 = vand.u32 4294901760, %v7943_v63 }
  0xe7   : > { %1681 = vmatmul.f32.gmra.mxu1 %v7906_v3  ;;  %v1822_v3 = vld [vmem:[%s12396_s4 + $0x48] sm:$0xff] }
  0xe8   : > { %1311 = vmatmul.f32.gmra.mxu3 %v12848_v9  ;;  %v8337_v36 = vand.u32 4294901760, %v1822_v3 }
  0xe9   : > { %1532 = vmatmul.f32.gmra.mxu0 %v7930_v40 }
  0xea   : > { %1123 = vmatmul.f32.gmra.mxu2 %v7943_v63  ;;  %12851 = vst [vmem:[#allocation40_spill] sm:$0xff] %v8337_v36  ;;  %2569 = vmatpush.msra.mxu1 %v8337_v36 }
  0xeb   : > { %v1014_v29 = vpop.f32.mrf.mxu3  ;;  %1846 = vmatpush.msra.mxu2 %v8337_v36 }
  0xec   : > { %v8324_v47 = vadd.f32 %v1014_v29, %v798_v0  ;;  %v8326_v49 = vpop.f32.mrf.mxu1  ;;  %v8342_v29 = vsub.f32 %v1822_v3, %v8337_v36 }
  0xed   : > { %v805_v22 = vpop.f32.mrf.mxu2 }
  0xee   : > { %12849 = vst [vmem:[#allocation39_spill] sm:$0xff] %v8324_v47  ;;  %v8328_v57 = vpop.f32.mrf.mxu0  ;;  %v806_v21 = vadd.f32 %v8168_v25, %v805_v22  ;;  %v12486_v63 = vand.u32 4294901760, %v8342_v29  ;;  %2367 = vmatpush.msra.mxu0 %v8342_v29 }
  0xef   : > { %1685 = vmatmul.f32.gmra.mxu1 %v7930_v40  ;;  %12852 = vst [vmem:[#allocation41_spill] sm:$0xff] %v8342_v29 }
  0xf0   : > { %1317 = vmatmul.f32.gmra.mxu3 %v12850_v60  ;;  %v2161_v3 = vsub.f32 %v8342_v29, %v12486_v63 }
  0xf1   : > { %1536 = vmatmul.f32.gmra.mxu0 %v7954_v10 }
  0xf2   : > { %1128 = vmatmul.f32.gmra.mxu2 %v7967_v19 }
  0xf3   : > { %v1018_v40 = vpop.f32.mrf.mxu3 }
  0xf4   : > { %v8346_v0 = vadd.f32 %v1018_v40, %v806_v21  ;;  %v8348_v22 = vpop.f32.mrf.mxu1  ;;  %v12854_v21 = vand.u32 4294901760, %v7967_v19  ;;  %v2162_v40 = vand.u32 4294901760, %v2161_v3 }
  0xf5   : > { %v813_v9 = vpop.f32.mrf.mxu2 }
  0xf6   : > { %12853 = vst [vmem:[#allocation42_spill] sm:$0xff] %v8346_v0  ;;  %v8352_v45 = vpop.f32.mrf.mxu0  ;;  %v814_v60 = vadd.f32 %v8168_v25, %v813_v9  ;;  %2163 = vmatpush.msra.mxu3 %v2162_v40  ;;  %v12856_v9 = vand.u32 4294901760, %v7991_v34 }
  0xf7   : > { %1689 = vmatmul.f32.gmra.mxu1 %v7954_v10  ;;  %v1821_v10 = vld [vmem:[%s12396_s4 + $0x40] sm:$0xff] }
  0xf8   : > { %1323 = vmatmul.f32.gmra.mxu3 %v12854_v21  ;;  %v8376_v3 = vand.u32 4294901760, %v1821_v10 }
  0xf9   : > { %1540 = vmatmul.f32.gmra.mxu0 %v7978_v53 }
  0xfa   : > { %1133 = vmatmul.f32.gmra.mxu2 %v7991_v34  ;;  %12857 = vst [vmem:[#allocation44_spill] sm:$0xff] %v8376_v3  ;;  %2571 = vmatpush.msra.mxu1 %v8376_v3 }
  0xfb   : > { %v1022_v0 = vpop.f32.mrf.mxu3  ;;  %1848 = vmatpush.msra.mxu2 %v8376_v3 }
  0xfc   : > { %v8363_v47 = vadd.f32 %v1022_v0, %v814_v60  ;;  %v8365_v36 = vpop.f32.mrf.mxu1  ;;  %v8381_v0 = vsub.f32 %v1821_v10, %v8376_v3 }
  0xfd   : > { %v821_v44 = vpop.f32.mrf.mxu2 }
  0xfe   : > { %12855 = vst [vmem:[#allocation43_spill] sm:$0xff] %v8363_v47  ;;  %v8367_v63 = vpop.f32.mrf.mxu0  ;;  %v822_v19 = vadd.f32 %v8168_v25, %v821_v44  ;;  %v12489_v34 = vand.u32 4294901760, %v8381_v0  ;;  %2370 = vmatpush.msra.mxu0 %v8381_v0 }
  0xff   : > { %1693 = vmatmul.f32.gmra.mxu1 %v7978_v53 }
 0x100   : > { %1329 = vmatmul.f32.gmra.mxu3 %v12856_v9  ;;  %v2167_v10 = vsub.f32 %v8381_v0, %v12489_v34 }
 0x101   : > { %1544 = vmatmul.f32.gmra.mxu0 %v8002_v24 }
 0x102   : > { %1138 = vmatmul.f32.gmra.mxu2 %v8015_v32 }
 0x103   : > { %v1026_v53 = vpop.f32.mrf.mxu3 }
 0x104   : > { %v8385_v60 = vadd.f32 %v1026_v53, %v822_v19  ;;  %v8387_v44 = vpop.f32.mrf.mxu1  ;;  %v12859_v19 = vand.u32 4294901760, %v8015_v32  ;;  %v2168_v53 = vand.u32 4294901760, %v2167_v10  ;;  %v12862_v10 = vand.u32 4294901760, %v8039_v33 }
 0x105   : > { %v829_v21 = vpop.f32.mrf.mxu2 }
 0x106   : > { %12858 = vst [vmem:[#allocation45_spill] sm:$0xff] %v8385_v60  ;;  %v8391_v40 = vpop.f32.mrf.mxu0  ;;  %v830_v9 = vadd.f32 %v8168_v25, %v829_v21  ;;  %2169 = vmatpush.msra.mxu3 %v2168_v53 }
 0x107   : > { %1697 = vmatmul.f32.gmra.mxu1 %v8002_v24  ;;  %v1820_v24 = vld [vmem:[%s12396_s4 + $0x38] sm:$0xff] }
 0x108   : > { %1335 = vmatmul.f32.gmra.mxu3 %v12859_v19  ;;  %v8412_v32 = vand.u32 4294901760, %v1820_v24 }
 0x109   : > { %1548 = vmatmul.f32.gmra.mxu0 %v8026_v39 }
 0x10a   : > { %1143 = vmatmul.f32.gmra.mxu2 %v8039_v33  ;;  %12861 = vst [vmem:[#allocation47_spill] sm:$0xff] %v8412_v32  ;;  %2573 = vmatpush.msra.mxu1 %v8412_v32 }
 0x10b   : > { %v1030_v60 = vpop.f32.mrf.mxu3  ;;  %1850 = vmatpush.msra.mxu2 %v8412_v32 }
 0x10c   : > { %v8402_v47 = vadd.f32 %v1030_v60, %v830_v9  ;;  %v8404_v3 = vpop.f32.mrf.mxu1  ;;  %v8420_v60 = vsub.f32 %v1820_v24, %v8412_v32  ;;  %v12865_v32 = vand.u32 4294901760, %v8063_v31 }
 0x10d   : > { %v837_v29 = vpop.f32.mrf.mxu2 }
 0x10e   : > { %12860 = vst [vmem:[#allocation46_spill] sm:$0xff] %v8402_v47  ;;  %v8406_v34 = vpop.f32.mrf.mxu0  ;;  %v838_v21 = vadd.f32 %v8168_v25, %v837_v29  ;;  %2373 = vmatpush.msra.mxu0 %v8420_v60 }
 0x10f   : > { %1701 = vmatmul.f32.gmra.mxu1 %v8026_v39  ;;  %12863 = vst [vmem:[#allocation48_spill] sm:$0xff] %v8420_v60  ;;  %v12491_v39 = vand.u32 4294901760, %v8420_v60 }
 0x110   : > { %1341 = vmatmul.f32.gmra.mxu3 %v12862_v10 }
 0x111   : > { %1552 = vmatmul.f32.gmra.mxu0 %v8050_v2  ;;  %v2173_v53 = vsub.f32 %v8420_v60, %v12491_v39 }
 0x112   : > { %1148 = vmatmul.f32.gmra.mxu2 %v8063_v31  ;;  %v12867_v31 = vand.u32 4294901760, %v8087_v5 }
 0x113   : > { %v1034_v9 = vpop.f32.mrf.mxu3  ;;  %v2174_v10 = vand.u32 4294901760, %v2173_v53 }
 0x114   : > { %v8426_v29 = vadd.f32 %v1034_v9, %v838_v21  ;;  %v8428_v33 = vpop.f32.mrf.mxu1 }
 0x115   : > { %v845_v19 = vpop.f32.mrf.mxu2  ;;  %2175 = vmatpush.msra.mxu3 %v2174_v10 }
 0x116   : > { %12864 = vst [vmem:[#allocation49_spill] sm:$0xff] %v8426_v29  ;;  %v8433_v24 = vpop.f32.mrf.mxu0  ;;  %v846_v47 = vadd.f32 %v8168_v25, %v845_v19 }
 0x117   : > { %1705 = vmatmul.f32.gmra.mxu1 %v8050_v2 }
 0x118   : > { %1347 = vmatmul.f32.gmra.mxu3 %v12865_v32 }
 0x119   : > { %1556 = vmatmul.f32.gmra.mxu0 %v8074_v62 }
 0x11a   : > { %1153 = vmatmul.f32.gmra.mxu2 %v8087_v5 }
 0x11b   : > { %v1038_v21 = vpop.f32.mrf.mxu3 }
 0x11c   : > { %v8441_v9 = vadd.f32 %v1038_v21, %v846_v47  ;;  %v8443_v29 = vpop.f32.mrf.mxu1  ;;  %v12871_v21 = vand.u32 4294901760, %v8114_v61 }
 0x11d   : > { %v853_v39 = vpop.f32.mrf.mxu2 }
 0x11e   : > { %12866 = vst [vmem:[#allocation50_spill] sm:$0xff] %v8441_v9  ;;  %v8445_v60 = vpop.f32.mrf.mxu0  ;;  %v854_v2 = vadd.f32 %v8168_v25, %v853_v39 }
 0x11f   : > { %1709 = vmatmul.f32.gmra.mxu1 %v8074_v62  ;;  %v1819_v62 = vld [vmem:[%s12396_s4 + $0x30] sm:$0xff] }
 0x120   : > { %1353 = vmatmul.f32.gmra.mxu3 %v12867_v31  ;;  %v8463_v5 = vand.u32 4294901760, %v1819_v62 }
 0x121   : > { %1560 = vmatmul.f32.gmra.mxu0 %v8098_v27 }
 0x122   : > { %1158 = vmatmul.f32.gmra.mxu2 %v8114_v61  ;;  %12870 = vst [vmem:[#allocation53_spill] sm:$0xff] %v8463_v5  ;;  %2575 = vmatpush.msra.mxu1 %v8463_v5  ;;  %v614_v61 = vadd.f32 %v8168_v25, %v8156_v30 }
 0x123   : > { %v1042_v32 = vpop.f32.mrf.mxu3  ;;  %1852 = vmatpush.msra.mxu2 %v8463_v5 }
 0x124   : > { %v8453_v19 = vadd.f32 %v1042_v32, %v854_v2  ;;  %v8455_v47 = vpop.f32.mrf.mxu1  ;;  %v8471_v2 = vsub.f32 %v1819_v62, %v8463_v5  ;;  %v12873_v5 = vand.u32 4294901760, %v7713_v55 }
 0x125   : > { %12869 = vst [vmem:[#allocation52_spill] sm:$0xff] %v8455_v47  ;;  %v861_v53 = vpop.f32.mrf.mxu2  ;;  %v923_v47 = vadd.f32 %v8170_v35, %v614_v61 }
 0x126   : > { %12868 = vst [vmem:[#allocation51_spill] sm:$0xff] %v8453_v19  ;;  %v8457_v10 = vpop.f32.mrf.mxu0  ;;  %v862_v39 = vadd.f32 %v8168_v25, %v861_v53  ;;  %2376 = vmatpush.msra.mxu0 %v8471_v2 }
 0x127   : > { %1713 = vmatmul.f32.gmra.mxu1 %v8098_v27  ;;  %v12494_v27 = vand.u32 4294901760, %v8471_v2 }
 0x128   : > { %1359 = vmatmul.f32.gmra.mxu3 %v12871_v21 }
 0x129   : > { %1564 = vmatmul.f32.gmra.mxu0 %v7695_v46  ;;  %v2179_v62 = vsub.f32 %v8471_v2, %v12494_v27 }
 0x12a   : > { %1163 = vmatmul.f32.gmra.mxu2 %v7713_v55  ;;  %v1818_v55 = vld [vmem:[%s12396_s4 + $0x28] sm:$0xff] }
 0x12b   : > { %v1046_v31 = vpop.f32.mrf.mxu3  ;;  %v2180_v9 = vand.u32 4294901760, %v2179_v62  ;;  %v8506_v35 = vand.u32 4294901760, %v1818_v55 }
 0x12c   : > { %v8479_v32 = vadd.f32 %v1046_v31, %v862_v39  ;;  %v8481_v53 = vpop.f32.mrf.mxu1  ;;  %v622_v31 = vadd.f32 %v8168_v25, %v8172_v17 }
 0x12d   : > { %v1084_v21 = vpop.f32.mrf.mxu2  ;;  %2181 = vmatpush.msra.mxu3 %v2180_v9  ;;  %1854 = vmatpush.msra.mxu2 %v8506_v35  ;;  %v8514_v17 = vsub.f32 %v1818_v55, %v8506_v35 }
 0x12e   : > { %12872 = vst [vmem:[#allocation54_spill] sm:$0xff] %v8479_v32  ;;  %v8486_v19 = vpop.f32.mrf.mxu0  ;;  %v1085_v30 = vadd.f32 %v1084_v21, %v923_v47  ;;  %v927_v9 = vadd.f32 %v8192_v52, %v622_v31  ;;  %v12874_v47 = vand.u32 4294901760, %v7737_v6  ;;  %2577 = vmatpush.msra.mxu1 %v8506_v35 }
 0x12f   : > { %1717 = vmatmul.f32.gmra.mxu1 %v7695_v46  ;;  %v12495_v61 = vand.u32 4294901760, %v8514_v17  ;;  %2379 = vmatpush.msra.mxu0 %v8514_v17 }
 0x130   : > { %1365 = vmatmul.f32.gmra.mxu3 %v12873_v5 }
 0x131   : > { %1568 = vmatmul.f32.gmra.mxu0 %v7721_v59 }
 0x132   : > { %1168 = vmatmul.f32.gmra.mxu2 %v7737_v6  ;;  %v630_v6 = vadd.f32 %v8168_v25, %v8196_v1 }
 0x133   : > { %v1270_v39 = vpop.f32.mrf.mxu3 }
 0x134   : > { %v8496_v27 = vadd.f32 %v1270_v39, %v1085_v30  ;;  %v8498_v32 = vpop.f32.mrf.mxu1  ;;  %v2185_v39 = vsub.f32 %v8514_v17, %v12495_v61  ;;  %v931_v55 = vadd.f32 %v8209_v48, %v630_v6 }
 0x135   : > { %v1089_v46 = vpop.f32.mrf.mxu2 }
 0x136   : > { %v8500_v62 = vpop.f32.mrf.mxu0  ;;  %v1090_v5 = vadd.f32 %v1089_v46, %v927_v9  ;;  %v2186_v46 = vand.u32 4294901760, %v2185_v39  ;;  %v12875_v9 = vand.u32 4294901760, %v7766_v42 }
 0x137   : > { %1721 = vmatmul.f32.gmra.mxu1 %v7721_v59 }
 0x138   : > { %1371 = vmatmul.f32.gmra.mxu3 %v12874_v47 }
 0x139   : > { %1572 = vmatmul.f32.gmra.mxu0 %v7748_v28  ;;  %2187 = vmatpush.msra.mxu3 %v2186_v46 }
 0x13a   : > { %1173 = vmatmul.f32.gmra.mxu2 %v7766_v42  ;;  %v1817_v42 = vld [vmem:[%s12396_s4 + $0x20] sm:$0xff] }
 0x13b   : > { %v1276_v59 = vpop.f32.mrf.mxu3  ;;  %v8549_v48 = vand.u32 4294901760, %v1817_v42 }
 0x13c   : > { %v8522_v52 = vadd.f32 %v1276_v59, %v1090_v5  ;;  %v8524_v21 = vpop.f32.mrf.mxu1  ;;  %v638_v5 = vadd.f32 %v8168_v25, %v8211_v50 }
 0x13d   : > { %v1094_v30 = vpop.f32.mrf.mxu2  ;;  %1856 = vmatpush.msra.mxu2 %v8549_v48  ;;  %v8557_v50 = vsub.f32 %v1817_v42, %v8549_v48  ;;  %2579 = vmatpush.msra.mxu1 %v8549_v48 }
 0x13e   : > { %v8529_v31 = vpop.f32.mrf.mxu0  ;;  %v1095_v1 = vadd.f32 %v1094_v30, %v931_v55  ;;  %v935_v6 = vadd.f32 %v8231_v11, %v638_v5  ;;  %v12876_v30 = vand.u32 4294901760, %v7798_v23 }
 0x13f   : > { %1725 = vmatmul.f32.gmra.mxu1 %v7748_v28  ;;  %v12496_v55 = vand.u32 4294901760, %v8557_v50  ;;  %2382 = vmatpush.msra.mxu0 %v8557_v50 }
 0x140   : > { %1377 = vmatmul.f32.gmra.mxu3 %v12875_v9 }
 0x141   : > { %1576 = vmatmul.f32.gmra.mxu0 %v7778_v54 }
 0x142   : > { %1178 = vmatmul.f32.gmra.mxu2 %v7798_v23  ;;  %v646_v23 = vadd.f32 %v8168_v25, %v8235_v41 }
 0x143   : > { %v1282_v47 = vpop.f32.mrf.mxu3 }
 0x144   : > { %v8539_v59 = vadd.f32 %v1282_v47, %v1095_v1  ;;  %v8541_v61 = vpop.f32.mrf.mxu1  ;;  %v2191_v47 = vsub.f32 %v8557_v50, %v12496_v55  ;;  %v939_v42 = vadd.f32 %v8248_v58, %v646_v23 }
 0x145   : > { %v1099_v28 = vpop.f32.mrf.mxu2 }
 0x146   : > { %v8543_v39 = vpop.f32.mrf.mxu0  ;;  %v1100_v46 = vadd.f32 %v1099_v28, %v935_v6  ;;  %v2192_v28 = vand.u32 4294901760, %v2191_v47  ;;  %v12877_v6 = vand.u32 4294901760, %v7837_v26 }
 0x147   : > { %1729 = vmatmul.f32.gmra.mxu1 %v7778_v54 }
 0x148   : > { %1383 = vmatmul.f32.gmra.mxu3 %v12876_v30 }
 0x149   : > { %1580 = vmatmul.f32.gmra.mxu0 %v7815_v12  ;;  %2193 = vmatpush.msra.mxu3 %v2192_v28 }
 0x14a   : > { %1183 = vmatmul.f32.gmra.mxu2 %v7837_v26  ;;  %v1816_v26 = vld [vmem:[%s12396_s4 + $0x18] sm:$0xff] }
 0x14b   : > { %v1288_v54 = vpop.f32.mrf.mxu3  ;;  %v8592_v58 = vand.u32 4294901760, %v1816_v26 }
 0x14c   : > { %v8565_v11 = vadd.f32 %v1288_v54, %v1100_v46  ;;  %v8567_v9 = vpop.f32.mrf.mxu1  ;;  %v654_v46 = vadd.f32 %v8168_v25, %v8250_v38 }
 0x14d   : > { %v1104_v1 = vpop.f32.mrf.mxu2  ;;  %1858 = vmatpush.msra.mxu2 %v8592_v58  ;;  %v8600_v38 = vsub.f32 %v1816_v26, %v8592_v58  ;;  %2581 = vmatpush.msra.mxu1 %v8592_v58 }
 0x14e   : > { %v8572_v5 = vpop.f32.mrf.mxu0  ;;  %v1105_v41 = vadd.f32 %v1104_v1, %v939_v42  ;;  %v943_v23 = vadd.f32 %v8270_v13, %v654_v46  ;;  %v12878_v1 = vand.u32 4294901760, %v7874_v51 }
 0x14f   : > { %1733 = vmatmul.f32.gmra.mxu1 %v7815_v12  ;;  %v12497_v42 = vand.u32 4294901760, %v8600_v38  ;;  %2385 = vmatpush.msra.mxu0 %v8600_v38 }
 0x150   : > { %1389 = vmatmul.f32.gmra.mxu3 %v12877_v6 }
 0x151   : > { %1584 = vmatmul.f32.gmra.mxu0 %v7853_v37 }
 0x152   : > { %1188 = vmatmul.f32.gmra.mxu2 %v7874_v51  ;;  %v662_v51 = vadd.f32 %v8168_v25, %v8274_v7 }
 0x153   : > { %v1294_v30 = vpop.f32.mrf.mxu3 }
 0x154   : > { %v8582_v54 = vadd.f32 %v1294_v30, %v1105_v41  ;;  %v8584_v55 = vpop.f32.mrf.mxu1  ;;  %v2197_v30 = vsub.f32 %v8600_v38, %v12497_v42  ;;  %v947_v26 = vadd.f32 %v8287_v56, %v662_v51 }
 0x155   : > { %v1109_v12 = vpop.f32.mrf.mxu2 }
 0x156   : > { %v8586_v47 = vpop.f32.mrf.mxu0  ;;  %v1110_v28 = vadd.f32 %v1109_v12, %v943_v23  ;;  %v2198_v12 = vand.u32 4294901760, %v2197_v30  ;;  %v12880_v23 = vand.u32 4294901760, %v7901_v15 }
 0x157   : > { %1737 = vmatmul.f32.gmra.mxu1 %v7853_v37 }
 0x158   : > { %1395 = vmatmul.f32.gmra.mxu3 %v12878_v1  ;;  %v12881_v1 = vld [vmem:[#allocation5_spill] sm:$0xff] }
 0x159   : > { %1588 = vmatmul.f32.gmra.mxu0 %v7884_v14  ;;  %2199 = vmatpush.msra.mxu3 %v2198_v12 }
 0x15a   : > { %1193 = vmatmul.f32.gmra.mxu2 %v7901_v15  ;;  %v1815_v15 = vld [vmem:[%s12396_s4 + $0x10] sm:$0xff] }
 0x15b   : > { %v1300_v37 = vpop.f32.mrf.mxu3  ;;  %v8635_v56 = vand.u32 4294901760, %v1815_v15 }
 0x15c   : > { %v8608_v13 = vadd.f32 %v1300_v37, %v1110_v28  ;;  %v8610_v6 = vpop.f32.mrf.mxu1  ;;  %v670_v37 = vadd.f32 %v8168_v25, %v8289_v20  ;;  %v12885_v20 = vld [vmem:[#allocation6_spill] sm:$0xff] }
 0x15d   : > { %v1114_v41 = vpop.f32.mrf.mxu2  ;;  %1860 = vmatpush.msra.mxu2 %v8635_v56  ;;  %v8643_v12 = vsub.f32 %v1815_v15, %v8635_v56  ;;  %2583 = vmatpush.msra.mxu1 %v8635_v56 }
 0x15e   : > { %v8615_v46 = vpop.f32.mrf.mxu0  ;;  %v1115_v7 = vadd.f32 %v1114_v41, %v947_v26  ;;  %v951_v51 = vadd.f32 %v8309_v18, %v670_v37  ;;  %v12884_v41 = vand.u32 4294901760, %v12881_v1  ;;  %v678_v18 = vadd.f32 %v8168_v25, %v8313_v8  ;;  %v12890_v8 = vld [vmem:[#allocation8_spill] sm:$0xff] }
 0x15f   : > { %12879 = vst [vmem:[#allocation55_spill] sm:$0xff] %v8615_v46  ;;  %1741 = vmatmul.f32.gmra.mxu1 %v7884_v14  ;;  %2388 = vmatpush.msra.mxu0 %v8643_v12 }
 0x160   : > { %1401 = vmatmul.f32.gmra.mxu3 %v12880_v23  ;;  %v12886_v23 = vld [vmem:[#allocation7_spill] sm:$0xff] }
 0x161   : > { %1592 = vmatmul.f32.gmra.mxu0 %v7909_v4 }
 0x162   : > { %1198 = vmatmul.f32.gmra.mxu2 %v12881_v1 }
 0x163   : > { %v1306_v28 = vpop.f32.mrf.mxu3 }
 0x164   : > { %v8625_v42 = vadd.f32 %v1306_v28, %v1115_v7  ;;  %v8627_v46 = vpop.f32.mrf.mxu1  ;;  %v12498_v7 = vand.u32 4294901760, %v8643_v12 }
 0x165   : > { %12882 = vst [vmem:[#allocation5_spill] sm:$0xff] %v8627_v46  ;;  %v1119_v14 = vpop.f32.mrf.mxu2 }
 0x166   : > { %v8629_v30 = vpop.f32.mrf.mxu0  ;;  %v1120_v26 = vadd.f32 %v1119_v14, %v951_v51  ;;  %v2203_v14 = vsub.f32 %v8643_v12, %v12498_v7  ;;  %v686_v7 = vadd.f32 %v8168_v25, %v8328_v57  ;;  %v12895_v57 = vld [vmem:[#allocation10_spill] sm:$0xff] }
 0x167   : > { %12883 = vst [vmem:[#allocation56_spill] sm:$0xff] %v8629_v30  ;;  %1745 = vmatmul.f32.gmra.mxu1 %v7909_v4  ;;  %v12889_v30 = vand.u32 4294901760, %v12886_v23 }
 0x168   : > { %1407 = vmatmul.f32.gmra.mxu3 %v12884_v41  ;;  %v2204_v51 = vand.u32 4294901760, %v2203_v14  ;;  %v955_v41 = vadd.f32 %v8326_v49, %v678_v18  ;;  %v1814_v49 = vld [vmem:[%s12396_s4 + $0x8] sm:$0xff] }
 0x169   : > { %1596 = vmatmul.f32.gmra.mxu0 %v12885_v20 }
 0x16a   : > { %1203 = vmatmul.f32.gmra.mxu2 %v12886_v23  ;;  %2205 = vmatpush.msra.mxu3 %v2204_v51  ;;  %v959_v23 = vadd.f32 %v8348_v22, %v686_v7  ;;  %v12896_v51 = vld [vmem:[#allocation11_spill] sm:$0xff]  ;;  %v694_v22 = vadd.f32 %v8168_v25, %v8352_v45  ;;  %v12900_v45 = vld [vmem:[#allocation12_spill] sm:$0xff] }
 0x16b   : > { %v1312_v4 = vpop.f32.mrf.mxu3 }
 0x16c   : > { %v8651_v1 = vadd.f32 %v1312_v4, %v1120_v26  ;;  %v8653_v28 = vpop.f32.mrf.mxu1  ;;  %v12891_v4 = vld [vmem:[#allocation9_spill] sm:$0xff] }
 0x16d   : > { %12887 = vst [vmem:[#allocation6_spill] sm:$0xff] %v8653_v28  ;;  %v1124_v37 = vpop.f32.mrf.mxu2  ;;  %v12894_v18 = vand.u32 4294901760, %v12891_v4 }
 0x16e   : > { %v8658_v15 = vpop.f32.mrf.mxu0  ;;  %v1125_v26 = vadd.f32 %v1124_v37, %v955_v41 }
 0x16f   : > { %12888 = vst [vmem:[#allocation7_spill] sm:$0xff] %v8658_v15  ;;  %1749 = vmatmul.f32.gmra.mxu1 %v12885_v20 }
 0x170   : > { %1413 = vmatmul.f32.gmra.mxu3 %v12889_v30  ;;  %v8678_v30 = vand.u32 4294901760, %v1814_v49 }
 0x171   : > { %1600 = vmatmul.f32.gmra.mxu0 %v12890_v8 }
 0x172   : > { %1208 = vmatmul.f32.gmra.mxu2 %v12891_v4  ;;  %2585 = vmatpush.msra.mxu1 %v8678_v30 }
 0x173   : > { %v1318_v28 = vpop.f32.mrf.mxu3  ;;  %1862 = vmatpush.msra.mxu2 %v8678_v30 }
 0x174   : > { %v8668_v46 = vadd.f32 %v1318_v28, %v1125_v26  ;;  %v8670_v15 = vpop.f32.mrf.mxu1  ;;  %v8686_v28 = vsub.f32 %v1814_v49, %v8678_v30 }
 0x175   : > { %12892 = vst [vmem:[#allocation8_spill] sm:$0xff] %v8670_v15  ;;  %v1129_v20 = vpop.f32.mrf.mxu2 }
 0x176   : > { %v8672_v14 = vpop.f32.mrf.mxu0  ;;  %v1130_v37 = vadd.f32 %v1129_v20, %v959_v23  ;;  %2391 = vmatpush.msra.mxu0 %v8686_v28 }
 0x177   : > { %12893 = vst [vmem:[#allocation9_spill] sm:$0xff] %v8672_v14  ;;  %1753 = vmatmul.f32.gmra.mxu1 %v12890_v8  ;;  %v12499_v8 = vand.u32 4294901760, %v8686_v28  ;;  %v12899_v14 = vand.u32 4294901760, %v12896_v51 }
 0x178   : > { %1419 = vmatmul.f32.gmra.mxu3 %v12894_v18  ;;  %v963_v18 = vadd.f32 %v8365_v36, %v694_v22  ;;  %v1813_v36 = vld [vmem:[%s12396_s4] sm:$0xff] }
 0x179   : > { %1604 = vmatmul.f32.gmra.mxu0 %v12895_v57  ;;  %v2209_v20 = vsub.f32 %v8686_v28, %v12499_v8  ;;  %v702_v8 = vadd.f32 %v8168_v25, %v8367_v63 }
 0x17a   : > { %1213 = vmatmul.f32.gmra.mxu2 %v12896_v51 }
 0x17b   : > { %v1324_v41 = vpop.f32.mrf.mxu3  ;;  %v2210_v23 = vand.u32 4294901760, %v2209_v20  ;;  %v967_v63 = vadd.f32 %v8387_v44, %v702_v8  ;;  %v1502_v44 = vadd.f32 %v8457_v10, %v8496_v27 }
 0x17c   : > { %v8694_v7 = vadd.f32 %v1324_v41, %v1130_v37  ;;  %v8696_v26 = vpop.f32.mrf.mxu1  ;;  %v12901_v41 = vld [vmem:[#allocation13_spill] sm:$0xff] }
 0x17d   : > { %12897 = vst [vmem:[#allocation10_spill] sm:$0xff] %v8696_v26  ;;  %v1134_v4 = vpop.f32.mrf.mxu2  ;;  %2211 = vmatpush.msra.mxu3 %v2210_v23  ;;  %v1655_v27 = vadd.f32 %v8481_v53, %v1502_v44  ;;  %v12916_v44 = vld [vmem:[#allocation22_spill] sm:$0xff] }
 0x17e   : > { %v8701_v49 = vpop.f32.mrf.mxu0  ;;  %v1135_v37 = vadd.f32 %v1134_v4, %v963_v18  ;;  %v12904_v4 = vand.u32 4294901760, %v8123_v43  ;;  %v12905_v18 = vld [vmem:[#allocation14_spill] sm:$0xff] }
 0x17f   : > { %12898 = vst [vmem:[#allocation11_spill] sm:$0xff] %v8701_v49  ;;  %1757 = vmatmul.f32.gmra.mxu1 %v12895_v57 }
 0x180   : > { %1425 = vmatmul.f32.gmra.mxu3 %v12899_v14  ;;  %v8718_v14 = vand.u32 4294901760, %v1813_v36 }
 0x181   : > { %1608 = vmatmul.f32.gmra.mxu0 %v12900_v45 }
 0x182   : > { %1218 = vmatmul.f32.gmra.mxu2 %v12901_v41  ;;  %v8725_v22 = vsub.f32 %v1813_v36, %v8718_v14  ;;  %2587 = vmatpush.msra.mxu1 %v8718_v14 }
 0x183   : > { %v1330_v26 = vpop.f32.mrf.mxu3  ;;  %1864 = vmatpush.msra.mxu2 %v8718_v14 }
 0x184   : > { %v8711_v15 = vadd.f32 %v1330_v26, %v1135_v37  ;;  %v8713_v49 = vpop.f32.mrf.mxu1  ;;  %v12903_v26 = vand.u32 4294901760, %v12901_v41  ;;  %v12500_v20 = vand.u32 4294901760, %v8725_v22  ;;  %2394 = vmatpush.msra.mxu0 %v8725_v22  ;;  %v710_v41 = vadd.f32 %v8168_v25, %v8391_v40 }
 0x185   : > { %v1139_v57 = vpop.f32.mrf.mxu2  ;;  %2784 = vmatpush.msrb.mxu2 %v12904_v4  ;;  %v12908_v4 = vld [vmem:[#allocation25_spill] sm:$0xff]  ;;  %v12910_v40 = vand.u32 4294901760, %v12905_v18 }
 0x186   : > { %v8720_v51 = vpop.f32.mrf.mxu0  ;;  %v1140_v23 = vadd.f32 %v1139_v57, %v967_v63  ;;  %v2215_v43 = vsub.f32 %v8725_v22, %v12500_v20  ;;  %v1781_v20 = vmax.f32 %v1655_v27, 0.0  ;;  %v12920_v27 = vld [vmem:[#allocation37_spill] sm:$0xff] }
 0x187   : > { %12902 = vst [vmem:[#allocation12_spill] sm:$0xff] %v8720_v51  ;;  %1761 = vmatmul.f32.gmra.mxu1 %v12900_v45  ;;  %v12906_v45 = vld [vmem:[#allocation23_spill] sm:$0xff]  ;;  %v12909_v51 = vand.u32 4294901760, %v12908_v4  ;;  %v12915_v4 = vld [vmem:[#allocation16_spill] sm:$0xff] }
 0x188   : > { %1431 = vmatmul.f32.gmra.mxu3 %v12903_v26  ;;  %v12907_v37 = vand.u32 4294901760, %v12906_v45  ;;  %v2216_v26 = vand.u32 4294901760, %v2215_v43  ;;  %v971_v45 = vadd.f32 %v8404_v3, %v710_v41  ;;  %v12914_v43 = vld [vmem:[#allocation20_spill] sm:$0xff]  ;;  %v718_v3 = vadd.f32 %v8168_v25, %v8406_v34 }
 0x189   : > { %1612 = vmatmul.f32.gmra.mxu0 %v8029_v16  ;;  %v12922_v34 = vld [vmem:[#allocation28_spill] sm:$0xff] }
 0x18a   : > { %1223 = vmatmul.f32.gmra.mxu2 %v12905_v18  ;;  %2217 = vmatpush.msra.mxu3 %v2216_v26  ;;  %v1506_v18 = vadd.f32 %v8486_v19, %v8522_v52  ;;  %v975_v19 = vadd.f32 %v8428_v33, %v718_v3  ;;  %v12929_v33 = vld [vmem:[#allocation36_spill] sm:$0xff] }
 0x18b   : > { %v1336_v8 = vpop.f32.mrf.mxu3  ;;  %2788 = vmatpush.msrb.mxu2 %v12907_v37  ;;  %v12913_v37 = vld [vmem:[#allocation15_spill] sm:$0xff] }
 0x18c   : > { %v8746_v36 = vadd.f32 %v1336_v8, %v1140_v23  ;;  %v8748_v57 = vpop.f32.mrf.mxu1  ;;  %v12911_v23 = vld [vmem:[#allocation29_spill] sm:$0xff]  ;;  %2975 = vmatpush.msrb.mxu3 %v12914_v43  ;;  %v8780_v43 = vand.u32 4294901760, %v1781_v20  ;;  %v1659_v52 = vadd.f32 %v8498_v32, %v1506_v18  ;;  %v12930_v32 = vand.u32 4294901760, %v8381_v0 }
 0x18d   : > { %v1144_v63 = vpop.f32.mrf.mxu2  ;;  %2792 = vmatpush.msrb.mxu2 %v12909_v51  ;;  %v12912_v8 = vand.u32 4294901760, %v12911_v23  ;;  %v12921_v23 = vand.u32 4294901760, %v12920_v27  ;;  %v12928_v27 = vld [vmem:[#allocation18_spill] sm:$0xff]  ;;  %v1510_v18 = vadd.f32 %v8500_v62, %v8539_v59 }
 0x18e   : > { %v8752_v10 = vpop.f32.mrf.mxu0  ;;  %v1145_v51 = vadd.f32 %v1144_v63, %v971_v45  ;;  %2977 = vmatpush.msrb.mxu3 %v12916_v44  ;;  %v12919_v45 = vld [vmem:[#allocation24_spill] sm:$0xff]  ;;  %v1782_v3 = vmax.f32 %v1659_v52, 0.0 }
 0x18f   : > { %1765 = vmatmul.f32.gmra.mxu1 %v8029_v16  ;;  %2796 = vmatpush.msrb.mxu2 %v12912_v8  ;;  %v12917_v16 = vld [vmem:[#allocation33_spill] sm:$0xff]  ;;  %v1663_v52 = vadd.f32 %v8524_v21, %v1510_v18 }
 0x190   : > { %1437 = vmatmul.f32.gmra.mxu3 %v12910_v40  ;;  %v12918_v26 = vand.u32 4294901760, %v12917_v16  ;;  %v12926_v16 = vld [vmem:[#allocation17_spill] sm:$0xff]  ;;  %v8816_v59 = vand.u32 4294901760, %v1782_v3 }
 0x191   : > { %1616 = vmatmul.f32.gmra.mxu0 %v12913_v37  ;;  %2979 = vmatpush.msrb.mxu3 %v12919_v45  ;;  %v12941_v21 = vld [vmem:[#allocation53_spill] sm:$0xff]  ;;  %v1783_v18 = vmax.f32 %v1663_v52, 0.0 }
 0x192   : > { %1228 = vmatmul.f32.gmra.mxu2 %v12915_v4  ;;  %12935 = vst [vmem:[#allocation13_spill] sm:$0xff] %v8816_v59 }
 0x193   : > { %v1342_v53 = vpop.f32.mrf.mxu3  ;;  %2800 = vmatpush.msrb.mxu2 %v12918_v26  ;;  %2981 = vmatpush.msrb.mxu3 %v12922_v34  ;;  %v12927_v26 = vld [vmem:[#allocation32_spill] sm:$0xff] }
 0x194   : > { %v8771_v41 = vadd.f32 %v1342_v53, %v1145_v51  ;;  %v8773_v40 = vpop.f32.mrf.mxu1  ;;  %v12923_v51 = vand.u32 4294901760, %v12915_v4  ;;  %v12924_v53 = vld [vmem:[#allocation41_spill] sm:$0xff]  ;;  %v726_v4 = vadd.f32 %v8168_v25, %v8433_v24  ;;  %v12934_v24 = vld [vmem:[#allocation44_spill] sm:$0xff] }
 0x195   : > { %v1149_v63 = vpop.f32.mrf.mxu2  ;;  %2804 = vmatpush.msrb.mxu2 %v12921_v23  ;;  %v12925_v44 = vand.u32 4294901760, %v12924_v53  ;;  %2983 = vmatpush.msrb.mxu3 %v12927_v26  ;;  %v12936_v26 = vand.u32 4294901760, %v12928_v27 }
 0x196   : > { %v8778_v8 = vpop.f32.mrf.mxu0  ;;  %v1150_v45 = vadd.f32 %v1149_v63, %v975_v19  ;;  %v979_v62 = vadd.f32 %v8443_v29, %v726_v4  ;;  %v734_v29 = vadd.f32 %v8168_v25, %v8445_v60  ;;  %v12943_v25 = vand.u32 4294901760, %v8557_v50 }
 0x197   : > { %1769 = vmatmul.f32.gmra.mxu1 %v12913_v37  ;;  %2808 = vmatpush.msrb.mxu2 %v12925_v44  ;;  %v8794_v37 = vsub.f32 %v1781_v20, %v8780_v43  ;;  %v12931_v20 = vld [vmem:[#allocation40_spill] sm:$0xff]  ;;  %v12947_v50 = vand.u32 4294901760, %v8600_v38 }
 0x198   : > { %1443 = vmatmul.f32.gmra.mxu3 %v12923_v51  ;;  %v12932_v51 = vld [vmem:[#allocation48_spill] sm:$0xff] }
 0x199   : > { %1620 = vmatmul.f32.gmra.mxu0 %v12926_v16  ;;  %2985 = vmatpush.msrb.mxu3 %v12929_v33  ;;  %v12933_v53 = vand.u32 4294901760, %v12932_v51  ;;  %v1867_v0 = vand.u32 4294901760, %v8794_v37  ;;  %v12939_v33 = vld [vmem:[#allocation47_spill] sm:$0xff]  ;;  %v1514_v51 = vadd.f32 %v8529_v31, %v8565_v11 }
 0x19a   : > { %1233 = vmatmul.f32.gmra.mxu2 %v12928_v27  ;;  %v12942_v27 = vand.u32 4294901760, %v8514_v17  ;;  %v12944_v17 = vld [vmem:[#allocation52_spill] sm:$0xff] }
 0x19b   : > { %v1348_v23 = vpop.f32.mrf.mxu3  ;;  %2812 = vmatpush.msrb.mxu2 %v12930_v32  ;;  %2987 = vmatpush.msrb.mxu3 %v12931_v20  ;;  %v1868_v20 = vsub.f32 %v8794_v37, %v1867_v0  ;;  %v1667_v31 = vadd.f32 %v8541_v61, %v1514_v51  ;;  %v12948_v61 = vand.u32 4294901760, %v8643_v12 }
 0x19c   : > { %v8803_v34 = vadd.f32 %v1348_v23, %v1150_v45  ;;  %v8805_v63 = vpop.f32.mrf.mxu1  ;;  %v12937_v45 = vand.u32 4294901760, %v8471_v2  ;;  %v12938_v23 = vld [vmem:[#allocation19_spill] sm:$0xff]  ;;  %v1874_v2 = vsub.f32 %v1782_v3, %v8816_v59  ;;  %v8847_v3 = vand.u32 4294901760, %v1783_v18 }
 0x19d   : > { %v1154_v19 = vpop.f32.mrf.mxu2  ;;  %2816 = vmatpush.msrb.mxu2 %v12933_v53  ;;  %2989 = vmatpush.msrb.mxu3 %v12934_v24  ;;  %v1869_v52 = vand.u32 4294901760, %v1868_v20 }
 0x19e   : > { %v8810_v44 = vpop.f32.mrf.mxu0  ;;  %v1155_v32 = vadd.f32 %v1154_v19, %v979_v62  ;;  %v983_v62 = vadd.f32 %v12944_v17, %v734_v29  ;;  %12945 = vst [vmem:[#allocation14_spill] sm:$0xff] %v8847_v3  ;;  %v12951_v29 = vand.u32 4294901760, %v8725_v22 }
 0x19f   : > { %1773 = vmatmul.f32.gmra.mxu1 %v12926_v16  ;;  %2820 = vmatpush.msrb.mxu2 %v12937_v45  ;;  %v12940_v16 = vld [vmem:[#allocation21_spill] sm:$0xff] }
 0x1a0   : > { %1449 = vmatmul.f32.gmra.mxu3 %v12936_v26  ;;  %v12946_v11 = vand.u32 4294901760, %v12940_v16 }
 0x1a1   : > { %1624 = vmatmul.f32.gmra.mxu0 %v12938_v23  ;;  %2991 = vmatpush.msrb.mxu3 %v12939_v33  ;;  %v1784_v33 = vmax.f32 %v1667_v31, 0.0 }
 0x1a2   : > { %1238 = vmatmul.f32.gmra.mxu2 %v12940_v16  ;;  %v12949_v16 = vand.u32 4294901760, %v8686_v28 }
 0x1a3   : > { %v1354_v4 = vpop.f32.mrf.mxu3  ;;  %2993 = vmatpush.msrb.mxu3 %v12941_v21  ;;  %2824 = vmatpush.msrb.mxu2 %v12942_v27 }
 0x1a4   : > { %v8835_v19 = vadd.f32 %v1354_v4, %v1155_v32  ;;  %v8837_v53 = vpop.f32.mrf.mxu1  ;;  %v8875_v4 = vand.u32 4294901760, %v1784_v33 }
 0x1a5   : > { %v1159_v24 = vpop.f32.mrf.mxu2  ;;  %2995 = vmatpush.msrb.mxu3 %v8506_v35  ;;  %2828 = vmatpush.msrb.mxu2 %v12943_v25  ;;  %v1875_v35 = vand.u32 4294901760, %v1874_v2 }
 0x1a6   : > { %v8842_v60 = vpop.f32.mrf.mxu0  ;;  %v1160_v26 = vadd.f32 %v1159_v24, %v983_v62  ;;  %12952 = vst [vmem:[#allocation23_spill] sm:$0xff] %v8875_v4  ;;  %v1890_v27 = vsub.f32 %v1784_v33, %v8875_v4  ;;  %v12953_v24 = vld [vmem:[#allocation27_spill] sm:$0xff] }
 0x1a7   : > { %1777 = vmatmul.f32.gmra.mxu1 %v12938_v23  ;;  %2997 = vmatpush.msrb.mxu3 %v8549_v48  ;;  %v1518_v48 = vadd.f32 %v8543_v39, %v8582_v54  ;;  %v1882_v23 = vsub.f32 %v1783_v18, %v8847_v3  ;;  %v12950_v39 = vld [vmem:[#allocation26_spill] sm:$0xff] }
 0x1a8   : > { %1455 = vmatmul.f32.gmra.mxu3 %v12946_v11  ;;  %2832 = vmatpush.msrb.mxu2 %v12947_v50  ;;  %v1891_v31 = vand.u32 4294901760, %v1890_v27 }
 0x1a9   : > { %2397 = vmatmul.f32.vlgmr.msra.gmra.mxu0 %v8794_v37  ;;  %2999 = vmatpush.msrb.mxu3 %v8592_v58  ;;  %v1876_v37 = vsub.f32 %v1874_v2, %v1875_v35  ;;  %v1883_v21 = vand.u32 4294901760, %v1882_v23 }
 0x1aa   : > { %1870 = vmatmul.f32.vlgmr.msra.gmra.mxu2 %v1869_v52  ;;  %v1526_v52 = vadd.f32 %v8586_v47, %v8625_v42 }
 0x1ab   : > { %v1360_v45 = vpop.f32.mrf.mxu3  ;;  %2836 = vmatpush.msrb.mxu2 %v12948_v61  ;;  %3001 = vmatpush.msrb.mxu3 %v8635_v56  ;;  %v1671_v56 = vadd.f32 %v8567_v9, %v1518_v48  ;;  %v1877_v20 = vand.u32 4294901760, %v1876_v37  ;;  %v1522_v9 = vadd.f32 %v8572_v5, %v8608_v13  ;;  %v1884_v18 = vsub.f32 %v1882_v23, %v1883_v21 }
 0x1ac   : > { %v8862_v38 = vadd.f32 %v1360_v45, %v1160_v26  ;;  %v8864_v32 = vpop.f32.mrf.mxu1  ;;  %v1679_v37 = vadd.f32 %v8610_v6, %v1526_v52 }
 0x1ad   : > { %v1164_v58 = vpop.f32.mrf.mxu2  ;;  %2840 = vmatpush.msrb.mxu2 %v12949_v16  ;;  %3003 = vmatpush.msrb.mxu3 %v8678_v30  ;;  %v1785_v30 = vmax.f32 %v1671_v56, 0.0  ;;  %v1885_v62 = vand.u32 4294901760, %v1884_v18 }
 0x1ae   : > { %v1165_v54 = vadd.f32 %v1164_v58, %v12950_v39  ;;  %v8870_v12 = vpop.f32.mrf.mxu0  ;;  %v1787_v39 = vmax.f32 %v1679_v37, 0.0  ;;  %v12963_v37 = vld [vmem:[#allocation6_spill] sm:$0xff] }
 0x1af   : > { %2591 = vmatmul.f32.vlgmr.msra.gmra.mxu1 %v1867_v0  ;;  %2844 = vmatpush.msrb.mxu2 %v12951_v29 }
 0x1b0   : > { %2219 = vmatmul.f32.vlgmr.msra.gmra.mxu3 %v8780_v43 }
 0x1b1   : > { %2402 = vmatmul.f32.gmra.mxu0 %v1874_v2  ;;  %3005 = vmatpush.msrb.mxu3 %v8718_v14  ;;  %v8889_v2 = vand.u32 4294901760, %v1785_v30  ;;  %v1675_v14 = vadd.f32 %v8584_v55, %v1522_v9  ;;  %v12955_v55 = vld [vmem:[#allocation30_spill] sm:$0xff]  ;;  %v12960_v9 = vld [vmem:[#allocation5_spill] sm:$0xff] }
 0x1b2   : > { %1878 = vmatmul.f32.gmra.mxu2 %v1877_v20 }
 0x1b3   : > { %v1366_v28 = vpop.f32.mrf.mxu3  ;;  %12954 = vst [vmem:[#allocation25_spill] sm:$0xff] %v8889_v2  ;;  %v1898_v5 = vsub.f32 %v1785_v30, %v8889_v2  ;;  %v1786_v11 = vmax.f32 %v1675_v14, 0.0  ;;  %v12958_v30 = vld [vmem:[#allocation31_spill] sm:$0xff] }
 0x1b4   : > { %v8882_v0 = vadd.f32 %v1366_v28, %v1165_v54  ;;  %v8884_v22 = vpop.f32.mrf.mxu1  ;;  %v12957_v54 = vld [vmem:[#allocation55_spill] sm:$0xff] }
 0x1b5   : > { %v1169_v51 = vpop.f32.mrf.mxu2  ;;  %v8903_v33 = vand.u32 4294901760, %v1786_v11  ;;  %v1530_v56 = vadd.f32 %v12957_v54, %v8651_v1  ;;  %v12961_v1 = vld [vmem:[#allocation56_spill] sm:$0xff] }
 0x1b6   : > { %v1170_v25 = vadd.f32 %v1169_v51, %v12953_v24  ;;  %v8887_v17 = vpop.f32.mrf.mxu0 }
 0x1b7   : > { %2597 = vmatmul.f32.gmra.mxu1 %v1875_v35  ;;  %v1892_v35 = vsub.f32 %v1890_v27, %v1891_v31  ;;  %12956 = vst [vmem:[#allocation29_spill] sm:$0xff] %v8903_v33  ;;  %v1906_v16 = vsub.f32 %v1786_v11, %v8903_v33  ;;  %v1683_v18 = vadd.f32 %v12960_v9, %v1530_v56  ;;  %v12965_v56 = vld [vmem:[#allocation7_spill] sm:$0xff] }
 0x1b8   : > { %2223 = vmatmul.f32.gmra.mxu3 %v8816_v59 }
 0x1b9   : > { %2407 = vmatmul.f32.gmra.mxu0 %v1882_v23  ;;  %v1899_v23 = vand.u32 4294901760, %v1898_v5  ;;  %v1893_v58 = vand.u32 4294901760, %v1892_v35  ;;  %v1907_v24 = vand.u32 4294901760, %v1906_v16 }
 0x1ba   : > { %1886 = vmatmul.f32.gmra.mxu2 %v1885_v62 }
 0x1bb   : > { %v1372_v13 = vpop.f32.mrf.mxu3  ;;  %v1900_v42 = vsub.f32 %v1898_v5, %v1899_v23  ;;  %v1908_v52 = vsub.f32 %v1906_v16, %v1907_v24 }
 0x1bc   : > { %v8896_v50 = vadd.f32 %v1372_v13, %v1170_v25  ;;  %v8898_v26 = vpop.f32.mrf.mxu1  ;;  %v1534_v25 = vadd.f32 %v12961_v1, %v8668_v46  ;;  %v1788_v13 = vmax.f32 %v1683_v18, 0.0  ;;  %v12966_v18 = vld [vmem:[#allocation35_spill] sm:$0xff] }
 0x1bd   : > { %v1174_v48 = vpop.f32.mrf.mxu2  ;;  %v1901_v51 = vand.u32 4294901760, %v1900_v42  ;;  %v1909_v46 = vand.u32 4294901760, %v1908_v52 }
 0x1be   : > { %v1175_v45 = vadd.f32 %v1174_v48, %v12955_v55  ;;  %v8901_v61 = vpop.f32.mrf.mxu0  ;;  %v12962_v48 = vld [vmem:[#allocation34_spill] sm:$0xff] }
 0x1bf   : > { %2603 = vmatmul.f32.gmra.mxu1 %v1883_v21 }
 0x1c0   : > { %2227 = vmatmul.f32.gmra.mxu3 %v8847_v3 }
 0x1c1   : > { %2412 = vmatmul.f32.gmra.mxu0 %v1890_v27  ;;  %v8917_v27 = vand.u32 4294901760, %v1787_v39 }
 0x1c2   : > { %1894 = vmatmul.f32.gmra.mxu2 %v1893_v58  ;;  %v8932_v58 = vand.u32 4294901760, %v1788_v13 }
 0x1c3   : > { %v1378_v47 = vpop.f32.mrf.mxu3  ;;  %12959 = vst [vmem:[#allocation15_spill] sm:$0xff] %v8917_v27  ;;  %v1914_v62 = vsub.f32 %v1787_v39, %v8917_v27 }
 0x1c4   : > { %v8910_v29 = vadd.f32 %v1378_v47, %v1175_v45  ;;  %v8912_v20 = vpop.f32.mrf.mxu1  ;;  %12964 = vst [vmem:[#allocation20_spill] sm:$0xff] %v8932_v58  ;;  %v1922_v54 = vsub.f32 %v1788_v13, %v8932_v58 }
 0x1c5   : > { %v1179_v21 = vpop.f32.mrf.mxu2  ;;  %v1915_v47 = vand.u32 4294901760, %v1914_v62 }
 0x1c6   : > { %v1180_v6 = vadd.f32 %v1179_v21, %v12958_v30  ;;  %v8915_v28 = vpop.f32.mrf.mxu0  ;;  %v1538_v21 = vadd.f32 %v12965_v56, %v8694_v7  ;;  %v1923_v52 = vand.u32 4294901760, %v1922_v54  ;;  %v12970_v56 = vld [vmem:[#allocation38_spill] sm:$0xff] }
 0x1c7   : > { %2609 = vmatmul.f32.gmra.mxu1 %v1891_v31 }
 0x1c8   : > { %2231 = vmatmul.f32.gmra.mxu3 %v8875_v4 }
 0x1c9   : > { %2417 = vmatmul.f32.gmra.mxu0 %v1898_v5  ;;  %v1687_v5 = vadd.f32 %v12963_v37, %v1534_v25 }
 0x1ca   : > { %1902 = vmatmul.f32.gmra.mxu2 %v1901_v51 }
 0x1cb   : > { %v1384_v14 = vpop.f32.mrf.mxu3  ;;  %v1789_v42 = vmax.f32 %v1687_v5, 0.0 }
 0x1cc   : > { %v8924_v11 = vadd.f32 %v1384_v14, %v1180_v6  ;;  %v8926_v31 = vpop.f32.mrf.mxu1 }
 0x1cd   : > { %v1184_v35 = vpop.f32.mrf.mxu2  ;;  %v8945_v25 = vand.u32 4294901760, %v1789_v42 }
 0x1ce   : > { %v1185_v55 = vadd.f32 %v1184_v35, %v12962_v48  ;;  %v8929_v45 = vpop.f32.mrf.mxu0 }
 0x1cf   : > { %2615 = vmatmul.f32.gmra.mxu1 %v1899_v23  ;;  %v1916_v23 = vsub.f32 %v1914_v62, %v1915_v47  ;;  %12967 = vst [vmem:[#allocation16_spill] sm:$0xff] %v8945_v25  ;;  %v1930_v7 = vsub.f32 %v1789_v42, %v8945_v25  ;;  %v12972_v42 = vld [vmem:[#allocation10_spill] sm:$0xff] }
 0x1d0   : > { %2235 = vmatmul.f32.gmra.mxu3 %v8889_v2  ;;  %v12983_v2 = vld [vmem:[#allocation46_spill] sm:$0xff] }
 0x1d1   : > { %2422 = vmatmul.f32.gmra.mxu0 %v1906_v16  ;;  %v12968_v16 = vld [vmem:[#allocation8_spill] sm:$0xff]  ;;  %v1917_v13 = vand.u32 4294901760, %v1916_v23 }
 0x1d2   : > { %1910 = vmatmul.f32.gmra.mxu2 %v1909_v46  ;;  %v1691_v14 = vadd.f32 %v12968_v16, %v1538_v21 }
 0x1d3   : > { %v1390_v39 = vpop.f32.mrf.mxu3 }
 0x1d4   : > { %v8938_v30 = vadd.f32 %v1390_v39, %v1185_v55  ;;  %v8940_v6 = vpop.f32.mrf.mxu1  ;;  %v1790_v48 = vmax.f32 %v1691_v14, 0.0  ;;  %v12969_v55 = vld [vmem:[#allocation9_spill] sm:$0xff] }
 0x1d5   : > { %v1189_v9 = vpop.f32.mrf.mxu2  ;;  %v1542_v37 = vadd.f32 %v12969_v55, %v8711_v15 }
 0x1d6   : > { %v1190_v51 = vadd.f32 %v1189_v9, %v12966_v18  ;;  %v8943_v1 = vpop.f32.mrf.mxu0  ;;  %v8959_v23 = vand.u32 4294901760, %v1790_v48 }
 0x1d7   : > { %2621 = vmatmul.f32.gmra.mxu1 %v1907_v24  ;;  %v1924_v24 = vsub.f32 %v1922_v54, %v1923_v52  ;;  %v1695_v18 = vadd.f32 %v12972_v42, %v1542_v37 }
 0x1d8   : > { %2239 = vmatmul.f32.gmra.mxu3 %v8903_v33  ;;  %12971 = vst [vmem:[#allocation22_spill] sm:$0xff] %v8959_v23  ;;  %v1938_v14 = vsub.f32 %v1790_v48, %v8959_v23  ;;  %v12974_v33 = vld [vmem:[#allocation39_spill] sm:$0xff] }
 0x1d9   : > { %2427 = vmatmul.f32.gmra.mxu0 %v1914_v62  ;;  %v1931_v62 = vand.u32 4294901760, %v1930_v7  ;;  %v1925_v16 = vand.u32 4294901760, %v1924_v24 }
 0x1da   : > { %1918 = vmatmul.f32.gmra.mxu2 %v1917_v13  ;;  %v1791_v13 = vmax.f32 %v1695_v18, 0.0  ;;  %v1939_v18 = vand.u32 4294901760, %v1938_v14 }
 0x1db   : > { %v1396_v35 = vpop.f32.mrf.mxu3 }
 0x1dc   : > { %v8952_v5 = vadd.f32 %v1396_v35, %v1190_v51  ;;  %v8954_v46 = vpop.f32.mrf.mxu1  ;;  %v1932_v51 = vsub.f32 %v1930_v7, %v1931_v62  ;;  %v12973_v35 = vld [vmem:[#allocation11_spill] sm:$0xff] }
 0x1dd   : > { %v1194_v39 = vpop.f32.mrf.mxu2  ;;  %v1546_v55 = vadd.f32 %v12973_v35, %v8746_v36  ;;  %v12976_v36 = vld [vmem:[#allocation12_spill] sm:$0xff] }
 0x1de   : > { %v1195_v21 = vadd.f32 %v1194_v39, %v12970_v56  ;;  %v8957_v9 = vpop.f32.mrf.mxu0  ;;  %v1933_v48 = vand.u32 4294901760, %v1932_v51 }
 0x1df   : > { %2627 = vmatmul.f32.gmra.mxu1 %v1915_v47  ;;  %v1699_v24 = vadd.f32 %v8713_v49, %v1546_v55  ;;  %v12977_v49 = vld [vmem:[#allocation42_spill] sm:$0xff] }
 0x1e0   : > { %2243 = vmatmul.f32.gmra.mxu3 %v8917_v27 }
 0x1e1   : > { %2432 = vmatmul.f32.gmra.mxu0 %v1922_v54  ;;  %v8973_v54 = vand.u32 4294901760, %v1791_v13 }
 0x1e2   : > { %1926 = vmatmul.f32.gmra.mxu2 %v1925_v16 }
 0x1e3   : > { %v1402_v15 = vpop.f32.mrf.mxu3  ;;  %12975 = vst [vmem:[#allocation33_spill] sm:$0xff] %v8973_v54 }
 0x1e4   : > { %v8966_v39 = vadd.f32 %v1402_v15, %v1195_v21  ;;  %v8968_v47 = vpop.f32.mrf.mxu1  ;;  %v1550_v21 = vadd.f32 %v12976_v36, %v8771_v41  ;;  %v1946_v15 = vsub.f32 %v1791_v13, %v8973_v54 }
 0x1e5   : > { %v1199_v56 = vpop.f32.mrf.mxu2 }
 0x1e6   : > { %v1200_v37 = vadd.f32 %v1199_v56, %v12974_v33  ;;  %v8971_v42 = vpop.f32.mrf.mxu0  ;;  %v1792_v33 = vmax.f32 %v1699_v24, 0.0  ;;  %v1940_v56 = vsub.f32 %v1938_v14, %v1939_v18  ;;  %v1947_v13 = vand.u32 4294901760, %v1946_v15 }
 0x1e7   : > { %2633 = vmatmul.f32.gmra.mxu1 %v1923_v52 }
 0x1e8   : > { %2247 = vmatmul.f32.gmra.mxu3 %v8932_v58  ;;  %v8988_v51 = vand.u32 4294901760, %v1792_v33  ;;  %v1941_v41 = vand.u32 4294901760, %v1940_v56 }
 0x1e9   : > { %2437 = vmatmul.f32.gmra.mxu0 %v1930_v7  ;;  %v1703_v7 = vadd.f32 %v8748_v57, %v1550_v21  ;;  %v1948_v57 = vsub.f32 %v1946_v15, %v1947_v13  ;;  %v12979_v21 = vld [vmem:[#allocation43_spill] sm:$0xff] }
 0x1ea   : > { %1934 = vmatmul.f32.gmra.mxu2 %v1933_v48  ;;  %12978 = vst [vmem:[#allocation24_spill] sm:$0xff] %v8988_v51  ;;  %v1954_v48 = vsub.f32 %v1792_v33, %v8988_v51 }
 0x1eb   : > { %v1408_v16 = vpop.f32.mrf.mxu3  ;;  %v1949_v33 = vand.u32 4294901760, %v1948_v57 }
 0x1ec   : > { %v8980_v35 = vadd.f32 %v1408_v16, %v1200_v37  ;;  %v8982_v52 = vpop.f32.mrf.mxu1  ;;  %v1793_v37 = vmax.f32 %v1703_v7, 0.0  ;;  %v1955_v7 = vand.u32 4294901760, %v1954_v48 }
 0x1ed   : > { %v1204_v27 = vpop.f32.mrf.mxu2 }
 0x1ee   : > { %v1205_v55 = vadd.f32 %v1204_v27, %v12977_v49  ;;  %v8985_v58 = vpop.f32.mrf.mxu0  ;;  %v1554_v27 = vadd.f32 %v8752_v10, %v8803_v34  ;;  %v9001_v56 = vand.u32 4294901760, %v1793_v37 }
 0x1ef   : > { %2639 = vmatmul.f32.gmra.mxu1 %v1931_v62 }
 0x1f0   : > { %2251 = vmatmul.f32.gmra.mxu3 %v8945_v25  ;;  %12980 = vst [vmem:[#allocation37_spill] sm:$0xff] %v9001_v56  ;;  %v1962_v10 = vsub.f32 %v1793_v37, %v9001_v56 }
 0x1f1   : > { %2442 = vmatmul.f32.gmra.mxu0 %v1938_v14  ;;  %v1707_v14 = vadd.f32 %v8773_v40, %v1554_v27  ;;  %v12981_v40 = vld [vmem:[#allocation45_spill] sm:$0xff] }
 0x1f2   : > { %1942 = vmatmul.f32.gmra.mxu2 %v1941_v41  ;;  %v1558_v41 = vadd.f32 %v8778_v8, %v8835_v19 }
 0x1f3   : > { %v1414_v24 = vpop.f32.mrf.mxu3 }
 0x1f4   : > { %v8994_v36 = vadd.f32 %v1414_v24, %v1205_v55  ;;  %v8996_v16 = vpop.f32.mrf.mxu1  ;;  %v1794_v55 = vmax.f32 %v1707_v14, 0.0  ;;  %v1711_v37 = vadd.f32 %v8805_v63, %v1558_v41 }
 0x1f5   : > { %v1209_v62 = vpop.f32.mrf.mxu2 }
 0x1f6   : > { %v1210_v49 = vadd.f32 %v1209_v62, %v12979_v21  ;;  %v8999_v25 = vpop.f32.mrf.mxu0  ;;  %v9015_v57 = vand.u32 4294901760, %v1794_v55 }
 0x1f7   : > { %2645 = vmatmul.f32.gmra.mxu1 %v1939_v18  ;;  %v1956_v18 = vsub.f32 %v1954_v48, %v1955_v7 }
 0x1f8   : > { %2255 = vmatmul.f32.gmra.mxu3 %v8959_v23  ;;  %12982 = vst [vmem:[#allocation28_spill] sm:$0xff] %v9015_v57 }
 0x1f9   : > { %2447 = vmatmul.f32.gmra.mxu0 %v1946_v15  ;;  %v1963_v15 = vand.u32 4294901760, %v1962_v10  ;;  %v1957_v14 = vand.u32 4294901760, %v1956_v18 }
 0x1fa   : > { %1950 = vmatmul.f32.gmra.mxu2 %v1949_v33  ;;  %v1795_v33 = vmax.f32 %v1711_v37, 0.0 }
 0x1fb   : > { %v1420_v34 = vpop.f32.mrf.mxu3  ;;  %v1964_v19 = vsub.f32 %v1962_v10, %v1963_v15 }
 0x1fc   : > { %v9008_v24 = vadd.f32 %v1420_v34, %v1210_v49  ;;  %v9010_v62 = vpop.f32.mrf.mxu1  ;;  %v1970_v49 = vsub.f32 %v1794_v55, %v9015_v57  ;;  %v1562_v34 = vadd.f32 %v8810_v44, %v8862_v38  ;;  %v1566_v44 = vadd.f32 %v8842_v60, %v8882_v0 }
 0x1fd   : > { %v1214_v21 = vpop.f32.mrf.mxu2  ;;  %v1965_v55 = vand.u32 4294901760, %v1964_v19 }
 0x1fe   : > { %v1215_v27 = vadd.f32 %v1214_v21, %v12981_v40  ;;  %v9013_v23 = vpop.f32.mrf.mxu0  ;;  %v1715_v18 = vadd.f32 %v8837_v53, %v1562_v34  ;;  %v1971_v37 = vand.u32 4294901760, %v1970_v49  ;;  %v12985_v53 = vld [vmem:[#allocation49_spill] sm:$0xff] }
 0x1ff   : > { %2651 = vmatmul.f32.gmra.mxu1 %v1947_v13 }
 0x200   : > { %2259 = vmatmul.f32.gmra.mxu3 %v8973_v54  ;;  %v12990_v54 = vld [vmem:[#allocation54_spill] sm:$0xff] }
 0x201   : > { %2452 = vmatmul.f32.gmra.mxu0 %v1954_v48  ;;  %v9029_v48 = vand.u32 4294901760, %v1795_v33 }
 0x202   : > { %1958 = vmatmul.f32.gmra.mxu2 %v1957_v14 }
 0x203   : > { %v1426_v8 = vpop.f32.mrf.mxu3  ;;  %12984 = vst [vmem:[#allocation41_spill] sm:$0xff] %v9029_v48 }
 0x204   : > { %v9022_v21 = vadd.f32 %v1426_v8, %v1215_v27  ;;  %v9024_v13 = vpop.f32.mrf.mxu1  ;;  %v1978_v27 = vsub.f32 %v1795_v33, %v9029_v48  ;;  %v1972_v8 = vsub.f32 %v1970_v49, %v1971_v37 }
 0x205   : > { %v1219_v40 = vpop.f32.mrf.mxu2 }
 0x206   : > { %v1220_v63 = vadd.f32 %v1219_v40, %v12983_v2  ;;  %v9027_v41 = vpop.f32.mrf.mxu0  ;;  %v1796_v2 = vmax.f32 %v1715_v18, 0.0  ;;  %v1973_v60 = vand.u32 4294901760, %v1972_v8  ;;  %v1979_v0 = vand.u32 4294901760, %v1978_v27 }
 0x207   : > { %2657 = vmatmul.f32.gmra.mxu1 %v1955_v7 }
 0x208   : > { %2263 = vmatmul.f32.gmra.mxu3 %v8988_v51  ;;  %v9044_v19 = vand.u32 4294901760, %v1796_v2 }
 0x209   : > { %2457 = vmatmul.f32.gmra.mxu0 %v1962_v10  ;;  %v1719_v10 = vadd.f32 %v8864_v32, %v1566_v44  ;;  %v1980_v32 = vsub.f32 %v1978_v27, %v1979_v0  ;;  %v12987_v44 = vld [vmem:[#allocation50_spill] sm:$0xff] }
 0x20a   : > { %1966 = vmatmul.f32.gmra.mxu2 %v1965_v55  ;;  %12986 = vst [vmem:[#allocation17_spill] sm:$0xff] %v9044_v19  ;;  %v1986_v18 = vsub.f32 %v1796_v2, %v9044_v19  ;;  %v1570_v55 = vadd.f32 %v8870_v12, %v8896_v50 }
 0x20b   : > { %v1432_v38 = vpop.f32.mrf.mxu3  ;;  %v1797_v33 = vmax.f32 %v1719_v10, 0.0  ;;  %v1981_v2 = vand.u32 4294901760, %v1980_v32 }
 0x20c   : > { %v9036_v14 = vadd.f32 %v1432_v38, %v1220_v63  ;;  %v9038_v7 = vpop.f32.mrf.mxu1  ;;  %v1987_v10 = vand.u32 4294901760, %v1986_v18 }
 0x20d   : > { %v1224_v40 = vpop.f32.mrf.mxu2  ;;  %v9057_v8 = vand.u32 4294901760, %v1797_v33 }
 0x20e   : > { %v1225_v34 = vadd.f32 %v1224_v40, %v12985_v53  ;;  %v9041_v51 = vpop.f32.mrf.mxu0 }
 0x20f   : > { %2663 = vmatmul.f32.gmra.mxu1 %v1963_v15  ;;  %12988 = vst [vmem:[#allocation32_spill] sm:$0xff] %v9057_v8  ;;  %v1994_v12 = vsub.f32 %v1797_v33, %v9057_v8 }
 0x210   : > { %2267 = vmatmul.f32.gmra.mxu3 %v9001_v56 }
 0x211   : > { %2462 = vmatmul.f32.gmra.mxu0 %v1970_v49  ;;  %v1723_v49 = vadd.f32 %v8884_v22, %v1570_v55  ;;  %v12989_v22 = vld [vmem:[#allocation51_spill] sm:$0xff] }
 0x212   : > { %1974 = vmatmul.f32.gmra.mxu2 %v1973_v60  ;;  %v1574_v60 = vadd.f32 %v8887_v17, %v8910_v29 }
 0x213   : > { %v1438_v63 = vpop.f32.mrf.mxu3 }
 0x214   : > { %v9050_v38 = vadd.f32 %v1438_v63, %v1225_v34  ;;  %v9052_v40 = vpop.f32.mrf.mxu1  ;;  %v1798_v34 = vmax.f32 %v1723_v49, 0.0  ;;  %v1727_v33 = vadd.f32 %v8898_v26, %v1574_v60 }
 0x215   : > { %v1229_v15 = vpop.f32.mrf.mxu2 }
 0x216   : > { %v1230_v53 = vadd.f32 %v1229_v15, %v12987_v44  ;;  %v9055_v56 = vpop.f32.mrf.mxu0  ;;  %v9071_v32 = vand.u32 4294901760, %v1798_v34 }
 0x217   : > { %2669 = vmatmul.f32.gmra.mxu1 %v1971_v37  ;;  %v1988_v37 = vsub.f32 %v1986_v18, %v1987_v10 }
 0x218   : > { %2271 = vmatmul.f32.gmra.mxu3 %v9015_v57 }
 0x219   : > { %2467 = vmatmul.f32.gmra.mxu0 %v1978_v27  ;;  %v1995_v27 = vand.u32 4294901760, %v1994_v12  ;;  %v1989_v49 = vand.u32 4294901760, %v1988_v37 }
 0x21a   : > { %1982 = vmatmul.f32.gmra.mxu2 %v1981_v2  ;;  %v1799_v2 = vmax.f32 %v1727_v33, 0.0 }
 0x21b   : > { %v1444_v50 = vpop.f32.mrf.mxu3  ;;  %v1996_v29 = vsub.f32 %v1994_v12, %v1995_v27 }
 0x21c   : > { %v9064_v63 = vadd.f32 %v1444_v50, %v1230_v53  ;;  %v9066_v15 = vpop.f32.mrf.mxu1  ;;  %v2002_v53 = vsub.f32 %v1798_v34, %v9071_v32  ;;  %v1578_v50 = vadd.f32 %v8901_v61, %v8924_v11  ;;  %v9088_v34 = vand.u32 4294901760, %v1799_v2 }
 0x21d   : > { %v1234_v44 = vpop.f32.mrf.mxu2  ;;  %v1997_v61 = vand.u32 4294901760, %v1996_v29 }
 0x21e   : > { %v1235_v55 = vadd.f32 %v1234_v44, %v12989_v22  ;;  %v9069_v57 = vpop.f32.mrf.mxu0  ;;  %v1731_v33 = vadd.f32 %v8912_v20, %v1578_v50  ;;  %v2003_v11 = vand.u32 4294901760, %v2002_v53  ;;  %v2010_v20 = vsub.f32 %v1799_v2, %v9088_v34 }
 0x21f   : > { %2675 = vmatmul.f32.gmra.mxu1 %v1979_v0 }
 0x220   : > { %2275 = vmatmul.f32.gmra.mxu3 %v9029_v48  ;;  %v2004_v50 = vsub.f32 %v2002_v53, %v2003_v11 }
 0x221   : > { %2472 = vmatmul.f32.gmra.mxu0 %v1986_v18  ;;  %v3190_v18 = vld [vmem:[%s12399_s7 + $0x38] sm:$0xff] }
 0x222   : > { %1990 = vmatmul.f32.gmra.mxu2 %v1989_v49  ;;  %v9086_v37 = vand.u32 4294901760, %v3190_v18 }
 0x223   : > { %v1450_v17 = vpop.f32.mrf.mxu3 }
 0x224   : > { %v9078_v44 = vadd.f32 %v1450_v17, %v1235_v55  ;;  %v9080_v0 = vpop.f32.mrf.mxu1  ;;  %v9093_v55 = vsub.f32 %v3190_v18, %v9086_v37  ;;  %3956 = vmatpush.msra.mxu3 %v9086_v37  ;;  %3297 = vmatpush.msrb.mxu0 %v9086_v37  ;;  %v1800_v17 = vmax.f32 %v1731_v33, 0.0 }
 0x225   : > { %v1239_v22 = vpop.f32.mrf.mxu2 }
 0x226   : > { %v1240_v26 = vadd.f32 %v1239_v22, %v12990_v54  ;;  %v2398_v60 = vpop.f32.mrf.mxu0  ;;  %v1582_v54 = vadd.f32 %v8915_v28, %v8938_v30  ;;  %v12521_v49 = vand.u32 4294901760, %v9093_v55  ;;  %3764 = vmatpush.msra.mxu2 %v9093_v55  ;;  %v9110_v28 = vld [vmem:[%s12397_s5] ss:$0 sm:$0xff]  ;;  %v9113_v33 = vand.u32 4294901760, %v1800_v17 }
 0x227   : > { %2681 = vmatmul.f32.gmra.mxu1 %v1987_v10 }
 0x228   : > { %2279 = vmatmul.f32.gmra.mxu3 %v9044_v19  ;;  %v3580_v18 = vsub.f32 %v9093_v55, %v12521_v49  ;;  %v2018_v4 = vsub.f32 %v1800_v17, %v9113_v33 }
 0x229   : > { %2477 = vmatmul.f32.gmra.mxu0 %v1994_v12 }
 0x22a   : > { %1998 = vmatmul.f32.gmra.mxu2 %v1997_v61  ;;  %v1735_v61 = vadd.f32 %v8926_v31, %v1582_v54  ;;  %v3581_v2 = vand.u32 4294901760, %v3580_v18  ;;  %v1586_v31 = vadd.f32 %v8929_v45, %v8952_v5 }
 0x22b   : > { %v1456_v10 = vpop.f32.mrf.mxu3 }
 0x22c   : > { %v9102_v12 = vadd.f32 %v1456_v10, %v1240_v26  ;;  %v2592_v29 = vpop.f32.mrf.mxu1  ;;  %v2005_v26 = vand.u32 4294901760, %v2004_v50  ;;  %v2011_v10 = vand.u32 4294901760, %v2010_v20  ;;  %3582 = vmatpush.msrb.mxu1 %v3581_v2  ;;  %v1801_v19 = vmax.f32 %v1735_v61, 0.0 }
 0x22d   : > { %v1871_v22 = vpop.f32.mrf.mxu2  ;;  %v2019_v61 = vand.u32 4294901760, %v2018_v4 }
 0x22e   : > { %v2403_v30 = vpop.f32.mrf.mxu0  ;;  %v1872_v49 = vadd.f32 %v9110_v28, %v1871_v22  ;;  %v2012_v18 = vsub.f32 %v2010_v20, %v2011_v10  ;;  %v9120_v50 = vand.u32 4294901760, %v1801_v19 }
 0x22f   : > { %2687 = vmatmul.f32.gmra.mxu1 %v1995_v27 }
 0x230   : > { %2283 = vmatmul.f32.gmra.mxu3 %v9057_v8  ;;  %v2013_v22 = vand.u32 4294901760, %v2012_v18  ;;  %v2026_v5 = vsub.f32 %v1801_v19, %v9120_v50 }
 0x231   : > { %2482 = vmatmul.f32.gmra.mxu0 %v2002_v53  ;;  %v1739_v53 = vadd.f32 %v8940_v6, %v1586_v31  ;;  %v2020_v6 = vsub.f32 %v2018_v4, %v2019_v61 }
 0x232   : > { %2006 = vmatmul.f32.gmra.mxu2 %v2005_v26 }
 0x233   : > { %v2220_v48 = vpop.f32.mrf.mxu3  ;;  %v2021_v19 = vand.u32 4294901760, %v2020_v6 }
 0x234   : > { %v2221_v27 = vadd.f32 %v2220_v48, %v1872_v49  ;;  %v2598_v54 = vpop.f32.mrf.mxu1  ;;  %v1590_v49 = vadd.f32 %v8943_v1, %v8966_v39 }
 0x235   : > { %v1879_v3 = vpop.f32.mrf.mxu2 }
 0x236   : > { %v2399_v59 = vadd.f32 %v2398_v60, %v2221_v27  ;;  %v2408_v8 = vpop.f32.mrf.mxu0  ;;  %v1880_v45 = vadd.f32 %v9110_v28, %v1879_v3  ;;  %v1802_v60 = vmax.f32 %v1739_v53, 0.0  ;;  %v1743_v3 = vadd.f32 %v8954_v46, %v1590_v49 }
 0x237   : > { %2693 = vmatmul.f32.gmra.mxu1 %v2003_v11 }
 0x238   : > { %2287 = vmatmul.f32.gmra.mxu3 %v9071_v32  ;;  %v9124_v2 = vadd.f32 %v2592_v29, %v2399_v59  ;;  %v2027_v59 = vand.u32 4294901760, %v2026_v5  ;;  %v9130_v29 = vand.u32 4294901760, %v1802_v60  ;;  %v1803_v53 = vmax.f32 %v1743_v3, 0.0 }
 0x239   : > { %2487 = vmatmul.f32.gmra.mxu0 %v2010_v20 }
 0x23a   : > { %2014 = vmatmul.f32.gmra.mxu2 %v2013_v22  ;;  %v2028_v18 = vsub.f32 %v2026_v5, %v2027_v59  ;;  %v9145_v6 = vand.u32 4294901760, %v1803_v53 }
 0x23b   : > { %v2224_v48 = vpop.f32.mrf.mxu3 }
 0x23c   : > { %v2225_v11 = vadd.f32 %v2224_v48, %v1880_v45  ;;  %v2604_v17 = vpop.f32.mrf.mxu1 }
 0x23d   : > { %v1887_v26 = vpop.f32.mrf.mxu2 }
 0x23e   : > { %v2404_v31 = vadd.f32 %v2403_v30, %v2225_v11  ;;  %v2413_v27 = vpop.f32.mrf.mxu0  ;;  %v1888_v1 = vadd.f32 %v9110_v28, %v1887_v26  ;;  %v2034_v30 = vsub.f32 %v1802_v60, %v9130_v29  ;;  %v1598_v26 = vadd.f32 %v8971_v42, %v8994_v36 }
 0x23f   : > { %2699 = vmatmul.f32.gmra.mxu1 %v2011_v10  ;;  %v1594_v10 = vadd.f32 %v8957_v9, %v8980_v35 }
 0x240   : > { %2291 = vmatmul.f32.gmra.mxu3 %v9088_v34  ;;  %v9134_v20 = vadd.f32 %v2598_v54, %v2404_v31  ;;  %v2029_v54 = vand.u32 4294901760, %v2028_v18  ;;  %v2035_v9 = vand.u32 4294901760, %v2034_v30  ;;  %v1751_v42 = vadd.f32 %v8982_v52, %v1598_v26 }
 0x241   : > { %2492 = vmatmul.f32.gmra.mxu0 %v2018_v4  ;;  %v3189_v4 = vld [vmem:[%s12399_s7 + $0x30] sm:$0xff]  ;;  %v1747_v60 = vadd.f32 %v8968_v47, %v1594_v10  ;;  %v1602_v52 = vadd.f32 %v8985_v58, %v9008_v24 }
 0x242   : > { %2022 = vmatmul.f32.gmra.mxu2 %v2021_v19  ;;  %v9143_v11 = vand.u32 4294901760, %v3189_v4 }
 0x243   : > { %v2228_v39 = vpop.f32.mrf.mxu3 }
 0x244   : > { %v2229_v22 = vadd.f32 %v2228_v39, %v1888_v1  ;;  %v2610_v45 = vpop.f32.mrf.mxu1  ;;  %3958 = vmatpush.msra.mxu3 %v9143_v11  ;;  %3299 = vmatpush.msrb.mxu0 %v9143_v11  ;;  %v2036_v1 = vsub.f32 %v2034_v30, %v2035_v9 }
 0x245   : > { %v1895_v46 = vpop.f32.mrf.mxu2 }
 0x246   : > { %v2409_v48 = vadd.f32 %v2408_v8, %v2229_v22  ;;  %v2418_v49 = vpop.f32.mrf.mxu0  ;;  %v9152_v8 = vsub.f32 %v3189_v4, %v9143_v11 }
 0x247   : > { %2705 = vmatmul.f32.gmra.mxu1 %v2019_v61  ;;  %v1896_v61 = vadd.f32 %v9110_v28, %v1895_v46 }
 0x248   : > { %2295 = vmatmul.f32.gmra.mxu3 %v9113_v33  ;;  %v9149_v35 = vadd.f32 %v2604_v17, %v2409_v48  ;;  %v12537_v31 = vand.u32 4294901760, %v9152_v8  ;;  %3767 = vmatpush.msra.mxu2 %v9152_v8  ;;  %v1804_v17 = vmax.f32 %v1747_v60, 0.0  ;;  %v1805_v60 = vmax.f32 %v1751_v42, 0.0 }
 0x249   : > { %2497 = vmatmul.f32.gmra.mxu0 %v2026_v5  ;;  %v2042_v5 = vsub.f32 %v1803_v53, %v9145_v6  ;;  %v2037_v53 = vand.u32 4294901760, %v2036_v1 }
 0x24a   : > { %2030 = vmatmul.f32.gmra.mxu2 %v2029_v54  ;;  %v3586_v18 = vsub.f32 %v9152_v8, %v12537_v31  ;;  %v9166_v46 = vand.u32 4294901760, %v1804_v17 }
 0x24b   : > { %v2232_v47 = vpop.f32.mrf.mxu3  ;;  %v2043_v48 = vand.u32 4294901760, %v2042_v5 }
 0x24c   : > { %v2233_v3 = vadd.f32 %v2232_v47, %v1896_v61  ;;  %v2616_v19 = vpop.f32.mrf.mxu1  ;;  %v3587_v36 = vand.u32 4294901760, %v3586_v18  ;;  %v2050_v61 = vsub.f32 %v1804_v17, %v9166_v46 }
 0x24d   : > { %v1903_v39 = vpop.f32.mrf.mxu2  ;;  %v2044_v47 = vsub.f32 %v2042_v5, %v2043_v48 }
 0x24e   : > { %v2414_v10 = vadd.f32 %v2413_v27, %v2233_v3  ;;  %v2423_v22 = vpop.f32.mrf.mxu0  ;;  %3588 = vmatpush.msrb.mxu1 %v3587_v36  ;;  %v1904_v54 = vadd.f32 %v9110_v28, %v1903_v39  ;;  %v1606_v36 = vadd.f32 %v8999_v25, %v9022_v21 }
 0x24f   : > { %2711 = vmatmul.f32.gmra.mxu1 %v2027_v59  ;;  %v2045_v39 = vand.u32 4294901760, %v2044_v47 }
 0x250   : > { %2299 = vmatmul.f32.gmra.mxu3 %v9120_v50  ;;  %v9169_v4 = vadd.f32 %v2610_v45, %v2414_v10  ;;  %v9175_v45 = vand.u32 4294901760, %v1805_v60  ;;  %v2051_v10 = vand.u32 4294901760, %v2050_v61 }
 0x251   : > { %2502 = vmatmul.f32.gmra.mxu0 %v2034_v30  ;;  %v1755_v30 = vadd.f32 %v8996_v16, %v1602_v52 }
 0x252   : > { %2038 = vmatmul.f32.gmra.mxu2 %v2037_v53  ;;  %v2058_v24 = vsub.f32 %v1805_v60, %v9175_v45  ;;  %v2052_v16 = vsub.f32 %v2050_v61, %v2051_v10 }
 0x253   : > { %v2236_v27 = vpop.f32.mrf.mxu3 }
 0x254   : > { %v2237_v59 = vadd.f32 %v2236_v27, %v1904_v54  ;;  %v2622_v26 = vpop.f32.mrf.mxu1  ;;  %v2053_v60 = vand.u32 4294901760, %v2052_v16 }
 0x255   : > { %v1911_v3 = vpop.f32.mrf.mxu2 }
 0x256   : > { %v2419_v1 = vadd.f32 %v2418_v49, %v2237_v59  ;;  %v2428_v18 = vpop.f32.mrf.mxu0  ;;  %v1912_v58 = vadd.f32 %v9110_v28, %v1911_v3  ;;  %v1806_v49 = vmax.f32 %v1755_v30, 0.0 }
 0x257   : > { %2717 = vmatmul.f32.gmra.mxu1 %v2035_v9 }
 0x258   : > { %2303 = vmatmul.f32.gmra.mxu3 %v9130_v29  ;;  %v9179_v42 = vadd.f32 %v2616_v19, %v2419_v1  ;;  %v2059_v19 = vand.u32 4294901760, %v2058_v24  ;;  %v9185_v59 = vand.u32 4294901760, %v1806_v49 }
 0x259   : > { %2507 = vmatmul.f32.gmra.mxu0 %v2042_v5  ;;  %v1759_v5 = vadd.f32 %v9010_v62, %v1606_v36 }
 0x25a   : > { %2046 = vmatmul.f32.gmra.mxu2 %v2045_v39  ;;  %v2060_v3 = vsub.f32 %v2058_v24, %v2059_v19 }
 0x25b   : > { %v2240_v17 = vpop.f32.mrf.mxu3  ;;  %v1807_v1 = vmax.f32 %v1759_v5, 0.0 }
 0x25c   : > { %v2241_v9 = vadd.f32 %v2240_v17, %v1912_v58  ;;  %v2628_v53 = vpop.f32.mrf.mxu1 }
 0x25d   : > { %v1919_v54 = vpop.f32.mrf.mxu2 }
 0x25e   : > { %v2424_v27 = vadd.f32 %v2423_v22, %v2241_v9  ;;  %v2433_v52 = vpop.f32.mrf.mxu0  ;;  %v1920_v25 = vadd.f32 %v9110_v28, %v1919_v54  ;;  %v2066_v22 = vsub.f32 %v1806_v49, %v9185_v59  ;;  %v9200_v9 = vand.u32 4294901760, %v1807_v1 }
 0x25f   : > { %2723 = vmatmul.f32.gmra.mxu1 %v2043_v48  ;;  %v1610_v48 = vadd.f32 %v9013_v23, %v9036_v14 }
 0x260   : > { %2307 = vmatmul.f32.gmra.mxu3 %v9145_v6  ;;  %v9189_v47 = vadd.f32 %v2622_v26, %v2424_v27  ;;  %v2061_v26 = vand.u32 4294901760, %v2060_v3  ;;  %v2067_v23 = vand.u32 4294901760, %v2066_v22 }
 0x261   : > { %2512 = vmatmul.f32.gmra.mxu0 %v2050_v61  ;;  %v3188_v61 = vld [vmem:[%s12399_s7 + $0x28] sm:$0xff]  ;;  %v1763_v49 = vadd.f32 %v9024_v13, %v1610_v48 }
 0x262   : > { %2054 = vmatmul.f32.gmra.mxu2 %v2053_v60  ;;  %v9198_v36 = vand.u32 4294901760, %v3188_v61 }
 0x263   : > { %v2244_v21 = vpop.f32.mrf.mxu3  ;;  %v1808_v27 = vmax.f32 %v1763_v49, 0.0 }
 0x264   : > { %v2245_v30 = vadd.f32 %v2244_v21, %v1920_v25  ;;  %v2634_v39 = vpop.f32.mrf.mxu1  ;;  %v9209_v16 = vsub.f32 %v3188_v61, %v9198_v36  ;;  %3960 = vmatpush.msra.mxu3 %v9198_v36  ;;  %3301 = vmatpush.msrb.mxu0 %v9198_v36 }
 0x265   : > { %v1927_v62 = vpop.f32.mrf.mxu2 }
 0x266   : > { %v2429_v58 = vadd.f32 %v2428_v18, %v2245_v30  ;;  %v2438_v17 = vpop.f32.mrf.mxu0  ;;  %v1614_v18 = vadd.f32 %v9027_v41, %v9050_v38  ;;  %v12535_v54 = vand.u32 4294901760, %v9209_v16  ;;  %3770 = vmatpush.msra.mxu2 %v9209_v16  ;;  %v9221_v30 = vand.u32 4294901760, %v1808_v27 }
 0x267   : > { %2729 = vmatmul.f32.gmra.mxu1 %v2051_v10  ;;  %v1928_v10 = vadd.f32 %v9110_v28, %v1927_v62 }
 0x268   : > { %2311 = vmatmul.f32.gmra.mxu3 %v9166_v46  ;;  %v9204_v14 = vadd.f32 %v2628_v53, %v2429_v58  ;;  %v2074_v53 = vsub.f32 %v1807_v1, %v9200_v9  ;;  %v1767_v5 = vadd.f32 %v9038_v7, %v1614_v18  ;;  %v3592_v25 = vsub.f32 %v9209_v16, %v12535_v54 }
 0x269   : > { %2517 = vmatmul.f32.gmra.mxu0 %v2058_v24  ;;  %v2068_v24 = vsub.f32 %v2066_v22, %v2067_v23  ;;  %12991 = vst [vmem:[#allocation18_spill] sm:$0xff] %v9221_v30 }
 0x26a   : > { %2062 = vmatmul.f32.gmra.mxu2 %v2061_v26  ;;  %v3593_v48 = vand.u32 4294901760, %v3592_v25  ;;  %v2075_v62 = vand.u32 4294901760, %v2074_v53  ;;  %v1809_v61 = vmax.f32 %v1767_v5, 0.0 }
 0x26b   : > { %v2248_v13 = vpop.f32.mrf.mxu3  ;;  %v2069_v1 = vand.u32 4294901760, %v2068_v24 }
 0x26c   : > { %v2249_v41 = vadd.f32 %v2248_v13, %v1928_v10  ;;  %v2640_v38 = vpop.f32.mrf.mxu1  ;;  %3594 = vmatpush.msrb.mxu1 %v3593_v48  ;;  %v2076_v10 = vsub.f32 %v2074_v53, %v2075_v62  ;;  %v9232_v13 = vand.u32 4294901760, %v1809_v61 }
 0x26d   : > { %v1935_v60 = vpop.f32.mrf.mxu2 }
 0x26e   : > { %v2434_v21 = vadd.f32 %v2433_v52, %v2249_v41  ;;  %v2443_v3 = vpop.f32.mrf.mxu0  ;;  %v1936_v7 = vadd.f32 %v9110_v28, %v1935_v60  ;;  %v1618_v52 = vadd.f32 %v9041_v51, %v9064_v63  ;;  %v2077_v5 = vand.u32 4294901760, %v2076_v10 }
 0x26f   : > { %2735 = vmatmul.f32.gmra.mxu1 %v2059_v19  ;;  %v9230_v19 = vsub.f32 %v1808_v27, %v9221_v30  ;;  %v9240_v27 = vsub.f32 %v1809_v61, %v9232_v13 }
 0x270   : > { %2315 = vmatmul.f32.gmra.mxu3 %v9175_v45  ;;  %v9224_v58 = vadd.f32 %v2634_v39, %v2434_v21 }
 0x271   : > { %2522 = vmatmul.f32.gmra.mxu0 %v2066_v22  ;;  %v1771_v22 = vadd.f32 %v9052_v40, %v1618_v52  ;;  %v2083_v51 = vand.u32 4294901760, %v9230_v19 }
 0x272   : > { %2070 = vmatmul.f32.gmra.mxu2 %v2069_v1 }
 0x273   : > { %v2252_v26 = vpop.f32.mrf.mxu3  ;;  %v1810_v25 = vmax.f32 %v1771_v22, 0.0  ;;  %v2084_v48 = vsub.f32 %v9230_v19, %v2083_v51 }
 0x274   : > { %v2253_v49 = vadd.f32 %v2252_v26, %v1936_v7  ;;  %v2646_v18 = vpop.f32.mrf.mxu1 }
 0x275   : > { %v1943_v39 = vpop.f32.mrf.mxu2  ;;  %v9256_v26 = vand.u32 4294901760, %v1810_v25 }
 0x276   : > { %v2439_v41 = vadd.f32 %v2438_v17, %v2253_v49  ;;  %v2448_v24 = vpop.f32.mrf.mxu0  ;;  %v1944_v60 = vadd.f32 %v9110_v28, %v1943_v39  ;;  %v1622_v17 = vadd.f32 %v9055_v56, %v9078_v44  ;;  %v3186_v44 = vld [vmem:[%s12399_s7 + $0x18] sm:$0xff]  ;;  %v2085_v49 = vand.u32 4294901760, %v2084_v48 }
 0x277   : > { %2741 = vmatmul.f32.gmra.mxu1 %v2067_v23 }
 0x278   : > { %2319 = vmatmul.f32.gmra.mxu3 %v9185_v59  ;;  %v9237_v63 = vadd.f32 %v2640_v38, %v2439_v41  ;;  %v12536_v38 = vand.u32 4294901760, %v9240_v27  ;;  %v9259_v56 = vadd.f32 %v9066_v15, %v1622_v17 }
 0x279   : > { %2527 = vmatmul.f32.gmra.mxu0 %v2074_v53  ;;  %v3187_v53 = vld [vmem:[%s12399_s7 + $0x20] sm:$0xff] }
 0x27a   : > { %2078 = vmatmul.f32.gmra.mxu2 %v2077_v5  ;;  %v9254_v52 = vand.u32 4294901760, %v3187_v53  ;;  %v2092_v15 = vsub.f32 %v9240_v27, %v12536_v38  ;;  %v9290_v5 = vsub.f32 %v1810_v25, %v9256_v26 }
 0x27b   : > { %v2256_v40 = vpop.f32.mrf.mxu3 }
 0x27c   : > { %v2257_v23 = vadd.f32 %v2256_v40, %v1944_v60  ;;  %v9245_v21 = vpop.f32.mrf.mxu1  ;;  %3303 = vmatpush.msrb.mxu0 %v9254_v52  ;;  %v9269_v10 = vsub.f32 %v3187_v53, %v9254_v52  ;;  %3962 = vmatpush.msra.mxu3 %v9254_v52  ;;  %v1811_v60 = vmax.f32 %v9259_v56, 0.0  ;;  %v3184_v40 = vld [vmem:[%s12399_s7 + $0x8] sm:$0xff]  ;;  %v3183_v56 = vld [vmem:[%s12399_s7] sm:$0xff]  ;;  %v12541_v54 = vand.u32 4294901760, %v9290_v5 }
 0x27d   : > { %v1951_v1 = vpop.f32.mrf.mxu2  ;;  %v9303_v25 = vand.u32 4294901760, %v3184_v40 }
 0x27e   : > { %v2444_v61 = vadd.f32 %v2443_v3, %v2257_v23  ;;  %v9252_v7 = vpop.f32.mrf.mxu0  ;;  %v9266_v3 = vand.u32 4294901760, %v3186_v44  ;;  %v1952_v41 = vadd.f32 %v9110_v28, %v1951_v1  ;;  %3773 = vmatpush.msra.mxu2 %v9269_v10  ;;  %v1626_v23 = vadd.f32 %v9069_v57, %v9102_v12 }
 0x27f   : > { %2747 = vmatmul.f32.gmra.mxu1 %v2075_v62  ;;  %v3185_v62 = vld [vmem:[%s12399_s7 + $0x10] sm:$0xff]  ;;  %v9328_v31 = vsub.f32 %v3184_v40, %v9303_v25 }
 0x280   : > { %2323 = vmatmul.f32.gmra.mxu3 %v9200_v9  ;;  %v9271_v39 = vadd.f32 %v2646_v18, %v2444_v61  ;;  %3305 = vmatpush.msrb.mxu0 %v9266_v3  ;;  %v9283_v22 = vand.u32 4294901760, %v3185_v62  ;;  %v12534_v18 = vand.u32 4294901760, %v9269_v10 }
 0x281   : > { %2532 = vmatmul.f32.gmra.mxu0 %v9230_v19  ;;  %v9287_v19 = vsub.f32 %v3186_v44, %v9266_v3  ;;  %3964 = vmatpush.msra.mxu3 %v9266_v3 }
 0x282   : > { %2086 = vmatmul.f32.gmra.mxu2 %v2085_v49  ;;  %3307 = vmatpush.msrb.mxu0 %v9283_v22  ;;  %v3598_v53 = vsub.f32 %v9269_v10, %v12534_v18  ;;  %v9313_v57 = vsub.f32 %v3185_v62, %v9283_v22  ;;  %v9320_v18 = vand.u32 4294901760, %v3183_v56 }
 0x283   : > { %v2260_v17 = vpop.f32.mrf.mxu3  ;;  %v12538_v44 = vand.u32 4294901760, %v9287_v19  ;;  %3776 = vmatpush.msra.mxu2 %v9287_v19  ;;  %3966 = vmatpush.msra.mxu3 %v9283_v22 }
 0x284   : > { %v2261_v48 = vadd.f32 %v2260_v17, %v1952_v41  ;;  %v9300_v1 = vpop.f32.mrf.mxu1  ;;  %v2093_v41 = vand.u32 4294901760, %v2092_v15  ;;  %3309 = vmatpush.msrb.mxu0 %v9303_v25  ;;  %v3599_v17 = vand.u32 4294901760, %v3598_v53  ;;  %v12540_v38 = vand.u32 4294901760, %v9313_v57 }
 0x285   : > { %v1959_v61 = vpop.f32.mrf.mxu2  ;;  %v3604_v62 = vsub.f32 %v9287_v19, %v12538_v44  ;;  %3779 = vmatpush.msra.mxu2 %v9313_v57  ;;  %v1779_v15 = vadd.f32 %v9080_v0, %v1626_v23  ;;  %v12539_v44 = vand.u32 4294901760, %v9328_v31  ;;  %3968 = vmatpush.msra.mxu3 %v9303_v25 }
 0x286   : > { %v2449_v12 = vadd.f32 %v2448_v24, %v2261_v48  ;;  %v9317_v49 = vpop.f32.mrf.mxu0  ;;  %v9331_v24 = vand.u32 4294901760, %v1811_v60  ;;  %3600 = vmatpush.msrb.mxu1 %v3599_v17  ;;  %v3610_v53 = vsub.f32 %v9313_v57, %v12540_v38  ;;  %v1960_v0 = vadd.f32 %v9110_v28, %v1959_v61  ;;  %3311 = vmatpush.msrb.mxu0 %v9320_v18 }
 0x287   : > { %2753 = vmatmul.f32.gmra.mxu1 %v2083_v51  ;;  %v9336_v51 = vsub.f32 %v3183_v56, %v9320_v18  ;;  %v3605_v40 = vand.u32 4294901760, %v3604_v62  ;;  %3782 = vmatpush.msra.mxu2 %v9328_v31  ;;  %v2100_v56 = vsub.f32 %v9290_v5, %v12541_v54  ;;  %v3616_v17 = vsub.f32 %v9328_v31, %v12539_v44 }
 0x288   : > { %2327 = vmatmul.f32.gmra.mxu3 %v9221_v30  ;;  %v9339_v48 = vadd.f32 %v9245_v21, %v2449_v12  ;;  %v3611_v12 = vand.u32 4294901760, %v3610_v53  ;;  %v12992_v62 = vand.u32 4294901760, %v9093_v55  ;;  %v9366_v61 = vsub.f32 %v1811_v60, %v9331_v24 }
 0x289   : > { %2537 = vmatmul.f32.gmra.mxu0 %v9240_v27  ;;  %v12542_v21 = vand.u32 4294901760, %v9336_v51  ;;  %3606 = vmatpush.msrb.mxu1 %v3605_v40  ;;  %v12993_v38 = vand.u32 4294901760, %v9152_v8 }
 0x28a   : > { %2094 = vmatmul.f32.gmra.mxu2 %v2093_v41  ;;  %4175 = vmatpush.msra.mxu0 %v12992_v62  ;;  %v1812_v41 = vmax.f32 %v1779_v15, 0.0  ;;  %v3617_v62 = vand.u32 4294901760, %v3616_v17  ;;  %v2107_v8 = vand.u32 4294901760, %v9366_v61 }
 0x28b   : > { %v2264_v23 = vpop.f32.mrf.mxu3  ;;  %v3622_v44 = vsub.f32 %v9336_v51, %v12542_v21  ;;  %3785 = vmatpush.msra.mxu2 %v9336_v51  ;;  %3612 = vmatpush.msrb.mxu1 %v3611_v12  ;;  %v12995_v21 = vand.u32 4294901760, %v9209_v16  ;;  %v2101_v12 = vand.u32 4294901760, %v2100_v56 }
 0x28c   : > { %v2265_v40 = vadd.f32 %v2264_v23, %v1960_v0  ;;  %v2664_v53 = vpop.f32.mrf.mxu1  ;;  %4179 = vmatpush.msra.mxu0 %v12993_v38  ;;  %3970 = vmatpush.msra.mxu3 %v9320_v18  ;;  %v12994_v0 = vand.u32 4294901760, %v9240_v27  ;;  %v442_v23 = vld [vmem:[%s9363_s29] sm:$0xff]  ;;  %v9382_v30 = vand.u32 4294901760, %v1812_v41  ;;  %v2108_v17 = vsub.f32 %v9366_v61, %v2107_v8 }
 0x28d   : > { %v1967_v55 = vpop.f32.mrf.mxu2  ;;  %v3623_v15 = vand.u32 4294901760, %v3622_v44  ;;  %3618 = vmatpush.msrb.mxu1 %v3617_v62  ;;  %v12996_v44 = vand.u32 4294901760, %v9269_v10  ;;  %v12998_v10 = vand.u32 4294901760, %v9290_v5 }
 0x28e   : > { %v2454_v60 = vadd.f32 %v9252_v7, %v2265_v40  ;;  %v2463_v54 = vpop.f32.mrf.mxu0  ;;  %4183 = vmatpush.msra.mxu0 %v12995_v21  ;;  %v1968_v27 = vadd.f32 %v9110_v28, %v1967_v55  ;;  %v3193_v7 = vsel %vm486_vm0, %v442_v23, 0  ;;  %v2114_v21 = vsub.f32 %v1812_v41, %v9382_v30 }
 0x28f   : > { %2759 = vmatmul.f32.gmra.mxu1 %v12994_v0  ;;  %v9397_v62 = vand.u32 4294901760, %v3193_v7  ;;  %v12997_v55 = vand.u32 4294901760, %v9287_v19  ;;  %v12999_v41 = vand.u32 4294901760, %v9313_v57  ;;  %v2109_v0 = vand.u32 4294901760, %v2108_v17 }
 0x290   : > { %2331 = vmatmul.f32.gmra.mxu3 %v9232_v13  ;;  %v9387_v38 = vadd.f32 %v9300_v1, %v2454_v60  ;;  %3624 = vmatpush.msrb.mxu1 %v3623_v15  ;;  %v443_v15 = vld [vmem:[%s9363_s29 + $0x8] sm:$0xff]  ;;  %v2115_v23 = vand.u32 4294901760, %v2114_v21 }
 0x291   : > { %2542 = vmatmul.f32.gmra.mxu0 %v9290_v5  ;;  %v9414_v19 = vsub.f32 %v3193_v7, %v9397_v62  ;;  %v3196_v57 = vsel %vm486_vm0, %v443_v15, 0 }
 0x292   : > { %2102 = vmatmul.f32.gmra.mxu2 %v2101_v12  ;;  %4342 = vmatpush.msra.mxu1 %v9086_v37 }
 0x293   : > { %v2268_v16 = vpop.f32.mrf.mxu3  ;;  %4187 = vmatpush.msra.mxu0 %v12996_v44  ;;  %v9424_v44 = vand.u32 4294901760, %v3196_v57 }
 0x294   : > { %v2269_v56 = vadd.f32 %v2268_v16, %v1968_v27  ;;  %v2670_v1 = vpop.f32.mrf.mxu1  ;;  %4344 = vmatpush.msra.mxu1 %v9143_v11  ;;  %v2116_v27 = vsub.f32 %v2114_v21, %v2115_v23  ;;  %v12548_v16 = vand.u32 4294901760, %v9414_v19 }
 0x295   : > { %v1975_v40 = vpop.f32.mrf.mxu2  ;;  %4191 = vmatpush.msra.mxu0 %v12997_v55  ;;  %v9436_v55 = vsub.f32 %v3196_v57, %v9424_v44 }
 0x296   : > { %v2459_v60 = vadd.f32 %v9317_v49, %v2269_v56  ;;  %v2468_v37 = vpop.f32.mrf.mxu0  ;;  %4346 = vmatpush.msra.mxu1 %v9198_v36  ;;  %v1976_v5 = vadd.f32 %v9110_v28, %v1975_v40  ;;  %v13000_v49 = vand.u32 4294901760, %v9328_v31  ;;  %v444_v31 = vld [vmem:[%s9363_s29 + $0x10] sm:$0xff] }
 0x297   : > { %2765 = vmatmul.f32.gmra.mxu1 %v12998_v10  ;;  %4195 = vmatpush.msra.mxu0 %v12999_v41  ;;  %v12547_v10 = vand.u32 4294901760, %v9436_v55 }
 0x298   : > { %2335 = vmatmul.f32.gmra.mxu3 %v9256_v26  ;;  %v9410_v11 = vadd.f32 %v2664_v53, %v2459_v60  ;;  %4348 = vmatpush.msra.mxu1 %v9254_v52  ;;  %v2117_v52 = vand.u32 4294901760, %v2116_v27 }
 0x299   : > { %2547 = vmatmul.f32.gmra.mxu0 %v9366_v61  ;;  %v13001_v61 = vand.u32 4294901760, %v9336_v51  ;;  %v3315_v51 = vsub.f32 %v9414_v19, %v12548_v16 }
 0x29a   : > { %2110 = vmatmul.f32.gmra.mxu2 %v2109_v0  ;;  %4199 = vmatpush.msra.mxu0 %v13000_v49 }
 0x29b   : > { %v2272_v12 = vpop.f32.mrf.mxu3  ;;  %4350 = vmatpush.msra.mxu1 %v9266_v3  ;;  %v3199_v3 = vsel %vm486_vm0, %v444_v31, 0 }
 0x29c   : > { %v2273_v36 = vadd.f32 %v2272_v12, %v1976_v5  ;;  %v2676_v53 = vpop.f32.mrf.mxu1  ;;  %4203 = vmatpush.msra.mxu0 %v13001_v61  ;;  %v9443_v15 = vand.u32 4294901760, %v3199_v3  ;;  %v445_v5 = vld [vmem:[%s9363_s29 + $0x18] sm:$0xff] }
 0x29d   : > { %v1983_v7 = vpop.f32.mrf.mxu2  ;;  %4352 = vmatpush.msra.mxu1 %v9283_v22 }
 0x29e   : > { %v2464_v56 = vadd.f32 %v2463_v54, %v2273_v36  ;;  %v2473_v17 = vpop.f32.mrf.mxu0  ;;  %v1984_v54 = vadd.f32 %v9110_v28, %v1983_v7 }
 0x29f   : > { %2771 = vmatmul.f32.gmra.mxu1 %v2107_v8 }
 0x2a0   : > { %2339 = vmatmul.f32.gmra.mxu3 %v9331_v24  ;;  %v9429_v40 = vadd.f32 %v2670_v1, %v2464_v56  ;;  %4354 = vmatpush.msra.mxu1 %v9303_v25  ;;  %v9453_v25 = vsub.f32 %v3199_v3, %v9443_v15 }
 0x2a1   : > { %2552 = vmatmul.f32.gmra.mxu0 %v2114_v21  ;;  %v3316_v21 = vand.u32 4294901760, %v3315_v51 }
 0x2a2   : > { %2118 = vmatmul.f32.gmra.mxu2 %v2117_v52  ;;  %4356 = vmatpush.msra.mxu1 %v9320_v18  ;;  %v3323_v18 = vsub.f32 %v9436_v55, %v12547_v10  ;;  %v12546_v61 = vand.u32 4294901760, %v9453_v25  ;;  %v446_v52 = vld [vmem:[%s9363_s29 + $0x20] sm:$0xff] }
 0x2a3   : > { %v2276_v8 = vpop.f32.mrf.mxu3 }
 0x2a4   : > { %v2277_v1 = vadd.f32 %v2276_v8, %v1984_v54  ;;  %v2682_v60 = vpop.f32.mrf.mxu1  ;;  %v3324_v27 = vand.u32 4294901760, %v3323_v18  ;;  %v3331_v54 = vsub.f32 %v9453_v25, %v12546_v61 }
 0x2a5   : > { %v1991_v22 = vpop.f32.mrf.mxu2 }
 0x2a6   : > { %v2469_v41 = vadd.f32 %v2468_v37, %v2277_v1  ;;  %v2478_v0 = vpop.f32.mrf.mxu0  ;;  %v1992_v49 = vadd.f32 %v9110_v28, %v1991_v22  ;;  %v3202_v37 = vsel %vm486_vm0, %v445_v5, 0  ;;  %v3205_v1 = vsel %vm486_vm0, %v446_v52, 0 }
 0x2a7   : > { %2777 = vmatmul.f32.gmra.mxu1 %v2115_v23  ;;  %v9459_v7 = vand.u32 4294901760, %v3202_v37  ;;  %v9476_v18 = vand.u32 4294901760, %v3205_v1 }
 0x2a8   : > { %2343 = vmatmul.f32.gmra.mxu3 %v9382_v30  ;;  %v9447_v57 = vadd.f32 %v2676_v53, %v2469_v41  ;;  %v3332_v41 = vand.u32 4294901760, %v3331_v54 }
 0x2a9   : > { %3317 = vmatmul.f32.vlgmr.msrb.gmra.mxu0 %v3316_v21  ;;  %13002 = vst [vmem:[#allocation36_spill] sm:$0xff] %v9459_v7  ;;  %v9470_v3 = vsub.f32 %v3202_v37, %v9459_v7  ;;  %v447_v37 = vld [vmem:[%s9363_s29 + $0x28] sm:$0xff] }
 0x2aa   : > { %2846 = vmatmul.f32.vlgmr.msrb.gmra.mxu2 %v8780_v43  ;;  %13005 = vst [vmem:[#allocation48_spill] sm:$0xff] %v9476_v18  ;;  %v3208_v52 = vsel %vm486_vm0, %v447_v37, 0 }
 0x2ab   : > { %v2280_v23 = vpop.f32.mrf.mxu3  ;;  %13003 = vst [vmem:[#allocation40_spill] sm:$0xff] %v9470_v3  ;;  %v12545_v5 = vand.u32 4294901760, %v9470_v3 }
 0x2ac   : > { %v2281_v12 = vadd.f32 %v2280_v23, %v1992_v49  ;;  %v2688_v36 = vpop.f32.mrf.mxu1 }
 0x2ad   : > { %v1999_v53 = vpop.f32.mrf.mxu2 }
 0x2ae   : > { %v2474_v56 = vadd.f32 %v2473_v17, %v2281_v12  ;;  %v2483_v31 = vpop.f32.mrf.mxu0  ;;  %v2000_v8 = vadd.f32 %v9110_v28, %v1999_v53  ;;  %v13004_v17 = vld [vmem:[#allocation13_spill] sm:$0xff]  ;;  %v3339_v53 = vsub.f32 %v9470_v3, %v12545_v5 }
 0x2af   : > { %3626 = vmatmul.f32.vlgmr.msrb.gmra.mxu1 %v9397_v62 }
 0x2b0   : > { %3007 = vmatmul.f32.vlgmr.msrb.gmra.mxu3 %v8780_v43  ;;  %v9464_v51 = vadd.f32 %v2682_v60, %v2474_v56 }
 0x2b1   : > { %3325 = vmatmul.f32.gmra.mxu0 %v3324_v27  ;;  %v9487_v27 = vsub.f32 %v3205_v1, %v9476_v18  ;;  %v448_v1 = vld [vmem:[%s9363_s29 + $0x30] sm:$0xff] }
 0x2b2   : > { %2850 = vmatmul.f32.gmra.mxu2 %v13004_v17 }
 0x2b3   : > { %v2284_v22 = vpop.f32.mrf.mxu3  ;;  %13006 = vst [vmem:[#allocation44_spill] sm:$0xff] %v9487_v27 }
 0x2b4   : > { %v2285_v21 = vadd.f32 %v2284_v22, %v2000_v8  ;;  %v2694_v43 = vpop.f32.mrf.mxu1  ;;  %v3340_v22 = vand.u32 4294901760, %v3339_v53 }
 0x2b5   : > { %v2007_v60 = vpop.f32.mrf.mxu2 }
 0x2b6   : > { %v2479_v49 = vadd.f32 %v2478_v0, %v2285_v21  ;;  %v2488_v23 = vpop.f32.mrf.mxu0  ;;  %v2008_v56 = vadd.f32 %v9110_v28, %v2007_v60  ;;  %v13007_v0 = vld [vmem:[#allocation14_spill] sm:$0xff]  ;;  %v12549_v21 = vand.u32 4294901760, %v9487_v27 }
 0x2b7   : > { %3630 = vmatmul.f32.gmra.mxu1 %v9424_v44 }
 0x2b8   : > { %3011 = vmatmul.f32.gmra.mxu3 %v13004_v17  ;;  %v9481_v12 = vadd.f32 %v2688_v36, %v2479_v49  ;;  %v3347_v37 = vsub.f32 %v9487_v27, %v12549_v21 }
 0x2b9   : > { %3333 = vmatmul.f32.gmra.mxu0 %v3332_v41  ;;  %v9493_v41 = vand.u32 4294901760, %v3208_v52 }
 0x2ba   : > { %2854 = vmatmul.f32.gmra.mxu2 %v13007_v0 }
 0x2bb   : > { %v2288_v54 = vpop.f32.mrf.mxu3  ;;  %13008 = vst [vmem:[#allocation19_spill] sm:$0xff] %v9493_v41  ;;  %v9504_v53 = vsub.f32 %v3208_v52, %v9493_v41  ;;  %v449_v52 = vld [vmem:[%s9363_s29 + $0x38] sm:$0xff] }
 0x2bc   : > { %v2289_v8 = vadd.f32 %v2288_v54, %v2008_v56  ;;  %v2700_v17 = vpop.f32.mrf.mxu1  ;;  %v3211_v54 = vsel %vm486_vm0, %v448_v1, 0 }
 0x2bd   : > { %v2015_v36 = vpop.f32.mrf.mxu2  ;;  %13009 = vst [vmem:[#allocation47_spill] sm:$0xff] %v9504_v53  ;;  %v9510_v10 = vand.u32 4294901760, %v3211_v54 }
 0x2be   : > { %v2484_v49 = vadd.f32 %v2483_v31, %v2289_v8  ;;  %v2493_v5 = vpop.f32.mrf.mxu0  ;;  %v2016_v56 = vadd.f32 %v9110_v28, %v2015_v36  ;;  %v13010_v31 = vld [vmem:[#allocation23_spill] sm:$0xff] }
 0x2bf   : > { %3634 = vmatmul.f32.gmra.mxu1 %v9443_v15  ;;  %13011 = vst [vmem:[#allocation21_spill] sm:$0xff] %v9510_v10 }
 0x2c0   : > { %3015 = vmatmul.f32.gmra.mxu3 %v13007_v0  ;;  %v9498_v60 = vadd.f32 %v2694_v43, %v2484_v49  ;;  %v3348_v49 = vand.u32 4294901760, %v3347_v37  ;;  %v9521_v37 = vsub.f32 %v3211_v54, %v9510_v10  ;;  %v450_v54 = vld [vmem:[%s9363_s29 + $0x40] sm:$0xff] }
 0x2c1   : > { %3341 = vmatmul.f32.gmra.mxu0 %v3340_v22  ;;  %v12556_v22 = vand.u32 4294901760, %v9504_v53 }
 0x2c2   : > { %2858 = vmatmul.f32.gmra.mxu2 %v13010_v31  ;;  %13012 = vst [vmem:[#allocation53_spill] sm:$0xff] %v9521_v37 }
 0x2c3   : > { %v2292_v8 = vpop.f32.mrf.mxu3  ;;  %v3355_v1 = vsub.f32 %v9504_v53, %v12556_v22 }
 0x2c4   : > { %v2293_v61 = vadd.f32 %v2292_v8, %v2016_v56  ;;  %v2706_v0 = vpop.f32.mrf.mxu1 }
 0x2c5   : > { %v2023_v43 = vpop.f32.mrf.mxu2 }
 0x2c6   : > { %v2489_v16 = vadd.f32 %v2488_v23, %v2293_v61  ;;  %v2498_v21 = vpop.f32.mrf.mxu0  ;;  %v2024_v56 = vadd.f32 %v9110_v28, %v2023_v43  ;;  %v13013_v61 = vld [vmem:[#allocation25_spill] sm:$0xff]  ;;  %v3214_v23 = vsel %vm486_vm0, %v449_v52, 0 }
 0x2c7   : > { %3638 = vmatmul.f32.gmra.mxu1 %v9459_v7  ;;  %v9527_v3 = vand.u32 4294901760, %v3214_v23 }
 0x2c8   : > { %3019 = vmatmul.f32.gmra.mxu3 %v13010_v31  ;;  %v9515_v36 = vadd.f32 %v2700_v17, %v2489_v16  ;;  %v3356_v17 = vand.u32 4294901760, %v3355_v1 }
 0x2c9   : > { %3349 = vmatmul.f32.gmra.mxu0 %v3348_v49  ;;  %v12561_v49 = vand.u32 4294901760, %v9521_v37  ;;  %13014 = vst [vmem:[#allocation52_spill] sm:$0xff] %v9527_v3  ;;  %v9538_v1 = vsub.f32 %v3214_v23, %v9527_v3  ;;  %v451_v23 = vld [vmem:[%s9363_s29 + $0x48] sm:$0xff] }
 0x2ca   : > { %2862 = vmatmul.f32.gmra.mxu2 %v13013_v61 }
 0x2cb   : > { %v2296_v8 = vpop.f32.mrf.mxu3  ;;  %v3363_v52 = vsub.f32 %v9521_v37, %v12561_v49  ;;  %13016 = vst [vmem:[#allocation27_spill] sm:$0xff] %v9538_v1 }
 0x2cc   : > { %v2297_v27 = vadd.f32 %v2296_v8, %v2024_v56  ;;  %v2712_v31 = vpop.f32.mrf.mxu1 }
 0x2cd   : > { %v2031_v16 = vpop.f32.mrf.mxu2 }
 0x2ce   : > { %v2494_v7 = vadd.f32 %v2493_v5, %v2297_v27  ;;  %v2503_v22 = vpop.f32.mrf.mxu0  ;;  %v2032_v56 = vadd.f32 %v9110_v28, %v2031_v16  ;;  %v13017_v5 = vld [vmem:[#allocation29_spill] sm:$0xff]  ;;  %v3217_v27 = vsel %vm486_vm0, %v450_v54, 0 }
 0x2cf   : > { %3642 = vmatmul.f32.gmra.mxu1 %v9476_v18  ;;  %v9544_v18 = vand.u32 4294901760, %v3217_v27 }
 0x2d0   : > { %3023 = vmatmul.f32.gmra.mxu3 %v13013_v61  ;;  %v9532_v43 = vadd.f32 %v2706_v0, %v2494_v7  ;;  %v3364_v0 = vand.u32 4294901760, %v3363_v52 }
 0x2d1   : > { %3357 = vmatmul.f32.gmra.mxu0 %v3356_v17  ;;  %v12566_v17 = vand.u32 4294901760, %v9538_v1  ;;  %13018 = vst [vmem:[#allocation30_spill] sm:$0xff] %v9544_v18  ;;  %v9555_v52 = vsub.f32 %v3217_v27, %v9544_v18  ;;  %v452_v27 = vld [vmem:[%s9363_s29 + $0x50] sm:$0xff] }
 0x2d2   : > { %13015 = vst [vmem:[#allocation26_spill] sm:$0xff] %v9532_v43  ;;  %2866 = vmatmul.f32.gmra.mxu2 %v13017_v5 }
 0x2d3   : > { %v2300_v8 = vpop.f32.mrf.mxu3  ;;  %v3371_v54 = vsub.f32 %v9538_v1, %v12566_v17  ;;  %13020 = vst [vmem:[#allocation31_spill] sm:$0xff] %v9555_v52 }
 0x2d4   : > { %v2301_v53 = vadd.f32 %v2300_v8, %v2032_v56  ;;  %v2718_v61 = vpop.f32.mrf.mxu1 }
 0x2d5   : > { %v2039_v7 = vpop.f32.mrf.mxu2 }
 0x2d6   : > { %v2499_v43 = vadd.f32 %v2498_v21, %v2301_v53  ;;  %v2508_v49 = vpop.f32.mrf.mxu0  ;;  %v2040_v56 = vadd.f32 %v9110_v28, %v2039_v7  ;;  %v13021_v21 = vld [vmem:[#allocation15_spill] sm:$0xff]  ;;  %v3220_v53 = vsel %vm486_vm0, %v451_v23, 0 }
 0x2d7   : > { %3646 = vmatmul.f32.gmra.mxu1 %v9493_v41  ;;  %v9561_v41 = vand.u32 4294901760, %v3220_v53 }
 0x2d8   : > { %3027 = vmatmul.f32.gmra.mxu3 %v13017_v5  ;;  %v9549_v16 = vadd.f32 %v2712_v31, %v2499_v43  ;;  %v3372_v43 = vand.u32 4294901760, %v3371_v54  ;;  %v13025_v54 = vld [vmem:[#allocation20_spill] sm:$0xff] }
 0x2d9   : > { %3365 = vmatmul.f32.gmra.mxu0 %v3364_v0  ;;  %v12567_v0 = vand.u32 4294901760, %v9555_v52  ;;  %13022 = vst [vmem:[#allocation5_spill] sm:$0xff] %v9561_v41  ;;  %v9572_v23 = vsub.f32 %v3220_v53, %v9561_v41 }
 0x2da   : > { %13019 = vst [vmem:[#allocation55_spill] sm:$0xff] %v9549_v16  ;;  %2870 = vmatmul.f32.gmra.mxu2 %v13021_v21 }
 0x2db   : > { %v2304_v8 = vpop.f32.mrf.mxu3  ;;  %v3379_v7 = vsub.f32 %v9555_v52, %v12567_v0  ;;  %13024 = vst [vmem:[#allocation34_spill] sm:$0xff] %v9572_v23  ;;  %v12576_v0 = vand.u32 4294901760, %v9572_v23 }
 0x2dc   : > { %v2305_v37 = vadd.f32 %v2304_v8, %v2040_v56  ;;  %v2724_v5 = vpop.f32.mrf.mxu1 }
 0x2dd   : > { %v2047_v31 = vpop.f32.mrf.mxu2 }
 0x2de   : > { %v2504_v16 = vadd.f32 %v2503_v22, %v2305_v37  ;;  %v2513_v17 = vpop.f32.mrf.mxu0  ;;  %v9577_v22 = vld [vmem:[%s12397_s5] ss:$0 sm:$0xff] }
 0x2df   : > { %3650 = vmatmul.f32.gmra.mxu1 %v9510_v10  ;;  %v2048_v37 = vadd.f32 %v9577_v22, %v2047_v31  ;;  %v453_v10 = vld [vmem:[%s9363_s29 + $0x58] sm:$0xff] }
 0x2e0   : > { %3031 = vmatmul.f32.gmra.mxu3 %v13021_v21  ;;  %v9566_v28 = vadd.f32 %v2718_v61, %v2504_v16  ;;  %v3223_v61 = vsel %vm486_vm0, %v452_v27, 0  ;;  %v3387_v27 = vsub.f32 %v9572_v23, %v12576_v0 }
 0x2e1   : > { %3373 = vmatmul.f32.gmra.mxu0 %v3372_v43  ;;  %v3380_v43 = vand.u32 4294901760, %v3379_v7  ;;  %v9583_v53 = vand.u32 4294901760, %v3223_v61 }
 0x2e2   : > { %13023 = vst [vmem:[#allocation56_spill] sm:$0xff] %v9566_v28  ;;  %2874 = vmatmul.f32.gmra.mxu2 %v13025_v54 }
 0x2e3   : > { %v2308_v16 = vpop.f32.mrf.mxu3  ;;  %13026 = vst [vmem:[#allocation6_spill] sm:$0xff] %v9583_v53  ;;  %v9594_v7 = vsub.f32 %v3223_v61, %v9583_v53  ;;  %v454_v61 = vld [vmem:[%s9363_s29 + $0x60] sm:$0xff] }
 0x2e4   : > { %v2309_v56 = vadd.f32 %v2308_v16, %v2048_v37  ;;  %v2730_v21 = vpop.f32.mrf.mxu1  ;;  %v3226_v16 = vsel %vm486_vm0, %v453_v10, 0 }
 0x2e5   : > { %v2055_v8 = vpop.f32.mrf.mxu2  ;;  %13028 = vst [vmem:[#allocation35_spill] sm:$0xff] %v9594_v7 }
 0x2e6   : > { %v2509_v52 = vadd.f32 %v2508_v49, %v2309_v56  ;;  %v2518_v1 = vpop.f32.mrf.mxu0  ;;  %v2056_v37 = vadd.f32 %v9577_v22, %v2055_v8  ;;  %v13029_v49 = vld [vmem:[#allocation16_spill] sm:$0xff] }
 0x2e7   : > { %3654 = vmatmul.f32.gmra.mxu1 %v9527_v3 }
 0x2e8   : > { %3035 = vmatmul.f32.gmra.mxu3 %v13025_v54  ;;  %v9588_v31 = vadd.f32 %v2724_v5, %v2509_v52  ;;  %v3388_v5 = vand.u32 4294901760, %v3387_v27 }
 0x2e9   : > { %3381 = vmatmul.f32.gmra.mxu0 %v3380_v43  ;;  %v12581_v43 = vand.u32 4294901760, %v9594_v7 }
 0x2ea   : > { %13027 = vst [vmem:[#allocation7_spill] sm:$0xff] %v9588_v31  ;;  %2878 = vmatmul.f32.gmra.mxu2 %v13029_v49  ;;  %v9600_v31 = vand.u32 4294901760, %v3226_v16 }
 0x2eb   : > { %v2312_v56 = vpop.f32.mrf.mxu3  ;;  %v3395_v10 = vsub.f32 %v9594_v7, %v12581_v43 }
 0x2ec   : > { %v2313_v3 = vadd.f32 %v2312_v56, %v2056_v37  ;;  %v2736_v54 = vpop.f32.mrf.mxu1  ;;  %13030 = vst [vmem:[#allocation8_spill] sm:$0xff] %v9600_v31  ;;  %v9611_v27 = vsub.f32 %v3226_v16, %v9600_v31  ;;  %v455_v16 = vld [vmem:[%s9363_s29 + $0x68] sm:$0xff] }
 0x2ed   : > { %v2063_v52 = vpop.f32.mrf.mxu2 }
 0x2ee   : > { %v2514_v28 = vadd.f32 %v2513_v17, %v2313_v3  ;;  %v2523_v0 = vpop.f32.mrf.mxu0  ;;  %13032 = vst [vmem:[#allocation38_spill] sm:$0xff] %v9611_v27  ;;  %v2064_v37 = vadd.f32 %v9577_v22, %v2063_v52  ;;  %v13033_v3 = vld [vmem:[#allocation22_spill] sm:$0xff]  ;;  %v3229_v17 = vsel %vm486_vm0, %v454_v61, 0 }
 0x2ef   : > { %3658 = vmatmul.f32.gmra.mxu1 %v9544_v18  ;;  %v9617_v18 = vand.u32 4294901760, %v3229_v17 }
 0x2f0   : > { %3039 = vmatmul.f32.gmra.mxu3 %v13029_v49  ;;  %v9605_v8 = vadd.f32 %v2730_v21, %v2514_v28  ;;  %v3396_v21 = vand.u32 4294901760, %v3395_v10 }
 0x2f1   : > { %3389 = vmatmul.f32.gmra.mxu0 %v3388_v5  ;;  %v12586_v5 = vand.u32 4294901760, %v9611_v27  ;;  %13034 = vst [vmem:[#allocation10_spill] sm:$0xff] %v9617_v18  ;;  %v9628_v10 = vsub.f32 %v3229_v17, %v9617_v18  ;;  %v456_v17 = vld [vmem:[%s9363_s29 + $0x70] sm:$0xff] }
 0x2f2   : > { %13031 = vst [vmem:[#allocation9_spill] sm:$0xff] %v9605_v8  ;;  %2882 = vmatmul.f32.gmra.mxu2 %v13033_v3 }
 0x2f3   : > { %v2316_v56 = vpop.f32.mrf.mxu3  ;;  %v3403_v61 = vsub.f32 %v9611_v27, %v12586_v5  ;;  %13036 = vst [vmem:[#allocation39_spill] sm:$0xff] %v9628_v10 }
 0x2f4   : > { %v2317_v23 = vadd.f32 %v2316_v56, %v2064_v37  ;;  %v2742_v49 = vpop.f32.mrf.mxu1 }
 0x2f5   : > { %v2071_v28 = vpop.f32.mrf.mxu2 }
 0x2f6   : > { %v2519_v8 = vadd.f32 %v2518_v1, %v2317_v23  ;;  %v2528_v43 = vpop.f32.mrf.mxu0  ;;  %v2072_v37 = vadd.f32 %v9577_v22, %v2071_v28  ;;  %v13037_v1 = vld [vmem:[#allocation33_spill] sm:$0xff]  ;;  %v3232_v23 = vsel %vm486_vm0, %v455_v16, 0 }
 0x2f7   : > { %3662 = vmatmul.f32.gmra.mxu1 %v9561_v41  ;;  %v9634_v41 = vand.u32 4294901760, %v3232_v23 }
 0x2f8   : > { %3043 = vmatmul.f32.gmra.mxu3 %v13033_v3  ;;  %v9622_v52 = vadd.f32 %v2736_v54, %v2519_v8  ;;  %v3404_v8 = vand.u32 4294901760, %v3403_v61 }
 0x2f9   : > { %3397 = vmatmul.f32.gmra.mxu0 %v3396_v21  ;;  %v12591_v21 = vand.u32 4294901760, %v9628_v10  ;;  %13038 = vst [vmem:[#allocation12_spill] sm:$0xff] %v9634_v41  ;;  %v9645_v61 = vsub.f32 %v3232_v23, %v9634_v41  ;;  %v457_v23 = vld [vmem:[%s9363_s29 + $0x78] sm:$0xff] }
 0x2fa   : > { %13035 = vst [vmem:[#allocation11_spill] sm:$0xff] %v9622_v52  ;;  %2886 = vmatmul.f32.gmra.mxu2 %v13037_v1 }
 0x2fb   : > { %v2320_v56 = vpop.f32.mrf.mxu3  ;;  %v3411_v16 = vsub.f32 %v9628_v10, %v12591_v21  ;;  %13040 = vst [vmem:[#allocation43_spill] sm:$0xff] %v9645_v61 }
 0x2fc   : > { %v2321_v7 = vadd.f32 %v2320_v56, %v2072_v37  ;;  %v2748_v3 = vpop.f32.mrf.mxu1 }
 0x2fd   : > { %v2079_v54 = vpop.f32.mrf.mxu2 }
 0x2fe   : > { %v2524_v52 = vadd.f32 %v2523_v0, %v2321_v7  ;;  %v2533_v5 = vpop.f32.mrf.mxu0  ;;  %v2080_v37 = vadd.f32 %v9577_v22, %v2079_v54  ;;  %v13041_v0 = vld [vmem:[#allocation24_spill] sm:$0xff]  ;;  %v3235_v7 = vsel %vm486_vm0, %v456_v17, 0 }
 0x2ff   : > { %3666 = vmatmul.f32.gmra.mxu1 %v9583_v53  ;;  %v9651_v53 = vand.u32 4294901760, %v3235_v7 }
 0x300   : > { %3047 = vmatmul.f32.gmra.mxu3 %v13037_v1  ;;  %v9639_v28 = vadd.f32 %v2742_v49, %v2524_v52  ;;  %v3412_v52 = vand.u32 4294901760, %v3411_v16 }
 0x301   : > { %3405 = vmatmul.f32.gmra.mxu0 %v3404_v8  ;;  %v12596_v8 = vand.u32 4294901760, %v9645_v61  ;;  %13042 = vst [vmem:[#allocation45_spill] sm:$0xff] %v9651_v53  ;;  %v9662_v16 = vsub.f32 %v3235_v7, %v9651_v53  ;;  %v458_v7 = vld [vmem:[%s9363_s29 + $0x80] sm:$0xff] }
 0x302   : > { %13039 = vst [vmem:[#allocation42_spill] sm:$0xff] %v9639_v28  ;;  %2890 = vmatmul.f32.gmra.mxu2 %v13041_v0 }
 0x303   : > { %v2324_v56 = vpop.f32.mrf.mxu3  ;;  %v3419_v17 = vsub.f32 %v9645_v61, %v12596_v8  ;;  %13044 = vst [vmem:[#allocation49_spill] sm:$0xff] %v9662_v16 }
 0x304   : > { %v2325_v27 = vadd.f32 %v2324_v56, %v2080_v37  ;;  %v2754_v1 = vpop.f32.mrf.mxu1 }
 0x305   : > { %v2087_v49 = vpop.f32.mrf.mxu2 }
 0x306   : > { %v2529_v28 = vadd.f32 %v2528_v43, %v2325_v27  ;;  %v2538_v21 = vpop.f32.mrf.mxu0  ;;  %v2088_v37 = vadd.f32 %v9577_v22, %v2087_v49  ;;  %v13045_v43 = vld [vmem:[#allocation37_spill] sm:$0xff]  ;;  %v3238_v27 = vsel %vm486_vm0, %v457_v23, 0 }
 0x307   : > { %3670 = vmatmul.f32.gmra.mxu1 %v9600_v31  ;;  %v9668_v31 = vand.u32 4294901760, %v3238_v27 }
 0x308   : > { %3051 = vmatmul.f32.gmra.mxu3 %v13041_v0  ;;  %v9656_v54 = vadd.f32 %v2748_v3, %v2529_v28  ;;  %v3420_v28 = vand.u32 4294901760, %v3419_v17 }
 0x309   : > { %3413 = vmatmul.f32.gmra.mxu0 %v3412_v52  ;;  %v12601_v52 = vand.u32 4294901760, %v9662_v16  ;;  %v9679_v17 = vsub.f32 %v3238_v27, %v9668_v31  ;;  %v459_v27 = vld [vmem:[%s9363_s29 + $0x88] sm:$0xff] }
 0x30a   : > { %13043 = vst [vmem:[#allocation46_spill] sm:$0xff] %v9656_v54  ;;  %2894 = vmatmul.f32.gmra.mxu2 %v13045_v43 }
 0x30b   : > { %v2328_v56 = vpop.f32.mrf.mxu3  ;;  %v3427_v23 = vsub.f32 %v9662_v16, %v12601_v52  ;;  %13047 = vst [vmem:[#allocation51_spill] sm:$0xff] %v9679_v17 }
 0x30c   : > { %v2329_v10 = vadd.f32 %v2328_v56, %v2088_v37  ;;  %v2760_v0 = vpop.f32.mrf.mxu1 }
 0x30d   : > { %v2095_v3 = vpop.f32.mrf.mxu2 }
 0x30e   : > { %v2534_v54 = vadd.f32 %v2533_v5, %v2329_v10  ;;  %v2543_v8 = vpop.f32.mrf.mxu0  ;;  %v2096_v37 = vadd.f32 %v9577_v22, %v2095_v3  ;;  %v13048_v5 = vld [vmem:[#allocation28_spill] sm:$0xff]  ;;  %v3241_v10 = vsel %vm486_vm0, %v458_v7, 0 }
 0x30f   : > { %3674 = vmatmul.f32.gmra.mxu1 %v9617_v18  ;;  %v9685_v18 = vand.u32 4294901760, %v3241_v10 }
 0x310   : > { %3055 = vmatmul.f32.gmra.mxu3 %v13045_v43  ;;  %v9673_v49 = vadd.f32 %v2754_v1, %v2534_v54  ;;  %v3428_v54 = vand.u32 4294901760, %v3427_v23 }
 0x311   : > { %3421 = vmatmul.f32.gmra.mxu0 %v3420_v28  ;;  %v12606_v28 = vand.u32 4294901760, %v9679_v17  ;;  %v9696_v23 = vsub.f32 %v3241_v10, %v9685_v18  ;;  %v460_v10 = vld [vmem:[%s9363_s29 + $0x90] sm:$0xff] }
 0x312   : > { %13046 = vst [vmem:[#allocation50_spill] sm:$0xff] %v9673_v49  ;;  %2898 = vmatmul.f32.gmra.mxu2 %v13048_v5 }
 0x313   : > { %v2332_v56 = vpop.f32.mrf.mxu3  ;;  %v3435_v7 = vsub.f32 %v9679_v17, %v12606_v28  ;;  %13050 = vst [vmem:[#allocation13_spill] sm:$0xff] %v9696_v23 }
 0x314   : > { %v2333_v61 = vadd.f32 %v2332_v56, %v2096_v37  ;;  %v2766_v43 = vpop.f32.mrf.mxu1 }
 0x315   : > { %v2103_v1 = vpop.f32.mrf.mxu2 }
 0x316   : > { %v2539_v49 = vadd.f32 %v2538_v21, %v2333_v61  ;;  %v2548_v52 = vpop.f32.mrf.mxu0  ;;  %v2104_v37 = vadd.f32 %v9577_v22, %v2103_v1  ;;  %v13051_v21 = vld [vmem:[#allocation41_spill] sm:$0xff]  ;;  %v3244_v61 = vsel %vm486_vm0, %v459_v27, 0 }
 0x317   : > { %3678 = vmatmul.f32.gmra.mxu1 %v9634_v41  ;;  %v9702_v41 = vand.u32 4294901760, %v3244_v61 }
 0x318   : > { %3059 = vmatmul.f32.gmra.mxu3 %v13048_v5  ;;  %v9690_v3 = vadd.f32 %v2760_v0, %v2539_v49  ;;  %v3436_v49 = vand.u32 4294901760, %v3435_v7 }
 0x319   : > { %3429 = vmatmul.f32.gmra.mxu0 %v3428_v54  ;;  %v12611_v54 = vand.u32 4294901760, %v9696_v23  ;;  %v9713_v7 = vsub.f32 %v3244_v61, %v9702_v41  ;;  %v461_v61 = vld [vmem:[%s9363_s29 + $0x98] sm:$0xff] }
 0x31a   : > { %13049 = vst [vmem:[#allocation54_spill] sm:$0xff] %v9690_v3  ;;  %2902 = vmatmul.f32.gmra.mxu2 %v13051_v21 }
 0x31b   : > { %v2336_v56 = vpop.f32.mrf.mxu3  ;;  %v3443_v27 = vsub.f32 %v9696_v23, %v12611_v54  ;;  %13053 = vst [vmem:[#allocation23_spill] sm:$0xff] %v9713_v7 }
 0x31c   : > { %v2337_v16 = vadd.f32 %v2336_v56, %v2104_v37  ;;  %v2772_v5 = vpop.f32.mrf.mxu1 }
 0x31d   : > { %v2111_v0 = vpop.f32.mrf.mxu2 }
 0x31e   : > { %v2544_v3 = vadd.f32 %v2543_v8, %v2337_v16  ;;  %v2553_v28 = vpop.f32.mrf.mxu0  ;;  %v2112_v37 = vadd.f32 %v9577_v22, %v2111_v0  ;;  %v13054_v8 = vld [vmem:[#allocation17_spill] sm:$0xff]  ;;  %v3247_v16 = vsel %vm486_vm0, %v460_v10, 0 }
 0x31f   : > { %3682 = vmatmul.f32.gmra.mxu1 %v9651_v53  ;;  %v9719_v53 = vand.u32 4294901760, %v3247_v16 }
 0x320   : > { %3063 = vmatmul.f32.gmra.mxu3 %v13051_v21  ;;  %v9707_v1 = vadd.f32 %v2766_v43, %v2544_v3  ;;  %v3444_v3 = vand.u32 4294901760, %v3443_v27 }
 0x321   : > { %3437 = vmatmul.f32.gmra.mxu0 %v3436_v49  ;;  %v12614_v49 = vand.u32 4294901760, %v9713_v7  ;;  %v9732_v27 = vsub.f32 %v3247_v16, %v9719_v53 }
 0x322   : > { %13052 = vst [vmem:[#allocation14_spill] sm:$0xff] %v9707_v1  ;;  %2906 = vmatmul.f32.gmra.mxu2 %v13054_v8 }
 0x323   : > { %v2340_v56 = vpop.f32.mrf.mxu3  ;;  %v3451_v10 = vsub.f32 %v9713_v7, %v12614_v49 }
 0x324   : > { %v2341_v17 = vadd.f32 %v2340_v56, %v2112_v37  ;;  %v2778_v21 = vpop.f32.mrf.mxu1  ;;  %v3250_v37 = vsel %vm486_vm0, %v461_v61, 0 }
 0x325   : > { %v2119_v43 = vpop.f32.mrf.mxu2  ;;  %v9740_v23 = vand.u32 4294901760, %v3250_v37 }
 0x326   : > { %v2549_v1 = vadd.f32 %v2548_v52, %v2341_v17  ;;  %v9721_v54 = vpop.f32.mrf.mxu0  ;;  %v2120_v52 = vadd.f32 %v9577_v22, %v2119_v43  ;;  %v13056_v17 = vld [vmem:[#allocation32_spill] sm:$0xff]  ;;  %v462_v22 = vld [vmem:[%s9363_s29 + $0xa0] sm:$0xff] }
 0x327   : > { %13055 = vst [vmem:[#allocation25_spill] sm:$0xff] %v9721_v54  ;;  %3686 = vmatmul.f32.gmra.mxu1 %v9668_v31 }
 0x328   : > { %3067 = vmatmul.f32.gmra.mxu3 %v13054_v8  ;;  %v9726_v0 = vadd.f32 %v2772_v5, %v2549_v1  ;;  %v3452_v1 = vand.u32 4294901760, %v3451_v10  ;;  %v9754_v10 = vsub.f32 %v3250_v37, %v9740_v23  ;;  %v463_v37 = vld [vmem:[%s9363_s29 + $0xa8] sm:$0xff] }
 0x329   : > { %3445 = vmatmul.f32.gmra.mxu0 %v3444_v3  ;;  %v12617_v3 = vand.u32 4294901760, %v9732_v27 }
 0x32a   : > { %2910 = vmatmul.f32.gmra.mxu2 %v13056_v17  ;;  %13057 = vst [vmem:[#allocation29_spill] sm:$0xff] %v9754_v10 }
 0x32b   : > { %v2344_v56 = vpop.f32.mrf.mxu3  ;;  %v3459_v61 = vsub.f32 %v9732_v27, %v12617_v3 }
 0x32c   : > { %v2345_v54 = vadd.f32 %v2344_v56, %v2120_v52  ;;  %v9737_v8 = vpop.f32.mrf.mxu1 }
 0x32d   : > { %v2847_v5 = vpop.f32.mrf.mxu2 }
 0x32e   : > { %v2554_v49 = vadd.f32 %v2553_v28, %v2345_v54  ;;  %v2848_v16 = vadd.f32 %v2847_v5, %v9124_v2  ;;  %v9743_v7 = vpop.f32.mrf.mxu0  ;;  %v3253_v2 = vsel %vm486_vm0, %v462_v22, 0 }
 0x32f   : > { %3690 = vmatmul.f32.gmra.mxu1 %v9685_v18  ;;  %v9763_v56 = vand.u32 4294901760, %v3253_v2 }
 0x330   : > { %3071 = vmatmul.f32.gmra.mxu3 %v13056_v17  ;;  %v9748_v43 = vadd.f32 %v2778_v21, %v2554_v49  ;;  %v3460_v49 = vand.u32 4294901760, %v3459_v61  ;;  %v12618_v17 = vand.u32 4294901760, %v9754_v10 }
 0x331   : > { %3453 = vmatmul.f32.gmra.mxu0 %v3452_v1  ;;  %v9775_v22 = vsub.f32 %v3253_v2, %v9763_v56  ;;  %v464_v2 = vld [vmem:[%s9363_s29 + $0xb0] sm:$0xff] }
 0x332   : > { %2914 = vmatmul.f32.gmra.mxu2 %v9071_v32 }
 0x333   : > { %v3008_v28 = vpop.f32.mrf.mxu3  ;;  %13059 = vst [vmem:[#allocation20_spill] sm:$0xff] %v9775_v22 }
 0x334   : > { %v9758_v54 = vadd.f32 %v3008_v28, %v2848_v16  ;;  %v9760_v52 = vpop.f32.mrf.mxu1  ;;  %v3467_v16 = vsub.f32 %v9754_v10, %v12618_v17 }
 0x335   : > { %v2851_v21 = vpop.f32.mrf.mxu2 }
 0x336   : > { %13058 = vst [vmem:[#allocation15_spill] sm:$0xff] %v9758_v54  ;;  %v2852_v5 = vadd.f32 %v2851_v21, %v9134_v20  ;;  %v9766_v1 = vpop.f32.mrf.mxu0  ;;  %v3256_v20 = vsel %vm486_vm0, %v463_v37, 0 }
 0x337   : > { %3694 = vmatmul.f32.gmra.mxu1 %v9702_v41  ;;  %v9784_v54 = vand.u32 4294901760, %v3256_v20 }
 0x338   : > { %3075 = vmatmul.f32.gmra.mxu3 %v9071_v32  ;;  %v3468_v32 = vand.u32 4294901760, %v3467_v16 }
 0x339   : > { %3461 = vmatmul.f32.gmra.mxu0 %v3460_v49  ;;  %v12621_v49 = vand.u32 4294901760, %v9775_v22  ;;  %v9796_v37 = vsub.f32 %v3256_v20, %v9784_v54  ;;  %v465_v20 = vld [vmem:[%s9363_s29 + $0xb8] sm:$0xff] }
 0x33a   : > { %2918 = vmatmul.f32.gmra.mxu2 %v9088_v34 }
 0x33b   : > { %v3012_v61 = vpop.f32.mrf.mxu3  ;;  %13062 = vst [vmem:[#allocation33_spill] sm:$0xff] %v9796_v37 }
 0x33c   : > { %v9779_v28 = vadd.f32 %v3012_v61, %v2852_v5  ;;  %v9781_v21 = vpop.f32.mrf.mxu1  ;;  %v3475_v5 = vsub.f32 %v9775_v22, %v12621_v49 }
 0x33d   : > { %v2855_v3 = vpop.f32.mrf.mxu2 }
 0x33e   : > { %13060 = vst [vmem:[#allocation16_spill] sm:$0xff] %v9779_v28  ;;  %v2856_v17 = vadd.f32 %v2855_v3, %v9149_v35  ;;  %v9787_v10 = vpop.f32.mrf.mxu0  ;;  %v3259_v35 = vsel %vm486_vm0, %v464_v2, 0 }
 0x33f   : > { %13061 = vst [vmem:[#allocation22_spill] sm:$0xff] %v9787_v10  ;;  %3698 = vmatmul.f32.gmra.mxu1 %v9719_v53  ;;  %v9805_v10 = vand.u32 4294901760, %v3259_v35 }
 0x340   : > { %3079 = vmatmul.f32.gmra.mxu3 %v9088_v34  ;;  %v3476_v34 = vand.u32 4294901760, %v3475_v5 }
 0x341   : > { %3469 = vmatmul.f32.gmra.mxu0 %v3468_v32  ;;  %v12624_v32 = vand.u32 4294901760, %v9796_v37  ;;  %v9817_v2 = vsub.f32 %v3259_v35, %v9805_v10  ;;  %v466_v35 = vld [vmem:[%s9363_s29 + $0xc0] sm:$0xff] }
 0x342   : > { %2922 = vmatmul.f32.gmra.mxu2 %v9113_v33 }
 0x343   : > { %v3016_v3 = vpop.f32.mrf.mxu3  ;;  %13065 = vst [vmem:[#allocation28_spill] sm:$0xff] %v9817_v2 }
 0x344   : > { %v9800_v16 = vadd.f32 %v3016_v3, %v2856_v17  ;;  %v9802_v61 = vpop.f32.mrf.mxu1  ;;  %v3483_v17 = vsub.f32 %v9796_v37, %v12624_v32 }
 0x345   : > { %v2859_v28 = vpop.f32.mrf.mxu2 }
 0x346   : > { %13063 = vst [vmem:[#allocation24_spill] sm:$0xff] %v9800_v16  ;;  %v2860_v49 = vadd.f32 %v2859_v28, %v9169_v4  ;;  %v9808_v22 = vpop.f32.mrf.mxu0  ;;  %v3262_v4 = vsel %vm486_vm0, %v465_v20, 0 }
 0x347   : > { %13064 = vst [vmem:[#allocation37_spill] sm:$0xff] %v9808_v22  ;;  %3702 = vmatmul.f32.gmra.mxu1 %v9740_v23  ;;  %v9826_v22 = vand.u32 4294901760, %v3262_v4 }
 0x348   : > { %3083 = vmatmul.f32.gmra.mxu3 %v9113_v33  ;;  %v3484_v33 = vand.u32 4294901760, %v3483_v17 }
 0x349   : > { %3477 = vmatmul.f32.gmra.mxu0 %v3476_v34  ;;  %v12627_v34 = vand.u32 4294901760, %v9817_v2  ;;  %v9838_v20 = vsub.f32 %v3262_v4, %v9826_v22  ;;  %v467_v4 = vld [vmem:[%s9363_s29 + $0xc8] sm:$0xff] }
 0x34a   : > { %2926 = vmatmul.f32.gmra.mxu2 %v9120_v50 }
 0x34b   : > { %v3020_v28 = vpop.f32.mrf.mxu3  ;;  %13068 = vst [vmem:[#allocation32_spill] sm:$0xff] %v9838_v20 }
 0x34c   : > { %v9821_v5 = vadd.f32 %v3020_v28, %v2860_v49  ;;  %v9823_v3 = vpop.f32.mrf.mxu1  ;;  %v3491_v49 = vsub.f32 %v9817_v2, %v12627_v34 }
 0x34d   : > { %v2863_v16 = vpop.f32.mrf.mxu2 }
 0x34e   : > { %13066 = vst [vmem:[#allocation41_spill] sm:$0xff] %v9821_v5  ;;  %v2864_v32 = vadd.f32 %v2863_v16, %v9179_v42  ;;  %v9829_v37 = vpop.f32.mrf.mxu0  ;;  %v3265_v42 = vsel %vm486_vm0, %v466_v35, 0 }
 0x34f   : > { %13067 = vst [vmem:[#allocation17_spill] sm:$0xff] %v9829_v37  ;;  %3706 = vmatmul.f32.gmra.mxu1 %v9763_v56  ;;  %v9847_v37 = vand.u32 4294901760, %v3265_v42 }
 0x350   : > { %3087 = vmatmul.f32.gmra.mxu3 %v9120_v50  ;;  %v3492_v50 = vand.u32 4294901760, %v3491_v49 }
 0x351   : > { %3485 = vmatmul.f32.gmra.mxu0 %v3484_v33  ;;  %v12630_v33 = vand.u32 4294901760, %v9838_v20  ;;  %v9859_v35 = vsub.f32 %v3265_v42, %v9847_v37  ;;  %v468_v42 = vld [vmem:[%s9363_s29 + $0xd0] sm:$0xff] }
 0x352   : > { %2930 = vmatmul.f32.gmra.mxu2 %v9130_v29 }
 0x353   : > { %v3024_v16 = vpop.f32.mrf.mxu3  ;;  %13071 = vst [vmem:[#allocation59_spill] sm:$0xff] %v9859_v35 }
 0x354   : > { %v9842_v17 = vadd.f32 %v3024_v16, %v2864_v32  ;;  %v9844_v28 = vpop.f32.mrf.mxu1  ;;  %v3499_v32 = vsub.f32 %v9838_v20, %v12630_v33 }
 0x355   : > { %v2867_v5 = vpop.f32.mrf.mxu2 }
 0x356   : > { %13069 = vst [vmem:[#allocation57_spill] sm:$0xff] %v9842_v17  ;;  %v2868_v34 = vadd.f32 %v2867_v5, %v9189_v47  ;;  %v9850_v2 = vpop.f32.mrf.mxu0  ;;  %v3268_v47 = vsel %vm486_vm0, %v467_v4, 0 }
 0x357   : > { %13070 = vst [vmem:[#allocation58_spill] sm:$0xff] %v9850_v2  ;;  %3710 = vmatmul.f32.gmra.mxu1 %v9784_v54  ;;  %v9868_v2 = vand.u32 4294901760, %v3268_v47 }
 0x358   : > { %3091 = vmatmul.f32.gmra.mxu3 %v9130_v29  ;;  %v3500_v29 = vand.u32 4294901760, %v3499_v32 }
 0x359   : > { %3493 = vmatmul.f32.gmra.mxu0 %v3492_v50  ;;  %v12633_v50 = vand.u32 4294901760, %v9859_v35  ;;  %v9880_v4 = vsub.f32 %v3268_v47, %v9868_v2  ;;  %v469_v47 = vld [vmem:[%s9363_s29 + $0xd8] sm:$0xff] }
 0x35a   : > { %2934 = vmatmul.f32.gmra.mxu2 %v9145_v6 }
 0x35b   : > { %v3028_v5 = vpop.f32.mrf.mxu3  ;;  %13074 = vst [vmem:[#allocation62_spill] sm:$0xff] %v9880_v4 }
 0x35c   : > { %v9863_v49 = vadd.f32 %v3028_v5, %v2868_v34  ;;  %v9865_v16 = vpop.f32.mrf.mxu1  ;;  %v3507_v34 = vsub.f32 %v9859_v35, %v12633_v50 }
 0x35d   : > { %v2871_v17 = vpop.f32.mrf.mxu2 }
 0x35e   : > { %13072 = vst [vmem:[#allocation60_spill] sm:$0xff] %v9863_v49  ;;  %v2872_v33 = vadd.f32 %v2871_v17, %v9204_v14  ;;  %v9871_v20 = vpop.f32.mrf.mxu0  ;;  %v3271_v14 = vsel %vm486_vm0, %v468_v42, 0 }
 0x35f   : > { %13073 = vst [vmem:[#allocation61_spill] sm:$0xff] %v9871_v20  ;;  %3714 = vmatmul.f32.gmra.mxu1 %v9805_v10  ;;  %v9889_v20 = vand.u32 4294901760, %v3271_v14 }
 0x360   : > { %3095 = vmatmul.f32.gmra.mxu3 %v9145_v6  ;;  %v3508_v6 = vand.u32 4294901760, %v3507_v34 }
 0x361   : > { %3501 = vmatmul.f32.gmra.mxu0 %v3500_v29  ;;  %v12636_v29 = vand.u32 4294901760, %v9880_v4  ;;  %v9901_v42 = vsub.f32 %v3271_v14, %v9889_v20  ;;  %v470_v14 = vld [vmem:[%s9363_s29 + $0xe0] sm:$0xff] }
 0x362   : > { %2938 = vmatmul.f32.gmra.mxu2 %v9166_v46 }
 0x363   : > { %v3032_v17 = vpop.f32.mrf.mxu3  ;;  %13077 = vst [vmem:[#allocation65_spill] sm:$0xff] %v9901_v42 }
 0x364   : > { %v9884_v32 = vadd.f32 %v3032_v17, %v2872_v33  ;;  %v9886_v5 = vpop.f32.mrf.mxu1  ;;  %v3515_v33 = vsub.f32 %v9880_v4, %v12636_v29 }
 0x365   : > { %v2875_v49 = vpop.f32.mrf.mxu2 }
 0x366   : > { %13075 = vst [vmem:[#allocation63_spill] sm:$0xff] %v9884_v32  ;;  %v2876_v50 = vadd.f32 %v2875_v49, %v9224_v58  ;;  %v9892_v35 = vpop.f32.mrf.mxu0  ;;  %v3274_v58 = vsel %vm486_vm0, %v469_v47, 0 }
 0x367   : > { %13076 = vst [vmem:[#allocation64_spill] sm:$0xff] %v9892_v35  ;;  %3718 = vmatmul.f32.gmra.mxu1 %v9826_v22  ;;  %v9910_v35 = vand.u32 4294901760, %v3274_v58 }
 0x368   : > { %3099 = vmatmul.f32.gmra.mxu3 %v9166_v46  ;;  %v3516_v46 = vand.u32 4294901760, %v3515_v33 }
 0x369   : > { %3509 = vmatmul.f32.gmra.mxu0 %v3508_v6  ;;  %v12639_v6 = vand.u32 4294901760, %v9901_v42  ;;  %v9922_v47 = vsub.f32 %v3274_v58, %v9910_v35  ;;  %v471_v58 = vld [vmem:[%s9363_s29 + $0xe8] sm:$0xff] }
 0x36a   : > { %2942 = vmatmul.f32.gmra.mxu2 %v9175_v45 }
 0x36b   : > { %v3036_v49 = vpop.f32.mrf.mxu3  ;;  %13080 = vst [vmem:[#allocation68_spill] sm:$0xff] %v9922_v47 }
 0x36c   : > { %v9905_v34 = vadd.f32 %v3036_v49, %v2876_v50  ;;  %v9907_v17 = vpop.f32.mrf.mxu1  ;;  %v3523_v50 = vsub.f32 %v9901_v42, %v12639_v6 }
 0x36d   : > { %v2879_v32 = vpop.f32.mrf.mxu2 }
 0x36e   : > { %13078 = vst [vmem:[#allocation66_spill] sm:$0xff] %v9905_v34  ;;  %v2880_v29 = vadd.f32 %v2879_v32, %v9237_v63  ;;  %v9913_v4 = vpop.f32.mrf.mxu0  ;;  %v3277_v63 = vsel %vm486_vm0, %v470_v14, 0 }
 0x36f   : > { %13079 = vst [vmem:[#allocation67_spill] sm:$0xff] %v9913_v4  ;;  %3722 = vmatmul.f32.gmra.mxu1 %v9847_v37  ;;  %v9931_v4 = vand.u32 4294901760, %v3277_v63 }
 0x370   : > { %3103 = vmatmul.f32.gmra.mxu3 %v9175_v45  ;;  %v3524_v45 = vand.u32 4294901760, %v3523_v50 }
 0x371   : > { %3517 = vmatmul.f32.gmra.mxu0 %v3516_v46  ;;  %v12642_v46 = vand.u32 4294901760, %v9922_v47  ;;  %v9943_v14 = vsub.f32 %v3277_v63, %v9931_v4  ;;  %v472_v63 = vld [vmem:[%s9363_s29 + $0xf0] sm:$0xff] }
 0x372   : > { %2946 = vmatmul.f32.gmra.mxu2 %v9185_v59 }
 0x373   : > { %v3040_v32 = vpop.f32.mrf.mxu3  ;;  %13083 = vst [vmem:[#allocation71_spill] sm:$0xff] %v9943_v14 }
 0x374   : > { %v9926_v33 = vadd.f32 %v3040_v32, %v2880_v29  ;;  %v9928_v49 = vpop.f32.mrf.mxu1  ;;  %v3531_v29 = vsub.f32 %v9922_v47, %v12642_v46 }
 0x375   : > { %v2883_v34 = vpop.f32.mrf.mxu2 }
 0x376   : > { %13081 = vst [vmem:[#allocation69_spill] sm:$0xff] %v9926_v33  ;;  %v2884_v6 = vadd.f32 %v2883_v34, %v9271_v39  ;;  %v9934_v42 = vpop.f32.mrf.mxu0  ;;  %v3280_v39 = vsel %vm486_vm0, %v471_v58, 0 }
 0x377   : > { %13082 = vst [vmem:[#allocation70_spill] sm:$0xff] %v9934_v42  ;;  %3726 = vmatmul.f32.gmra.mxu1 %v9868_v2  ;;  %v9952_v42 = vand.u32 4294901760, %v3280_v39 }
 0x378   : > { %3107 = vmatmul.f32.gmra.mxu3 %v9185_v59  ;;  %v3532_v59 = vand.u32 4294901760, %v3531_v29  ;;  %v13088_v29 = vld [vmem:[#allocation18_spill] sm:$0xff] }
 0x379   : > { %3525 = vmatmul.f32.gmra.mxu0 %v3524_v45  ;;  %v12645_v45 = vand.u32 4294901760, %v9943_v14  ;;  %v9964_v58 = vsub.f32 %v3280_v39, %v9952_v42  ;;  %v473_v39 = vld [vmem:[%s9363_s29 + $0xf8] sm:$0xff]  ;;  %s7430_s29 = scalar_lea.hbm %s12403_s11, 512 }
 0x37a   : > { %2950 = vmatmul.f32.gmra.mxu2 %v9200_v9  ;;  %p7432_p1 = scmp.lt.s32.totalorder %s7430_s29, %s7426_s15 }
 0x37b   : > { %v3044_v34 = vpop.f32.mrf.mxu3  ;;  %13087 = vst [vmem:[#allocation75_spill] sm:$0xff] %v9964_v58 }
 0x37c   : > { %v9947_v50 = vadd.f32 %v3044_v34, %v2884_v6  ;;  %v9949_v32 = vpop.f32.mrf.mxu1  ;;  %v3539_v6 = vsub.f32 %v9943_v14, %v12645_v45  ;;  %p7433_p2 = por %p7432_p1, %p7431_p0 }
 0x37d   : > { %13085 = vst [vmem:[#allocation73_spill] sm:$0xff] %v9949_v32  ;;  %v2887_v33 = vpop.f32.mrf.mxu2 }
 0x37e   : > { %13084 = vst [vmem:[#allocation72_spill] sm:$0xff] %v9947_v50  ;;  %v2888_v46 = vadd.f32 %v2887_v33, %v9339_v48  ;;  %v9955_v47 = vpop.f32.mrf.mxu0  ;;  %v3283_v48 = vsel %vm486_vm0, %v472_v63, 0  ;;  %p7434_p3 = pnand %p7433_p2, %p7429_p13 }
 0x37f   : > { %13086 = vst [vmem:[#allocation74_spill] sm:$0xff] %v9955_v47  ;;  %3730 = vmatmul.f32.gmra.mxu1 %v9889_v20  ;;  %v9973_v32 = vand.u32 4294901760, %v3283_v48 }
 0x380   : > { %3111 = vmatmul.f32.gmra.mxu3 %v9200_v9  ;;  %v3540_v9 = vand.u32 4294901760, %v3539_v6  ;;  %v3286_v6 = vsel %vm486_vm0, %v473_v39, 0 }
 0x381   : > { %3533 = vmatmul.f32.gmra.mxu0 %v3532_v59  ;;  %v12648_v59 = vand.u32 4294901760, %v9964_v58  ;;  %v9985_v63 = vsub.f32 %v3283_v48, %v9973_v32 }
 0x382   : > { %2954 = vmatmul.f32.gmra.mxu2 %v13088_v29 }
 0x383   : > { %v3048_v33 = vpop.f32.mrf.mxu3  ;;  %13091 = vst [vmem:[#allocation77_spill] sm:$0xff] %v9985_v63 }
 0x384   : > { %v9968_v34 = vadd.f32 %v3048_v33, %v2888_v46  ;;  %v9970_v50 = vpop.f32.mrf.mxu1  ;;  %v3547_v46 = vsub.f32 %v9964_v58, %v12648_v59 }
 0x385   : > { %v2891_v47 = vpop.f32.mrf.mxu2 }
 0x386   : > { %13089 = vst [vmem:[#allocation18_spill] sm:$0xff] %v9968_v34  ;;  %v2892_v45 = vadd.f32 %v2891_v47, %v9387_v38  ;;  %v9976_v14 = vpop.f32.mrf.mxu0 }
 0x387   : > { %13090 = vst [vmem:[#allocation76_spill] sm:$0xff] %v9976_v14  ;;  %3734 = vmatmul.f32.gmra.mxu1 %v9910_v35  ;;  %v3548_v14 = vand.u32 4294901760, %v3547_v46 }
 0x388   : > { %3115 = vmatmul.f32.gmra.mxu3 %v13088_v29  ;;  %v12651_v29 = vand.u32 4294901760, %v9985_v63 }
 0x389   : > { %3541 = vmatmul.f32.gmra.mxu0 %v3540_v9  ;;  %v9994_v9 = vand.u32 4294901760, %v3286_v6 }
 0x38a   : > { %2958 = vmatmul.f32.gmra.mxu2 %v9232_v13 }
 0x38b   : > { %v3052_v38 = vpop.f32.mrf.mxu3  ;;  %13093 = vst [vmem:[#allocation79_spill] sm:$0xff] %v9994_v9  ;;  %v10005_v48 = vsub.f32 %v3286_v6, %v9994_v9 }
 0x38c   : > { %v9989_v47 = vadd.f32 %v3052_v38, %v2892_v45  ;;  %v9991_v33 = vpop.f32.mrf.mxu1  ;;  %v3555_v45 = vsub.f32 %v9985_v63, %v12651_v29 }
 0x38d   : > { %v2895_v34 = vpop.f32.mrf.mxu2  ;;  %13094 = vst [vmem:[#allocation80_spill] sm:$0xff] %v10005_v48  ;;  %v12654_v29 = vand.u32 4294901760, %v10005_v48 }
 0x38e   : > { %13092 = vst [vmem:[#allocation78_spill] sm:$0xff] %v9989_v47  ;;  %v2896_v59 = vadd.f32 %v2895_v34, %v9410_v11  ;;  %v9997_v58 = vpop.f32.mrf.mxu0  ;;  %v3182_v11 = vld [vmem:[%s12398_s6 + $0x78] sm:$0xff]  ;;  %v3556_v38 = vand.u32 4294901760, %v3555_v45 }
 0x38f   : > { %3738 = vmatmul.f32.gmra.mxu1 %v9931_v4  ;;  %v10011_v39 = vand.u32 4294901760, %v3182_v11  ;;  %v3563_v45 = vsub.f32 %v10005_v48, %v12654_v29 }
 0x390   : > { %3119 = vmatmul.f32.gmra.mxu3 %v9232_v13 }
 0x391   : > { %3549 = vmatmul.f32.gmra.mxu0 %v3548_v14  ;;  %4487 = vmatpush.msrb.mxu2 %v10011_v39  ;;  %v10020_v6 = vsub.f32 %v3182_v11, %v10011_v39 }
 0x392   : > { %2962 = vmatmul.f32.gmra.mxu2 %v9256_v26  ;;  %5210 = vmatpush.msrb.mxu1 %v10011_v39 }
 0x393   : > { %v3056_v34 = vpop.f32.mrf.mxu3  ;;  %5002 = vmatpush.msrb.mxu0 %v10020_v6 }
 0x394   : > { %v10013_v46 = vadd.f32 %v3056_v34, %v2896_v59  ;;  %v10015_v13 = vpop.f32.mrf.mxu1  ;;  %v12655_v59 = vand.u32 4294901760, %v10020_v6 }
 0x395   : > { %13096 = vst [vmem:[#allocation82_spill] sm:$0xff] %v10015_v13  ;;  %v2899_v14 = vpop.f32.mrf.mxu2  ;;  %v3564_v13 = vand.u32 4294901760, %v3563_v45 }
 0x396   : > { %13095 = vst [vmem:[#allocation81_spill] sm:$0xff] %v10013_v46  ;;  %v2900_v47 = vadd.f32 %v2899_v14, %v9429_v40  ;;  %v10024_v63 = vpop.f32.mrf.mxu0  ;;  %v4778_v11 = vsub.f32 %v10020_v6, %v12655_v59 }
 0x397   : > { %13097 = vst [vmem:[#allocation83_spill] sm:$0xff] %v10024_v63  ;;  %3742 = vmatmul.f32.gmra.mxu1 %v9952_v42 }
 0x398   : > { %3123 = vmatmul.f32.gmra.mxu3 %v9256_v26  ;;  %v4779_v34 = vand.u32 4294901760, %v4778_v11 }
 0x399   : > { %3557 = vmatmul.f32.gmra.mxu0 %v3556_v38 }
 0x39a   : > { %2966 = vmatmul.f32.gmra.mxu2 %v9331_v24  ;;  %4780 = vmatpush.msrb.mxu3 %v4779_v34 }
 0x39b   : > { %v3060_v40 = vpop.f32.mrf.mxu3 }
 0x39c   : > { %v10037_v14 = vadd.f32 %v3060_v40, %v2900_v47  ;;  %v10039_v46 = vpop.f32.mrf.mxu1  ;;  %v3181_v47 = vld [vmem:[%s12398_s6 + $0x70] sm:$0xff] }
 0x39d   : > { %13099 = vst [vmem:[#allocation85_spill] sm:$0xff] %v10039_v46  ;;  %v2903_v63 = vpop.f32.mrf.mxu2  ;;  %v10050_v40 = vand.u32 4294901760, %v3181_v47 }
 0x39e   : > { %13098 = vst [vmem:[#allocation84_spill] sm:$0xff] %v10037_v14  ;;  %v2904_v26 = vadd.f32 %v2903_v63, %v9447_v57  ;;  %v10042_v38 = vpop.f32.mrf.mxu0 }
 0x39f   : > { %13100 = vst [vmem:[#allocation86_spill] sm:$0xff] %v10042_v38  ;;  %3746 = vmatmul.f32.gmra.mxu1 %v9973_v32  ;;  %4489 = vmatpush.msrb.mxu2 %v10050_v40  ;;  %v10058_v63 = vsub.f32 %v3181_v47, %v10050_v40  ;;  %v13159_v38 = vld [vmem:[#allocation34_spill] sm:$0xff] }
 0x3a0   : > { %3127 = vmatmul.f32.gmra.mxu3 %v9331_v24  ;;  %5212 = vmatpush.msrb.mxu1 %v10050_v40 }
 0x3a1   : > { %3565 = vmatmul.f32.gmra.mxu0 %v3564_v13  ;;  %v12656_v29 = vand.u32 4294901760, %v10058_v63 }
 0x3a2   : > { %2970 = vmatmul.f32.gmra.mxu2 %v9382_v30  ;;  %5005 = vmatpush.msrb.mxu0 %v10058_v63 }
 0x3a3   : > { %v3064_v11 = vpop.f32.mrf.mxu3 }
 0x3a4   : > { %v10052_v45 = vadd.f32 %v3064_v11, %v2904_v26  ;;  %v10054_v34 = vpop.f32.mrf.mxu1  ;;  %v4784_v26 = vsub.f32 %v10058_v63, %v12656_v29 }
 0x3a5   : > { %13102 = vst [vmem:[#allocation88_spill] sm:$0xff] %v10054_v34  ;;  %v2907_v57 = vpop.f32.mrf.mxu2 }
 0x3a6   : > { %13101 = vst [vmem:[#allocation87_spill] sm:$0xff] %v10052_v45  ;;  %v2908_v24 = vadd.f32 %v2907_v57, %v9464_v51  ;;  %v10062_v13 = vpop.f32.mrf.mxu0  ;;  %v4785_v51 = vand.u32 4294901760, %v4784_v26 }
 0x3a7   : > { %13103 = vst [vmem:[#allocation89_spill] sm:$0xff] %v10062_v13  ;;  %3750 = vmatmul.f32.gmra.mxu1 %v9994_v9  ;;  %v13145_v13 = vld [vmem:[#allocation27_spill] sm:$0xff]  ;;  %v13173_v9 = vld [vmem:[#allocation38_spill] sm:$0xff] }
 0x3a8   : > { %3131 = vmatmul.f32.gmra.mxu3 %v9382_v30  ;;  %v13107_v30 = vand.u32 4294901760, %v9414_v19 }
 0x3a9   : > { %4205 = vmatmul.f32.vlgmr.msra.gmra.mxu0 %v9397_v62  ;;  %4786 = vmatpush.msrb.mxu3 %v4785_v51 }
 0x3aa   : > { %3788 = vmatmul.f32.vlgmr.msra.gmra.mxu2 %v9414_v19 }
 0x3ab   : > { %v3068_v47 = vpop.f32.mrf.mxu3 }
 0x3ac   : > { %v10073_v11 = vadd.f32 %v3068_v47, %v2908_v24  ;;  %v10075_v57 = vpop.f32.mrf.mxu1  ;;  %v3180_v24 = vld [vmem:[%s12398_s6 + $0x68] sm:$0xff] }
 0x3ad   : > { %13105 = vst [vmem:[#allocation91_spill] sm:$0xff] %v10075_v57  ;;  %v2911_v59 = vpop.f32.mrf.mxu2  ;;  %v10088_v47 = vand.u32 4294901760, %v3180_v24 }
 0x3ae   : > { %13104 = vst [vmem:[#allocation90_spill] sm:$0xff] %v10073_v11  ;;  %v2912_v45 = vadd.f32 %v2911_v59, %v9481_v12  ;;  %v10078_v14 = vpop.f32.mrf.mxu0 }
 0x3af   : > { %13106 = vst [vmem:[#allocation92_spill] sm:$0xff] %v10078_v14  ;;  %4358 = vmatmul.f32.vlgmr.msra.gmra.mxu1 %v9397_v62  ;;  %4491 = vmatpush.msrb.mxu2 %v10088_v47  ;;  %v10096_v62 = vsub.f32 %v3180_v24, %v10088_v47  ;;  %v13131_v14 = vld [vmem:[#allocation47_spill] sm:$0xff] }
 0x3b0   : > { %3974 = vmatmul.f32.vlgmr.msra.gmra.mxu3 %v13107_v30  ;;  %5214 = vmatpush.msrb.mxu1 %v10088_v47 }
 0x3b1   : > { %4209 = vmatmul.f32.gmra.mxu0 %v9424_v44  ;;  %v12657_v29 = vand.u32 4294901760, %v10096_v62 }
 0x3b2   : > { %3793 = vmatmul.f32.gmra.mxu2 %v9436_v55  ;;  %5008 = vmatpush.msrb.mxu0 %v10096_v62 }
 0x3b3   : > { %v3072_v26 = vpop.f32.mrf.mxu3  ;;  %v4790_v24 = vsub.f32 %v10096_v62, %v12657_v29  ;;  %v13116_v29 = vld [vmem:[#allocation36_spill] sm:$0xff] }
 0x3b4   : > { %v10090_v51 = vadd.f32 %v3072_v26, %v2912_v45  ;;  %v10092_v12 = vpop.f32.mrf.mxu1  ;;  %v13111_v45 = vand.u32 4294901760, %v9436_v55 }
 0x3b5   : > { %13109 = vst [vmem:[#allocation94_spill] sm:$0xff] %v10092_v12  ;;  %v2915_v59 = vpop.f32.mrf.mxu2  ;;  %v4791_v26 = vand.u32 4294901760, %v4790_v24 }
 0x3b6   : > { %13108 = vst [vmem:[#allocation93_spill] sm:$0xff] %v10090_v51  ;;  %v2916_v19 = vadd.f32 %v2915_v59, %v9498_v60  ;;  %v10100_v30 = vpop.f32.mrf.mxu0 }
 0x3b7   : > { %13110 = vst [vmem:[#allocation95_spill] sm:$0xff] %v10100_v30  ;;  %4362 = vmatmul.f32.gmra.mxu1 %v9424_v44  ;;  %4792 = vmatpush.msrb.mxu3 %v4791_v26  ;;  %v13117_v30 = vld [vmem:[#allocation40_spill] sm:$0xff] }
 0x3b8   : > { %3980 = vmatmul.f32.gmra.mxu3 %v13111_v45  ;;  %v13115_v45 = vand.u32 4294901760, %v9453_v25 }
 0x3b9   : > { %4213 = vmatmul.f32.gmra.mxu0 %v9443_v15 }
 0x3ba   : > { %3798 = vmatmul.f32.gmra.mxu2 %v9453_v25  ;;  %v13120_v25 = vld [vmem:[#allocation26_spill] sm:$0xff] }
 0x3bb   : > { %v3076_v60 = vpop.f32.mrf.mxu3 }
 0x3bc   : > { %v10112_v59 = vadd.f32 %v3076_v60, %v2916_v19  ;;  %v10114_v44 = vpop.f32.mrf.mxu1  ;;  %v3179_v19 = vld [vmem:[%s12398_s6 + $0x60] sm:$0xff] }
 0x3bd   : > { %13113 = vst [vmem:[#allocation97_spill] sm:$0xff] %v10114_v44  ;;  %v2919_v51 = vpop.f32.mrf.mxu2  ;;  %v10127_v60 = vand.u32 4294901760, %v3179_v19  ;;  %v13127_v44 = vld [vmem:[#allocation55_spill] sm:$0xff] }
 0x3be   : > { %13112 = vst [vmem:[#allocation96_spill] sm:$0xff] %v10112_v59  ;;  %v2920_v11 = vadd.f32 %v2919_v51, %v9515_v36  ;;  %v10117_v55 = vpop.f32.mrf.mxu0 }
 0x3bf   : > { %13114 = vst [vmem:[#allocation98_spill] sm:$0xff] %v10117_v55  ;;  %4366 = vmatmul.f32.gmra.mxu1 %v9443_v15  ;;  %4493 = vmatpush.msrb.mxu2 %v10127_v60  ;;  %v10135_v15 = vsub.f32 %v3179_v19, %v10127_v60 }
 0x3c0   : > { %3986 = vmatmul.f32.gmra.mxu3 %v13115_v45  ;;  %5216 = vmatpush.msrb.mxu1 %v10127_v60 }
 0x3c1   : > { %4217 = vmatmul.f32.gmra.mxu0 %v13116_v29  ;;  %v12658_v55 = vand.u32 4294901760, %v10135_v15 }
 0x3c2   : > { %3803 = vmatmul.f32.gmra.mxu2 %v13117_v30  ;;  %5011 = vmatpush.msrb.mxu0 %v10135_v15 }
 0x3c3   : > { %v3080_v24 = vpop.f32.mrf.mxu3  ;;  %v4796_v19 = vsub.f32 %v10135_v15, %v12658_v55  ;;  %v13130_v55 = vld [vmem:[#allocation19_spill] sm:$0xff] }
 0x3c4   : > { %v10129_v26 = vadd.f32 %v3080_v24, %v2920_v11  ;;  %v10131_v36 = vpop.f32.mrf.mxu1  ;;  %v13122_v11 = vand.u32 4294901760, %v13117_v30  ;;  %v13123_v24 = vld [vmem:[#allocation48_spill] sm:$0xff] }
 0x3c5   : > { %13119 = vst [vmem:[#allocation40_spill] sm:$0xff] %v10131_v36  ;;  %v2923_v51 = vpop.f32.mrf.mxu2 }
 0x3c6   : > { %13118 = vst [vmem:[#allocation36_spill] sm:$0xff] %v10129_v26  ;;  %v2924_v45 = vadd.f32 %v2923_v51, %v13120_v25  ;;  %v10139_v59 = vpop.f32.mrf.mxu0  ;;  %v13124_v26 = vld [vmem:[#allocation44_spill] sm:$0xff]  ;;  %v4797_v25 = vand.u32 4294901760, %v4796_v19 }
 0x3c7   : > { %13121 = vst [vmem:[#allocation26_spill] sm:$0xff] %v10139_v59  ;;  %4370 = vmatmul.f32.gmra.mxu1 %v13116_v29 }
 0x3c8   : > { %3992 = vmatmul.f32.gmra.mxu3 %v13122_v11  ;;  %v13129_v11 = vand.u32 4294901760, %v13124_v26 }
 0x3c9   : > { %4221 = vmatmul.f32.gmra.mxu0 %v13123_v24  ;;  %4798 = vmatpush.msrb.mxu3 %v4797_v25 }
 0x3ca   : > { %3808 = vmatmul.f32.gmra.mxu2 %v13124_v26 }
 0x3cb   : > { %v3084_v51 = vpop.f32.mrf.mxu3 }
 0x3cc   : > { %v10151_v59 = vadd.f32 %v3084_v51, %v2924_v45  ;;  %v10153_v29 = vpop.f32.mrf.mxu1  ;;  %v3178_v45 = vld [vmem:[%s12398_s6 + $0x58] sm:$0xff] }
 0x3cd   : > { %13126 = vst [vmem:[#allocation44_spill] sm:$0xff] %v10153_v29  ;;  %v2927_v36 = vpop.f32.mrf.mxu2  ;;  %v10166_v51 = vand.u32 4294901760, %v3178_v45  ;;  %v13141_v29 = vld [vmem:[#allocation7_spill] sm:$0xff] }
 0x3ce   : > { %13125 = vst [vmem:[#allocation48_spill] sm:$0xff] %v10151_v59  ;;  %v2928_v12 = vadd.f32 %v2927_v36, %v13127_v44  ;;  %v10156_v30 = vpop.f32.mrf.mxu0 }
 0x3cf   : > { %13128 = vst [vmem:[#allocation55_spill] sm:$0xff] %v10156_v30  ;;  %4374 = vmatmul.f32.gmra.mxu1 %v13123_v24  ;;  %4495 = vmatpush.msrb.mxu2 %v10166_v51  ;;  %v10174_v26 = vsub.f32 %v3178_v45, %v10166_v51  ;;  %v13134_v24 = vld [vmem:[#allocation56_spill] sm:$0xff] }
 0x3d0   : > { %3998 = vmatmul.f32.gmra.mxu3 %v13129_v11  ;;  %5218 = vmatpush.msrb.mxu1 %v10166_v51 }
 0x3d1   : > { %4225 = vmatmul.f32.gmra.mxu0 %v13130_v55  ;;  %v12659_v30 = vand.u32 4294901760, %v10174_v26 }
 0x3d2   : > { %3813 = vmatmul.f32.gmra.mxu2 %v13131_v14  ;;  %5014 = vmatpush.msrb.mxu0 %v10174_v26 }
 0x3d3   : > { %v3088_v19 = vpop.f32.mrf.mxu3  ;;  %v4802_v45 = vsub.f32 %v10174_v26, %v12659_v30  ;;  %v13144_v30 = vld [vmem:[#allocation52_spill] sm:$0xff] }
 0x3d4   : > { %v10168_v25 = vadd.f32 %v3088_v19, %v2928_v12  ;;  %v10170_v44 = vpop.f32.mrf.mxu1  ;;  %v13136_v12 = vand.u32 4294901760, %v13131_v14  ;;  %v13137_v19 = vld [vmem:[#allocation21_spill] sm:$0xff] }
 0x3d5   : > { %13133 = vst [vmem:[#allocation47_spill] sm:$0xff] %v10170_v44  ;;  %v2931_v36 = vpop.f32.mrf.mxu2 }
 0x3d6   : > { %13132 = vst [vmem:[#allocation19_spill] sm:$0xff] %v10168_v25  ;;  %v2932_v11 = vadd.f32 %v2931_v36, %v13134_v24  ;;  %v10178_v59 = vpop.f32.mrf.mxu0  ;;  %v13138_v25 = vld [vmem:[#allocation53_spill] sm:$0xff]  ;;  %v4803_v24 = vand.u32 4294901760, %v4802_v45 }
 0x3d7   : > { %13135 = vst [vmem:[#allocation56_spill] sm:$0xff] %v10178_v59  ;;  %4378 = vmatmul.f32.gmra.mxu1 %v13130_v55 }
 0x3d8   : > { %4004 = vmatmul.f32.gmra.mxu3 %v13136_v12  ;;  %v13143_v12 = vand.u32 4294901760, %v13138_v25 }
 0x3d9   : > { %4229 = vmatmul.f32.gmra.mxu0 %v13137_v19  ;;  %4804 = vmatpush.msrb.mxu3 %v4803_v24 }
 0x3da   : > { %3818 = vmatmul.f32.gmra.mxu2 %v13138_v25 }
 0x3db   : > { %v3092_v36 = vpop.f32.mrf.mxu3 }
 0x3dc   : > { %v10190_v59 = vadd.f32 %v3092_v36, %v2932_v11  ;;  %v10192_v55 = vpop.f32.mrf.mxu1  ;;  %v3177_v11 = vld [vmem:[%s12398_s6 + $0x50] sm:$0xff] }
 0x3dd   : > { %13140 = vst [vmem:[#allocation53_spill] sm:$0xff] %v10192_v55  ;;  %v2935_v44 = vpop.f32.mrf.mxu2  ;;  %v10205_v36 = vand.u32 4294901760, %v3177_v11  ;;  %v13155_v55 = vld [vmem:[#allocation11_spill] sm:$0xff] }
 0x3de   : > { %13139 = vst [vmem:[#allocation21_spill] sm:$0xff] %v10190_v59  ;;  %v2936_v57 = vadd.f32 %v2935_v44, %v13141_v29  ;;  %v10195_v14 = vpop.f32.mrf.mxu0 }
 0x3df   : > { %13142 = vst [vmem:[#allocation7_spill] sm:$0xff] %v10195_v14  ;;  %4382 = vmatmul.f32.gmra.mxu1 %v13137_v19  ;;  %4497 = vmatpush.msrb.mxu2 %v10205_v36  ;;  %v10213_v25 = vsub.f32 %v3177_v11, %v10205_v36  ;;  %v13148_v19 = vld [vmem:[#allocation9_spill] sm:$0xff] }
 0x3e0   : > { %4010 = vmatmul.f32.gmra.mxu3 %v13143_v12  ;;  %5220 = vmatpush.msrb.mxu1 %v10205_v36 }
 0x3e1   : > { %4233 = vmatmul.f32.gmra.mxu0 %v13144_v30  ;;  %v12660_v14 = vand.u32 4294901760, %v10213_v25 }
 0x3e2   : > { %3823 = vmatmul.f32.gmra.mxu2 %v13145_v13  ;;  %5017 = vmatpush.msrb.mxu0 %v10213_v25 }
 0x3e3   : > { %v3096_v45 = vpop.f32.mrf.mxu3  ;;  %v4808_v11 = vsub.f32 %v10213_v25, %v12660_v14  ;;  %v13158_v14 = vld [vmem:[#allocation5_spill] sm:$0xff] }
 0x3e4   : > { %v10207_v24 = vadd.f32 %v3096_v45, %v2936_v57  ;;  %v10209_v29 = vpop.f32.mrf.mxu1  ;;  %v13150_v57 = vand.u32 4294901760, %v13145_v13  ;;  %v13151_v45 = vld [vmem:[#allocation30_spill] sm:$0xff] }
 0x3e5   : > { %13147 = vst [vmem:[#allocation27_spill] sm:$0xff] %v10209_v29  ;;  %v2939_v44 = vpop.f32.mrf.mxu2 }
 0x3e6   : > { %13146 = vst [vmem:[#allocation52_spill] sm:$0xff] %v10207_v24  ;;  %v2940_v12 = vadd.f32 %v2939_v44, %v13148_v19  ;;  %v10217_v59 = vpop.f32.mrf.mxu0  ;;  %v13152_v24 = vld [vmem:[#allocation31_spill] sm:$0xff]  ;;  %v4809_v19 = vand.u32 4294901760, %v4808_v11 }
 0x3e7   : > { %13149 = vst [vmem:[#allocation9_spill] sm:$0xff] %v10217_v59  ;;  %4386 = vmatmul.f32.gmra.mxu1 %v13144_v30 }
 0x3e8   : > { %4016 = vmatmul.f32.gmra.mxu3 %v13150_v57  ;;  %v13157_v57 = vand.u32 4294901760, %v13152_v24 }
 0x3e9   : > { %4237 = vmatmul.f32.gmra.mxu0 %v13151_v45  ;;  %4810 = vmatpush.msrb.mxu3 %v4809_v19 }
 0x3ea   : > { %3828 = vmatmul.f32.gmra.mxu2 %v13152_v24 }
 0x3eb   : > { %v3100_v44 = vpop.f32.mrf.mxu3 }
 0x3ec   : > { %v10229_v59 = vadd.f32 %v3100_v44, %v2940_v12  ;;  %v10231_v30 = vpop.f32.mrf.mxu1  ;;  %v3176_v12 = vld [vmem:[%s12398_s6 + $0x48] sm:$0xff] }
 0x3ed   : > { %13154 = vst [vmem:[#allocation31_spill] sm:$0xff] %v10231_v30  ;;  %v2943_v29 = vpop.f32.mrf.mxu2  ;;  %v10244_v44 = vand.u32 4294901760, %v3176_v12  ;;  %v13169_v30 = vld [vmem:[#allocation46_spill] sm:$0xff] }
 0x3ee   : > { %13153 = vst [vmem:[#allocation30_spill] sm:$0xff] %v10229_v59  ;;  %v2944_v34 = vadd.f32 %v2943_v29, %v13155_v55  ;;  %v10234_v13 = vpop.f32.mrf.mxu0 }
 0x3ef   : > { %13156 = vst [vmem:[#allocation11_spill] sm:$0xff] %v10234_v13  ;;  %4390 = vmatmul.f32.gmra.mxu1 %v13151_v45  ;;  %4499 = vmatpush.msrb.mxu2 %v10244_v44  ;;  %v10252_v24 = vsub.f32 %v3176_v12, %v10244_v44  ;;  %v13162_v45 = vld [vmem:[#allocation42_spill] sm:$0xff] }
 0x3f0   : > { %4022 = vmatmul.f32.gmra.mxu3 %v13157_v57  ;;  %5222 = vmatpush.msrb.mxu1 %v10244_v44 }
 0x3f1   : > { %4241 = vmatmul.f32.gmra.mxu0 %v13158_v14  ;;  %v12663_v13 = vand.u32 4294901760, %v10252_v24 }
 0x3f2   : > { %3833 = vmatmul.f32.gmra.mxu2 %v13159_v38  ;;  %5020 = vmatpush.msrb.mxu0 %v10252_v24 }
 0x3f3   : > { %v3104_v11 = vpop.f32.mrf.mxu3  ;;  %v4814_v12 = vsub.f32 %v10252_v24, %v12663_v13  ;;  %v13172_v13 = vld [vmem:[#allocation8_spill] sm:$0xff] }
 0x3f4   : > { %v10246_v19 = vadd.f32 %v3104_v11, %v2944_v34  ;;  %v10248_v55 = vpop.f32.mrf.mxu1  ;;  %v13164_v34 = vand.u32 4294901760, %v13159_v38  ;;  %v13165_v11 = vld [vmem:[#allocation6_spill] sm:$0xff] }
 0x3f5   : > { %13161 = vst [vmem:[#allocation34_spill] sm:$0xff] %v10248_v55  ;;  %v2947_v29 = vpop.f32.mrf.mxu2 }
 0x3f6   : > { %13160 = vst [vmem:[#allocation5_spill] sm:$0xff] %v10246_v19  ;;  %v2948_v57 = vadd.f32 %v2947_v29, %v13162_v45  ;;  %v10256_v59 = vpop.f32.mrf.mxu0  ;;  %v13166_v19 = vld [vmem:[#allocation35_spill] sm:$0xff]  ;;  %v4815_v45 = vand.u32 4294901760, %v4814_v12 }
 0x3f7   : > { %13163 = vst [vmem:[#allocation42_spill] sm:$0xff] %v10256_v59  ;;  %4394 = vmatmul.f32.gmra.mxu1 %v13158_v14 }
 0x3f8   : > { %4028 = vmatmul.f32.gmra.mxu3 %v13164_v34  ;;  %v13171_v34 = vand.u32 4294901760, %v13166_v19 }
 0x3f9   : > { %4245 = vmatmul.f32.gmra.mxu0 %v13165_v11  ;;  %4816 = vmatpush.msrb.mxu3 %v4815_v45 }
 0x3fa   : > { %3838 = vmatmul.f32.gmra.mxu2 %v13166_v19 }
 0x3fb   : > { %v3108_v29 = vpop.f32.mrf.mxu3 }
 0x3fc   : > { %v10268_v59 = vadd.f32 %v3108_v29, %v2948_v57  ;;  %v10270_v14 = vpop.f32.mrf.mxu1  ;;  %v3175_v57 = vld [vmem:[%s12398_s6 + $0x40] sm:$0xff] }
 0x3fd   : > { %13168 = vst [vmem:[#allocation35_spill] sm:$0xff] %v10270_v14  ;;  %v2951_v55 = vpop.f32.mrf.mxu2  ;;  %v10283_v29 = vand.u32 4294901760, %v3175_v57  ;;  %v13184_v14 = vld [vmem:[#allocation54_spill] sm:$0xff] }
 0x3fe   : > { %13167 = vst [vmem:[#allocation6_spill] sm:$0xff] %v10268_v59  ;;  %v2952_v48 = vadd.f32 %v2951_v55, %v13169_v30  ;;  %v10273_v38 = vpop.f32.mrf.mxu0 }
 0x3ff   : > { %13170 = vst [vmem:[#allocation46_spill] sm:$0xff] %v10273_v38  ;;  %4398 = vmatmul.f32.gmra.mxu1 %v13165_v11  ;;  %4501 = vmatpush.msrb.mxu2 %v10283_v29  ;;  %v10291_v19 = vsub.f32 %v3175_v57, %v10283_v29  ;;  %v13177_v11 = vld [vmem:[#allocation50_spill] sm:$0xff] }
 0x400   : > { %4034 = vmatmul.f32.gmra.mxu3 %v13171_v34  ;;  %13174 = vst [vmem:[#allocation8_spill] sm:$0xff] %v10283_v29  ;;  %5224 = vmatpush.msrb.mxu1 %v10283_v29  ;;  %v13188_v29 = vld [vmem:[#allocation43_spill] sm:$0xff] }
 0x401   : > { %4249 = vmatmul.f32.gmra.mxu0 %v13172_v13  ;;  %v12666_v38 = vand.u32 4294901760, %v10291_v19 }
 0x402   : > { %3843 = vmatmul.f32.gmra.mxu2 %v13173_v9  ;;  %5023 = vmatpush.msrb.mxu0 %v10291_v19 }
 0x403   : > { %v3112_v12 = vpop.f32.mrf.mxu3  ;;  %v4820_v57 = vsub.f32 %v10291_v19, %v12666_v38  ;;  %v13187_v38 = vld [vmem:[#allocation12_spill] sm:$0xff] }
 0x404   : > { %v10285_v45 = vadd.f32 %v3112_v12, %v2952_v48  ;;  %v10287_v30 = vpop.f32.mrf.mxu1  ;;  %v13179_v48 = vand.u32 4294901760, %v13173_v9  ;;  %v13180_v12 = vld [vmem:[#allocation10_spill] sm:$0xff] }
 0x405   : > { %13176 = vst [vmem:[#allocation99_spill] sm:$0xff] %v10287_v30  ;;  %v2955_v55 = vpop.f32.mrf.mxu2 }
 0x406   : > { %13175 = vst [vmem:[#allocation38_spill] sm:$0xff] %v10285_v45  ;;  %v2956_v34 = vadd.f32 %v2955_v55, %v13177_v11  ;;  %v10295_v59 = vpop.f32.mrf.mxu0  ;;  %v13181_v45 = vld [vmem:[#allocation39_spill] sm:$0xff]  ;;  %v4821_v11 = vand.u32 4294901760, %v4820_v57 }
 0x407   : > { %13178 = vst [vmem:[#allocation50_spill] sm:$0xff] %v10295_v59  ;;  %4402 = vmatmul.f32.gmra.mxu1 %v13172_v13 }
 0x408   : > { %4040 = vmatmul.f32.gmra.mxu3 %v13179_v48  ;;  %v13186_v48 = vand.u32 4294901760, %v13181_v45 }
 0x409   : > { %4253 = vmatmul.f32.gmra.mxu0 %v13180_v12  ;;  %4822 = vmatpush.msrb.mxu3 %v4821_v11 }
 0x40a   : > { %3848 = vmatmul.f32.gmra.mxu2 %v13181_v45 }
 0x40b   : > { %v3116_v55 = vpop.f32.mrf.mxu3 }
 0x40c   : > { %v10307_v59 = vadd.f32 %v3116_v55, %v2956_v34  ;;  %v10309_v13 = vpop.f32.mrf.mxu1  ;;  %v3174_v34 = vld [vmem:[%s12398_s6 + $0x38] sm:$0xff] }
 0x40d   : > { %13183 = vst [vmem:[#allocation39_spill] sm:$0xff] %v10309_v13  ;;  %v2959_v30 = vpop.f32.mrf.mxu2  ;;  %v10322_v55 = vand.u32 4294901760, %v3174_v34 }
 0x40e   : > { %13182 = vst [vmem:[#allocation10_spill] sm:$0xff] %v10307_v59  ;;  %v2960_v46 = vadd.f32 %v2959_v30, %v13184_v14  ;;  %v10312_v9 = vpop.f32.mrf.mxu0 }
 0x40f   : > { %13185 = vst [vmem:[#allocation54_spill] sm:$0xff] %v10312_v9  ;;  %4406 = vmatmul.f32.gmra.mxu1 %v13180_v12  ;;  %4503 = vmatpush.msrb.mxu2 %v10322_v55  ;;  %v10330_v45 = vsub.f32 %v3174_v34, %v10322_v55  ;;  %v13192_v12 = vld [vmem:[#allocation14_spill] sm:$0xff] }
 0x410   : > { %4046 = vmatmul.f32.gmra.mxu3 %v13186_v48  ;;  %13189 = vst [vmem:[#allocation12_spill] sm:$0xff] %v10322_v55  ;;  %5226 = vmatpush.msrb.mxu1 %v10322_v55 }
 0x411   : > { %4257 = vmatmul.f32.gmra.mxu0 %v13187_v38  ;;  %v12668_v9 = vand.u32 4294901760, %v10330_v45 }
 0x412   : > { %3853 = vmatmul.f32.gmra.mxu2 %v13188_v29  ;;  %5026 = vmatpush.msrb.mxu0 %v10330_v45 }
 0x413   : > { %v3120_v57 = vpop.f32.mrf.mxu3  ;;  %v4826_v34 = vsub.f32 %v10330_v45, %v12668_v9 }
 0x414   : > { %v10324_v11 = vadd.f32 %v3120_v57, %v2960_v46  ;;  %v10326_v14 = vpop.f32.mrf.mxu1  ;;  %v13194_v46 = vand.u32 4294901760, %v13188_v29  ;;  %v13195_v57 = vld [vmem:[#allocation45_spill] sm:$0xff] }
 0x415   : > { %13191 = vst [vmem:[#allocation100_spill] sm:$0xff] %v10326_v14  ;;  %v2963_v30 = vpop.f32.mrf.mxu2 }
 0x416   : > { %13190 = vst [vmem:[#allocation43_spill] sm:$0xff] %v10324_v11  ;;  %v2964_v48 = vadd.f32 %v2963_v30, %v13192_v12  ;;  %v10334_v59 = vpop.f32.mrf.mxu0  ;;  %v13196_v11 = vld [vmem:[#allocation49_spill] sm:$0xff]  ;;  %v4827_v12 = vand.u32 4294901760, %v4826_v34 }
 0x417   : > { %13193 = vst [vmem:[#allocation14_spill] sm:$0xff] %v10334_v59  ;;  %4410 = vmatmul.f32.gmra.mxu1 %v13187_v38  ;;  %v13201_v34 = vand.u32 4294901760, %v13196_v11 }
 0x418   : > { %4052 = vmatmul.f32.gmra.mxu3 %v13194_v46  ;;  %v3173_v46 = vld [vmem:[%s12398_s6 + $0x30] sm:$0xff] }
 0x419   : > { %4261 = vmatmul.f32.gmra.mxu0 %v13195_v57  ;;  %4828 = vmatpush.msrb.mxu3 %v4827_v12  ;;  %v10357_v9 = vand.u32 4294901760, %v3173_v46 }
 0x41a   : > { %3858 = vmatmul.f32.gmra.mxu2 %v13196_v11 }
 0x41b   : > { %v3124_v30 = vpop.f32.mrf.mxu3  ;;  %13200 = vst [vmem:[#allocation102_spill] sm:$0xff] %v10357_v9  ;;  %4505 = vmatpush.msrb.mxu2 %v10357_v9  ;;  %5228 = vmatpush.msrb.mxu1 %v10357_v9 }
 0x41c   : > { %v10346_v59 = vadd.f32 %v3124_v30, %v2964_v48  ;;  %v10348_v38 = vpop.f32.mrf.mxu1  ;;  %v10364_v48 = vsub.f32 %v3173_v46, %v10357_v9 }
 0x41d   : > { %13198 = vst [vmem:[#allocation49_spill] sm:$0xff] %v10348_v38  ;;  %v2967_v14 = vpop.f32.mrf.mxu2 }
 0x41e   : > { %13197 = vst [vmem:[#allocation45_spill] sm:$0xff] %v10346_v59  ;;  %v2968_v13 = vadd.f32 %v2967_v14, %v9726_v0  ;;  %v10351_v29 = vpop.f32.mrf.mxu0  ;;  %v13203_v0 = vld [vmem:[#allocation51_spill] sm:$0xff]  ;;  %v12670_v30 = vand.u32 4294901760, %v10364_v48  ;;  %5029 = vmatpush.msrb.mxu0 %v10364_v48 }
 0x41f   : > { %13199 = vst [vmem:[#allocation101_spill] sm:$0xff] %v10351_v29  ;;  %4414 = vmatmul.f32.gmra.mxu1 %v13195_v57  ;;  %v13206_v38 = vand.u32 4294901760, %v13203_v0 }
 0x420   : > { %4058 = vmatmul.f32.gmra.mxu3 %v13201_v34  ;;  %13202 = vst [vmem:[#allocation103_spill] sm:$0xff] %v10364_v48  ;;  %v4832_v34 = vsub.f32 %v10364_v48, %v12670_v30 }
 0x421   : > { %4265 = vmatmul.f32.gmra.mxu0 %v9668_v31 }
 0x422   : > { %3863 = vmatmul.f32.gmra.mxu2 %v13203_v0  ;;  %v4833_v29 = vand.u32 4294901760, %v4832_v34  ;;  %v13212_v0 = vld [vmem:[#allocation23_spill] sm:$0xff] }
 0x423   : > { %v3128_v14 = vpop.f32.mrf.mxu3 }
 0x424   : > { %v10370_v57 = vadd.f32 %v3128_v14, %v2968_v13  ;;  %v10372_v11 = vpop.f32.mrf.mxu1  ;;  %4834 = vmatpush.msrb.mxu3 %v4833_v29  ;;  %v13207_v13 = vld [vmem:[#allocation13_spill] sm:$0xff] }
 0x425   : > { %13205 = vst [vmem:[#allocation104_spill] sm:$0xff] %v10372_v11  ;;  %v2971_v12 = vpop.f32.mrf.mxu2  ;;  %v13211_v29 = vand.u32 4294901760, %v13207_v13 }
 0x426   : > { %13204 = vst [vmem:[#allocation51_spill] sm:$0xff] %v10370_v57  ;;  %v2972_v46 = vadd.f32 %v2971_v12, %v9748_v43  ;;  %v4206_v59 = vpop.f32.mrf.mxu0  ;;  %v13208_v57 = vld [vmem:[#allocation25_spill] sm:$0xff] }
 0x427   : > { %4418 = vmatmul.f32.gmra.mxu1 %v9668_v31  ;;  %v3628_v11 = vadd.f32 %v9737_v8, %v13208_v57  ;;  %v3172_v31 = vld [vmem:[%s12398_s6 + $0x28] sm:$0xff] }
 0x428   : > { %4064 = vmatmul.f32.gmra.mxu3 %v13206_v38  ;;  %v10391_v38 = vand.u32 4294901760, %v3172_v31 }
 0x429   : > { %4269 = vmatmul.f32.gmra.mxu0 %v9685_v18 }
 0x42a   : > { %3868 = vmatmul.f32.gmra.mxu2 %v13207_v13  ;;  %13210 = vst [vmem:[#allocation25_spill] sm:$0xff] %v10391_v38  ;;  %v10398_v8 = vsub.f32 %v3172_v31, %v10391_v38  ;;  %5230 = vmatpush.msrb.mxu1 %v10391_v38 }
 0x42b   : > { %v3132_v14 = vpop.f32.mrf.mxu3  ;;  %4507 = vmatpush.msrb.mxu2 %v10391_v38  ;;  %v13213_v38 = vand.u32 4294901760, %v13212_v0 }
 0x42c   : > { %v10385_v9 = vadd.f32 %v3132_v14, %v2972_v46  ;;  %v4359_v30 = vpop.f32.mrf.mxu1  ;;  %5032 = vmatpush.msrb.mxu0 %v10398_v8 }
 0x42d   : > { %v3789_v43 = vpop.f32.mrf.mxu2 }
 0x42e   : > { %13209 = vst [vmem:[#allocation13_spill] sm:$0xff] %v10385_v9  ;;  %v3790_v12 = vadd.f32 %v3789_v43, %v3628_v11  ;;  %v4210_v48 = vpop.f32.mrf.mxu0  ;;  %v4837_v11 = vand.u32 4294901760, %v10398_v8 }
 0x42f   : > { %4422 = vmatmul.f32.gmra.mxu1 %v9685_v18  ;;  %v3632_v18 = vadd.f32 %v9760_v52, %v9743_v7  ;;  %v3636_v52 = vadd.f32 %v9781_v21, %v9766_v1  ;;  %v13215_v21 = vld [vmem:[#allocation29_spill] sm:$0xff] }
 0x430   : > { %4070 = vmatmul.f32.gmra.mxu3 %v13211_v29  ;;  %v4838_v14 = vsub.f32 %v10398_v8, %v4837_v11  ;;  %v13270_v8 = vld [vmem:[#allocation79_spill] sm:$0xff] }
 0x431   : > { %4273 = vmatmul.f32.gmra.mxu0 %v9702_v41 }
 0x432   : > { %3873 = vmatmul.f32.gmra.mxu2 %v13212_v0  ;;  %v4839_v9 = vand.u32 4294901760, %v4838_v14 }
 0x433   : > { %v3975_v57 = vpop.f32.mrf.mxu3 }
 0x434   : > { %v3976_v34 = vadd.f32 %v3975_v57, %v3790_v12  ;;  %v4363_v46 = vpop.f32.mrf.mxu1  ;;  %4840 = vmatpush.msrb.mxu3 %v4839_v9  ;;  %v13214_v9 = vand.u32 4294901760, %v9732_v27 }
 0x435   : > { %v3794_v13 = vpop.f32.mrf.mxu2 }
 0x436   : > { %v4207_v43 = vadd.f32 %v4206_v59, %v3976_v34  ;;  %v3795_v31 = vadd.f32 %v3794_v13, %v3632_v18  ;;  %v4214_v29 = vpop.f32.mrf.mxu0 }
 0x437   : > { %4426 = vmatmul.f32.gmra.mxu1 %v9702_v41 }
 0x438   : > { %4076 = vmatmul.f32.gmra.mxu3 %v13213_v38  ;;  %v10412_v55 = vadd.f32 %v4359_v30, %v4207_v43  ;;  %v3171_v30 = vld [vmem:[%s12398_s6 + $0x20] sm:$0xff] }
 0x439   : > { %4277 = vmatmul.f32.gmra.mxu0 %v9719_v53  ;;  %v10422_v38 = vand.u32 4294901760, %v3171_v30 }
 0x43a   : > { %3878 = vmatmul.f32.gmra.mxu2 %v9732_v27  ;;  %v13216_v27 = vld [vmem:[#allocation22_spill] sm:$0xff] }
 0x43b   : > { %v3981_v7 = vpop.f32.mrf.mxu3  ;;  %4509 = vmatpush.msrb.mxu2 %v10422_v38  ;;  %v10431_v1 = vsub.f32 %v3171_v30, %v10422_v38  ;;  %5232 = vmatpush.msrb.mxu1 %v10422_v38 }
 0x43c   : > { %v3982_v59 = vadd.f32 %v3981_v7, %v3795_v31  ;;  %v4367_v12 = vpop.f32.mrf.mxu1 }
 0x43d   : > { %v3799_v57 = vpop.f32.mrf.mxu2  ;;  %5035 = vmatpush.msrb.mxu0 %v10431_v1 }
 0x43e   : > { %v4211_v18 = vadd.f32 %v4210_v48, %v3982_v59  ;;  %v3800_v41 = vadd.f32 %v3799_v57, %v3636_v52  ;;  %v4218_v34 = vpop.f32.mrf.mxu0 }
 0x43f   : > { %4430 = vmatmul.f32.gmra.mxu1 %v9719_v53  ;;  %v4843_v53 = vand.u32 4294901760, %v10431_v1 }
 0x440   : > { %4082 = vmatmul.f32.gmra.mxu3 %v13214_v9  ;;  %v10426_v0 = vadd.f32 %v4363_v46, %v4211_v18  ;;  %v3640_v46 = vadd.f32 %v9802_v61, %v13216_v27  ;;  %v13217_v18 = vand.u32 4294901760, %v13215_v21  ;;  %v13218_v61 = vld [vmem:[#allocation20_spill] sm:$0xff]  ;;  %v13219_v9 = vld [vmem:[#allocation37_spill] sm:$0xff] }
 0x441   : > { %4281 = vmatmul.f32.gmra.mxu0 %v9740_v23  ;;  %v4844_v31 = vsub.f32 %v10431_v1, %v4843_v53 }
 0x442   : > { %3883 = vmatmul.f32.gmra.mxu2 %v13215_v21 }
 0x443   : > { %v3987_v48 = vpop.f32.mrf.mxu3  ;;  %v4845_v57 = vand.u32 4294901760, %v4844_v31  ;;  %v13220_v31 = vand.u32 4294901760, %v13218_v61 }
 0x444   : > { %v3988_v13 = vadd.f32 %v3987_v48, %v3800_v41  ;;  %v4371_v14 = vpop.f32.mrf.mxu1  ;;  %v3644_v48 = vadd.f32 %v9823_v3, %v13219_v9 }
 0x445   : > { %v3804_v43 = vpop.f32.mrf.mxu2  ;;  %4846 = vmatpush.msrb.mxu3 %v4845_v57  ;;  %v13222_v57 = vld [vmem:[#allocation17_spill] sm:$0xff] }
 0x446   : > { %v4215_v7 = vadd.f32 %v4214_v29, %v3988_v13  ;;  %v3805_v52 = vadd.f32 %v3804_v43, %v3640_v46  ;;  %v4222_v59 = vpop.f32.mrf.mxu0 }
 0x447   : > { %4434 = vmatmul.f32.gmra.mxu1 %v9740_v23 }
 0x448   : > { %4088 = vmatmul.f32.gmra.mxu3 %v13217_v18  ;;  %v10445_v30 = vadd.f32 %v4367_v12, %v4215_v7  ;;  %v3170_v12 = vld [vmem:[%s12398_s6 + $0x18] sm:$0xff] }
 0x449   : > { %4285 = vmatmul.f32.gmra.mxu0 %v9763_v56  ;;  %v10455_v21 = vand.u32 4294901760, %v3170_v12 }
 0x44a   : > { %3888 = vmatmul.f32.gmra.mxu2 %v13218_v61 }
 0x44b   : > { %v3993_v41 = vpop.f32.mrf.mxu3  ;;  %4511 = vmatpush.msrb.mxu2 %v10455_v21  ;;  %v10464_v3 = vsub.f32 %v3170_v12, %v10455_v21  ;;  %5234 = vmatpush.msrb.mxu1 %v10455_v21 }
 0x44c   : > { %v3994_v29 = vadd.f32 %v3993_v41, %v3805_v52  ;;  %v4375_v27 = vpop.f32.mrf.mxu1 }
 0x44d   : > { %v3809_v46 = vpop.f32.mrf.mxu2  ;;  %5038 = vmatpush.msrb.mxu0 %v10464_v3 }
 0x44e   : > { %v4219_v13 = vadd.f32 %v4218_v34, %v3994_v29  ;;  %v3810_v23 = vadd.f32 %v3809_v46, %v3644_v48  ;;  %v4226_v43 = vpop.f32.mrf.mxu0  ;;  %v13221_v34 = vld [vmem:[#allocation33_spill] sm:$0xff] }
 0x44f   : > { %4438 = vmatmul.f32.gmra.mxu1 %v9763_v56  ;;  %v12674_v56 = vand.u32 4294901760, %v10464_v3  ;;  %v13223_v12 = vand.u32 4294901760, %v13221_v34 }
 0x450   : > { %4094 = vmatmul.f32.gmra.mxu3 %v13220_v31  ;;  %v10459_v7 = vadd.f32 %v4371_v14, %v4219_v13  ;;  %v3648_v14 = vadd.f32 %v9844_v28, %v13222_v57  ;;  %v13224_v28 = vld [vmem:[#allocation28_spill] sm:$0xff] }
 0x451   : > { %4289 = vmatmul.f32.gmra.mxu0 %v9784_v54  ;;  %v4850_v9 = vsub.f32 %v10464_v3, %v12674_v56 }
 0x452   : > { %3893 = vmatmul.f32.gmra.mxu2 %v13221_v34 }
 0x453   : > { %v3999_v52 = vpop.f32.mrf.mxu3  ;;  %v4851_v13 = vand.u32 4294901760, %v4850_v9 }
 0x454   : > { %v4000_v18 = vadd.f32 %v3999_v52, %v3810_v23  ;;  %v4379_v61 = vpop.f32.mrf.mxu1  ;;  %v13225_v52 = vld [vmem:[#allocation58_spill] sm:$0xff] }
 0x455   : > { %v3814_v41 = vpop.f32.mrf.mxu2  ;;  %4852 = vmatpush.msrb.mxu3 %v4851_v13  ;;  %v3652_v57 = vadd.f32 %v9865_v16, %v13225_v52 }
 0x456   : > { %v4223_v48 = vadd.f32 %v4222_v59, %v4000_v18  ;;  %v3815_v29 = vadd.f32 %v3814_v41, %v3648_v14  ;;  %v4230_v46 = vpop.f32.mrf.mxu0 }
 0x457   : > { %4442 = vmatmul.f32.gmra.mxu1 %v9784_v54 }
 0x458   : > { %4100 = vmatmul.f32.gmra.mxu3 %v13223_v12  ;;  %v10478_v31 = vadd.f32 %v4375_v27, %v4223_v48  ;;  %v3169_v27 = vld [vmem:[%s12398_s6 + $0x10] sm:$0xff]  ;;  %v13226_v48 = vand.u32 4294901760, %v13224_v28  ;;  %v13228_v12 = vld [vmem:[#allocation61_spill] sm:$0xff] }
 0x459   : > { %4293 = vmatmul.f32.gmra.mxu0 %v9805_v10  ;;  %v10488_v34 = vand.u32 4294901760, %v3169_v27 }
 0x45a   : > { %3898 = vmatmul.f32.gmra.mxu2 %v13224_v28 }
 0x45b   : > { %v4005_v23 = vpop.f32.mrf.mxu3  ;;  %4513 = vmatpush.msrb.mxu2 %v10488_v34  ;;  %v10497_v16 = vsub.f32 %v3169_v27, %v10488_v34  ;;  %5236 = vmatpush.msrb.mxu1 %v10488_v34 }
 0x45c   : > { %v4006_v59 = vadd.f32 %v4005_v23, %v3815_v29  ;;  %v4383_v14 = vpop.f32.mrf.mxu1 }
 0x45d   : > { %v3819_v18 = vpop.f32.mrf.mxu2  ;;  %5041 = vmatpush.msrb.mxu0 %v10497_v16 }
 0x45e   : > { %v4227_v41 = vadd.f32 %v4226_v43, %v4006_v59  ;;  %v3820_v54 = vadd.f32 %v3819_v18, %v3652_v57  ;;  %v4234_v9 = vpop.f32.mrf.mxu0  ;;  %v13227_v43 = vld [vmem:[#allocation32_spill] sm:$0xff] }
 0x45f   : > { %4446 = vmatmul.f32.gmra.mxu1 %v9805_v10  ;;  %v12675_v10 = vand.u32 4294901760, %v10497_v16 }
 0x460   : > { %4106 = vmatmul.f32.gmra.mxu3 %v13226_v48  ;;  %v10492_v13 = vadd.f32 %v4379_v61, %v4227_v41  ;;  %v3656_v61 = vadd.f32 %v9886_v5, %v13228_v12  ;;  %v13229_v48 = vand.u32 4294901760, %v13227_v43  ;;  %v13230_v5 = vld [vmem:[#allocation59_spill] sm:$0xff] }
 0x461   : > { %4297 = vmatmul.f32.gmra.mxu0 %v9826_v22  ;;  %v4856_v57 = vsub.f32 %v10497_v16, %v12675_v10 }
 0x462   : > { %3903 = vmatmul.f32.gmra.mxu2 %v13227_v43 }
 0x463   : > { %v4011_v29 = vpop.f32.mrf.mxu3  ;;  %v4857_v27 = vand.u32 4294901760, %v4856_v57 }
 0x464   : > { %v4012_v28 = vadd.f32 %v4011_v29, %v3820_v54  ;;  %v4387_v23 = vpop.f32.mrf.mxu1  ;;  %v13231_v29 = vld [vmem:[#allocation64_spill] sm:$0xff] }
 0x465   : > { %v3824_v52 = vpop.f32.mrf.mxu2  ;;  %4858 = vmatpush.msrb.mxu3 %v4857_v27  ;;  %v3660_v12 = vadd.f32 %v9907_v17, %v13231_v29 }
 0x466   : > { %v4231_v59 = vadd.f32 %v4230_v46, %v4012_v28  ;;  %v3825_v18 = vadd.f32 %v3824_v52, %v3656_v61  ;;  %v4238_v41 = vpop.f32.mrf.mxu0 }
 0x467   : > { %4450 = vmatmul.f32.gmra.mxu1 %v9826_v22 }
 0x468   : > { %4112 = vmatmul.f32.gmra.mxu3 %v13229_v48  ;;  %v10511_v56 = vadd.f32 %v4383_v14, %v4231_v59  ;;  %v3168_v14 = vld [vmem:[%s12398_s6 + $0x8] sm:$0xff]  ;;  %v13232_v59 = vand.u32 4294901760, %v13230_v5  ;;  %v13234_v48 = vld [vmem:[#allocation67_spill] sm:$0xff] }
 0x469   : > { %4301 = vmatmul.f32.gmra.mxu0 %v9847_v37  ;;  %v10521_v43 = vand.u32 4294901760, %v3168_v14 }
 0x46a   : > { %3908 = vmatmul.f32.gmra.mxu2 %v13230_v5 }
 0x46b   : > { %v4017_v54 = vpop.f32.mrf.mxu3  ;;  %4515 = vmatpush.msrb.mxu2 %v10521_v43  ;;  %v10530_v17 = vsub.f32 %v3168_v14, %v10521_v43  ;;  %5238 = vmatpush.msrb.mxu1 %v10521_v43 }
 0x46c   : > { %v4018_v46 = vadd.f32 %v4017_v54, %v3825_v18  ;;  %v4391_v61 = vpop.f32.mrf.mxu1 }
 0x46d   : > { %v3829_v28 = vpop.f32.mrf.mxu2  ;;  %5044 = vmatpush.msrb.mxu0 %v10530_v17 }
 0x46e   : > { %v4235_v52 = vadd.f32 %v4234_v9, %v4018_v46  ;;  %v3830_v22 = vadd.f32 %v3829_v28, %v3660_v12  ;;  %v4242_v57 = vpop.f32.mrf.mxu0  ;;  %v13233_v9 = vld [vmem:[#allocation62_spill] sm:$0xff] }
 0x46f   : > { %4454 = vmatmul.f32.gmra.mxu1 %v9847_v37  ;;  %v12676_v37 = vand.u32 4294901760, %v10530_v17 }
 0x470   : > { %4118 = vmatmul.f32.gmra.mxu3 %v13232_v59  ;;  %v10525_v27 = vadd.f32 %v4387_v23, %v4235_v52  ;;  %v3664_v23 = vadd.f32 %v9928_v49, %v13234_v48  ;;  %v13235_v59 = vand.u32 4294901760, %v13233_v9  ;;  %v13236_v49 = vld [vmem:[#allocation65_spill] sm:$0xff] }
 0x471   : > { %4305 = vmatmul.f32.gmra.mxu0 %v9868_v2  ;;  %v4862_v12 = vsub.f32 %v10530_v17, %v12676_v37  ;;  %v13238_v48 = vld [vmem:[#allocation73_spill] sm:$0xff] }
 0x472   : > { %3913 = vmatmul.f32.gmra.mxu2 %v13233_v9 }
 0x473   : > { %v4023_v18 = vpop.f32.mrf.mxu3  ;;  %v4863_v14 = vand.u32 4294901760, %v4862_v12 }
 0x474   : > { %v4024_v5 = vadd.f32 %v4023_v18, %v3830_v22  ;;  %v4395_v54 = vpop.f32.mrf.mxu1  ;;  %v13237_v18 = vld [vmem:[#allocation70_spill] sm:$0xff] }
 0x475   : > { %v3834_v29 = vpop.f32.mrf.mxu2  ;;  %4864 = vmatpush.msrb.mxu3 %v4863_v14  ;;  %v3668_v37 = vadd.f32 %v13238_v48, %v13237_v18 }
 0x476   : > { %v4239_v46 = vadd.f32 %v4238_v41, %v4024_v5  ;;  %v3835_v28 = vadd.f32 %v3834_v29, %v3664_v23  ;;  %v4246_v52 = vpop.f32.mrf.mxu0 }
 0x477   : > { %4458 = vmatmul.f32.gmra.mxu1 %v9868_v2 }
 0x478   : > { %4124 = vmatmul.f32.gmra.mxu3 %v13235_v59  ;;  %v10544_v10 = vadd.f32 %v4391_v61, %v4239_v46  ;;  %v3167_v61 = vld [vmem:[%s12398_s6] sm:$0xff]  ;;  %v13239_v46 = vand.u32 4294901760, %v13236_v49  ;;  %v13241_v59 = vand.u32 4294901760, %v10020_v6 }
 0x479   : > { %4309 = vmatmul.f32.gmra.mxu0 %v9889_v20  ;;  %v10554_v9 = vand.u32 4294901760, %v3167_v61 }
 0x47a   : > { %3918 = vmatmul.f32.gmra.mxu2 %v13236_v49 }
 0x47b   : > { %v4029_v22 = vpop.f32.mrf.mxu3  ;;  %4517 = vmatpush.msrb.mxu2 %v10554_v9  ;;  %5240 = vmatpush.msrb.mxu1 %v10554_v9 }
 0x47c   : > { %v4030_v41 = vadd.f32 %v4029_v22, %v3835_v28  ;;  %v4399_v23 = vpop.f32.mrf.mxu1 }
 0x47d   : > { %v3839_v5 = vpop.f32.mrf.mxu2  ;;  %5437 = vmatpush.msra.mxu2 %v13241_v59  ;;  %v13244_v59 = vand.u32 4294901760, %v10096_v62 }
 0x47e   : > { %v4243_v29 = vadd.f32 %v4242_v57, %v4030_v41  ;;  %v3840_v2 = vadd.f32 %v3839_v5, %v3668_v37  ;;  %v4250_v12 = vpop.f32.mrf.mxu0  ;;  %v10563_v57 = vsub.f32 %v3167_v61, %v10554_v9  ;;  %v13240_v37 = vld [vmem:[#allocation68_spill] sm:$0xff]  ;;  %v13243_v5 = vand.u32 4294901760, %v10058_v63 }
 0x47f   : > { %4462 = vmatmul.f32.gmra.mxu1 %v9889_v20 }
 0x480   : > { %4130 = vmatmul.f32.gmra.mxu3 %v13239_v46  ;;  %v10558_v14 = vadd.f32 %v4395_v54, %v4243_v29  ;;  %v4867_v20 = vand.u32 4294901760, %v10563_v57  ;;  %5047 = vmatpush.msrb.mxu0 %v10563_v57  ;;  %v13242_v54 = vld [vmem:[#allocation74_spill] sm:$0xff] }
 0x481   : > { %4313 = vmatmul.f32.gmra.mxu0 %v9910_v35  ;;  %v3672_v49 = vadd.f32 %v9970_v50, %v13242_v54  ;;  %5441 = vmatpush.msra.mxu2 %v13243_v5  ;;  %v13245_v50 = vand.u32 4294901760, %v13240_v37 }
 0x482   : > { %3923 = vmatmul.f32.gmra.mxu2 %v13240_v37  ;;  %v4868_v41 = vsub.f32 %v10563_v57, %v4867_v20  ;;  %v13249_v37 = vand.u32 4294901760, %v10174_v26 }
 0x483   : > { %v4035_v28 = vpop.f32.mrf.mxu3  ;;  %5445 = vmatpush.msra.mxu2 %v13244_v59 }
 0x484   : > { %v4036_v22 = vadd.f32 %v4035_v28, %v3840_v2  ;;  %v4403_v18 = vpop.f32.mrf.mxu1  ;;  %v4869_v6 = vand.u32 4294901760, %v4868_v41  ;;  %v13246_v28 = vld [vmem:[#allocation71_spill] sm:$0xff] }
 0x485   : > { %v3844_v48 = vpop.f32.mrf.mxu2 }
 0x486   : > { %v4247_v29 = vadd.f32 %v4246_v52, %v4036_v22  ;;  %v3845_v61 = vadd.f32 %v3844_v48, %v3672_v49  ;;  %v4254_v46 = vpop.f32.mrf.mxu0  ;;  %4870 = vmatpush.msrb.mxu3 %v4869_v6  ;;  %v13247_v52 = vand.u32 4294901760, %v10135_v15 }
 0x487   : > { %4466 = vmatmul.f32.gmra.mxu1 %v9910_v35  ;;  %v13248_v35 = vld [vmem:[#allocation76_spill] sm:$0xff] }
 0x488   : > { %4136 = vmatmul.f32.gmra.mxu3 %v13245_v50  ;;  %v10583_v2 = vadd.f32 %v4399_v23, %v4247_v29  ;;  %5449 = vmatpush.msra.mxu2 %v13247_v52  ;;  %v3676_v62 = vadd.f32 %v9991_v33, %v13248_v35  ;;  %v13251_v33 = vand.u32 4294901760, %v13246_v28  ;;  %v13263_v52 = vld [vmem:[#allocation103_spill] sm:$0xff] }
 0x489   : > { %4317 = vmatmul.f32.gmra.mxu0 %v9931_v4  ;;  %5628 = vmatpush.msra.mxu3 %v10011_v39  ;;  %v13250_v39 = vand.u32 4294901760, %v10213_v25  ;;  %v13264_v35 = vand.u32 4294901760, %v13263_v52 }
 0x48a   : > { %3928 = vmatmul.f32.gmra.mxu2 %v13246_v28 }
 0x48b   : > { %v4041_v63 = vpop.f32.mrf.mxu3  ;;  %5630 = vmatpush.msra.mxu3 %v10050_v40  ;;  %5453 = vmatpush.msra.mxu2 %v13249_v37  ;;  %v13252_v40 = vld [vmem:[#allocation75_spill] sm:$0xff] }
 0x48c   : > { %v4042_v54 = vadd.f32 %v4041_v63, %v3845_v61  ;;  %v4407_v49 = vpop.f32.mrf.mxu1 }
 0x48d   : > { %v3849_v23 = vpop.f32.mrf.mxu2  ;;  %5632 = vmatpush.msra.mxu3 %v10088_v47  ;;  %5457 = vmatpush.msra.mxu2 %v13250_v39  ;;  %v13253_v47 = vand.u32 4294901760, %v10252_v24  ;;  %v13257_v24 = vand.u32 4294901760, %v13252_v40 }
 0x48e   : > { %v4251_v22 = vadd.f32 %v4250_v12, %v4042_v54  ;;  %v3850_v48 = vadd.f32 %v3849_v23, %v3676_v62  ;;  %v4258_v41 = vpop.f32.mrf.mxu0  ;;  %v13255_v12 = vld [vmem:[#allocation82_spill] sm:$0xff]  ;;  %v13266_v54 = vld [vmem:[#allocation85_spill] sm:$0xff] }
 0x48f   : > { %4470 = vmatmul.f32.gmra.mxu1 %v9931_v4  ;;  %5634 = vmatpush.msra.mxu3 %v10127_v60  ;;  %v13254_v4 = vld [vmem:[#allocation15_spill] sm:$0xff]  ;;  %v3680_v5 = vadd.f32 %v13255_v12, %v9997_v58  ;;  %v13256_v60 = vand.u32 4294901760, %v10291_v19  ;;  %v13258_v58 = vand.u32 4294901760, %v10330_v45  ;;  %v13260_v19 = vld [vmem:[#allocation77_spill] sm:$0xff] }
 0x490   : > { %4142 = vmatmul.f32.gmra.mxu3 %v13251_v33  ;;  %v10601_v15 = vadd.f32 %v4403_v18, %v4251_v22  ;;  %5461 = vmatpush.msra.mxu2 %v13253_v47  ;;  %v3135_v25 = vmax.f32 %v13254_v4, 0.0  ;;  %v13265_v45 = vld [vmem:[#allocation83_spill] sm:$0xff]  ;;  %v13268_v47 = vld [vmem:[#allocation25_spill] sm:$0xff] }
 0x491   : > { %4321 = vmatmul.f32.gmra.mxu0 %v9952_v42  ;;  %5636 = vmatpush.msra.mxu3 %v10166_v51 }
 0x492   : > { %3933 = vmatmul.f32.gmra.mxu2 %v13252_v40  ;;  %v10617_v51 = vand.u32 4294901760, %v3135_v25 }
 0x493   : > { %v4047_v26 = vpop.f32.mrf.mxu3  ;;  %5638 = vmatpush.msra.mxu3 %v10205_v36  ;;  %5465 = vmatpush.msra.mxu2 %v13256_v60  ;;  %v13259_v36 = vld [vmem:[#allocation8_spill] sm:$0xff] }
 0x494   : > { %v4048_v29 = vadd.f32 %v4047_v26, %v3850_v48  ;;  %v4411_v18 = vpop.f32.mrf.mxu1  ;;  %v4519_v62 = vsub.f32 %v3135_v25, %v10617_v51  ;;  %v13267_v48 = vld [vmem:[#allocation102_spill] sm:$0xff]  ;;  %v13269_v25 = vand.u32 4294901760, %v13260_v19 }
 0x495   : > { %v3854_v61 = vpop.f32.mrf.mxu2  ;;  %5640 = vmatpush.msra.mxu3 %v10244_v44  ;;  %5469 = vmatpush.msra.mxu2 %v13258_v58  ;;  %v13262_v44 = vld [vmem:[#allocation12_spill] sm:$0xff] }
 0x496   : > { %v4255_v6 = vadd.f32 %v4254_v46, %v4048_v29  ;;  %v3855_v59 = vadd.f32 %v3854_v61, %v3680_v5  ;;  %v4262_v50 = vpop.f32.mrf.mxu0  ;;  %v13261_v46 = vld [vmem:[#allocation16_spill] sm:$0xff]  ;;  %v4520_v4 = vand.u32 4294901760, %v4519_v62  ;;  %v13272_v5 = vand.u32 4294901760, %v10464_v3 }
 0x497   : > { %4474 = vmatmul.f32.gmra.mxu1 %v9952_v42  ;;  %5642 = vmatpush.msra.mxu3 %v13259_v36  ;;  %v3136_v42 = vmax.f32 %v13261_v46, 0.0  ;;  %v13273_v61 = vld [vmem:[#allocation24_spill] sm:$0xff] }
 0x498   : > { %4148 = vmatmul.f32.gmra.mxu3 %v13257_v24  ;;  %v10623_v28 = vadd.f32 %v4407_v49, %v4255_v6  ;;  %5473 = vmatpush.msra.mxu2 %v13264_v35  ;;  %v3684_v49 = vadd.f32 %v13266_v54, %v13265_v45  ;;  %v4521_v29 = vsub.f32 %v4519_v62, %v4520_v4  ;;  %v3137_v1 = vmax.f32 %v13273_v61, 0.0  ;;  %v13280_v35 = vld [vmem:[#allocation89_spill] sm:$0xff]  ;;  %v13281_v45 = vld [vmem:[#allocation91_spill] sm:$0xff] }
 0x499   : > { %4325 = vmatmul.f32.gmra.mxu0 %v9973_v32  ;;  %5644 = vmatpush.msra.mxu3 %v13262_v44  ;;  %v10638_v26 = vand.u32 4294901760, %v3136_v42  ;;  %v3692_v54 = vadd.f32 %v13281_v45, %v13280_v35 }
 0x49a   : > { %3938 = vmatmul.f32.gmra.mxu2 %v13260_v19  ;;  %v13277_v19 = vand.u32 4294901760, %v10530_v17  ;;  %v4522_v46 = vand.u32 4294901760, %v4521_v29 }
 0x49b   : > { %v4053_v63 = vpop.f32.mrf.mxu3  ;;  %5646 = vmatpush.msra.mxu3 %v13267_v48  ;;  %5477 = vmatpush.msra.mxu2 %v4837_v11  ;;  %v13271_v11 = vld [vmem:[#allocation80_spill] sm:$0xff] }
 0x49c   : > { %v4054_v23 = vadd.f32 %v4053_v63, %v3855_v59  ;;  %v4415_v37 = vpop.f32.mrf.mxu1  ;;  %v13278_v63 = vand.u32 4294901760, %v13271_v11 }
 0x49d   : > { %v3859_v22 = vpop.f32.mrf.mxu2  ;;  %5648 = vmatpush.msra.mxu3 %v13268_v47  ;;  %5481 = vmatpush.msra.mxu2 %v4843_v53  ;;  %v13274_v53 = vld [vmem:[#allocation86_spill] sm:$0xff] }
 0x49e   : > { %v4259_v39 = vadd.f32 %v4258_v41, %v4054_v23  ;;  %v3860_v33 = vadd.f32 %v3859_v22, %v3684_v49  ;;  %v4266_v40 = vpop.f32.mrf.mxu0  ;;  %v4527_v41 = vsub.f32 %v3136_v42, %v10638_v26  ;;  %v10664_v42 = vand.u32 4294901760, %v3137_v1 }
 0x49f   : > { %4478 = vmatmul.f32.gmra.mxu1 %v9973_v32  ;;  %5650 = vmatpush.msra.mxu3 %v10422_v38  ;;  %v13276_v38 = vand.u32 4294901760, %v10497_v16 }
 0x4a0   : > { %4154 = vmatmul.f32.gmra.mxu3 %v13269_v25  ;;  %v10646_v12 = vadd.f32 %v4411_v18, %v4259_v39  ;;  %5485 = vmatpush.msra.mxu2 %v13272_v5  ;;  %v13275_v18 = vld [vmem:[#allocation88_spill] sm:$0xff]  ;;  %v4535_v17 = vsub.f32 %v3137_v1, %v10664_v42  ;;  %v13282_v39 = vld [vmem:[#allocation57_spill] sm:$0xff] }
 0x4a1   : > { %4329 = vmatmul.f32.gmra.mxu0 %v13270_v8  ;;  %5652 = vmatpush.msra.mxu3 %v10455_v21  ;;  %v3688_v60 = vadd.f32 %v13275_v18, %v13274_v53  ;;  %v4528_v21 = vand.u32 4294901760, %v4527_v41 }
 0x4a2   : > { %3943 = vmatmul.f32.gmra.mxu2 %v13271_v11 }
 0x4a3   : > { %v4059_v32 = vpop.f32.mrf.mxu3  ;;  %5489 = vmatpush.msra.mxu2 %v13276_v38  ;;  %5654 = vmatpush.msra.mxu3 %v10488_v34  ;;  %v4529_v16 = vsub.f32 %v4527_v41, %v4528_v21  ;;  %v13285_v38 = vld [vmem:[#allocation60_spill] sm:$0xff] }
 0x4a4   : > { %v4060_v6 = vadd.f32 %v4059_v32, %v3860_v33  ;;  %v4419_v59 = vpop.f32.mrf.mxu1  ;;  %v3139_v33 = vmax.f32 %v13282_v39, 0.0 }
 0x4a5   : > { %v3864_v24 = vpop.f32.mrf.mxu2  ;;  %5493 = vmatpush.msra.mxu2 %v13277_v19  ;;  %5656 = vmatpush.msra.mxu3 %v10521_v43  ;;  %v4530_v57 = vand.u32 4294901760, %v4529_v16 }
 0x4a6   : > { %v4263_v58 = vadd.f32 %v4262_v50, %v4060_v6  ;;  %v3865_v36 = vadd.f32 %v3864_v24, %v3688_v60  ;;  %v4270_v3 = vpop.f32.mrf.mxu0  ;;  %v13279_v50 = vld [vmem:[#allocation41_spill] sm:$0xff]  ;;  %v10687_v18 = vand.u32 4294901760, %v3139_v33 }
 0x4a7   : > { %4482 = vmatmul.f32.gmra.mxu1 %v13270_v8  ;;  %5497 = vmatpush.msra.mxu2 %v4867_v20  ;;  %v3138_v52 = vmax.f32 %v13279_v50, 0.0  ;;  %v13283_v8 = vld [vmem:[#allocation92_spill] sm:$0xff] }
 0x4a8   : > { %4160 = vmatmul.f32.gmra.mxu3 %v13278_v63  ;;  %v10668_v44 = vadd.f32 %v4415_v37, %v4263_v58  ;;  %v3140_v58 = vmax.f32 %v13285_v38, 0.0 }
 0x4a9   : > { %5050 = vmatmul.f32.vlgmr.msrb.gmra.mxu0 %v4519_v62  ;;  %5658 = vmatpush.msra.mxu3 %v10554_v9  ;;  %v10678_v48 = vand.u32 4294901760, %v3138_v52  ;;  %v4536_v9 = vand.u32 4294901760, %v4535_v17 }
 0x4aa   : > { %4523 = vmatmul.f32.vlgmr.msrb.gmra.mxu2 %v4522_v46  ;;  %v10696_v45 = vand.u32 4294901760, %v3140_v58 }
 0x4ab   : > { %v4065_v34 = vpop.f32.mrf.mxu3  ;;  %v4543_v25 = vsub.f32 %v3138_v52, %v10678_v48  ;;  %v4537_v5 = vsub.f32 %v4535_v17, %v4536_v9 }
 0x4ac   : > { %v4066_v49 = vadd.f32 %v4065_v34, %v3865_v36  ;;  %v4423_v23 = vpop.f32.mrf.mxu1  ;;  %v13286_v36 = vld [vmem:[#allocation95_spill] sm:$0xff] }
 0x4ad   : > { %v3869_v62 = vpop.f32.mrf.mxu2  ;;  %v4544_v60 = vand.u32 4294901760, %v4543_v25 }
 0x4ae   : > { %v4267_v37 = vadd.f32 %v4266_v40, %v4066_v49  ;;  %v3870_v43 = vadd.f32 %v3869_v62, %v3692_v54  ;;  %v4274_v22 = vpop.f32.mrf.mxu0  ;;  %v13284_v40 = vld [vmem:[#allocation94_spill] sm:$0xff]  ;;  %v4559_v62 = vsub.f32 %v3140_v58, %v10696_v45 }
 0x4af   : > { %5244 = vmatmul.f32.vlgmr.msrb.gmra.mxu1 %v4520_v4  ;;  %v3696_v11 = vadd.f32 %v13284_v40, %v13283_v8  ;;  %v4545_v34 = vsub.f32 %v4543_v25, %v4544_v60 }
 0x4b0   : > { %4872 = vmatmul.f32.vlgmr.msrb.gmra.mxu3 %v10617_v51  ;;  %v10681_v20 = vadd.f32 %v4419_v59, %v4267_v37  ;;  %v4551_v59 = vsub.f32 %v3139_v33, %v10687_v18  ;;  %v13288_v37 = vld [vmem:[#allocation63_spill] sm:$0xff] }
 0x4b1   : > { %5055 = vmatmul.f32.gmra.mxu0 %v4527_v41  ;;  %v4538_v41 = vand.u32 4294901760, %v4537_v5 }
 0x4b2   : > { %4531 = vmatmul.f32.gmra.mxu2 %v4530_v57  ;;  %v4552_v35 = vand.u32 4294901760, %v4551_v59  ;;  %v13290_v57 = vld [vmem:[#allocation40_spill] sm:$0xff] }
 0x4b3   : > { %v4071_v47 = vpop.f32.mrf.mxu3 }
 0x4b4   : > { %v4072_v32 = vadd.f32 %v4071_v47, %v3870_v43  ;;  %v4427_v4 = vpop.f32.mrf.mxu1  ;;  %v3141_v43 = vmax.f32 %v13288_v37, 0.0  ;;  %v13295_v37 = vld [vmem:[#allocation55_spill] sm:$0xff] }
 0x4b5   : > { %v3874_v29 = vpop.f32.mrf.mxu2 }
 0x4b6   : > { %v4271_v61 = vadd.f32 %v4270_v3, %v4072_v32  ;;  %v3875_v1 = vadd.f32 %v3874_v29, %v3696_v11  ;;  %v4278_v53 = vpop.f32.mrf.mxu0  ;;  %v13287_v3 = vld [vmem:[#allocation97_spill] sm:$0xff]  ;;  %v10705_v32 = vand.u32 4294901760, %v3141_v43  ;;  %v13291_v29 = vld [vmem:[#allocation66_spill] sm:$0xff] }
 0x4b7   : > { %5250 = vmatmul.f32.gmra.mxu1 %v4528_v21  ;;  %v3700_v19 = vadd.f32 %v13287_v3, %v13286_v36 }
 0x4b8   : > { %4876 = vmatmul.f32.gmra.mxu3 %v10638_v26  ;;  %v10690_v6 = vadd.f32 %v4423_v23, %v4271_v61  ;;  %v4553_v23 = vsub.f32 %v4551_v59, %v4552_v35  ;;  %v3142_v61 = vmax.f32 %v13291_v29, 0.0 }
 0x4b9   : > { %5060 = vmatmul.f32.gmra.mxu0 %v4535_v17  ;;  %v4546_v17 = vand.u32 4294901760, %v4545_v34 }
 0x4ba   : > { %4539 = vmatmul.f32.gmra.mxu2 %v4538_v41  ;;  %v4567_v41 = vsub.f32 %v3141_v43, %v10705_v32 }
 0x4bb   : > { %v4077_v24 = vpop.f32.mrf.mxu3 }
 0x4bc   : > { %v4078_v46 = vadd.f32 %v4077_v24, %v3875_v1  ;;  %v4431_v63 = vpop.f32.mrf.mxu1  ;;  %v13292_v24 = vld [vmem:[#allocation26_spill] sm:$0xff] }
 0x4bd   : > { %v3879_v21 = vpop.f32.mrf.mxu2 }
 0x4be   : > { %v4275_v16 = vadd.f32 %v4274_v22, %v4078_v46  ;;  %v3880_v50 = vadd.f32 %v3879_v21, %v3700_v19  ;;  %v4282_v52 = vpop.f32.mrf.mxu0  ;;  %v13289_v22 = vld [vmem:[#allocation98_spill] sm:$0xff]  ;;  %v10714_v21 = vand.u32 4294901760, %v3142_v61 }
 0x4bf   : > { %5256 = vmatmul.f32.gmra.mxu1 %v4536_v9  ;;  %v3704_v39 = vadd.f32 %v13290_v57, %v13289_v22 }
 0x4c0   : > { %4880 = vmatmul.f32.gmra.mxu3 %v10664_v42  ;;  %v10699_v54 = vadd.f32 %v4427_v4, %v4275_v16  ;;  %v4560_v4 = vand.u32 4294901760, %v4559_v62 }
 0x4c1   : > { %5065 = vmatmul.f32.gmra.mxu0 %v4543_v25  ;;  %v4554_v25 = vand.u32 4294901760, %v4553_v23 }
 0x4c2   : > { %4547 = vmatmul.f32.gmra.mxu2 %v4546_v17  ;;  %v4561_v36 = vsub.f32 %v4559_v62, %v4560_v4 }
 0x4c3   : > { %v4083_v49 = vpop.f32.mrf.mxu3 }
 0x4c4   : > { %v4084_v9 = vadd.f32 %v4083_v49, %v3880_v50  ;;  %v4435_v33 = vpop.f32.mrf.mxu1  ;;  %v4575_v50 = vsub.f32 %v3142_v61, %v10714_v21  ;;  %v13294_v49 = vld [vmem:[#allocation69_spill] sm:$0xff] }
 0x4c5   : > { %v3884_v47 = vpop.f32.mrf.mxu2  ;;  %v3143_v23 = vmax.f32 %v13294_v49, 0.0 }
 0x4c6   : > { %v4279_v8 = vadd.f32 %v4278_v53, %v4084_v9  ;;  %v3885_v40 = vadd.f32 %v3884_v47, %v3704_v39  ;;  %v4286_v11 = vpop.f32.mrf.mxu0  ;;  %v13293_v53 = vld [vmem:[#allocation44_spill] sm:$0xff] }
 0x4c7   : > { %5262 = vmatmul.f32.gmra.mxu1 %v4544_v60  ;;  %v3708_v38 = vadd.f32 %v13293_v53, %v13292_v24  ;;  %v13297_v24 = vld [vmem:[#allocation72_spill] sm:$0xff] }
 0x4c8   : > { %4884 = vmatmul.f32.gmra.mxu3 %v10678_v48  ;;  %v10708_v5 = vadd.f32 %v4431_v63, %v4279_v8  ;;  %v4568_v63 = vand.u32 4294901760, %v4567_v41  ;;  %v3144_v53 = vmax.f32 %v13297_v24, 0.0 }
 0x4c9   : > { %5070 = vmatmul.f32.gmra.mxu0 %v4551_v59  ;;  %v4562_v59 = vand.u32 4294901760, %v4561_v36 }
 0x4ca   : > { %4555 = vmatmul.f32.gmra.mxu2 %v4554_v25  ;;  %v4569_v39 = vsub.f32 %v4567_v41, %v4568_v63 }
 0x4cb   : > { %v4089_v1 = vpop.f32.mrf.mxu3 }
 0x4cc   : > { %v4090_v58 = vadd.f32 %v4089_v1, %v3885_v40  ;;  %v4439_v60 = vpop.f32.mrf.mxu1  ;;  %v10723_v40 = vand.u32 4294901760, %v3143_v23 }
 0x4cd   : > { %v3889_v3 = vpop.f32.mrf.mxu2 }
 0x4ce   : > { %v4283_v19 = vadd.f32 %v4282_v52, %v4090_v58  ;;  %v3890_v46 = vadd.f32 %v3889_v3, %v3708_v38  ;;  %v4290_v34 = vpop.f32.mrf.mxu0  ;;  %v13296_v52 = vld [vmem:[#allocation47_spill] sm:$0xff]  ;;  %v4583_v1 = vsub.f32 %v3143_v23, %v10723_v40  ;;  %v13299_v38 = vld [vmem:[#allocation53_spill] sm:$0xff]  ;;  %v13301_v23 = vld [vmem:[#allocation18_spill] sm:$0xff] }
 0x4cf   : > { %5268 = vmatmul.f32.gmra.mxu1 %v4552_v35  ;;  %v3712_v43 = vadd.f32 %v13296_v52, %v13295_v37  ;;  %v3145_v37 = vmax.f32 %v13301_v23, 0.0 }
 0x4d0   : > { %4888 = vmatmul.f32.gmra.mxu3 %v10687_v18  ;;  %v10717_v16 = vadd.f32 %v4435_v33, %v4283_v19  ;;  %v4576_v33 = vand.u32 4294901760, %v4575_v50 }
 0x4d1   : > { %5075 = vmatmul.f32.gmra.mxu0 %v4559_v62  ;;  %v4570_v62 = vand.u32 4294901760, %v4569_v39  ;;  %v10741_v24 = vand.u32 4294901760, %v3145_v37 }
 0x4d2   : > { %4563 = vmatmul.f32.gmra.mxu2 %v4562_v59  ;;  %v4577_v61 = vsub.f32 %v4575_v50, %v4576_v33 }
 0x4d3   : > { %v4095_v17 = vpop.f32.mrf.mxu3  ;;  %13304 = vst [vmem:[#allocation29_spill] sm:$0xff] %v10741_v24 }
 0x4d4   : > { %v4096_v22 = vadd.f32 %v4095_v17, %v3890_v46  ;;  %v4443_v57 = vpop.f32.mrf.mxu1  ;;  %v4584_v17 = vand.u32 4294901760, %v4583_v1 }
 0x4d5   : > { %v3894_v35 = vpop.f32.mrf.mxu2 }
 0x4d6   : > { %v4287_v9 = vadd.f32 %v4286_v11, %v4096_v22  ;;  %v3895_v47 = vadd.f32 %v3894_v35, %v3712_v43  ;;  %v4294_v8 = vpop.f32.mrf.mxu0  ;;  %v13298_v11 = vld [vmem:[#allocation56_spill] sm:$0xff]  ;;  %v13302_v22 = vld [vmem:[#allocation7_spill] sm:$0xff] }
 0x4d7   : > { %5274 = vmatmul.f32.gmra.mxu1 %v4560_v4  ;;  %v3716_v58 = vadd.f32 %v13299_v38, %v13298_v11 }
 0x4d8   : > { %4892 = vmatmul.f32.gmra.mxu3 %v10696_v45  ;;  %v10726_v25 = vadd.f32 %v4439_v60, %v4287_v9  ;;  %v10732_v60 = vand.u32 4294901760, %v3144_v53  ;;  %v4585_v9 = vsub.f32 %v4583_v1, %v4584_v17 }
 0x4d9   : > { %5080 = vmatmul.f32.gmra.mxu0 %v4567_v41  ;;  %v4578_v41 = vand.u32 4294901760, %v4577_v61 }
 0x4da   : > { %4571 = vmatmul.f32.gmra.mxu2 %v4570_v62  ;;  %13300 = vst [vmem:[#allocation23_spill] sm:$0xff] %v10732_v60  ;;  %v4591_v43 = vsub.f32 %v3144_v53, %v10732_v60  ;;  %v4599_v53 = vsub.f32 %v3145_v37, %v10741_v24 }
 0x4db   : > { %v4101_v29 = vpop.f32.mrf.mxu3 }
 0x4dc   : > { %v4102_v4 = vadd.f32 %v4101_v29, %v3895_v47  ;;  %v4447_v36 = vpop.f32.mrf.mxu1 }
 0x4dd   : > { %v3899_v3 = vpop.f32.mrf.mxu2 }
 0x4de   : > { %v4291_v19 = vadd.f32 %v4290_v34, %v4102_v4  ;;  %v3900_v46 = vadd.f32 %v3899_v3, %v3716_v58  ;;  %v4298_v59 = vpop.f32.mrf.mxu0  ;;  %v13303_v34 = vld [vmem:[#allocation27_spill] sm:$0xff]  ;;  %v13305_v58 = vld [vmem:[#allocation78_spill] sm:$0xff]  ;;  %v13306_v3 = vld [vmem:[#allocation9_spill] sm:$0xff] }
 0x4df   : > { %5280 = vmatmul.f32.gmra.mxu1 %v4568_v63  ;;  %v3720_v39 = vadd.f32 %v13303_v34, %v13302_v22  ;;  %v3146_v4 = vmax.f32 %v13305_v58, 0.0 }
 0x4e0   : > { %4896 = vmatmul.f32.gmra.mxu3 %v10705_v32  ;;  %v10735_v49 = vadd.f32 %v4443_v57, %v4291_v19  ;;  %v4592_v57 = vand.u32 4294901760, %v4591_v43 }
 0x4e1   : > { %5085 = vmatmul.f32.gmra.mxu0 %v4575_v50  ;;  %v4586_v50 = vand.u32 4294901760, %v4585_v9 }
 0x4e2   : > { %4579 = vmatmul.f32.gmra.mxu2 %v4578_v41  ;;  %v4593_v23 = vsub.f32 %v4591_v43, %v4592_v57 }
 0x4e3   : > { %v4107_v52 = vpop.f32.mrf.mxu3 }
 0x4e4   : > { %v4108_v35 = vadd.f32 %v4107_v52, %v3900_v46  ;;  %v4451_v63 = vpop.f32.mrf.mxu1 }
 0x4e5   : > { %v3904_v47 = vpop.f32.mrf.mxu2 }
 0x4e6   : > { %v4295_v62 = vadd.f32 %v4294_v8, %v4108_v35  ;;  %v3905_v29 = vadd.f32 %v3904_v47, %v3720_v39  ;;  %v4302_v61 = vpop.f32.mrf.mxu0  ;;  %v13307_v8 = vld [vmem:[#allocation31_spill] sm:$0xff]  ;;  %v10750_v39 = vand.u32 4294901760, %v3146_v4 }
 0x4e7   : > { %5286 = vmatmul.f32.gmra.mxu1 %v4576_v33  ;;  %v3724_v19 = vadd.f32 %v13307_v8, %v13306_v3 }
 0x4e8   : > { %4900 = vmatmul.f32.gmra.mxu3 %v10714_v21  ;;  %v10744_v11 = vadd.f32 %v4447_v36, %v4295_v62  ;;  %v4600_v36 = vand.u32 4294901760, %v4599_v53  ;;  %13308 = vst [vmem:[#allocation22_spill] sm:$0xff] %v10750_v39  ;;  %v4607_v47 = vsub.f32 %v3146_v4, %v10750_v39  ;;  %v13309_v62 = vld [vmem:[#allocation81_spill] sm:$0xff]  ;;  %v13314_v4 = vld [vmem:[#allocation84_spill] sm:$0xff] }
 0x4e9   : > { %5090 = vmatmul.f32.gmra.mxu0 %v4583_v1  ;;  %v4594_v1 = vand.u32 4294901760, %v4593_v23 }
 0x4ea   : > { %4587 = vmatmul.f32.gmra.mxu2 %v4586_v50  ;;  %v4601_v9 = vsub.f32 %v4599_v53, %v4600_v36  ;;  %v13311_v50 = vld [vmem:[#allocation34_spill] sm:$0xff]  ;;  %v4608_v23 = vand.u32 4294901760, %v4607_v47 }
 0x4eb   : > { %v4113_v38 = vpop.f32.mrf.mxu3 }
 0x4ec   : > { %v4114_v46 = vadd.f32 %v4113_v38, %v3905_v29  ;;  %v4455_v41 = vpop.f32.mrf.mxu1  ;;  %v3147_v29 = vmax.f32 %v13309_v62, 0.0 }
 0x4ed   : > { %v3909_v33 = vpop.f32.mrf.mxu2 }
 0x4ee   : > { %v4299_v52 = vadd.f32 %v4298_v59, %v4114_v46  ;;  %v3910_v22 = vadd.f32 %v3909_v33, %v3724_v19  ;;  %v4306_v34 = vpop.f32.mrf.mxu0  ;;  %v13310_v59 = vld [vmem:[#allocation11_spill] sm:$0xff] }
 0x4ef   : > { %5292 = vmatmul.f32.gmra.mxu1 %v4584_v17  ;;  %v3728_v38 = vadd.f32 %v13311_v50, %v13310_v59  ;;  %v4609_v50 = vsub.f32 %v4607_v47, %v4608_v23 }
 0x4f0   : > { %4904 = vmatmul.f32.gmra.mxu3 %v10723_v40  ;;  %v10753_v37 = vadd.f32 %v4451_v63, %v4299_v52  ;;  %v10759_v63 = vand.u32 4294901760, %v3147_v29  ;;  %v3148_v52 = vmax.f32 %v13314_v4, 0.0 }
 0x4f1   : > { %5095 = vmatmul.f32.gmra.mxu0 %v4591_v43  ;;  %v4602_v43 = vand.u32 4294901760, %v4601_v9 }
 0x4f2   : > { %4595 = vmatmul.f32.gmra.mxu2 %v4594_v1  ;;  %13312 = vst [vmem:[#allocation20_spill] sm:$0xff] %v10759_v63 }
 0x4f3   : > { %v4119_v35 = vpop.f32.mrf.mxu3 }
 0x4f4   : > { %v4120_v17 = vadd.f32 %v4119_v35, %v3910_v22  ;;  %v4459_v58 = vpop.f32.mrf.mxu1  ;;  %v4615_v22 = vsub.f32 %v3147_v29, %v10759_v63  ;;  %v13315_v35 = vld [vmem:[#allocation42_spill] sm:$0xff] }
 0x4f5   : > { %v3914_v3 = vpop.f32.mrf.mxu2 }
 0x4f6   : > { %v4303_v8 = vadd.f32 %v4302_v61, %v4120_v17  ;;  %v3915_v19 = vadd.f32 %v3914_v3, %v3728_v38  ;;  %v4310_v46 = vpop.f32.mrf.mxu0  ;;  %v13316_v61 = vld [vmem:[#allocation35_spill] sm:$0xff] }
 0x4f7   : > { %5298 = vmatmul.f32.gmra.mxu1 %v4592_v57  ;;  %v3732_v62 = vadd.f32 %v13316_v61, %v13315_v35 }
 0x4f8   : > { %4908 = vmatmul.f32.gmra.mxu3 %v10732_v60  ;;  %v10762_v33 = vadd.f32 %v4455_v41, %v4303_v8  ;;  %v10768_v60 = vand.u32 4294901760, %v3148_v52  ;;  %v4616_v41 = vand.u32 4294901760, %v4615_v22 }
 0x4f9   : > { %5100 = vmatmul.f32.gmra.mxu0 %v4599_v53  ;;  %v4610_v53 = vand.u32 4294901760, %v4609_v50 }
 0x4fa   : > { %13313 = vst [vmem:[#allocation37_spill] sm:$0xff] %v10762_v33  ;;  %4603 = vmatmul.f32.gmra.mxu2 %v4602_v43  ;;  %v4623_v29 = vsub.f32 %v3148_v52, %v10768_v60  ;;  %v13319_v43 = vld [vmem:[#allocation87_spill] sm:$0xff] }
 0x4fb   : > { %v4125_v1 = vpop.f32.mrf.mxu3  ;;  %13317 = vst [vmem:[#allocation33_spill] sm:$0xff] %v10768_v60  ;;  %v3149_v4 = vmax.f32 %v13319_v43, 0.0 }
 0x4fc   : > { %v4126_v59 = vadd.f32 %v4125_v1, %v3915_v19  ;;  %v4463_v57 = vpop.f32.mrf.mxu1  ;;  %v13320_v1 = vld [vmem:[#allocation46_spill] sm:$0xff] }
 0x4fd   : > { %v3919_v38 = vpop.f32.mrf.mxu2 }
 0x4fe   : > { %v4307_v17 = vadd.f32 %v4306_v34, %v4126_v59  ;;  %v3920_v3 = vadd.f32 %v3919_v38, %v3732_v62  ;;  %v4314_v9 = vpop.f32.mrf.mxu0  ;;  %v13321_v34 = vld [vmem:[#allocation99_spill] sm:$0xff]  ;;  %v4617_v59 = vsub.f32 %v4615_v22, %v4616_v41 }
 0x4ff   : > { %5304 = vmatmul.f32.gmra.mxu1 %v4600_v36  ;;  %v3736_v35 = vadd.f32 %v13321_v34, %v13320_v1  ;;  %v13325_v34 = vld [vmem:[#allocation39_spill] sm:$0xff] }
 0x500   : > { %4912 = vmatmul.f32.gmra.mxu3 %v10741_v24  ;;  %v10771_v8 = vadd.f32 %v4459_v58, %v4307_v17  ;;  %v4624_v58 = vand.u32 4294901760, %v4623_v29  ;;  %v10777_v17 = vand.u32 4294901760, %v3149_v4 }
 0x501   : > { %5105 = vmatmul.f32.gmra.mxu0 %v4607_v47  ;;  %v4618_v47 = vand.u32 4294901760, %v4617_v59 }
 0x502   : > { %13318 = vst [vmem:[#allocation17_spill] sm:$0xff] %v10771_v8  ;;  %4611 = vmatmul.f32.gmra.mxu2 %v4610_v53  ;;  %v4625_v43 = vsub.f32 %v4623_v29, %v4624_v58 }
 0x503   : > { %v4131_v19 = vpop.f32.mrf.mxu3 }
 0x504   : > { %v4132_v61 = vadd.f32 %v4131_v19, %v3920_v3  ;;  %v4467_v62 = vpop.f32.mrf.mxu1  ;;  %v4631_v3 = vsub.f32 %v3149_v4, %v10777_v17  ;;  %v13323_v19 = vld [vmem:[#allocation90_spill] sm:$0xff]  ;;  %v13328_v4 = vld [vmem:[#allocation93_spill] sm:$0xff] }
 0x505   : > { %v3924_v36 = vpop.f32.mrf.mxu2  ;;  %v3150_v1 = vmax.f32 %v13323_v19, 0.0 }
 0x506   : > { %v4311_v38 = vadd.f32 %v4310_v46, %v4132_v61  ;;  %v3925_v24 = vadd.f32 %v3924_v36, %v3736_v35  ;;  %v4318_v50 = vpop.f32.mrf.mxu0  ;;  %v13324_v46 = vld [vmem:[#allocation50_spill] sm:$0xff]  ;;  %v4632_v59 = vand.u32 4294901760, %v4631_v3 }
 0x507   : > { %5310 = vmatmul.f32.gmra.mxu1 %v4608_v23  ;;  %v3740_v35 = vadd.f32 %v13325_v34, %v13324_v46 }
 0x508   : > { %4916 = vmatmul.f32.gmra.mxu3 %v10750_v39  ;;  %v10780_v52 = vadd.f32 %v4463_v57, %v4311_v38  ;;  %v10786_v57 = vand.u32 4294901760, %v3150_v1 }
 0x509   : > { %5110 = vmatmul.f32.gmra.mxu0 %v4615_v22  ;;  %v4626_v22 = vand.u32 4294901760, %v4625_v43 }
 0x50a   : > { %13322 = vst [vmem:[#allocation28_spill] sm:$0xff] %v10780_v52  ;;  %4619 = vmatmul.f32.gmra.mxu2 %v4618_v47  ;;  %v3151_v47 = vmax.f32 %v13328_v4, 0.0 }
 0x50b   : > { %v4137_v53 = vpop.f32.mrf.mxu3  ;;  %13326 = vst [vmem:[#allocation58_spill] sm:$0xff] %v10786_v57 }
 0x50c   : > { %v4138_v23 = vadd.f32 %v4137_v53, %v3925_v24  ;;  %v4471_v61 = vpop.f32.mrf.mxu1  ;;  %v4639_v24 = vsub.f32 %v3150_v1, %v10786_v57  ;;  %v13329_v53 = vld [vmem:[#allocation54_spill] sm:$0xff]  ;;  %v10795_v52 = vand.u32 4294901760, %v3151_v47 }
 0x50d   : > { %v3929_v36 = vpop.f32.mrf.mxu2 }
 0x50e   : > { %v4315_v8 = vadd.f32 %v4314_v9, %v4138_v23  ;;  %v3930_v33 = vadd.f32 %v3929_v36, %v3740_v35  ;;  %v4322_v39 = vpop.f32.mrf.mxu0  ;;  %v13330_v9 = vld [vmem:[#allocation100_spill] sm:$0xff]  ;;  %v4633_v35 = vsub.f32 %v4631_v3, %v4632_v59  ;;  %13331 = vst [vmem:[#allocation61_spill] sm:$0xff] %v10795_v52  ;;  %v4647_v1 = vsub.f32 %v3151_v47, %v10795_v52 }
 0x50f   : > { %5316 = vmatmul.f32.gmra.mxu1 %v4616_v41  ;;  %v3744_v46 = vadd.f32 %v13330_v9, %v13329_v53 }
 0x510   : > { %4920 = vmatmul.f32.gmra.mxu3 %v10759_v63  ;;  %v10789_v38 = vadd.f32 %v4467_v62, %v4315_v8  ;;  %v4634_v8 = vand.u32 4294901760, %v4633_v35 }
 0x511   : > { %5115 = vmatmul.f32.gmra.mxu0 %v4623_v29  ;;  %v4640_v29 = vand.u32 4294901760, %v4639_v24 }
 0x512   : > { %13327 = vst [vmem:[#allocation32_spill] sm:$0xff] %v10789_v38  ;;  %4627 = vmatmul.f32.gmra.mxu2 %v4626_v22  ;;  %v13333_v22 = vld [vmem:[#allocation96_spill] sm:$0xff] }
 0x513   : > { %v4143_v19 = vpop.f32.mrf.mxu3  ;;  %v3152_v4 = vmax.f32 %v13333_v22, 0.0 }
 0x514   : > { %v4144_v34 = vadd.f32 %v4143_v19, %v3930_v33  ;;  %v4475_v41 = vpop.f32.mrf.mxu1  ;;  %v13334_v19 = vld [vmem:[#allocation14_spill] sm:$0xff] }
 0x515   : > { %v3934_v23 = vpop.f32.mrf.mxu2 }
 0x516   : > { %v4319_v36 = vadd.f32 %v4318_v50, %v4144_v34  ;;  %v3935_v63 = vadd.f32 %v3934_v23, %v3744_v46  ;;  %v4326_v43 = vpop.f32.mrf.mxu0  ;;  %v13335_v50 = vld [vmem:[#allocation49_spill] sm:$0xff]  ;;  %v4641_v34 = vsub.f32 %v4639_v24, %v4640_v29 }
 0x517   : > { %5322 = vmatmul.f32.gmra.mxu1 %v4624_v58  ;;  %v3748_v53 = vadd.f32 %v13335_v50, %v13334_v19  ;;  %v13339_v50 = vld [vmem:[#allocation104_spill] sm:$0xff] }
 0x518   : > { %4924 = vmatmul.f32.gmra.mxu3 %v10768_v60  ;;  %v10798_v62 = vadd.f32 %v4471_v61, %v4319_v36  ;;  %v4648_v61 = vand.u32 4294901760, %v4647_v1  ;;  %v10804_v36 = vand.u32 4294901760, %v3152_v4 }
 0x519   : > { %5120 = vmatmul.f32.gmra.mxu0 %v4631_v3  ;;  %v4642_v3 = vand.u32 4294901760, %v4641_v34 }
 0x51a   : > { %13332 = vst [vmem:[#allocation59_spill] sm:$0xff] %v10798_v62  ;;  %4635 = vmatmul.f32.gmra.mxu2 %v4634_v8  ;;  %v4649_v22 = vsub.f32 %v4647_v1, %v4648_v61 }
 0x51b   : > { %v4149_v33 = vpop.f32.mrf.mxu3  ;;  %13336 = vst [vmem:[#allocation64_spill] sm:$0xff] %v10804_v36 }
 0x51c   : > { %v4150_v9 = vadd.f32 %v4149_v33, %v3935_v63  ;;  %v4479_v46 = vpop.f32.mrf.mxu1  ;;  %v4655_v63 = vsub.f32 %v3152_v4, %v10804_v36  ;;  %v13337_v33 = vld [vmem:[#allocation36_spill] sm:$0xff]  ;;  %v4650_v4 = vand.u32 4294901760, %v4649_v22 }
 0x51d   : > { %v3939_v58 = vpop.f32.mrf.mxu2  ;;  %v3153_v19 = vmax.f32 %v13337_v33, 0.0  ;;  %v13342_v22 = vld [vmem:[#allocation48_spill] sm:$0xff] }
 0x51e   : > { %v4323_v23 = vadd.f32 %v4322_v39, %v4150_v9  ;;  %v3940_v60 = vadd.f32 %v3939_v58, %v3748_v53  ;;  %v4330_v35 = vpop.f32.mrf.mxu0  ;;  %v13338_v39 = vld [vmem:[#allocation101_spill] sm:$0xff] }
 0x51f   : > { %5328 = vmatmul.f32.gmra.mxu1 %v4632_v59  ;;  %v3752_v53 = vadd.f32 %v13339_v50, %v13338_v39  ;;  %v3154_v39 = vmax.f32 %v13342_v22, 0.0 }
 0x520   : > { %4928 = vmatmul.f32.gmra.mxu3 %v10777_v17  ;;  %v10807_v47 = vadd.f32 %v4475_v41, %v4323_v23  ;;  %v5870_v41 = vld [vmem:[%s12401_s9 + $0x78] sm:$0xff]  ;;  %v10818_v23 = vand.u32 4294901760, %v3153_v19 }
 0x521   : > { %5125 = vmatmul.f32.gmra.mxu0 %v4639_v24  ;;  %v10816_v34 = vand.u32 4294901760, %v5870_v41 }
 0x522   : > { %4643 = vmatmul.f32.gmra.mxu2 %v4642_v3  ;;  %13340 = vst [vmem:[#allocation62_spill] sm:$0xff] %v10818_v23  ;;  %v4656_v3 = vand.u32 4294901760, %v4655_v63 }
 0x523   : > { %v4155_v8 = vpop.f32.mrf.mxu3  ;;  %6599 = vmatpush.msrb.mxu3 %v10816_v34  ;;  %5876 = vmatpush.msra.mxu0 %v10816_v34 }
 0x524   : > { %v4156_v59 = vadd.f32 %v4155_v8, %v3940_v60  ;;  %v4483_v9 = vpop.f32.mrf.mxu1  ;;  %v10824_v60 = vsub.f32 %v5870_v41, %v10816_v34  ;;  %v4663_v8 = vsub.f32 %v3153_v19, %v10818_v23 }
 0x525   : > { %v3944_v58 = vpop.f32.mrf.mxu2 }
 0x526   : > { %v4327_v62 = vadd.f32 %v4326_v43, %v4156_v59  ;;  %v3945_v38 = vadd.f32 %v3944_v58, %v3752_v53  ;;  %v5051_v24 = vpop.f32.mrf.mxu0  ;;  %6391 = vmatpush.msrb.mxu2 %v10824_v60 }
 0x527   : > { %5334 = vmatmul.f32.gmra.mxu1 %v4640_v29  ;;  %v12689_v29 = vand.u32 4294901760, %v10824_v60 }
 0x528   : > { %4932 = vmatmul.f32.gmra.mxu3 %v10786_v57  ;;  %v10821_v33 = vadd.f32 %v4479_v46, %v4327_v62  ;;  %v4664_v57 = vand.u32 4294901760, %v4663_v8 }
 0x529   : > { %5130 = vmatmul.f32.gmra.mxu0 %v4647_v1  ;;  %v4657_v1 = vsub.f32 %v4655_v63, %v4656_v3  ;;  %v6167_v53 = vsub.f32 %v10824_v60, %v12689_v29 }
 0x52a   : > { %13341 = vst [vmem:[#allocation67_spill] sm:$0xff] %v10821_v33  ;;  %4651 = vmatmul.f32.gmra.mxu2 %v4650_v4  ;;  %v10836_v4 = vand.u32 4294901760, %v3154_v39 }
 0x52b   : > { %v4161_v43 = vpop.f32.mrf.mxu3  ;;  %v6168_v41 = vand.u32 4294901760, %v6167_v53  ;;  %v4658_v19 = vand.u32 4294901760, %v4657_v1 }
 0x52c   : > { %v4162_v62 = vadd.f32 %v4161_v43, %v3945_v38  ;;  %v5245_v46 = vpop.f32.mrf.mxu1  ;;  %13343 = vst [vmem:[#allocation65_spill] sm:$0xff] %v10836_v4  ;;  %v4671_v29 = vsub.f32 %v3154_v39, %v10836_v4 }
 0x52d   : > { %v4524_v50 = vpop.f32.mrf.mxu2  ;;  %6169 = vmatpush.msra.mxu1 %v6168_v41 }
 0x52e   : > { %v4331_v59 = vadd.f32 %v4330_v35, %v4162_v62  ;;  %v4525_v58 = vadd.f32 %v4524_v50, %v10412_v55  ;;  %v5056_v38 = vpop.f32.mrf.mxu0  ;;  %v13345_v35 = vld [vmem:[#allocation19_spill] sm:$0xff]  ;;  %v4665_v50 = vsub.f32 %v4663_v8, %v4664_v57 }
 0x52f   : > { %5340 = vmatmul.f32.gmra.mxu1 %v4648_v61  ;;  %v3155_v62 = vmax.f32 %v13345_v35, 0.0 }
 0x530   : > { %4936 = vmatmul.f32.gmra.mxu3 %v10795_v52  ;;  %v10839_v22 = vadd.f32 %v4483_v9, %v4331_v59  ;;  %v5869_v9 = vld [vmem:[%s12401_s9 + $0x70] sm:$0xff]  ;;  %v4666_v39 = vand.u32 4294901760, %v4665_v50  ;;  %v4672_v59 = vand.u32 4294901760, %v4671_v29 }
 0x531   : > { %5135 = vmatmul.f32.gmra.mxu0 %v4655_v63  ;;  %v10847_v63 = vand.u32 4294901760, %v5869_v9  ;;  %v10849_v1 = vand.u32 4294901760, %v3155_v62 }
 0x532   : > { %13344 = vst [vmem:[#allocation70_spill] sm:$0xff] %v10839_v22  ;;  %4659 = vmatmul.f32.gmra.mxu2 %v4658_v19 }
 0x533   : > { %v4873_v43 = vpop.f32.mrf.mxu3  ;;  %13346 = vst [vmem:[#allocation73_spill] sm:$0xff] %v10849_v1  ;;  %6601 = vmatpush.msrb.mxu3 %v10847_v63  ;;  %5878 = vmatpush.msra.mxu0 %v10847_v63  ;;  %v4679_v19 = vsub.f32 %v3155_v62, %v10849_v1 }
 0x534   : > { %v4874_v55 = vadd.f32 %v4873_v43, %v4525_v58  ;;  %v5251_v61 = vpop.f32.mrf.mxu1  ;;  %v13348_v43 = vld [vmem:[#allocation21_spill] sm:$0xff] }
 0x535   : > { %v4532_v53 = vpop.f32.mrf.mxu2 }
 0x536   : > { %v5052_v33 = vadd.f32 %v5051_v24, %v4874_v55  ;;  %v4533_v52 = vadd.f32 %v4532_v53, %v10426_v0  ;;  %v10855_v24 = vsub.f32 %v5869_v9, %v10847_v63  ;;  %v5061_v0 = vpop.f32.mrf.mxu0 }
 0x537   : > { %5346 = vmatmul.f32.gmra.mxu1 %v4656_v3 }
 0x538   : > { %4940 = vmatmul.f32.gmra.mxu3 %v10804_v36  ;;  %v10852_v58 = vadd.f32 %v5245_v46, %v5052_v33  ;;  %v12694_v41 = vand.u32 4294901760, %v10855_v24  ;;  %6394 = vmatpush.msrb.mxu2 %v10855_v24  ;;  %v3156_v33 = vmax.f32 %v13348_v43, 0.0 }
 0x539   : > { %5140 = vmatmul.f32.gmra.mxu0 %v4663_v8  ;;  %v4673_v8 = vsub.f32 %v4671_v29, %v4672_v59 }
 0x53a   : > { %13347 = vst [vmem:[#allocation68_spill] sm:$0xff] %v10852_v58  ;;  %4667 = vmatmul.f32.gmra.mxu2 %v4666_v39  ;;  %v6173_v50 = vsub.f32 %v10855_v24, %v12694_v41  ;;  %v10867_v36 = vand.u32 4294901760, %v3156_v33  ;;  %v4680_v58 = vand.u32 4294901760, %v4679_v19  ;;  %v13350_v41 = vld [vmem:[#allocation52_spill] sm:$0xff] }
 0x53b   : > { %v4877_v3 = vpop.f32.mrf.mxu3  ;;  %v4674_v62 = vand.u32 4294901760, %v4673_v8 }
 0x53c   : > { %v4878_v46 = vadd.f32 %v4877_v3, %v4533_v52  ;;  %v5257_v55 = vpop.f32.mrf.mxu1  ;;  %v6174_v39 = vand.u32 4294901760, %v6173_v50  ;;  %13349 = vst [vmem:[#allocation74_spill] sm:$0xff] %v10867_v36  ;;  %v4687_v3 = vsub.f32 %v3156_v33, %v10867_v36 }
 0x53d   : > { %v4540_v35 = vpop.f32.mrf.mxu2 }
 0x53e   : > { %v5057_v53 = vadd.f32 %v5056_v38, %v4878_v46  ;;  %v4541_v9 = vadd.f32 %v4540_v35, %v10445_v30  ;;  %6175 = vmatpush.msra.mxu1 %v6174_v39  ;;  %v3157_v38 = vmax.f32 %v13350_v41, 0.0  ;;  %v4681_v30 = vsub.f32 %v4679_v19, %v4680_v58 }
 0x53f   : > { %5352 = vmatmul.f32.gmra.mxu1 %v4664_v57  ;;  %v5066_v57 = vpop.f32.mrf.mxu0  ;;  %v4688_v33 = vand.u32 4294901760, %v4687_v3 }
 0x540   : > { %4944 = vmatmul.f32.gmra.mxu3 %v10818_v23  ;;  %v10870_v43 = vadd.f32 %v5251_v61, %v5057_v53  ;;  %v5868_v61 = vld [vmem:[%s12401_s9 + $0x68] sm:$0xff]  ;;  %v10880_v53 = vand.u32 4294901760, %v3157_v38  ;;  %v4682_v41 = vand.u32 4294901760, %v4681_v30 }
 0x541   : > { %5145 = vmatmul.f32.gmra.mxu0 %v4671_v29  ;;  %v10878_v29 = vand.u32 4294901760, %v5868_v61 }
 0x542   : > { %4675 = vmatmul.f32.gmra.mxu2 %v4674_v62  ;;  %13351 = vst [vmem:[#allocation71_spill] sm:$0xff] %v10880_v53  ;;  %v4695_v39 = vsub.f32 %v3157_v38, %v10880_v53  ;;  %v13353_v62 = vld [vmem:[#allocation30_spill] sm:$0xff] }
 0x543   : > { %v4881_v52 = vpop.f32.mrf.mxu3  ;;  %6603 = vmatpush.msrb.mxu3 %v10878_v29  ;;  %5880 = vmatpush.msra.mxu0 %v10878_v29 }
 0x544   : > { %v4882_v46 = vadd.f32 %v4881_v52, %v4541_v9  ;;  %v5263_v8 = vpop.f32.mrf.mxu1  ;;  %v3158_v52 = vmax.f32 %v13353_v62, 0.0 }
 0x545   : > { %v4548_v35 = vpop.f32.mrf.mxu2 }
 0x546   : > { %v5062_v50 = vadd.f32 %v5061_v0, %v4882_v46  ;;  %v4549_v22 = vadd.f32 %v4548_v35, %v10459_v7  ;;  %v10886_v0 = vsub.f32 %v5868_v61, %v10878_v29  ;;  %v4689_v46 = vsub.f32 %v4687_v3, %v4688_v33 }
 0x547   : > { %5358 = vmatmul.f32.gmra.mxu1 %v4672_v59  ;;  %v5071_v61 = vpop.f32.mrf.mxu0 }
 0x548   : > { %4948 = vmatmul.f32.gmra.mxu3 %v10836_v4  ;;  %v10883_v9 = vadd.f32 %v5257_v55, %v5062_v50  ;;  %v12697_v59 = vand.u32 4294901760, %v10886_v0  ;;  %6397 = vmatpush.msrb.mxu2 %v10886_v0  ;;  %v10898_v4 = vand.u32 4294901760, %v3158_v52  ;;  %v4690_v38 = vand.u32 4294901760, %v4689_v46 }
 0x549   : > { %5150 = vmatmul.f32.gmra.mxu0 %v4679_v19 }
 0x54a   : > { %13352 = vst [vmem:[#allocation76_spill] sm:$0xff] %v10883_v9  ;;  %4683 = vmatmul.f32.gmra.mxu2 %v4682_v41  ;;  %v6179_v30 = vsub.f32 %v10886_v0, %v12697_v59  ;;  %v4696_v9 = vand.u32 4294901760, %v4695_v39 }
 0x54b   : > { %v4885_v7 = vpop.f32.mrf.mxu3  ;;  %13354 = vst [vmem:[#allocation75_spill] sm:$0xff] %v10898_v4 }
 0x54c   : > { %v4886_v55 = vadd.f32 %v4885_v7, %v4549_v22  ;;  %v6180_v41 = vand.u32 4294901760, %v6179_v30  ;;  %v5269_v22 = vpop.f32.mrf.mxu1 }
 0x54d   : > { %v4556_v19 = vpop.f32.mrf.mxu2 }
 0x54e   : > { %v5067_v35 = vadd.f32 %v5066_v57, %v4886_v55  ;;  %v4557_v50 = vadd.f32 %v4556_v19, %v10478_v31  ;;  %6181 = vmatpush.msra.mxu1 %v6180_v41  ;;  %v4703_v57 = vsub.f32 %v3158_v52, %v10898_v4  ;;  %v13355_v55 = vld [vmem:[#allocation5_spill] sm:$0xff] }
 0x54f   : > { %5364 = vmatmul.f32.gmra.mxu1 %v4680_v58  ;;  %v3159_v31 = vmax.f32 %v13355_v55, 0.0  ;;  %v4697_v58 = vsub.f32 %v4695_v39, %v4696_v9 }
 0x550   : > { %4952 = vmatmul.f32.gmra.mxu3 %v10849_v1  ;;  %v10901_v62 = vadd.f32 %v5263_v8, %v5067_v35  ;;  %v5867_v8 = vld [vmem:[%s12401_s9 + $0x60] sm:$0xff]  ;;  %v4704_v35 = vand.u32 4294901760, %v4703_v57 }
 0x551   : > { %5155 = vmatmul.f32.gmra.mxu0 %v4687_v3  ;;  %v10909_v46 = vand.u32 4294901760, %v5867_v8  ;;  %v10911_v3 = vand.u32 4294901760, %v3159_v31  ;;  %v4698_v52 = vand.u32 4294901760, %v4697_v58 }
 0x552   : > { %4691 = vmatmul.f32.gmra.mxu2 %v4690_v38 }
 0x553   : > { %v4889_v7 = vpop.f32.mrf.mxu3  ;;  %13356 = vst [vmem:[#allocation15_spill] sm:$0xff] %v10911_v3  ;;  %6605 = vmatpush.msrb.mxu3 %v10909_v46  ;;  %5882 = vmatpush.msra.mxu0 %v10909_v46 }
 0x554   : > { %v4890_v19 = vadd.f32 %v4889_v7, %v4557_v50  ;;  %v5076_v50 = vpop.f32.mrf.mxu0  ;;  %v4711_v7 = vsub.f32 %v3159_v31, %v10911_v3 }
 0x555   : > { %v4564_v30 = vpop.f32.mrf.mxu2 }
 0x556   : > { %v5072_v59 = vadd.f32 %v5071_v61, %v4890_v19  ;;  %v4565_v23 = vadd.f32 %v4564_v30, %v10492_v13  ;;  %v10917_v61 = vsub.f32 %v5867_v8, %v10909_v46  ;;  %v5275_v13 = vpop.f32.mrf.mxu1  ;;  %v4712_v31 = vand.u32 4294901760, %v4711_v7 }
 0x557   : > { %5370 = vmatmul.f32.gmra.mxu1 %v4688_v33 }
 0x558   : > { %4956 = vmatmul.f32.gmra.mxu3 %v10867_v36  ;;  %v10914_v41 = vadd.f32 %v5269_v22, %v5072_v59  ;;  %v12704_v38 = vand.u32 4294901760, %v10917_v61  ;;  %6400 = vmatpush.msrb.mxu2 %v10917_v61  ;;  %v13358_v59 = vld [vmem:[#allocation6_spill] sm:$0xff] }
 0x559   : > { %5160 = vmatmul.f32.gmra.mxu0 %v4695_v39  ;;  %v3160_v22 = vmax.f32 %v13358_v59, 0.0  ;;  %v4705_v39 = vsub.f32 %v4703_v57, %v4704_v35 }
 0x55a   : > { %13357 = vst [vmem:[#allocation82_spill] sm:$0xff] %v10914_v41  ;;  %4699 = vmatmul.f32.gmra.mxu2 %v4698_v52  ;;  %v6185_v58 = vsub.f32 %v10917_v61, %v12704_v38 }
 0x55b   : > { %v4893_v33 = vpop.f32.mrf.mxu3  ;;  %v10929_v36 = vand.u32 4294901760, %v3160_v22  ;;  %v4706_v41 = vand.u32 4294901760, %v4705_v39 }
 0x55c   : > { %v4894_v55 = vadd.f32 %v4893_v33, %v4565_v23  ;;  %v6186_v52 = vand.u32 4294901760, %v6185_v58  ;;  %v5081_v23 = vpop.f32.mrf.mxu0 }
 0x55d   : > { %v4572_v19 = vpop.f32.mrf.mxu2  ;;  %13359 = vst [vmem:[#allocation8_spill] sm:$0xff] %v10929_v36  ;;  %v4719_v59 = vsub.f32 %v3160_v22, %v10929_v36 }
 0x55e   : > { %v5077_v30 = vadd.f32 %v5076_v50, %v4894_v55  ;;  %v4573_v8 = vadd.f32 %v4572_v19, %v10511_v56  ;;  %6187 = vmatpush.msra.mxu1 %v6186_v52  ;;  %v13360_v50 = vld [vmem:[#allocation38_spill] sm:$0xff]  ;;  %v5281_v19 = vpop.f32.mrf.mxu1 }
 0x55f   : > { %5376 = vmatmul.f32.gmra.mxu1 %v4696_v9  ;;  %v3161_v55 = vmax.f32 %v13360_v50, 0.0  ;;  %v4713_v9 = vsub.f32 %v4711_v7, %v4712_v31  ;;  %v4720_v39 = vand.u32 4294901760, %v4719_v59 }
 0x560   : > { %4960 = vmatmul.f32.gmra.mxu3 %v10880_v53  ;;  %v10932_v1 = vadd.f32 %v5275_v13, %v5077_v30  ;;  %v5866_v13 = vld [vmem:[%s12401_s9 + $0x58] sm:$0xff] }
 0x561   : > { %5165 = vmatmul.f32.gmra.mxu0 %v4703_v57  ;;  %v10940_v57 = vand.u32 4294901760, %v5866_v13  ;;  %v4714_v22 = vand.u32 4294901760, %v4713_v9  ;;  %v4721_v50 = vsub.f32 %v4719_v59, %v4720_v39 }
 0x562   : > { %4707 = vmatmul.f32.gmra.mxu2 %v4706_v41  ;;  %v10942_v41 = vand.u32 4294901760, %v3161_v55 }
 0x563   : > { %v4897_v33 = vpop.f32.mrf.mxu3  ;;  %6607 = vmatpush.msrb.mxu3 %v10940_v57  ;;  %5884 = vmatpush.msra.mxu0 %v10940_v57 }
 0x564   : > { %v4898_v56 = vadd.f32 %v4897_v33, %v4573_v8  ;;  %v10948_v8 = vsub.f32 %v5866_v13, %v10940_v57  ;;  %v4727_v52 = vsub.f32 %v3161_v55, %v10942_v41  ;;  %v4722_v55 = vand.u32 4294901760, %v4721_v50  ;;  %v5865_v50 = vld [vmem:[%s12401_s9 + $0x50] sm:$0xff] }
 0x565   : > { %v4580_v58 = vpop.f32.mrf.mxu2 }
 0x566   : > { %v5082_v38 = vadd.f32 %v5081_v23, %v4898_v56  ;;  %v4581_v53 = vadd.f32 %v4580_v58, %v10525_v27  ;;  %6403 = vmatpush.msrb.mxu2 %v10948_v8  ;;  %v13361_v23 = vld [vmem:[#allocation10_spill] sm:$0xff]  ;;  %v5287_v13 = vpop.f32.mrf.mxu1 }
 0x567   : > { %5382 = vmatmul.f32.gmra.mxu1 %v4704_v35  ;;  %v12709_v35 = vand.u32 4294901760, %v10948_v8  ;;  %v3162_v33 = vmax.f32 %v13361_v23, 0.0  ;;  %v4728_v23 = vand.u32 4294901760, %v4727_v52 }
 0x568   : > { %4964 = vmatmul.f32.gmra.mxu3 %v10898_v4  ;;  %v10945_v30 = vadd.f32 %v5281_v19, %v5082_v38 }
 0x569   : > { %5170 = vmatmul.f32.gmra.mxu0 %v4711_v7  ;;  %v5086_v7 = vpop.f32.mrf.mxu0  ;;  %v6191_v9 = vsub.f32 %v10948_v8, %v12709_v35  ;;  %v10960_v4 = vand.u32 4294901760, %v3162_v33 }
 0x56a   : > { %4715 = vmatmul.f32.gmra.mxu2 %v4714_v22 }
 0x56b   : > { %v4901_v27 = vpop.f32.mrf.mxu3  ;;  %v6192_v22 = vand.u32 4294901760, %v6191_v9  ;;  %13362 = vst [vmem:[#allocation77_spill] sm:$0xff] %v10960_v4  ;;  %v4735_v35 = vsub.f32 %v3162_v33, %v10960_v4 }
 0x56c   : > { %v4902_v38 = vadd.f32 %v4901_v27, %v4581_v53 }
 0x56d   : > { %v4588_v56 = vpop.f32.mrf.mxu2  ;;  %6193 = vmatpush.msra.mxu1 %v6192_v22 }
 0x56e   : > { %v5087_v19 = vadd.f32 %v5086_v7, %v4902_v38  ;;  %v4589_v58 = vadd.f32 %v4588_v56, %v10544_v10  ;;  %v13363_v38 = vld [vmem:[#allocation43_spill] sm:$0xff] }
 0x56f   : > { %5388 = vmatmul.f32.gmra.mxu1 %v4712_v31  ;;  %v3163_v7 = vmax.f32 %v13363_v38, 0.0  ;;  %v4729_v31 = vsub.f32 %v4727_v52, %v4728_v23 }
 0x570   : > { %4968 = vmatmul.f32.gmra.mxu3 %v10911_v3  ;;  %v10963_v53 = vadd.f32 %v5287_v13, %v5087_v19  ;;  %v10973_v19 = vand.u32 4294901760, %v5865_v50  ;;  %v4736_v13 = vand.u32 4294901760, %v4735_v35 }
 0x571   : > { %5175 = vmatmul.f32.gmra.mxu0 %v4719_v59  ;;  %v10975_v59 = vand.u32 4294901760, %v3163_v7  ;;  %v4730_v33 = vand.u32 4294901760, %v4729_v31 }
 0x572   : > { %4723 = vmatmul.f32.gmra.mxu2 %v4722_v55  ;;  %6609 = vmatpush.msrb.mxu3 %v10973_v19  ;;  %v13365_v55 = vld [vmem:[#allocation45_spill] sm:$0xff] }
 0x573   : > { %v4905_v27 = vpop.f32.mrf.mxu3  ;;  %5886 = vmatpush.msra.mxu0 %v10973_v19  ;;  %v4743_v22 = vsub.f32 %v3163_v7, %v10975_v59 }
 0x574   : > { %v10967_v10 = vadd.f32 %v4905_v27, %v4589_v58  ;;  %v10979_v58 = vsub.f32 %v5865_v50, %v10973_v19  ;;  %v3164_v27 = vmax.f32 %v13365_v55, 0.0  ;;  %v13367_v55 = vld [vmem:[#allocation51_spill] sm:$0xff] }
 0x575   : > { %v4596_v56 = vpop.f32.mrf.mxu2  ;;  %v4744_v7 = vand.u32 4294901760, %v4743_v22 }
 0x576   : > { %13364 = vst [vmem:[#allocation16_spill] sm:$0xff] %v10967_v10  ;;  %v4597_v9 = vadd.f32 %v4596_v56, %v10558_v14  ;;  %6406 = vmatpush.msrb.mxu2 %v10979_v58 }
 0x577   : > { %5394 = vmatmul.f32.gmra.mxu1 %v4720_v39  ;;  %v12714_v39 = vand.u32 4294901760, %v10979_v58 }
 0x578   : > { %4972 = vmatmul.f32.gmra.mxu3 %v10929_v36  ;;  %v10993_v36 = vand.u32 4294901760, %v3164_v27 }
 0x579   : > { %5180 = vmatmul.f32.gmra.mxu0 %v4727_v52  ;;  %v4737_v52 = vsub.f32 %v4735_v35, %v4736_v13  ;;  %v6197_v56 = vsub.f32 %v10979_v58, %v12714_v39  ;;  %v4745_v39 = vsub.f32 %v4743_v22, %v4744_v7 }
 0x57a   : > { %4731 = vmatmul.f32.gmra.mxu2 %v4730_v33 }
 0x57b   : > { %v4909_v14 = vpop.f32.mrf.mxu3  ;;  %v6198_v33 = vand.u32 4294901760, %v6197_v56  ;;  %v4738_v10 = vand.u32 4294901760, %v4737_v52 }
 0x57c   : > { %v10987_v38 = vadd.f32 %v4909_v14, %v4597_v9  ;;  %v4751_v14 = vsub.f32 %v3164_v27, %v10993_v36 }
 0x57d   : > { %v4604_v31 = vpop.f32.mrf.mxu2  ;;  %6199 = vmatpush.msra.mxu1 %v6198_v33  ;;  %v13370_v33 = vld [vmem:[#allocation13_spill] sm:$0xff] }
 0x57e   : > { %13366 = vst [vmem:[#allocation12_spill] sm:$0xff] %v10987_v38  ;;  %v4605_v50 = vadd.f32 %v4604_v31, %v10583_v2  ;;  %v3165_v38 = vmax.f32 %v13367_v55, 0.0  ;;  %v5864_v31 = vld [vmem:[%s12401_s9 + $0x48] sm:$0xff]  ;;  %v4752_v27 = vand.u32 4294901760, %v4751_v14 }
 0x57f   : > { %5400 = vmatmul.f32.gmra.mxu1 %v4728_v23  ;;  %v11004_v52 = vand.u32 4294901760, %v5864_v31 }
 0x580   : > { %4976 = vmatmul.f32.gmra.mxu3 %v10942_v41 }
 0x581   : > { %5185 = vmatmul.f32.gmra.mxu0 %v4735_v35  ;;  %v11006_v35 = vand.u32 4294901760, %v3165_v38  ;;  %v11010_v56 = vsub.f32 %v5864_v31, %v11004_v52  ;;  %6611 = vmatpush.msrb.mxu3 %v11004_v52 }
 0x582   : > { %4739 = vmatmul.f32.gmra.mxu2 %v4738_v10  ;;  %v4746_v10 = vand.u32 4294901760, %v4745_v39  ;;  %5888 = vmatpush.msra.mxu0 %v11004_v52 }
 0x583   : > { %v4913_v9 = vpop.f32.mrf.mxu3  ;;  %13369 = vst [vmem:[#allocation83_spill] sm:$0xff] %v11006_v35  ;;  %6409 = vmatpush.msrb.mxu2 %v11010_v56 }
 0x584   : > { %v10998_v3 = vadd.f32 %v4913_v9, %v4605_v50  ;;  %v4759_v50 = vsub.f32 %v3165_v38, %v11006_v35  ;;  %v3166_v9 = vmax.f32 %v13370_v33, 0.0 }
 0x585   : > { %v4612_v2 = vpop.f32.mrf.mxu2 }
 0x586   : > { %13368 = vst [vmem:[#allocation103_spill] sm:$0xff] %v10998_v3  ;;  %v4613_v23 = vadd.f32 %v4612_v2, %v10601_v15  ;;  %v4760_v38 = vand.u32 4294901760, %v4759_v50 }
 0x587   : > { %5406 = vmatmul.f32.gmra.mxu1 %v4736_v13  ;;  %v12717_v13 = vand.u32 4294901760, %v11010_v56 }
 0x588   : > { %4980 = vmatmul.f32.gmra.mxu3 %v10960_v4  ;;  %v11024_v4 = vand.u32 4294901760, %v3166_v9 }
 0x589   : > { %5190 = vmatmul.f32.gmra.mxu0 %v4743_v22  ;;  %v4753_v22 = vsub.f32 %v4751_v14, %v4752_v27  ;;  %v6203_v2 = vsub.f32 %v11010_v56, %v12717_v13 }
 0x58a   : > { %4747 = vmatmul.f32.gmra.mxu2 %v4746_v10  ;;  %13372 = vst [vmem:[#allocation102_spill] sm:$0xff] %v11024_v4 }
 0x58b   : > { %v4917_v15 = vpop.f32.mrf.mxu3  ;;  %v6204_v10 = vand.u32 4294901760, %v6203_v2  ;;  %v4754_v3 = vand.u32 4294901760, %v4753_v22 }
 0x58c   : > { %v11018_v39 = vadd.f32 %v4917_v15, %v4613_v23  ;;  %v4767_v15 = vsub.f32 %v3166_v9, %v11024_v4 }
 0x58d   : > { %v4620_v55 = vpop.f32.mrf.mxu2  ;;  %6205 = vmatpush.msra.mxu1 %v6204_v10 }
 0x58e   : > { %13371 = vst [vmem:[#allocation85_spill] sm:$0xff] %v11018_v39  ;;  %v4621_v31 = vadd.f32 %v4620_v55, %v10623_v28  ;;  %v4761_v39 = vsub.f32 %v4759_v50, %v4760_v38 }
 0x58f   : > { %5412 = vmatmul.f32.gmra.mxu1 %v4744_v7  ;;  %v5863_v7 = vld [vmem:[%s12401_s9 + $0x40] sm:$0xff] }
 0x590   : > { %4984 = vmatmul.f32.gmra.mxu3 %v10975_v59  ;;  %v11034_v55 = vand.u32 4294901760, %v5863_v7 }
 0x591   : > { %5195 = vmatmul.f32.gmra.mxu0 %v4751_v14  ;;  %v4762_v14 = vand.u32 4294901760, %v4761_v39 }
 0x592   : > { %4755 = vmatmul.f32.gmra.mxu2 %v4754_v3  ;;  %v4768_v3 = vand.u32 4294901760, %v4767_v15  ;;  %v11038_v9 = vsub.f32 %v5863_v7, %v11034_v55  ;;  %6613 = vmatpush.msrb.mxu3 %v11034_v55 }
 0x593   : > { %v4921_v23 = vpop.f32.mrf.mxu3  ;;  %5890 = vmatpush.msra.mxu0 %v11034_v55 }
 0x594   : > { %v11028_v33 = vadd.f32 %v4921_v23, %v4621_v31  ;;  %6412 = vmatpush.msrb.mxu2 %v11038_v9  ;;  %v4769_v22 = vsub.f32 %v4767_v15, %v4768_v3 }
 0x595   : > { %v4628_v13 = vpop.f32.mrf.mxu2 }
 0x596   : > { %v4629_v28 = vadd.f32 %v4628_v13, %v10646_v12  ;;  %v12721_v13 = vand.u32 4294901760, %v11038_v9  ;;  %v4770_v10 = vand.u32 4294901760, %v4769_v22 }
 0x597   : > { %5418 = vmatmul.f32.gmra.mxu1 %v4752_v27 }
 0x598   : > { %4988 = vmatmul.f32.gmra.mxu3 %v10993_v36 }
 0x599   : > { %5200 = vmatmul.f32.gmra.mxu0 %v4759_v50  ;;  %v6209_v50 = vsub.f32 %v11038_v9, %v12721_v13 }
 0x59a   : > { %4763 = vmatmul.f32.gmra.mxu2 %v4762_v14 }
 0x59b   : > { %v4925_v12 = vpop.f32.mrf.mxu3  ;;  %v6210_v31 = vand.u32 4294901760, %v6209_v50 }
 0x59c   : > { %v11044_v27 = vadd.f32 %v4925_v12, %v4629_v28  ;;  %v5862_v12 = vld [vmem:[%s12401_s9 + $0x38] sm:$0xff] }
 0x59d   : > { %v4636_v2 = vpop.f32.mrf.mxu2  ;;  %6211 = vmatpush.msra.mxu1 %v6210_v31 }
 0x59e   : > { %13373 = vst [vmem:[#allocation25_spill] sm:$0xff] %v11044_v27  ;;  %v4637_v39 = vadd.f32 %v4636_v2, %v10668_v44  ;;  %v11057_v44 = vand.u32 4294901760, %v5862_v12 }
 0x59f   : > { %5424 = vmatmul.f32.gmra.mxu1 %v4760_v38 }
 0x5a0   : > { %4992 = vmatmul.f32.gmra.mxu3 %v11006_v35  ;;  %5892 = vmatpush.msra.mxu0 %v11057_v44  ;;  %v11062_v38 = vsub.f32 %v5862_v12, %v11057_v44 }
 0x5a1   : > { %5205 = vmatmul.f32.gmra.mxu0 %v4767_v15  ;;  %6615 = vmatpush.msrb.mxu3 %v11057_v44 }
 0x5a2   : > { %4771 = vmatmul.f32.gmra.mxu2 %v4770_v10 }
 0x5a3   : > { %v4929_v23 = vpop.f32.mrf.mxu3  ;;  %6415 = vmatpush.msrb.mxu2 %v11062_v38 }
 0x5a4   : > { %v11051_v7 = vadd.f32 %v4929_v23, %v4637_v39 }
 0x5a5   : > { %v4644_v28 = vpop.f32.mrf.mxu2 }
 0x5a6   : > { %13374 = vst [vmem:[#allocation79_spill] sm:$0xff] %v11051_v7  ;;  %v4645_v14 = vadd.f32 %v4644_v28, %v10681_v20  ;;  %v12719_v20 = vand.u32 4294901760, %v11062_v38 }
 0x5a7   : > { %5430 = vmatmul.f32.gmra.mxu1 %v4768_v3 }
 0x5a8   : > { %4996 = vmatmul.f32.gmra.mxu3 %v11024_v4  ;;  %v6215_v2 = vsub.f32 %v11062_v38, %v12719_v20  ;;  %v13392_v4 = vld [vmem:[#allocation22_spill] sm:$0xff] }
 0x5aa   : > { %5499 = vmatmul.f32.vlgmr.msra.gmra.mxu2 %v10617_v51  ;;  %v6216_v39 = vand.u32 4294901760, %v6215_v2 }
 0x5ab   : > { %v4933_v15 = vpop.f32.mrf.mxu3 }
 0x5ac   : > { %v11068_v22 = vadd.f32 %v4933_v15, %v4645_v14  ;;  %6217 = vmatpush.msra.mxu1 %v6216_v39  ;;  %v5861_v14 = vld [vmem:[%s12401_s9 + $0x30] sm:$0xff] }
 0x5ad   : > { %v4652_v3 = vpop.f32.mrf.mxu2  ;;  %v11082_v12 = vand.u32 4294901760, %v5861_v14 }
 0x5ae   : > { %13375 = vst [vmem:[#allocation80_spill] sm:$0xff] %v11068_v22  ;;  %v4653_v50 = vadd.f32 %v4652_v3, %v10690_v6 }
 0x5af   : > { %5894 = vmatpush.msra.mxu0 %v11082_v12  ;;  %6617 = vmatpush.msrb.mxu3 %v11082_v12 }
 0x5b0   : > { %5660 = vmatmul.f32.vlgmr.msra.gmra.mxu3 %v10617_v51  ;;  %v11087_v51 = vsub.f32 %v5861_v14, %v11082_v12  ;;  %v5860_v14 = vld [vmem:[%s12401_s9 + $0x28] sm:$0xff] }
 0x5b2   : > { %5503 = vmatmul.f32.gmra.mxu2 %v10638_v26 }
 0x5b3   : > { %v4937_v31 = vpop.f32.mrf.mxu3  ;;  %6418 = vmatpush.msrb.mxu2 %v11087_v51 }
 0x5b4   : > { %v11076_v10 = vadd.f32 %v4937_v31, %v4653_v50 }
 0x5b5   : > { %v4660_v23 = vpop.f32.mrf.mxu2 }
 0x5b6   : > { %13376 = vst [vmem:[#allocation24_spill] sm:$0xff] %v11076_v10  ;;  %v4661_v28 = vadd.f32 %v4660_v23, %v10699_v54  ;;  %v12718_v54 = vand.u32 4294901760, %v11087_v51 }
 0x5b8   : > { %5664 = vmatmul.f32.gmra.mxu3 %v10638_v26  ;;  %v6221_v26 = vsub.f32 %v11087_v51, %v12718_v54 }
 0x5ba   : > { %5507 = vmatmul.f32.gmra.mxu2 %v10664_v42  ;;  %v6222_v50 = vand.u32 4294901760, %v6221_v26 }
 0x5bb   : > { %v4941_v6 = vpop.f32.mrf.mxu3 }
 0x5bc   : > { %v11093_v15 = vadd.f32 %v4941_v6, %v4661_v28  ;;  %6223 = vmatpush.msra.mxu1 %v6222_v50  ;;  %v11107_v6 = vand.u32 4294901760, %v5860_v14 }
 0x5bd   : > { %v4668_v3 = vpop.f32.mrf.mxu2 }
 0x5be   : > { %13377 = vst [vmem:[#allocation86_spill] sm:$0xff] %v11093_v15  ;;  %v4669_v2 = vadd.f32 %v4668_v3, %v10708_v5  ;;  %5896 = vmatpush.msra.mxu0 %v11107_v6  ;;  %6619 = vmatpush.msrb.mxu3 %v11107_v6  ;;  %v11116_v5 = vpop.f32.mrf.mxu1 }
 0x5c0   : > { %5668 = vmatmul.f32.gmra.mxu3 %v10664_v42  ;;  %v11112_v42 = vsub.f32 %v5860_v14, %v11107_v6 }
 0x5c2   : > { %5511 = vmatmul.f32.gmra.mxu2 %v10678_v48  ;;  %v12720_v3 = vand.u32 4294901760, %v11112_v42 }
 0x5c3   : > { %v4945_v39 = vpop.f32.mrf.mxu3  ;;  %6421 = vmatpush.msrb.mxu2 %v11112_v42 }
 0x5c4   : > { %v11101_v31 = vadd.f32 %v4945_v39, %v4669_v2 }
 0x5c5   : > { %v4676_v23 = vpop.f32.mrf.mxu2 }
 0x5c6   : > { %13378 = vst [vmem:[#allocation88_spill] sm:$0xff] %v11101_v31  ;;  %v4677_v28 = vadd.f32 %v4676_v23, %v10717_v16  ;;  %v11128_v23 = vpop.f32.mrf.mxu0 }
 0x5c8   : > { %5672 = vmatmul.f32.gmra.mxu3 %v10678_v48  ;;  %v6227_v48 = vsub.f32 %v11112_v42, %v12720_v3 }
 0x5ca   : > { %5515 = vmatmul.f32.gmra.mxu2 %v10687_v18  ;;  %v6228_v39 = vand.u32 4294901760, %v6227_v48 }
 0x5cb   : > { %v4949_v16 = vpop.f32.mrf.mxu3 }
 0x5cc   : > { %v11120_v26 = vadd.f32 %v4949_v16, %v4677_v28  ;;  %6229 = vmatpush.msra.mxu1 %v6228_v39  ;;  %v11132_v28 = vpop.f32.mrf.mxu1 }
 0x5cd   : > { %v4684_v2 = vpop.f32.mrf.mxu2 }
 0x5ce   : > { %13379 = vst [vmem:[#allocation41_spill] sm:$0xff] %v11120_v26  ;;  %v4685_v50 = vadd.f32 %v4684_v2, %v10726_v25  ;;  %v5859_v25 = vld [vmem:[%s12401_s9 + $0x20] sm:$0xff]  ;;  %v11151_v39 = vpop.f32.mrf.mxu0  ;;  %v13385_v26 = vld [vmem:[#allocation23_spill] sm:$0xff] }
 0x5cf   : > { %v11138_v2 = vand.u32 4294901760, %v5859_v25 }
 0x5d0   : > { %5676 = vmatmul.f32.gmra.mxu3 %v10687_v18 }
 0x5d1   : > { %5898 = vmatpush.msra.mxu0 %v11138_v2  ;;  %v11143_v18 = vsub.f32 %v5859_v25, %v11138_v2  ;;  %6621 = vmatpush.msrb.mxu3 %v11138_v2 }
 0x5d2   : > { %5519 = vmatmul.f32.gmra.mxu2 %v10696_v45 }
 0x5d3   : > { %v4953_v14 = vpop.f32.mrf.mxu3  ;;  %6424 = vmatpush.msrb.mxu2 %v11143_v18 }
 0x5d4   : > { %v11130_v54 = vadd.f32 %v4953_v14, %v4685_v50  ;;  %v11157_v25 = vpop.f32.mrf.mxu1 }
 0x5d5   : > { %v4692_v16 = vpop.f32.mrf.mxu2 }
 0x5d6   : > { %13380 = vst [vmem:[#allocation89_spill] sm:$0xff] %v11130_v54  ;;  %v4693_v20 = vadd.f32 %v4692_v16, %v10735_v49  ;;  %v12722_v49 = vand.u32 4294901760, %v11143_v18  ;;  %v11167_v54 = vpop.f32.mrf.mxu0 }
 0x5d8   : > { %5680 = vmatmul.f32.gmra.mxu3 %v10696_v45  ;;  %v6233_v45 = vsub.f32 %v11143_v18, %v12722_v49  ;;  %v5858_v49 = vld [vmem:[%s12401_s9 + $0x18] sm:$0xff] }
 0x5da   : > { %5523 = vmatmul.f32.gmra.mxu2 %v10705_v32  ;;  %v6234_v3 = vand.u32 4294901760, %v6233_v45 }
 0x5db   : > { %v4957_v48 = vpop.f32.mrf.mxu3 }
 0x5dc   : > { %v11149_v50 = vadd.f32 %v4957_v48, %v4693_v20  ;;  %6235 = vmatpush.msra.mxu1 %v6234_v3 }
 0x5dd   : > { %v4700_v14 = vpop.f32.mrf.mxu2 }
 0x5de   : > { %13381 = vst [vmem:[#allocation91_spill] sm:$0xff] %v11149_v50  ;;  %v4701_v16 = vadd.f32 %v4700_v14, %v10744_v11  ;;  %v11169_v11 = vand.u32 4294901760, %v5858_v49 }
 0x5e0   : > { %5684 = vmatmul.f32.gmra.mxu3 %v10705_v32  ;;  %v11172_v32 = vpop.f32.mrf.mxu1  ;;  %5900 = vmatpush.msra.mxu0 %v11169_v11 }
 0x5e1   : > { %6623 = vmatpush.msrb.mxu3 %v11169_v11 }
 0x5e2   : > { %5527 = vmatmul.f32.gmra.mxu2 %v10714_v21 }
 0x5e3   : > { %v4961_v13 = vpop.f32.mrf.mxu3 }
 0x5e4   : > { %v11161_v20 = vadd.f32 %v4961_v13, %v4701_v16  ;;  %v11176_v13 = vsub.f32 %v5858_v49, %v11169_v11  ;;  %v13384_v16 = vld [vmem:[#allocation37_spill] sm:$0xff] }
 0x5e5   : > { %v4708_v48 = vpop.f32.mrf.mxu2 }
 0x5e6   : > { %13382 = vst [vmem:[#allocation57_spill] sm:$0xff] %v11161_v20  ;;  %v4709_v50 = vadd.f32 %v4708_v48, %v10753_v37  ;;  %v12723_v3 = vand.u32 4294901760, %v11176_v13  ;;  %6427 = vmatpush.msrb.mxu2 %v11176_v13  ;;  %v11189_v20 = vpop.f32.mrf.mxu0 }
 0x5e8   : > { %5688 = vmatmul.f32.gmra.mxu3 %v10714_v21  ;;  %v6239_v21 = vsub.f32 %v11176_v13, %v12723_v3  ;;  %v11192_v31 = vpop.f32.mrf.mxu1  ;;  %v13391_v3 = vld [vmem:[#allocation28_spill] sm:$0xff] }
 0x5ea   : > { %5531 = vmatmul.f32.gmra.mxu2 %v10723_v40  ;;  %v6240_v49 = vand.u32 4294901760, %v6239_v21 }
 0x5eb   : > { %v4965_v37 = vpop.f32.mrf.mxu3 }
 0x5ec   : > { %v11182_v14 = vadd.f32 %v4965_v37, %v4709_v50  ;;  %6241 = vmatpush.msra.mxu1 %v6240_v49 }
 0x5ed   : > { %v4716_v45 = vpop.f32.mrf.mxu2 }
 0x5ee   : > { %13383 = vst [vmem:[#allocation92_spill] sm:$0xff] %v11182_v14  ;;  %v4717_v48 = vadd.f32 %v4716_v45, %v13384_v16  ;;  %v13387_v14 = vld [vmem:[#allocation17_spill] sm:$0xff]  ;;  %v5857_v45 = vld [vmem:[%s12401_s9 + $0x10] sm:$0xff]  ;;  %v11209_v16 = vpop.f32.mrf.mxu0 }
 0x5ef   : > { %v11200_v21 = vand.u32 4294901760, %v5857_v45 }
 0x5f0   : > { %5692 = vmatmul.f32.gmra.mxu3 %v10723_v40 }
 0x5f1   : > { %5902 = vmatpush.msra.mxu0 %v11200_v21  ;;  %v11205_v40 = vsub.f32 %v5857_v45, %v11200_v21  ;;  %6625 = vmatpush.msrb.mxu3 %v11200_v21 }
 0x5f2   : > { %5535 = vmatmul.f32.gmra.mxu2 %v13385_v26 }
 0x5f3   : > { %v4969_v15 = vpop.f32.mrf.mxu3  ;;  %6430 = vmatpush.msrb.mxu2 %v11205_v40 }
 0x5f4   : > { %v11194_v50 = vadd.f32 %v4969_v15, %v4717_v48  ;;  %v13388_v15 = vld [vmem:[#allocation29_spill] sm:$0xff]  ;;  %v12728_v48 = vand.u32 4294901760, %v11205_v40 }
 0x5f5   : > { %v4724_v37 = vpop.f32.mrf.mxu2 }
 0x5f6   : > { %13386 = vst [vmem:[#allocation94_spill] sm:$0xff] %v11194_v50  ;;  %v4725_v10 = vadd.f32 %v4724_v37, %v13387_v14  ;;  %v11215_v37 = vpop.f32.mrf.mxu1  ;;  %v6245_v45 = vsub.f32 %v11205_v40, %v12728_v48  ;;  %v5856_v48 = vld [vmem:[%s12401_s9 + $0x8] sm:$0xff] }
 0x5f7   : > { %13390 = vst [vmem:[#allocation95_spill] sm:$0xff] %v11215_v37 }
 0x5f8   : > { %5696 = vmatmul.f32.gmra.mxu3 %v13385_v26  ;;  %v6246_v22 = vand.u32 4294901760, %v6245_v45  ;;  %v13399_v45 = vld [vmem:[#allocation59_spill] sm:$0xff] }
 0x5fa   : > { %5539 = vmatmul.f32.gmra.mxu2 %v13388_v15  ;;  %6247 = vmatpush.msra.mxu1 %v6246_v22  ;;  %v13397_v22 = vld [vmem:[#allocation20_spill] sm:$0xff] }
 0x5fb   : > { %v4973_v14 = vpop.f32.mrf.mxu3 }
 0x5fc   : > { %v11213_v49 = vadd.f32 %v4973_v14, %v4725_v10  ;;  %v11225_v10 = vpop.f32.mrf.mxu0 }
 0x5fd   : > { %v4732_v26 = vpop.f32.mrf.mxu2  ;;  %13394 = vst [vmem:[#allocation63_spill] sm:$0xff] %v11225_v10 }
 0x5fe   : > { %13389 = vst [vmem:[#allocation60_spill] sm:$0xff] %v11213_v49  ;;  %v4733_v50 = vadd.f32 %v4732_v26, %v13391_v3  ;;  %v13395_v49 = vld [vmem:[#allocation32_spill] sm:$0xff]  ;;  %v11231_v27 = vpop.f32.mrf.mxu1  ;;  %v11233_v3 = vand.u32 4294901760, %v5856_v48 }
 0x5ff   : > { %13396 = vst [vmem:[#allocation98_spill] sm:$0xff] %v11231_v27 }
 0x600   : > { %5700 = vmatmul.f32.gmra.mxu3 %v13388_v15  ;;  %5904 = vmatpush.msra.mxu0 %v11233_v3 }
 0x601   : > { %6627 = vmatpush.msrb.mxu3 %v11233_v3 }
 0x602   : > { %5543 = vmatmul.f32.gmra.mxu2 %v13392_v4 }
 0x603   : > { %v4977_v7 = vpop.f32.mrf.mxu3 }
 0x604   : > { %v11223_v35 = vadd.f32 %v4977_v7, %v4733_v50  ;;  %v11238_v7 = vsub.f32 %v5856_v48, %v11233_v3  ;;  %v11250_v48 = vpop.f32.mrf.mxu0 }
 0x605   : > { %v4740_v14 = vpop.f32.mrf.mxu2 }
 0x606   : > { %13393 = vst [vmem:[#allocation97_spill] sm:$0xff] %v11223_v35  ;;  %v4741_v37 = vadd.f32 %v4740_v14, %v13395_v49  ;;  %v12729_v15 = vand.u32 4294901760, %v11238_v7  ;;  %6433 = vmatpush.msrb.mxu2 %v11238_v7  ;;  %v11253_v27 = vpop.f32.mrf.mxu1 }
 0x608   : > { %5704 = vmatmul.f32.gmra.mxu3 %v13392_v4  ;;  %v6251_v4 = vsub.f32 %v11238_v7, %v12729_v15 }
 0x60a   : > { %5547 = vmatmul.f32.gmra.mxu2 %v13397_v22  ;;  %v6252_v35 = vand.u32 4294901760, %v6251_v4 }
 0x60b   : > { %v4981_v50 = vpop.f32.mrf.mxu3 }
 0x60c   : > { %v11244_v49 = vadd.f32 %v4981_v50, %v4741_v37  ;;  %6253 = vmatpush.msra.mxu1 %v6252_v35  ;;  %v5855_v37 = vld [vmem:[%s12401_s9] sm:$0xff]  ;;  %v13402_v35 = vand.u32 4294901760, %v10824_v60 }
 0x60d   : > { %v4748_v26 = vpop.f32.mrf.mxu2  ;;  %v13400_v50 = vld [vmem:[#allocation33_spill] sm:$0xff] }
 0x60e   : > { %13398 = vst [vmem:[#allocation40_spill] sm:$0xff] %v11244_v49  ;;  %v4749_v14 = vadd.f32 %v4748_v26, %v13399_v45  ;;  %v11259_v49 = vand.u32 4294901760, %v5855_v37 }
 0x610   : > { %5708 = vmatmul.f32.gmra.mxu3 %v13397_v22  ;;  %5906 = vmatpush.msra.mxu0 %v11259_v49  ;;  %v11265_v26 = vsub.f32 %v5855_v37, %v11259_v49  ;;  %v11277_v37 = vpop.f32.mrf.mxu0 }
 0x611   : > { %6629 = vmatpush.msrb.mxu3 %v11259_v49 }
 0x612   : > { %5551 = vmatmul.f32.gmra.mxu2 %v13400_v50  ;;  %6826 = vmatpush.msrb.mxu0 %v13402_v35  ;;  %v6256_v45 = vand.u32 4294901760, %v11265_v26  ;;  %v13405_v35 = vand.u32 4294901760, %v10917_v61  ;;  %v13409_v61 = vand.u32 4294901760, %v11010_v56  ;;  %v13413_v56 = vld [vmem:[#allocation70_spill] sm:$0xff] }
 0x613   : > { %v4985_v10 = vpop.f32.mrf.mxu3  ;;  %6436 = vmatpush.msrb.mxu2 %v11265_v26 }
 0x614   : > { %v11261_v15 = vadd.f32 %v4985_v10, %v4749_v14  ;;  %v13403_v10 = vand.u32 4294901760, %v10855_v24  ;;  %v6257_v14 = vsub.f32 %v11265_v26, %v6256_v45  ;;  %v13406_v26 = vand.u32 4294901760, %v10948_v8 }
 0x615   : > { %v4756_v22 = vpop.f32.mrf.mxu2 }
 0x616   : > { %13401 = vst [vmem:[#allocation66_spill] sm:$0xff] %v11261_v15  ;;  %v4757_v4 = vadd.f32 %v4756_v22, %v10807_v47  ;;  %6830 = vmatpush.msrb.mxu0 %v13403_v10  ;;  %v13404_v15 = vand.u32 4294901760, %v10886_v0  ;;  %v6258_v60 = vand.u32 4294901760, %v6257_v14  ;;  %v11282_v47 = vpop.f32.mrf.mxu1  ;;  %v13407_v0 = vld [vmem:[#allocation67_spill] sm:$0xff]  ;;  %v13408_v10 = vand.u32 4294901760, %v10979_v58 }
 0x617   : > { %v13411_v14 = vand.u32 4294901760, %v11038_v9  ;;  %v13416_v9 = vld [vmem:[#allocation61_spill] sm:$0xff] }
 0x618   : > { %5712 = vmatmul.f32.gmra.mxu3 %v13400_v50  ;;  %6834 = vmatpush.msrb.mxu0 %v13404_v15 }
 0x619   : > { %6259 = vmatpush.msra.mxu1 %v6258_v60 }
 0x61a   : > { %5555 = vmatmul.f32.gmra.mxu2 %v10777_v17  ;;  %6838 = vmatpush.msrb.mxu0 %v13405_v35 }
 0x61b   : > { %v4989_v22 = vpop.f32.mrf.mxu3  ;;  %7017 = vmatpush.msrb.mxu1 %v10816_v34  ;;  %v11300_v34 = vpop.f32.mrf.mxu0 }
 0x61c   : > { %v11286_v24 = vadd.f32 %v4989_v22, %v4757_v4  ;;  %6842 = vmatpush.msrb.mxu0 %v13406_v26  ;;  %v13410_v4 = vld [vmem:[#allocation58_spill] sm:$0xff]  ;;  %v13414_v22 = vand.u32 4294901760, %v11087_v51 }
 0x61d   : > { %v4764_v50 = vpop.f32.mrf.mxu2  ;;  %7019 = vmatpush.msrb.mxu1 %v10847_v63 }
 0x61e   : > { %v4765_v15 = vadd.f32 %v4764_v50, %v13407_v0  ;;  %6846 = vmatpush.msrb.mxu0 %v13408_v10  ;;  %v11307_v58 = vpop.f32.mrf.mxu1  ;;  %v13419_v50 = vand.u32 4294901760, %v11205_v40 }
 0x61f   : > { %7021 = vmatpush.msrb.mxu1 %v10878_v29  ;;  %v13412_v29 = vand.u32 4294901760, %v11062_v38  ;;  %v13417_v38 = vand.u32 4294901760, %v11143_v18  ;;  %v13421_v18 = vld [vmem:[#allocation68_spill] sm:$0xff] }
 0x620   : > { %5716 = vmatmul.f32.gmra.mxu3 %v10777_v17  ;;  %6850 = vmatpush.msrb.mxu0 %v13409_v61 }
 0x621   : > { %7023 = vmatpush.msrb.mxu1 %v10909_v46  ;;  %v13415_v46 = vand.u32 4294901760, %v11112_v42 }
 0x622   : > { %5559 = vmatmul.f32.gmra.mxu2 %v13410_v4  ;;  %6854 = vmatpush.msrb.mxu0 %v13411_v14 }
 0x623   : > { %v4993_v8 = vpop.f32.mrf.mxu3  ;;  %7025 = vmatpush.msrb.mxu1 %v10940_v57 }
 0x624   : > { %v11305_v63 = vadd.f32 %v4993_v8, %v4765_v15  ;;  %6858 = vmatpush.msrb.mxu0 %v13412_v29 }
 0x625   : > { %v4772_v17 = vpop.f32.mrf.mxu2  ;;  %7027 = vmatpush.msrb.mxu1 %v10973_v19  ;;  %v11326_v19 = vpop.f32.mrf.mxu0 }
 0x626   : > { %v4773_v60 = vadd.f32 %v4772_v17, %v13413_v56  ;;  %6862 = vmatpush.msrb.mxu0 %v13414_v22  ;;  %v11331_v42 = vpop.f32.mrf.mxu1 }
 0x627   : > { %7029 = vmatpush.msrb.mxu1 %v11004_v52  ;;  %v13418_v52 = vand.u32 4294901760, %v11176_v13  ;;  %v11345_v13 = vld [vmem:[%s12400_s8] ss:$0 sm:$0xff] }
 0x628   : > { %5720 = vmatmul.f32.gmra.mxu3 %v13410_v4  ;;  %6866 = vmatpush.msrb.mxu0 %v13415_v46  ;;  %v13426_v46 = vld [vmem:[#allocation65_spill] sm:$0xff] }
 0x629   : > { %7031 = vmatpush.msrb.mxu1 %v11034_v55  ;;  %v13420_v55 = vand.u32 4294901760, %v11238_v7 }
 0x62a   : > { %5563 = vmatmul.f32.gmra.mxu2 %v13416_v9  ;;  %6870 = vmatpush.msrb.mxu0 %v13417_v38 }
 0x62b   : > { %v4997_v57 = vpop.f32.mrf.mxu3  ;;  %7033 = vmatpush.msrb.mxu1 %v11057_v44  ;;  %v13422_v44 = vld [vmem:[#allocation64_spill] sm:$0xff] }
 0x62c   : > { %v11324_v35 = vadd.f32 %v4997_v57, %v4773_v60  ;;  %6874 = vmatpush.msrb.mxu0 %v13418_v52  ;;  %v13425_v60 = vld [vmem:[#allocation76_spill] sm:$0xff] }
 0x62d   : > { %v5500_v51 = vpop.f32.mrf.mxu2  ;;  %7035 = vmatpush.msrb.mxu1 %v11082_v12  ;;  %v11350_v7 = vpop.f32.mrf.mxu0 }
 0x62e   : > { %6878 = vmatpush.msrb.mxu0 %v13419_v50  ;;  %v5501_v26 = vadd.f32 %v5500_v51, %v13421_v18  ;;  %v11354_v10 = vpop.f32.mrf.mxu1 }
 0x62f   : > { %7037 = vmatpush.msrb.mxu1 %v11107_v6 }
 0x630   : > { %5724 = vmatmul.f32.gmra.mxu3 %v13416_v9  ;;  %6882 = vmatpush.msrb.mxu0 %v13420_v55 }
 0x631   : > { %7039 = vmatpush.msrb.mxu1 %v11138_v2 }
 0x632   : > { %5567 = vmatmul.f32.gmra.mxu2 %v13422_v44  ;;  %6886 = vmatpush.msrb.mxu0 %v6256_v45  ;;  %v13423_v45 = vld [vmem:[#allocation62_spill] sm:$0xff] }
 0x633   : > { %v5661_v12 = vpop.f32.mrf.mxu3  ;;  %7041 = vmatpush.msrb.mxu1 %v11169_v11 }
 0x634   : > { %v5662_v40 = vadd.f32 %v5661_v12, %v5501_v26 }
 0x635   : > { %v5504_v0 = vpop.f32.mrf.mxu2  ;;  %7043 = vmatpush.msrb.mxu1 %v11200_v21  ;;  %v11372_v29 = vpop.f32.mrf.mxu0 }
 0x636   : > { %v5791_v6 = vadd.f32 %v11345_v13, %v5662_v40  ;;  %v5505_v2 = vadd.f32 %v5504_v0, %v10870_v43  ;;  %v11378_v9 = vpop.f32.mrf.mxu1  ;;  %v13428_v40 = vld [vmem:[#allocation73_spill] sm:$0xff] }
 0x637   : > { %7045 = vmatpush.msrb.mxu1 %v11233_v3 }
 0x638   : > { %v5823_v15 = vmax.f32 %v5791_v6, 0.0  ;;  %5728 = vmatmul.f32.gmra.mxu3 %v13422_v44 }
 0x639   : > { %7047 = vmatpush.msrb.mxu1 %v11259_v49 }
 0x63a   : > { %v11357_v61 = vand.u32 4294901760, %v5823_v15  ;;  %5571 = vmatmul.f32.gmra.mxu2 %v13423_v45 }
 0x63b   : > { %v5665_v11 = vpop.f32.mrf.mxu3 }
 0x63c   : > { %v11363_v4 = vsub.f32 %v5823_v15, %v11357_v61  ;;  %v5666_v21 = vadd.f32 %v5665_v11, %v5505_v2  ;;  %6261 = vmatmul.f32.vlgmr.msra.gmra.mxu1 %v11357_v61 }
 0x63d   : > { %v5508_v8 = vpop.f32.mrf.mxu2  ;;  %v11394_v6 = vpop.f32.mrf.mxu0 }
 0x63e   : > { %v12734_v14 = vand.u32 4294901760, %v11363_v4  ;;  %v5792_v3 = vadd.f32 %v11345_v13, %v5666_v21  ;;  %v5509_v22 = vadd.f32 %v5508_v8, %v13425_v60  ;;  %v11400_v11 = vpop.f32.mrf.mxu1 }
 0x640   : > { %v5910_v43 = vsub.f32 %v11363_v4, %v12734_v14  ;;  %v5824_v17 = vmax.f32 %v5792_v3, 0.0  ;;  %5732 = vmatmul.f32.gmra.mxu3 %v13423_v45 }
 0x642   : > { %v5911_v49 = vand.u32 4294901760, %v5910_v43  ;;  %v11374_v56 = vand.u32 4294901760, %v5824_v17  ;;  %5575 = vmatmul.f32.gmra.mxu2 %v13426_v46 }
 0x643   : > { %v5669_v57 = vpop.f32.mrf.mxu3 }
 0x644   : > { %13424 = vst [vmem:[#allocation26_spill] sm:$0xff] %v11374_v56  ;;  %v11381_v38 = vsub.f32 %v5824_v17, %v11374_v56  ;;  %v5670_v51 = vadd.f32 %v5669_v57, %v5509_v22  ;;  %5912 = vmatmul.f32.vlgmr.msra.gmra.mxu0 %v5911_v49  ;;  %6265 = vmatmul.f32.gmra.mxu1 %v11374_v56  ;;  %v13430_v49 = vld [vmem:[#allocation82_spill] sm:$0xff] }
 0x645   : > { %v5512_v52 = vpop.f32.mrf.mxu2  ;;  %v13431_v22 = vld [vmem:[#allocation74_spill] sm:$0xff] }
 0x646   : > { %v5793_v50 = vadd.f32 %v11345_v13, %v5670_v51  ;;  %v12733_v55 = vand.u32 4294901760, %v11381_v38  ;;  %v5513_v12 = vadd.f32 %v5512_v52, %v10901_v62 }
 0x648   : > { %v5825_v18 = vmax.f32 %v5793_v50, 0.0  ;;  %5736 = vmatmul.f32.gmra.mxu3 %v13426_v46  ;;  %v5918_v26 = vsub.f32 %v11381_v38, %v12733_v55  ;;  %v11416_v50 = vpop.f32.mrf.mxu0  ;;  %v13438_v55 = vld [vmem:[#allocation16_spill] sm:$0xff] }
 0x64a   : > { %v11390_v44 = vand.u32 4294901760, %v5825_v18  ;;  %5579 = vmatmul.f32.gmra.mxu2 %v13428_v40  ;;  %v5919_v0 = vand.u32 4294901760, %v5918_v26 }
 0x64b   : > { %v5673_v15 = vpop.f32.mrf.mxu3 }
 0x64c   : > { %13427 = vst [vmem:[#allocation44_spill] sm:$0xff] %v11390_v44  ;;  %v11397_v2 = vsub.f32 %v5825_v18, %v11390_v44  ;;  %v5674_v45 = vadd.f32 %v5673_v15, %v5513_v12  ;;  %5920 = vmatmul.f32.gmra.mxu0 %v5919_v0  ;;  %6269 = vmatmul.f32.gmra.mxu1 %v11390_v44 }
 0x64d   : > { %v5516_v21 = vpop.f32.mrf.mxu2 }
 0x64e   : > { %v5794_v8 = vadd.f32 %v11345_v13, %v5674_v45  ;;  %v12732_v62 = vand.u32 4294901760, %v11397_v2  ;;  %v5517_v60 = vadd.f32 %v5516_v21, %v13430_v49 }
 0x650   : > { %v5826_v3 = vmax.f32 %v5794_v8, 0.0  ;;  %5740 = vmatmul.f32.gmra.mxu3 %v13428_v40  ;;  %v5926_v43 = vsub.f32 %v11397_v2, %v12732_v62  ;;  %v11420_v40 = vpop.f32.mrf.mxu1  ;;  %v13433_v8 = vld [vmem:[#allocation71_spill] sm:$0xff] }
 0x652   : > { %v11408_v17 = vand.u32 4294901760, %v5826_v3  ;;  %5583 = vmatmul.f32.gmra.mxu2 %v13431_v22  ;;  %v5927_v46 = vand.u32 4294901760, %v5926_v43 }
 0x653   : > { %v5677_v57 = vpop.f32.mrf.mxu3 }
 0x654   : > { %13429 = vst [vmem:[#allocation69_spill] sm:$0xff] %v11408_v17  ;;  %v11413_v51 = vsub.f32 %v5826_v3, %v11408_v17  ;;  %v5678_v52 = vadd.f32 %v5677_v57, %v5517_v60  ;;  %5928 = vmatmul.f32.gmra.mxu0 %v5927_v46  ;;  %6273 = vmatmul.f32.gmra.mxu1 %v11408_v17  ;;  %v13455_v17 = vld [vmem:[#allocation98_spill] sm:$0xff] }
 0x655   : > { %v5520_v18 = vpop.f32.mrf.mxu2 }
 0x656   : > { %v5795_v26 = vadd.f32 %v11345_v13, %v5678_v52  ;;  %v12731_v12 = vand.u32 4294901760, %v11413_v51  ;;  %v5521_v21 = vadd.f32 %v5520_v18, %v10932_v1  ;;  %v11436_v52 = vpop.f32.mrf.mxu0 }
 0x658   : > { %v5827_v0 = vmax.f32 %v5795_v26, 0.0  ;;  %5744 = vmatmul.f32.gmra.mxu3 %v13431_v22  ;;  %v5934_v15 = vsub.f32 %v11413_v51, %v12731_v12  ;;  %v11442_v18 = vpop.f32.mrf.mxu1 }
 0x65a   : > { %v11426_v45 = vand.u32 4294901760, %v5827_v0  ;;  %5587 = vmatmul.f32.gmra.mxu2 %v13433_v8  ;;  %v5935_v3 = vand.u32 4294901760, %v5934_v15 }
 0x65b   : > { %v5681_v43 = vpop.f32.mrf.mxu3 }
 0x65c   : > { %13432 = vst [vmem:[#allocation55_spill] sm:$0xff] %v11426_v45  ;;  %v11431_v49 = vsub.f32 %v5827_v0, %v11426_v45  ;;  %v5682_v60 = vadd.f32 %v5681_v43, %v5521_v21  ;;  %5936 = vmatmul.f32.gmra.mxu0 %v5935_v3  ;;  %6277 = vmatmul.f32.gmra.mxu1 %v11426_v45  ;;  %v13435_v21 = vld [vmem:[#allocation75_spill] sm:$0xff] }
 0x65d   : > { %v5524_v22 = vpop.f32.mrf.mxu2 }
 0x65e   : > { %v5796_v46 = vadd.f32 %v11345_v13, %v5682_v60  ;;  %v12730_v57 = vand.u32 4294901760, %v11431_v49  ;;  %v5525_v15 = vadd.f32 %v5524_v22, %v10945_v30  ;;  %v11458_v22 = vpop.f32.mrf.mxu0 }
 0x660   : > { %v5828_v26 = vmax.f32 %v5796_v46, 0.0  ;;  %5748 = vmatmul.f32.gmra.mxu3 %v13433_v8  ;;  %v5942_v1 = vsub.f32 %v11431_v49, %v12730_v57 }
 0x662   : > { %v11444_v0 = vand.u32 4294901760, %v5828_v26  ;;  %5591 = vmatmul.f32.gmra.mxu2 %v13435_v21  ;;  %v5943_v3 = vand.u32 4294901760, %v5942_v1 }
 0x663   : > { %v5685_v43 = vpop.f32.mrf.mxu3 }
 0x664   : > { %13434 = vst [vmem:[#allocation47_spill] sm:$0xff] %v11444_v0  ;;  %v11449_v60 = vsub.f32 %v5828_v26, %v11444_v0  ;;  %v5686_v46 = vadd.f32 %v5685_v43, %v5525_v15  ;;  %5944 = vmatmul.f32.gmra.mxu0 %v5943_v3  ;;  %6281 = vmatmul.f32.gmra.mxu1 %v11444_v0  ;;  %v13437_v15 = vld [vmem:[#allocation15_spill] sm:$0xff]  ;;  %v11464_v43 = vpop.f32.mrf.mxu1 }
 0x665   : > { %v5528_v8 = vpop.f32.mrf.mxu2 }
 0x666   : > { %v5797_v57 = vadd.f32 %v11345_v13, %v5686_v46  ;;  %v12735_v12 = vand.u32 4294901760, %v11449_v60  ;;  %v5529_v1 = vadd.f32 %v5528_v8, %v10963_v53 }
 0x668   : > { %v5829_v62 = vmax.f32 %v5797_v57, 0.0  ;;  %5752 = vmatmul.f32.gmra.mxu3 %v13435_v21  ;;  %v5950_v30 = vsub.f32 %v11449_v60, %v12735_v12  ;;  %v5092_v57 = vadd.f32 %v11128_v23, %v13438_v55 }
 0x66a   : > { %v11460_v26 = vand.u32 4294901760, %v5829_v62  ;;  %5595 = vmatmul.f32.gmra.mxu2 %v13437_v15  ;;  %v5951_v3 = vand.u32 4294901760, %v5950_v30  ;;  %v5294_v30 = vadd.f32 %v11116_v5, %v5092_v57 }
 0x66b   : > { %v5689_v46 = vpop.f32.mrf.mxu3 }
 0x66c   : > { %13436 = vst [vmem:[#allocation72_spill] sm:$0xff] %v11460_v26  ;;  %v11469_v21 = vsub.f32 %v5829_v62, %v11460_v26  ;;  %v5690_v14 = vadd.f32 %v5689_v46, %v5529_v1  ;;  %5952 = vmatmul.f32.gmra.mxu0 %v5951_v3  ;;  %6285 = vmatmul.f32.gmra.mxu1 %v11460_v26  ;;  %v13440_v1 = vld [vmem:[#allocation8_spill] sm:$0xff]  ;;  %v11482_v46 = vpop.f32.mrf.mxu0  ;;  %v11490_v57 = vpop.f32.mrf.mxu1 }
 0x66d   : > { %v5532_v12 = vpop.f32.mrf.mxu2  ;;  %v13441_v26 = vld [vmem:[#allocation12_spill] sm:$0xff] }
 0x66e   : > { %v5798_v0 = vadd.f32 %v11345_v13, %v5690_v14  ;;  %v12740_v53 = vand.u32 4294901760, %v11469_v21  ;;  %v5533_v62 = vadd.f32 %v5532_v12, %v5294_v30 }
 0x670   : > { %v5830_v8 = vmax.f32 %v5798_v0, 0.0  ;;  %5756 = vmatmul.f32.gmra.mxu3 %v13437_v15  ;;  %v5958_v23 = vsub.f32 %v11469_v21, %v12740_v53  ;;  %v5097_v0 = vadd.f32 %v11151_v39, %v13441_v26 }
 0x672   : > { %v11479_v55 = vand.u32 4294901760, %v5830_v8  ;;  %5599 = vmatmul.f32.gmra.mxu2 %v13440_v1  ;;  %v5959_v3 = vand.u32 4294901760, %v5958_v23  ;;  %v5300_v45 = vadd.f32 %v11132_v28, %v5097_v0 }
 0x673   : > { %v5693_v14 = vpop.f32.mrf.mxu3 }
 0x674   : > { %13439 = vst [vmem:[#allocation56_spill] sm:$0xff] %v11479_v55  ;;  %v11487_v5 = vsub.f32 %v5830_v8, %v11479_v55  ;;  %v5694_v15 = vadd.f32 %v5693_v14, %v5533_v62  ;;  %5960 = vmatmul.f32.gmra.mxu0 %v5959_v3  ;;  %6289 = vmatmul.f32.gmra.mxu1 %v11479_v55  ;;  %v13443_v14 = vld [vmem:[#allocation103_spill] sm:$0xff] }
 0x675   : > { %v5536_v53 = vpop.f32.mrf.mxu2 }
 0x676   : > { %v5799_v12 = vadd.f32 %v11345_v13, %v5694_v15  ;;  %v12743_v30 = vand.u32 4294901760, %v11487_v5  ;;  %v5537_v8 = vadd.f32 %v5536_v53, %v5300_v45  ;;  %v5102_v15 = vadd.f32 %v11167_v54, %v13443_v14  ;;  %v11512_v53 = vpop.f32.mrf.mxu1 }
 0x678   : > { %v5831_v23 = vmax.f32 %v5799_v12, 0.0  ;;  %5760 = vmatmul.f32.gmra.mxu3 %v13440_v1  ;;  %v5966_v39 = vsub.f32 %v11487_v5, %v12743_v30  ;;  %v11508_v1 = vpop.f32.mrf.mxu0  ;;  %v5306_v55 = vadd.f32 %v11157_v25, %v5102_v15 }
 0x67a   : > { %v11499_v26 = vand.u32 4294901760, %v5831_v23  ;;  %5603 = vmatmul.f32.gmra.mxu2 %v10942_v41  ;;  %v5967_v62 = vand.u32 4294901760, %v5966_v39 }
 0x67b   : > { %v5697_v3 = vpop.f32.mrf.mxu3 }
 0x67c   : > { %13442 = vst [vmem:[#allocation53_spill] sm:$0xff] %v11499_v26  ;;  %v11505_v12 = vsub.f32 %v5831_v23, %v11499_v26  ;;  %v5698_v28 = vadd.f32 %v5697_v3, %v5537_v8  ;;  %5968 = vmatmul.f32.gmra.mxu0 %v5967_v62  ;;  %6293 = vmatmul.f32.gmra.mxu1 %v11499_v26  ;;  %v13445_v62 = vld [vmem:[#allocation77_spill] sm:$0xff] }
 0x67d   : > { %v5540_v0 = vpop.f32.mrf.mxu2 }
 0x67e   : > { %v5800_v30 = vadd.f32 %v11345_v13, %v5698_v28  ;;  %v12748_v45 = vand.u32 4294901760, %v11505_v12  ;;  %v5541_v8 = vadd.f32 %v5540_v0, %v5306_v55  ;;  %v13446_v28 = vld [vmem:[#allocation85_spill] sm:$0xff] }
 0x67f   : > { %v5107_v26 = vadd.f32 %v11189_v20, %v13446_v28 }
 0x680   : > { %v5832_v39 = vmax.f32 %v5800_v30, 0.0  ;;  %5764 = vmatmul.f32.gmra.mxu3 %v10942_v41  ;;  %v5974_v54 = vsub.f32 %v11505_v12, %v12748_v45  ;;  %v11530_v55 = vpop.f32.mrf.mxu0 }
 0x682   : > { %v11519_v23 = vand.u32 4294901760, %v5832_v39  ;;  %5607 = vmatmul.f32.gmra.mxu2 %v13445_v62  ;;  %v5975_v3 = vand.u32 4294901760, %v5974_v54  ;;  %v5312_v54 = vadd.f32 %v11172_v32, %v5107_v26 }
 0x683   : > { %v5701_v14 = vpop.f32.mrf.mxu3 }
 0x684   : > { %13444 = vst [vmem:[#allocation18_spill] sm:$0xff] %v11519_v23  ;;  %v11525_v30 = vsub.f32 %v5832_v39, %v11519_v23  ;;  %v5702_v25 = vadd.f32 %v5701_v14, %v5541_v8  ;;  %5976 = vmatmul.f32.gmra.mxu0 %v5975_v3  ;;  %6297 = vmatmul.f32.gmra.mxu1 %v11519_v23  ;;  %v11537_v39 = vpop.f32.mrf.mxu1 }
 0x685   : > { %v5544_v41 = vpop.f32.mrf.mxu2 }
 0x686   : > { %v5801_v15 = vadd.f32 %v11345_v13, %v5702_v25  ;;  %v12749_v45 = vand.u32 4294901760, %v11525_v30  ;;  %v5545_v3 = vadd.f32 %v5544_v41, %v5312_v54  ;;  %v5112_v25 = vadd.f32 %v11209_v16, %v11028_v33 }
 0x688   : > { %v5833_v0 = vmax.f32 %v5801_v15, 0.0  ;;  %5768 = vmatmul.f32.gmra.mxu3 %v13445_v62  ;;  %v5982_v20 = vsub.f32 %v11525_v30, %v12749_v45  ;;  %v5318_v54 = vadd.f32 %v11192_v31, %v5112_v25  ;;  %v11555_v16 = vpop.f32.mrf.mxu0 }
 0x68a   : > { %v11539_v8 = vand.u32 4294901760, %v5833_v0  ;;  %5611 = vmatmul.f32.gmra.mxu2 %v10975_v59  ;;  %v5983_v14 = vand.u32 4294901760, %v5982_v20 }
 0x68b   : > { %v5705_v28 = vpop.f32.mrf.mxu3 }
 0x68c   : > { %13447 = vst [vmem:[#allocation7_spill] sm:$0xff] %v11539_v8  ;;  %v11545_v32 = vsub.f32 %v5833_v0, %v11539_v8  ;;  %v5706_v26 = vadd.f32 %v5705_v28, %v5545_v3  ;;  %5984 = vmatmul.f32.gmra.mxu0 %v5983_v14  ;;  %6301 = vmatmul.f32.gmra.mxu1 %v11539_v8  ;;  %v11560_v14 = vpop.f32.mrf.mxu1 }
 0x68d   : > { %v5548_v62 = vpop.f32.mrf.mxu2 }
 0x68e   : > { %v5802_v15 = vadd.f32 %v11345_v13, %v5706_v26  ;;  %v12750_v45 = vand.u32 4294901760, %v11545_v32  ;;  %v5549_v20 = vadd.f32 %v5548_v62, %v5318_v54  ;;  %v13449_v26 = vld [vmem:[#allocation25_spill] sm:$0xff] }
 0x690   : > { %v5834_v41 = vmax.f32 %v5802_v15, 0.0  ;;  %5772 = vmatmul.f32.gmra.mxu3 %v10975_v59  ;;  %v5990_v33 = vsub.f32 %v11545_v32, %v12750_v45  ;;  %v13450_v15 = vld [vmem:[#allocation63_spill] sm:$0xff] }
 0x691   : > { %v5117_v31 = vadd.f32 %v13450_v15, %v13449_v26  ;;  %v11578_v15 = vpop.f32.mrf.mxu0 }
 0x692   : > { %v11557_v0 = vand.u32 4294901760, %v5834_v41  ;;  %5615 = vmatmul.f32.gmra.mxu2 %v10993_v36  ;;  %v5991_v3 = vand.u32 4294901760, %v5990_v33  ;;  %v13451_v33 = vld [vmem:[#allocation95_spill] sm:$0xff] }
 0x693   : > { %v5709_v28 = vpop.f32.mrf.mxu3  ;;  %v5324_v23 = vadd.f32 %v13451_v33, %v5117_v31 }
 0x694   : > { %13448 = vst [vmem:[#allocation27_spill] sm:$0xff] %v11557_v0  ;;  %v11565_v59 = vsub.f32 %v5834_v41, %v11557_v0  ;;  %v5710_v25 = vadd.f32 %v5709_v28, %v5549_v20  ;;  %5992 = vmatmul.f32.gmra.mxu0 %v5991_v3  ;;  %6305 = vmatmul.f32.gmra.mxu1 %v11557_v0  ;;  %v13453_v3 = vld [vmem:[#allocation83_spill] sm:$0xff]  ;;  %v11586_v33 = vpop.f32.mrf.mxu1 }
 0x695   : > { %v5552_v45 = vpop.f32.mrf.mxu2  ;;  %v13454_v0 = vld [vmem:[#allocation79_spill] sm:$0xff] }
 0x696   : > { %v5803_v8 = vadd.f32 %v11345_v13, %v5710_v25  ;;  %v12757_v62 = vand.u32 4294901760, %v11565_v59  ;;  %v5553_v20 = vadd.f32 %v5552_v45, %v5324_v23 }
 0x698   : > { %v5835_v54 = vmax.f32 %v5803_v8, 0.0  ;;  %5776 = vmatmul.f32.gmra.mxu3 %v10993_v36  ;;  %v5998_v26 = vsub.f32 %v11565_v59, %v12757_v62  ;;  %v5122_v8 = vadd.f32 %v11250_v48, %v13454_v0 }
 0x69a   : > { %v11575_v41 = vand.u32 4294901760, %v5835_v54  ;;  %5619 = vmatmul.f32.gmra.mxu2 %v13453_v3  ;;  %v5999_v28 = vand.u32 4294901760, %v5998_v26  ;;  %v5330_v44 = vadd.f32 %v13455_v17, %v5122_v8 }
 0x69b   : > { %v5713_v25 = vpop.f32.mrf.mxu3 }
 0x69c   : > { %13452 = vst [vmem:[#allocation78_spill] sm:$0xff] %v11575_v41  ;;  %v11583_v31 = vsub.f32 %v5835_v54, %v11575_v41  ;;  %v5714_v36 = vadd.f32 %v5713_v25, %v5553_v20  ;;  %6000 = vmatmul.f32.gmra.mxu0 %v5999_v28  ;;  %6309 = vmatmul.f32.gmra.mxu1 %v11575_v41  ;;  %v13457_v20 = vld [vmem:[#allocation102_spill] sm:$0xff]  ;;  %v13458_v41 = vld [vmem:[#allocation80_spill] sm:$0xff] }
 0x69d   : > { %v5556_v62 = vpop.f32.mrf.mxu2 }
 0x69e   : > { %v5804_v45 = vadd.f32 %v11345_v13, %v5714_v36  ;;  %v12764_v23 = vand.u32 4294901760, %v11583_v31  ;;  %v5557_v54 = vadd.f32 %v5556_v62, %v5330_v44  ;;  %v5127_v36 = vadd.f32 %v11277_v37, %v13458_v41  ;;  %v11608_v62 = vpop.f32.mrf.mxu1 }
 0x6a0   : > { %v5836_v26 = vmax.f32 %v5804_v45, 0.0  ;;  %5780 = vmatmul.f32.gmra.mxu3 %v13453_v3  ;;  %v6006_v48 = vsub.f32 %v11583_v31, %v12764_v23  ;;  %v11604_v3 = vpop.f32.mrf.mxu0  ;;  %v5336_v56 = vadd.f32 %v11253_v27, %v5127_v36 }
 0x6a2   : > { %v11595_v0 = vand.u32 4294901760, %v5836_v26  ;;  %5623 = vmatmul.f32.gmra.mxu2 %v13457_v20  ;;  %v6007_v28 = vand.u32 4294901760, %v6006_v48 }
 0x6a3   : > { %v5717_v25 = vpop.f32.mrf.mxu3 }
 0x6a4   : > { %13456 = vst [vmem:[#allocation9_spill] sm:$0xff] %v11595_v0  ;;  %v11601_v45 = vsub.f32 %v5836_v26, %v11595_v0  ;;  %v5718_v17 = vadd.f32 %v5717_v25, %v5557_v54  ;;  %6008 = vmatmul.f32.gmra.mxu0 %v6007_v28  ;;  %6313 = vmatmul.f32.gmra.mxu1 %v11595_v0  ;;  %v13459_v25 = vld [vmem:[#allocation24_spill] sm:$0xff]  ;;  %v13460_v0 = vand.u32 4294901760, %v11363_v4 }
 0x6a5   : > { %v5560_v8 = vpop.f32.mrf.mxu2 }
 0x6a6   : > { %v5805_v23 = vadd.f32 %v11345_v13, %v5718_v17  ;;  %v12767_v44 = vand.u32 4294901760, %v11601_v45  ;;  %v5561_v26 = vadd.f32 %v5560_v8, %v5336_v56  ;;  %v5132_v17 = vadd.f32 %v11300_v34, %v13459_v25 }
 0x6a8   : > { %v5837_v48 = vmax.f32 %v5805_v23, 0.0  ;;  %5784 = vmatmul.f32.gmra.mxu3 %v13457_v20  ;;  %v6014_v37 = vsub.f32 %v11601_v45, %v12767_v44  ;;  %v11626_v56 = vpop.f32.mrf.mxu0 }
 0x6aa   : > { %v11615_v41 = vand.u32 4294901760, %v5837_v48  ;;  %6439 = vmatmul.f32.vlgmr.msrb.gmra.mxu2 %v11363_v4  ;;  %v6015_v54 = vand.u32 4294901760, %v6014_v37  ;;  %v5342_v37 = vadd.f32 %v11282_v47, %v5132_v17 }
 0x6ab   : > { %v5721_v28 = vpop.f32.mrf.mxu3 }
 0x6ac   : > { %v11621_v23 = vsub.f32 %v5837_v48, %v11615_v41  ;;  %v5722_v27 = vadd.f32 %v5721_v28, %v5561_v26  ;;  %6016 = vmatmul.f32.gmra.mxu0 %v6015_v54  ;;  %6317 = vmatmul.f32.gmra.mxu1 %v11615_v41  ;;  %v11634_v48 = vpop.f32.mrf.mxu1 }
 0x6ad   : > { %v5564_v20 = vpop.f32.mrf.mxu2 }
 0x6ae   : > { %v5806_v36 = vadd.f32 %v11345_v13, %v5722_v27  ;;  %v12770_v44 = vand.u32 4294901760, %v11621_v23  ;;  %v5565_v54 = vadd.f32 %v5564_v20, %v5342_v37  ;;  %v13462_v27 = vld [vmem:[#allocation86_spill] sm:$0xff] }
 0x6b0   : > { %v5838_v8 = vmax.f32 %v5806_v36, 0.0  ;;  %6633 = vmatmul.f32.vlgmr.msrb.gmra.mxu3 %v13460_v0  ;;  %v6022_v34 = vsub.f32 %v11621_v23, %v12770_v44  ;;  %v5137_v36 = vadd.f32 %v11326_v19, %v13462_v27 }
 0x6b2   : > { %v11636_v26 = vand.u32 4294901760, %v5838_v8  ;;  %6444 = vmatmul.f32.gmra.mxu2 %v11381_v38  ;;  %v6023_v28 = vand.u32 4294901760, %v6022_v34  ;;  %v5348_v37 = vadd.f32 %v11307_v58, %v5137_v36  ;;  %v13463_v34 = vand.u32 4294901760, %v11381_v38 }
 0x6b3   : > { %v5725_v25 = vpop.f32.mrf.mxu3 }
 0x6b4   : > { %13461 = vst [vmem:[#allocation31_spill] sm:$0xff] %v11636_v26  ;;  %v11642_v47 = vsub.f32 %v5838_v8, %v11636_v26  ;;  %v5726_v4 = vadd.f32 %v5725_v25, %v5565_v54  ;;  %6024 = vmatmul.f32.gmra.mxu0 %v6023_v28  ;;  %6321 = vmatmul.f32.gmra.mxu1 %v11636_v26  ;;  %v11653_v8 = vpop.f32.mrf.mxu0 }
 0x6b5   : > { %v5568_v0 = vpop.f32.mrf.mxu2 }
 0x6b6   : > { %v5807_v17 = vadd.f32 %v11345_v13, %v5726_v4  ;;  %v12771_v44 = vand.u32 4294901760, %v11642_v47  ;;  %v5569_v25 = vadd.f32 %v5568_v0, %v5348_v37 }
 0x6b8   : > { %v5839_v20 = vmax.f32 %v5807_v17, 0.0  ;;  %6639 = vmatmul.f32.gmra.mxu3 %v13463_v34  ;;  %v6030_v19 = vsub.f32 %v11642_v47, %v12771_v44  ;;  %v13465_v17 = vld [vmem:[#allocation88_spill] sm:$0xff] }
 0x6b9   : > { %v11655_v54 = vpop.f32.mrf.mxu1  ;;  %v5142_v58 = vadd.f32 %v11350_v7, %v13465_v17 }
 0x6ba   : > { %v11657_v28 = vand.u32 4294901760, %v5839_v20  ;;  %6449 = vmatmul.f32.gmra.mxu2 %v11397_v2  ;;  %v6031_v27 = vand.u32 4294901760, %v6030_v19  ;;  %v13466_v19 = vand.u32 4294901760, %v11397_v2 }
 0x6bb   : > { %v5729_v4 = vpop.f32.mrf.mxu3  ;;  %v5354_v37 = vadd.f32 %v11331_v42, %v5142_v58 }
 0x6bc   : > { %13464 = vst [vmem:[#allocation81_spill] sm:$0xff] %v11657_v28  ;;  %v11663_v38 = vsub.f32 %v5839_v20, %v11657_v28  ;;  %v5730_v36 = vadd.f32 %v5729_v4, %v5569_v25  ;;  %6032 = vmatmul.f32.gmra.mxu0 %v6031_v27  ;;  %6325 = vmatmul.f32.gmra.mxu1 %v11657_v28 }
 0x6bd   : > { %v5572_v34 = vpop.f32.mrf.mxu2 }
 0x6be   : > { %v5808_v44 = vadd.f32 %v11345_v13, %v5730_v36  ;;  %v12774_v26 = vand.u32 4294901760, %v11663_v38  ;;  %v5573_v4 = vadd.f32 %v5572_v34, %v5354_v37  ;;  %v13468_v36 = vld [vmem:[#allocation41_spill] sm:$0xff] }
 0x6bf   : > { %v5147_v42 = vadd.f32 %v11372_v29, %v13468_v36 }
 0x6c0   : > { %v5840_v0 = vmax.f32 %v5808_v44, 0.0  ;;  %6645 = vmatmul.f32.gmra.mxu3 %v13466_v19  ;;  %v6038_v7 = vsub.f32 %v11663_v38, %v12774_v26 }
 0x6c1   : > { %v11674_v20 = vpop.f32.mrf.mxu0  ;;  %v11676_v25 = vpop.f32.mrf.mxu1  ;;  %v5360_v37 = vadd.f32 %v11354_v10, %v5147_v42 }
 0x6c2   : > { %v11678_v27 = vand.u32 4294901760, %v5840_v0  ;;  %6454 = vmatmul.f32.gmra.mxu2 %v11413_v51  ;;  %v6039_v17 = vand.u32 4294901760, %v6038_v7  ;;  %v13469_v7 = vand.u32 4294901760, %v11413_v51 }
 0x6c3   : > { %v5733_v44 = vpop.f32.mrf.mxu3 }
 0x6c4   : > { %13467 = vst [vmem:[#allocation11_spill] sm:$0xff] %v11678_v27  ;;  %v11684_v2 = vsub.f32 %v5840_v0, %v11678_v27  ;;  %v5734_v58 = vadd.f32 %v5733_v44, %v5573_v4  ;;  %6040 = vmatmul.f32.gmra.mxu0 %v6039_v17  ;;  %6329 = vmatmul.f32.gmra.mxu1 %v11678_v27 }
 0x6c5   : > { %v5576_v19 = vpop.f32.mrf.mxu2 }
 0x6c6   : > { %v5809_v26 = vadd.f32 %v11345_v13, %v5734_v58  ;;  %v12777_v28 = vand.u32 4294901760, %v11684_v2  ;;  %v5577_v44 = vadd.f32 %v5576_v19, %v5360_v37  ;;  %v13471_v58 = vld [vmem:[#allocation89_spill] sm:$0xff] }
 0x6c7   : > { %v5152_v10 = vadd.f32 %v11394_v6, %v13471_v58 }
 0x6c8   : > { %v5841_v34 = vmax.f32 %v5809_v26, 0.0  ;;  %6651 = vmatmul.f32.gmra.mxu3 %v13469_v7  ;;  %v6046_v29 = vsub.f32 %v11684_v2, %v12777_v28 }
 0x6c9   : > { %v11695_v0 = vpop.f32.mrf.mxu0  ;;  %v11697_v4 = vpop.f32.mrf.mxu1  ;;  %v5366_v37 = vadd.f32 %v11378_v9, %v5152_v10 }
 0x6ca   : > { %v11699_v17 = vand.u32 4294901760, %v5841_v34  ;;  %6459 = vmatmul.f32.gmra.mxu2 %v11431_v49  ;;  %v6047_v36 = vand.u32 4294901760, %v6046_v29  ;;  %v13472_v29 = vand.u32 4294901760, %v11431_v49 }
 0x6cb   : > { %v5737_v26 = vpop.f32.mrf.mxu3 }
 0x6cc   : > { %13470 = vst [vmem:[#allocation34_spill] sm:$0xff] %v11699_v17  ;;  %v11705_v51 = vsub.f32 %v5841_v34, %v11699_v17  ;;  %v5738_v42 = vadd.f32 %v5737_v26, %v5577_v44  ;;  %6048 = vmatmul.f32.gmra.mxu0 %v6047_v36  ;;  %6333 = vmatmul.f32.gmra.mxu1 %v11699_v17 }
 0x6cd   : > { %v5580_v7 = vpop.f32.mrf.mxu2 }
 0x6ce   : > { %v5810_v28 = vadd.f32 %v11345_v13, %v5738_v42  ;;  %v12780_v27 = vand.u32 4294901760, %v11705_v51  ;;  %v5581_v26 = vadd.f32 %v5580_v7, %v5366_v37  ;;  %v13474_v42 = vld [vmem:[#allocation91_spill] sm:$0xff] }
 0x6cf   : > { %v5157_v9 = vadd.f32 %v11416_v50, %v13474_v42 }
 0x6d0   : > { %v5842_v19 = vmax.f32 %v5810_v28, 0.0  ;;  %6657 = vmatmul.f32.gmra.mxu3 %v13472_v29  ;;  %v6054_v6 = vsub.f32 %v11705_v51, %v12780_v27 }
 0x6d1   : > { %v11716_v34 = vpop.f32.mrf.mxu0  ;;  %v11718_v44 = vpop.f32.mrf.mxu1  ;;  %v5372_v37 = vadd.f32 %v11400_v11, %v5157_v9 }
 0x6d2   : > { %v11720_v36 = vand.u32 4294901760, %v5842_v19  ;;  %6464 = vmatmul.f32.gmra.mxu2 %v11449_v60  ;;  %v6055_v58 = vand.u32 4294901760, %v6054_v6  ;;  %v13475_v6 = vand.u32 4294901760, %v11449_v60 }
 0x6d3   : > { %v5741_v28 = vpop.f32.mrf.mxu3 }
 0x6d4   : > { %13473 = vst [vmem:[#allocation84_spill] sm:$0xff] %v11720_v36  ;;  %v11726_v49 = vsub.f32 %v5842_v19, %v11720_v36  ;;  %v5742_v10 = vadd.f32 %v5741_v28, %v5581_v26  ;;  %6056 = vmatmul.f32.gmra.mxu0 %v6055_v58  ;;  %6337 = vmatmul.f32.gmra.mxu1 %v11720_v36 }
 0x6d5   : > { %v5584_v29 = vpop.f32.mrf.mxu2 }
 0x6d6   : > { %v5811_v27 = vadd.f32 %v11345_v13, %v5742_v10  ;;  %v12783_v17 = vand.u32 4294901760, %v11726_v49  ;;  %v5585_v28 = vadd.f32 %v5584_v29, %v5372_v37  ;;  %v13477_v10 = vld [vmem:[#allocation57_spill] sm:$0xff] }
 0x6d7   : > { %v5162_v11 = vadd.f32 %v11436_v52, %v13477_v10 }
 0x6d8   : > { %v5843_v7 = vmax.f32 %v5811_v27, 0.0  ;;  %6663 = vmatmul.f32.gmra.mxu3 %v13475_v6  ;;  %v6062_v50 = vsub.f32 %v11726_v49, %v12783_v17 }
 0x6d9   : > { %v11737_v19 = vpop.f32.mrf.mxu0  ;;  %v11739_v26 = vpop.f32.mrf.mxu1  ;;  %v5378_v37 = vadd.f32 %v11420_v40, %v5162_v11 }
 0x6da   : > { %v11741_v58 = vand.u32 4294901760, %v5843_v7  ;;  %6469 = vmatmul.f32.gmra.mxu2 %v11469_v21  ;;  %v6063_v42 = vand.u32 4294901760, %v6062_v50  ;;  %v13478_v50 = vand.u32 4294901760, %v11469_v21 }
 0x6db   : > { %v5745_v27 = vpop.f32.mrf.mxu3 }
 0x6dc   : > { %13476 = vst [vmem:[#allocation42_spill] sm:$0xff] %v11741_v58  ;;  %v11747_v60 = vsub.f32 %v5843_v7, %v11741_v58  ;;  %v5746_v9 = vadd.f32 %v5745_v27, %v5585_v28  ;;  %6064 = vmatmul.f32.gmra.mxu0 %v6063_v42  ;;  %6341 = vmatmul.f32.gmra.mxu1 %v11741_v58 }
 0x6dd   : > { %v5588_v6 = vpop.f32.mrf.mxu2 }
 0x6de   : > { %v5812_v17 = vadd.f32 %v11345_v13, %v5746_v9  ;;  %v12786_v36 = vand.u32 4294901760, %v11747_v60  ;;  %v5589_v27 = vadd.f32 %v5588_v6, %v5378_v37  ;;  %v13480_v9 = vld [vmem:[#allocation92_spill] sm:$0xff] }
 0x6df   : > { %v5167_v40 = vadd.f32 %v11458_v22, %v13480_v9 }
 0x6e0   : > { %v5844_v29 = vmax.f32 %v5812_v17, 0.0  ;;  %6669 = vmatmul.f32.gmra.mxu3 %v13478_v50  ;;  %v6070_v52 = vsub.f32 %v11747_v60, %v12786_v36 }
 0x6e1   : > { %v11758_v7 = vpop.f32.mrf.mxu0  ;;  %v11760_v28 = vpop.f32.mrf.mxu1  ;;  %v5384_v37 = vadd.f32 %v11442_v18, %v5167_v40 }
 0x6e2   : > { %v11762_v42 = vand.u32 4294901760, %v5844_v29  ;;  %6474 = vmatmul.f32.gmra.mxu2 %v11487_v5  ;;  %v6071_v10 = vand.u32 4294901760, %v6070_v52  ;;  %v13481_v52 = vand.u32 4294901760, %v11487_v5 }
 0x6e3   : > { %v5749_v17 = vpop.f32.mrf.mxu3 }
 0x6e4   : > { %13479 = vst [vmem:[#allocation35_spill] sm:$0xff] %v11762_v42  ;;  %v11768_v21 = vsub.f32 %v5844_v29, %v11762_v42  ;;  %v5750_v11 = vadd.f32 %v5749_v17, %v5589_v27  ;;  %6072 = vmatmul.f32.gmra.mxu0 %v6071_v10  ;;  %6345 = vmatmul.f32.gmra.mxu1 %v11762_v42 }
 0x6e5   : > { %v5592_v50 = vpop.f32.mrf.mxu2 }
 0x6e6   : > { %v5813_v36 = vadd.f32 %v11345_v13, %v5750_v11  ;;  %v12789_v58 = vand.u32 4294901760, %v11768_v21  ;;  %v5593_v17 = vadd.f32 %v5592_v50, %v5384_v37  ;;  %v13483_v11 = vld [vmem:[#allocation94_spill] sm:$0xff] }
 0x6e7   : > { %v5172_v18 = vadd.f32 %v11482_v46, %v13483_v11 }
 0x6e8   : > { %v5845_v6 = vmax.f32 %v5813_v36, 0.0  ;;  %6675 = vmatmul.f32.gmra.mxu3 %v13481_v52  ;;  %v6078_v22 = vsub.f32 %v11768_v21, %v12789_v58 }
 0x6e9   : > { %v11779_v29 = vpop.f32.mrf.mxu0  ;;  %v11781_v27 = vpop.f32.mrf.mxu1  ;;  %v5390_v37 = vadd.f32 %v11464_v43, %v5172_v18 }
 0x6ea   : > { %v11783_v10 = vand.u32 4294901760, %v5845_v6  ;;  %6479 = vmatmul.f32.gmra.mxu2 %v11505_v12  ;;  %v6079_v9 = vand.u32 4294901760, %v6078_v22  ;;  %v13484_v22 = vand.u32 4294901760, %v11505_v12 }
 0x6eb   : > { %v5753_v36 = vpop.f32.mrf.mxu3 }
 0x6ec   : > { %13482 = vst [vmem:[#allocation87_spill] sm:$0xff] %v11783_v10  ;;  %v11789_v5 = vsub.f32 %v5845_v6, %v11783_v10  ;;  %v5754_v40 = vadd.f32 %v5753_v36, %v5593_v17  ;;  %6080 = vmatmul.f32.gmra.mxu0 %v6079_v9  ;;  %6349 = vmatmul.f32.gmra.mxu1 %v11783_v10 }
 0x6ed   : > { %v5596_v52 = vpop.f32.mrf.mxu2 }
 0x6ee   : > { %v5814_v58 = vadd.f32 %v11345_v13, %v5754_v40  ;;  %v12792_v42 = vand.u32 4294901760, %v11789_v5  ;;  %v5597_v36 = vadd.f32 %v5596_v52, %v5390_v37  ;;  %v13485_v40 = vld [vmem:[#allocation60_spill] sm:$0xff] }
 0x6ef   : > { %v5177_v43 = vadd.f32 %v11508_v1, %v13485_v40 }
 0x6f0   : > { %v5846_v50 = vmax.f32 %v5814_v58, 0.0  ;;  %6681 = vmatmul.f32.gmra.mxu3 %v13484_v22  ;;  %v6086_v46 = vsub.f32 %v11789_v5, %v12792_v42 }
 0x6f1   : > { %v11800_v6 = vpop.f32.mrf.mxu0  ;;  %v11802_v17 = vpop.f32.mrf.mxu1  ;;  %v5396_v37 = vadd.f32 %v11490_v57, %v5177_v43 }
 0x6f2   : > { %v11804_v9 = vand.u32 4294901760, %v5846_v50  ;;  %6484 = vmatmul.f32.gmra.mxu2 %v11525_v30  ;;  %v6087_v11 = vand.u32 4294901760, %v6086_v46  ;;  %v13486_v46 = vand.u32 4294901760, %v11525_v30 }
 0x6f3   : > { %v5757_v58 = vpop.f32.mrf.mxu3 }
 0x6f4   : > { %v11810_v12 = vsub.f32 %v5846_v50, %v11804_v9  ;;  %v5758_v18 = vadd.f32 %v5757_v58, %v5597_v36  ;;  %6088 = vmatmul.f32.gmra.mxu0 %v6087_v11  ;;  %6353 = vmatmul.f32.gmra.mxu1 %v11804_v9 }
 0x6f5   : > { %v5600_v22 = vpop.f32.mrf.mxu2 }
 0x6f6   : > { %v5815_v42 = vadd.f32 %v11345_v13, %v5758_v18  ;;  %v12795_v10 = vand.u32 4294901760, %v11810_v12  ;;  %v5601_v58 = vadd.f32 %v5600_v22, %v5396_v37  ;;  %v13488_v18 = vld [vmem:[#allocation97_spill] sm:$0xff] }
 0x6f7   : > { %v5182_v57 = vadd.f32 %v11530_v55, %v13488_v18 }
 0x6f8   : > { %v5847_v52 = vmax.f32 %v5815_v42, 0.0  ;;  %6687 = vmatmul.f32.gmra.mxu3 %v13486_v46  ;;  %v6094_v1 = vsub.f32 %v11810_v12, %v12795_v10 }
 0x6f9   : > { %v11821_v50 = vpop.f32.mrf.mxu0  ;;  %v11823_v36 = vpop.f32.mrf.mxu1  ;;  %v5402_v37 = vadd.f32 %v11512_v53, %v5182_v57 }
 0x6fa   : > { %13487 = vst [vmem:[#allocation46_spill] sm:$0xff] %v11823_v36  ;;  %v11825_v11 = vand.u32 4294901760, %v5847_v52  ;;  %6489 = vmatmul.f32.gmra.mxu2 %v11545_v32  ;;  %v6095_v40 = vand.u32 4294901760, %v6094_v1  ;;  %v13489_v1 = vand.u32 4294901760, %v11545_v32 }
 0x6fb   : > { %v5761_v42 = vpop.f32.mrf.mxu3 }
 0x6fc   : > { %v11831_v30 = vsub.f32 %v5847_v52, %v11825_v11  ;;  %v5762_v43 = vadd.f32 %v5761_v42, %v5601_v58  ;;  %6096 = vmatmul.f32.gmra.mxu0 %v6095_v40  ;;  %6357 = vmatmul.f32.gmra.mxu1 %v11825_v11 }
 0x6fd   : > { %v5604_v46 = vpop.f32.mrf.mxu2 }
 0x6fe   : > { %v5816_v10 = vadd.f32 %v11345_v13, %v5762_v43  ;;  %v12796_v36 = vand.u32 4294901760, %v11831_v30  ;;  %v5605_v42 = vadd.f32 %v5604_v46, %v5402_v37  ;;  %v13491_v43 = vld [vmem:[#allocation40_spill] sm:$0xff] }
 0x6ff   : > { %v5187_v53 = vadd.f32 %v11555_v16, %v13491_v43 }
 0x700   : > { %v5848_v22 = vmax.f32 %v5816_v10, 0.0  ;;  %6693 = vmatmul.f32.gmra.mxu3 %v13489_v1  ;;  %v6102_v55 = vsub.f32 %v11831_v30, %v12796_v36 }
 0x701   : > { %v11842_v52 = vpop.f32.mrf.mxu0  ;;  %v11844_v58 = vpop.f32.mrf.mxu1  ;;  %v5408_v37 = vadd.f32 %v11537_v39, %v5187_v53 }
 0x702   : > { %13490 = vst [vmem:[#allocation99_spill] sm:$0xff] %v11844_v58  ;;  %v11846_v40 = vand.u32 4294901760, %v5848_v22  ;;  %6494 = vmatmul.f32.gmra.mxu2 %v11565_v59  ;;  %v6103_v18 = vand.u32 4294901760, %v6102_v55  ;;  %v13492_v55 = vand.u32 4294901760, %v11565_v59 }
 0x703   : > { %v5765_v10 = vpop.f32.mrf.mxu3 }
 0x704   : > { %v11852_v32 = vsub.f32 %v5848_v22, %v11846_v40  ;;  %v5766_v57 = vadd.f32 %v5765_v10, %v5605_v42  ;;  %6104 = vmatmul.f32.gmra.mxu0 %v6103_v18  ;;  %6361 = vmatmul.f32.gmra.mxu1 %v11846_v40 }
 0x705   : > { %v5608_v1 = vpop.f32.mrf.mxu2 }
 0x706   : > { %v5817_v36 = vadd.f32 %v11345_v13, %v5766_v57  ;;  %v12797_v58 = vand.u32 4294901760, %v11852_v32  ;;  %v5609_v10 = vadd.f32 %v5608_v1, %v5408_v37  ;;  %v13494_v57 = vld [vmem:[#allocation66_spill] sm:$0xff] }
 0x707   : > { %v5192_v39 = vadd.f32 %v11578_v15, %v13494_v57 }
 0x708   : > { %v5849_v46 = vmax.f32 %v5817_v36, 0.0  ;;  %6699 = vmatmul.f32.gmra.mxu3 %v13492_v55  ;;  %v6110_v16 = vsub.f32 %v11852_v32, %v12797_v58 }
 0x709   : > { %v11863_v22 = vpop.f32.mrf.mxu0  ;;  %v11865_v42 = vpop.f32.mrf.mxu1  ;;  %v5414_v37 = vadd.f32 %v11560_v14, %v5192_v39  ;;  %v5197_v14 = vadd.f32 %v11604_v3, %v11286_v24  ;;  %v13496_v24 = vand.u32 4294901760, %v11601_v45 }
 0x70a   : > { %13493 = vst [vmem:[#allocation90_spill] sm:$0xff] %v11865_v42  ;;  %v11867_v18 = vand.u32 4294901760, %v5849_v46  ;;  %6499 = vmatmul.f32.gmra.mxu2 %v11583_v31  ;;  %v6111_v43 = vand.u32 4294901760, %v6110_v16  ;;  %v13495_v16 = vand.u32 4294901760, %v11583_v31 }
 0x70b   : > { %v5769_v36 = vpop.f32.mrf.mxu3 }
 0x70c   : > { %v11873_v59 = vsub.f32 %v5849_v46, %v11867_v18  ;;  %v5770_v53 = vadd.f32 %v5769_v36, %v5609_v10  ;;  %6112 = vmatmul.f32.gmra.mxu0 %v6111_v43  ;;  %6365 = vmatmul.f32.gmra.mxu1 %v11867_v18 }
 0x70d   : > { %v5612_v55 = vpop.f32.mrf.mxu2 }
 0x70e   : > { %v5818_v58 = vadd.f32 %v11345_v13, %v5770_v53  ;;  %v12799_v42 = vand.u32 4294901760, %v11873_v59  ;;  %v5613_v36 = vadd.f32 %v5612_v55, %v5414_v37  ;;  %v7408_v53 = vld [vmem:[%s12400_s8] ss:$0 sm:$0xff] }
 0x710   : > { %v5850_v1 = vmax.f32 %v5818_v58, 0.0  ;;  %6705 = vmatmul.f32.gmra.mxu3 %v13495_v16  ;;  %v6118_v15 = vsub.f32 %v11873_v59, %v12799_v42 }
 0x711   : > { %v11884_v46 = vpop.f32.mrf.mxu0  ;;  %v11886_v10 = vpop.f32.mrf.mxu1 }
 0x712   : > { %v11888_v43 = vand.u32 4294901760, %v5850_v1  ;;  %6504 = vmatmul.f32.gmra.mxu2 %v11601_v45  ;;  %v6119_v13 = vand.u32 4294901760, %v6118_v15  ;;  %v5420_v15 = vadd.f32 %v11586_v33, %v5197_v14  ;;  %v5202_v33 = vadd.f32 %v11626_v56, %v11305_v63 }
 0x713   : > { %v5773_v58 = vpop.f32.mrf.mxu3 }
 0x714   : > { %v11894_v31 = vsub.f32 %v5850_v1, %v11888_v43  ;;  %v5774_v57 = vadd.f32 %v5773_v58, %v5613_v36  ;;  %6120 = vmatmul.f32.gmra.mxu0 %v6119_v13  ;;  %6369 = vmatmul.f32.gmra.mxu1 %v11888_v43 }
 0x715   : > { %v5616_v39 = vpop.f32.mrf.mxu2 }
 0x716   : > { %v5819_v55 = vadd.f32 %v7408_v53, %v5774_v57  ;;  %v12798_v37 = vand.u32 4294901760, %v11894_v31  ;;  %v5617_v58 = vadd.f32 %v5616_v39, %v5420_v15  ;;  %v5426_v39 = vadd.f32 %v11608_v62, %v5202_v33 }
 0x717   : > { %v13498_v15 = vand.u32 4294901760, %v11621_v23  ;;  %v5207_v62 = vadd.f32 %v11653_v8, %v11324_v35 }
 0x718   : > { %v5851_v16 = vmax.f32 %v5819_v55, 0.0  ;;  %6711 = vmatmul.f32.gmra.mxu3 %v13496_v24  ;;  %v6126_v3 = vsub.f32 %v11894_v31, %v12798_v37 }
 0x719   : > { %v11907_v1 = vpop.f32.mrf.mxu0  ;;  %v11909_v36 = vpop.f32.mrf.mxu1  ;;  %v5432_v8 = vadd.f32 %v11634_v48, %v5207_v62 }
 0x71a   : > { %13497 = vst [vmem:[#allocation50_spill] sm:$0xff] %v11909_v36  ;;  %v11911_v13 = vand.u32 4294901760, %v5851_v16  ;;  %6509 = vmatmul.f32.gmra.mxu2 %v11621_v23  ;;  %v6127_v57 = vand.u32 4294901760, %v6126_v3  ;;  %v11939_v23 = vld [vmem:[%s12402_s10] ss:$0 sm:$0xff] }
 0x71b   : > { %v5777_v55 = vpop.f32.mrf.mxu3 }
 0x71c   : > { %v11917_v45 = vsub.f32 %v5851_v16, %v11911_v13  ;;  %v5778_v14 = vadd.f32 %v5777_v55, %v5617_v58  ;;  %6128 = vmatmul.f32.gmra.mxu0 %v6127_v57  ;;  %6373 = vmatmul.f32.gmra.mxu1 %v11911_v13 }
 0x71d   : > { %v5620_v24 = vpop.f32.mrf.mxu2 }
 0x71e   : > { %v5820_v37 = vadd.f32 %v7408_v53, %v5778_v14  ;;  %v12801_v42 = vand.u32 4294901760, %v11917_v45  ;;  %v5621_v58 = vadd.f32 %v5620_v24, %v5426_v39 }
 0x720   : > { %v5852_v36 = vmax.f32 %v5820_v37, 0.0  ;;  %6717 = vmatmul.f32.gmra.mxu3 %v13498_v15  ;;  %v6134_v63 = vsub.f32 %v11917_v45, %v12801_v42  ;;  %v5914_v15 = vadd.f32 %v11939_v23, %v11674_v20 }
 0x721   : > { %v11927_v56 = vpop.f32.mrf.mxu0  ;;  %v11929_v16 = vpop.f32.mrf.mxu1 }
 0x722   : > { %v11931_v3 = vand.u32 4294901760, %v5852_v36  ;;  %6514 = vmatmul.f32.gmra.mxu2 %v11642_v47  ;;  %v6135_v57 = vand.u32 4294901760, %v6134_v63  ;;  %v13499_v63 = vand.u32 4294901760, %v11642_v47  ;;  %v6263_v62 = vadd.f32 %v11655_v54, %v5914_v15 }
 0x723   : > { %v5781_v37 = vpop.f32.mrf.mxu3 }
 0x724   : > { %v11942_v55 = vsub.f32 %v5852_v36, %v11931_v3  ;;  %v5782_v33 = vadd.f32 %v5781_v37, %v5621_v58  ;;  %6136 = vmatmul.f32.gmra.mxu0 %v6135_v57  ;;  %6377 = vmatmul.f32.gmra.mxu1 %v11931_v3 }
 0x725   : > { %v5624_v14 = vpop.f32.mrf.mxu2 }
 0x726   : > { %v5821_v24 = vadd.f32 %v7408_v53, %v5782_v33  ;;  %v12800_v39 = vand.u32 4294901760, %v11942_v55  ;;  %v5625_v33 = vadd.f32 %v5624_v14, %v5432_v8  ;;  %v5922_v14 = vadd.f32 %v11939_v23, %v11695_v0 }
 0x728   : > { %v5853_v35 = vmax.f32 %v5821_v24, 0.0  ;;  %6723 = vmatmul.f32.gmra.mxu3 %v13499_v63  ;;  %v6142_v36 = vsub.f32 %v11942_v55, %v12800_v39 }
 0x729   : > { %v11954_v58 = vpop.f32.mrf.mxu0  ;;  %v11956_v57 = vpop.f32.mrf.mxu1 }
 0x72a   : > { %13500 = vst [vmem:[#allocation39_spill] sm:$0xff] %v11956_v57  ;;  %v11958_v37 = vand.u32 4294901760, %v5853_v35  ;;  %6519 = vmatmul.f32.gmra.mxu2 %v11663_v38  ;;  %v6143_v20 = vand.u32 4294901760, %v6142_v36  ;;  %v13501_v36 = vand.u32 4294901760, %v11663_v38  ;;  %v6267_v38 = vadd.f32 %v11676_v25, %v5922_v14 }
 0x72b   : > { %v5785_v24 = vpop.f32.mrf.mxu3 }
 0x72c   : > { %v11962_v48 = vsub.f32 %v5853_v35, %v11958_v37  ;;  %v5786_v47 = vadd.f32 %v5785_v24, %v5625_v33  ;;  %6144 = vmatmul.f32.gmra.mxu0 %v6143_v20  ;;  %6381 = vmatmul.f32.gmra.mxu1 %v11958_v37 }
 0x72d   : > { %v6440_v63 = vpop.f32.mrf.mxu2 }
 0x72e   : > { %v5822_v39 = vadd.f32 %v7408_v53, %v5786_v47  ;;  %v6441_v42 = vadd.f32 %v6440_v63, %v6263_v62  ;;  %v6149_v57 = vand.u32 4294901760, %v11962_v48  ;;  %v5930_v63 = vadd.f32 %v11939_v23, %v11716_v34 }
 0x730   : > { %v5854_v8 = vmax.f32 %v5822_v39, 0.0  ;;  %6729 = vmatmul.f32.gmra.mxu3 %v13501_v36  ;;  %v6150_v35 = vsub.f32 %v11962_v48, %v6149_v57  ;;  %v13502_v36 = vand.u32 4294901760, %v11684_v2  ;;  %v6271_v34 = vadd.f32 %v11697_v4, %v5930_v63  ;;  %v13504_v63 = vld [vmem:[#allocation26_spill] sm:$0xff] }
 0x731   : > { %v11974_v33 = vpop.f32.mrf.mxu0  ;;  %v11976_v20 = vpop.f32.mrf.mxu1 }
 0x732   : > { %v11978_v54 = vand.u32 4294901760, %v5854_v8  ;;  %6524 = vmatmul.f32.gmra.mxu2 %v11684_v2  ;;  %v6151_v53 = vand.u32 4294901760, %v6150_v35 }
 0x733   : > { %v6634_v15 = vpop.f32.mrf.mxu3 }
 0x734   : > { %v11982_v0 = vsub.f32 %v5854_v8, %v11978_v54  ;;  %v11984_v39 = vadd.f32 %v6634_v15, %v6441_v42  ;;  %6152 = vmatmul.f32.gmra.mxu0 %v6151_v53  ;;  %6385 = vmatmul.f32.gmra.mxu1 %v11978_v54 }
 0x735   : > { %v6445_v24 = vpop.f32.mrf.mxu2 }
 0x736   : > { %v6446_v47 = vadd.f32 %v6445_v24, %v6267_v38  ;;  %v12802_v62 = vand.u32 4294901760, %v11982_v0  ;;  %v5938_v38 = vadd.f32 %v11939_v23, %v11737_v19  ;;  %v13503_v24 = vand.u32 4294901760, %v11705_v51 }
 0x738   : > { %6735 = vmatmul.f32.gmra.mxu3 %v13502_v36  ;;  %v6158_v42 = vsub.f32 %v11982_v0, %v12802_v62  ;;  %v6275_v4 = vadd.f32 %v11718_v44, %v5938_v38  ;;  %v13506_v38 = vld [vmem:[#allocation44_spill] sm:$0xff] }
 0x739   : > { %v11996_v8 = vpop.f32.mrf.mxu0  ;;  %v11998_v35 = vpop.f32.mrf.mxu1 }
 0x73a   : > { %6529 = vmatmul.f32.gmra.mxu2 %v11705_v51  ;;  %v6159_v25 = vand.u32 4294901760, %v6158_v42  ;;  %v5946_v51 = vadd.f32 %v11939_v23, %v11758_v7 }
 0x73b   : > { %v6640_v14 = vpop.f32.mrf.mxu3 }
 0x73c   : > { %v12001_v53 = vadd.f32 %v6640_v14, %v6446_v47  ;;  %6160 = vmatmul.f32.gmra.mxu0 %v6159_v25  ;;  %7049 = vmatmul.f32.vlgmr.msrb.gmra.mxu1 %v11357_v61  ;;  %v13505_v14 = vand.u32 4294901760, %v11726_v49 }
 0x73d   : > { %v6450_v2 = vpop.f32.mrf.mxu2 }
 0x73e   : > { %v6451_v15 = vadd.f32 %v6450_v2, %v6271_v34 }
 0x740   : > { %6741 = vmatmul.f32.gmra.mxu3 %v13503_v24 }
 0x741   : > { %v12009_v36 = vpop.f32.mrf.mxu0  ;;  %v12011_v62 = vpop.f32.mrf.mxu1 }
 0x742   : > { %6534 = vmatmul.f32.gmra.mxu2 %v11726_v49  ;;  %v5954_v49 = vadd.f32 %v11939_v23, %v11779_v29 }
 0x743   : > { %v6646_v47 = vpop.f32.mrf.mxu3 }
 0x744   : > { %v12014_v42 = vadd.f32 %v6646_v47, %v6451_v15  ;;  %6888 = vmatmul.f32.vlgmr.msrb.gmra.mxu0 %v11357_v61  ;;  %7053 = vmatmul.f32.gmra.mxu1 %v13504_v63  ;;  %v6279_v61 = vadd.f32 %v11739_v26, %v5946_v51  ;;  %v13507_v47 = vand.u32 4294901760, %v11747_v60  ;;  %v13508_v51 = vld [vmem:[#allocation69_spill] sm:$0xff] }
 0x745   : > { %v6455_v25 = vpop.f32.mrf.mxu2 }
 0x746   : > { %v6456_v19 = vadd.f32 %v6455_v25, %v6275_v4 }
 0x748   : > { %6747 = vmatmul.f32.gmra.mxu3 %v13505_v14 }
 0x749   : > { %v12023_v34 = vpop.f32.mrf.mxu0  ;;  %v12025_v2 = vpop.f32.mrf.mxu1 }
 0x74a   : > { %6539 = vmatmul.f32.gmra.mxu2 %v11747_v60  ;;  %v5962_v60 = vadd.f32 %v11939_v23, %v11800_v6 }
 0x74b   : > { %v6652_v15 = vpop.f32.mrf.mxu3 }
 0x74c   : > { %v12028_v44 = vadd.f32 %v6652_v15, %v6456_v19  ;;  %6892 = vmatmul.f32.gmra.mxu0 %v13504_v63  ;;  %7057 = vmatmul.f32.gmra.mxu1 %v13506_v38  ;;  %v6283_v63 = vadd.f32 %v11760_v28, %v5954_v49  ;;  %v13509_v15 = vand.u32 4294901760, %v11768_v21  ;;  %v13510_v49 = vld [vmem:[#allocation55_spill] sm:$0xff] }
 0x74d   : > { %v6460_v24 = vpop.f32.mrf.mxu2 }
 0x74e   : > { %v6461_v7 = vadd.f32 %v6460_v24, %v6279_v61 }
 0x750   : > { %6753 = vmatmul.f32.gmra.mxu3 %v13507_v47 }
 0x751   : > { %v12037_v4 = vpop.f32.mrf.mxu0  ;;  %v12039_v25 = vpop.f32.mrf.mxu1 }
 0x752   : > { %6544 = vmatmul.f32.gmra.mxu2 %v11768_v21  ;;  %v5970_v21 = vadd.f32 %v11939_v23, %v11821_v50 }
 0x753   : > { %v6658_v19 = vpop.f32.mrf.mxu3 }
 0x754   : > { %v12042_v26 = vadd.f32 %v6658_v19, %v6461_v7  ;;  %6896 = vmatmul.f32.gmra.mxu0 %v13506_v38  ;;  %7061 = vmatmul.f32.gmra.mxu1 %v13508_v51  ;;  %v6287_v38 = vadd.f32 %v11781_v27, %v5962_v60  ;;  %v13511_v19 = vand.u32 4294901760, %v11789_v5  ;;  %v13512_v60 = vld [vmem:[#allocation47_spill] sm:$0xff] }
 0x755   : > { %v6465_v14 = vpop.f32.mrf.mxu2 }
 0x756   : > { %v6466_v29 = vadd.f32 %v6465_v14, %v6283_v63 }
 0x758   : > { %6759 = vmatmul.f32.gmra.mxu3 %v13509_v15 }
 0x759   : > { %v12051_v61 = vpop.f32.mrf.mxu0  ;;  %v12053_v24 = vpop.f32.mrf.mxu1 }
 0x75a   : > { %6549 = vmatmul.f32.gmra.mxu2 %v11789_v5  ;;  %v13513_v5 = vand.u32 4294901760, %v11810_v12 }
 0x75b   : > { %v6664_v7 = vpop.f32.mrf.mxu3 }
 0x75c   : > { %v12056_v28 = vadd.f32 %v6664_v7, %v6466_v29  ;;  %6900 = vmatmul.f32.gmra.mxu0 %v13508_v51  ;;  %7065 = vmatmul.f32.gmra.mxu1 %v13510_v49  ;;  %v6291_v51 = vadd.f32 %v11802_v17, %v5970_v21  ;;  %v13514_v17 = vld [vmem:[#allocation72_spill] sm:$0xff] }
 0x75d   : > { %v6470_v47 = vpop.f32.mrf.mxu2 }
 0x75e   : > { %v6471_v6 = vadd.f32 %v6470_v47, %v6287_v38 }
 0x760   : > { %6765 = vmatmul.f32.gmra.mxu3 %v13511_v19  ;;  %v13516_v19 = vld [vmem:[#allocation56_spill] sm:$0xff] }
 0x761   : > { %v12065_v63 = vpop.f32.mrf.mxu0  ;;  %v12067_v14 = vpop.f32.mrf.mxu1 }
 0x762   : > { %6554 = vmatmul.f32.gmra.mxu2 %v11810_v12 }
 0x763   : > { %v6670_v29 = vpop.f32.mrf.mxu3 }
 0x764   : > { %v12070_v27 = vadd.f32 %v6670_v29, %v6471_v6  ;;  %6904 = vmatmul.f32.gmra.mxu0 %v13510_v49  ;;  %7069 = vmatmul.f32.gmra.mxu1 %v13512_v60  ;;  %v13515_v49 = vand.u32 4294901760, %v11831_v30  ;;  %v13517_v29 = vand.u32 4294901760, %v11852_v32 }
 0x765   : > { %v6475_v15 = vpop.f32.mrf.mxu2 }
 0x766   : > { %v6476_v50 = vadd.f32 %v6475_v15, %v6291_v51  ;;  %v13519_v15 = vand.u32 4294901760, %v11873_v59 }
 0x768   : > { %6771 = vmatmul.f32.gmra.mxu3 %v13513_v5 }
 0x769   : > { %v12077_v7 = vpop.f32.mrf.mxu0  ;;  %v12079_v38 = vpop.f32.mrf.mxu1 }
 0x76a   : > { %6559 = vmatmul.f32.gmra.mxu2 %v11831_v30  ;;  %v13518_v30 = vld [vmem:[#allocation53_spill] sm:$0xff] }
 0x76b   : > { %v6676_v47 = vpop.f32.mrf.mxu3 }
 0x76c   : > { %v12082_v6 = vadd.f32 %v6676_v47, %v6476_v50  ;;  %6908 = vmatmul.f32.gmra.mxu0 %v13512_v60  ;;  %7073 = vmatmul.f32.gmra.mxu1 %v13514_v17  ;;  %v13522_v47 = vand.u32 4294901760, %v11894_v31 }
 0x770   : > { %6777 = vmatmul.f32.gmra.mxu3 %v13515_v49 }
 0x771   : > { %v12088_v21 = vpop.f32.mrf.mxu0  ;;  %v12090_v12 = vpop.f32.mrf.mxu1 }
 0x772   : > { %6564 = vmatmul.f32.gmra.mxu2 %v11852_v32  ;;  %v13521_v32 = vld [vmem:[#allocation18_spill] sm:$0xff] }
 0x774   : > { %6912 = vmatmul.f32.gmra.mxu0 %v13514_v17  ;;  %7077 = vmatmul.f32.gmra.mxu1 %v13516_v19 }
 0x778   : > { %6783 = vmatmul.f32.gmra.mxu3 %v13517_v29 }
 0x779   : > { %v12097_v51 = vpop.f32.mrf.mxu0  ;;  %v12099_v60 = vpop.f32.mrf.mxu1 }
 0x77a   : > { %6569 = vmatmul.f32.gmra.mxu2 %v11873_v59  ;;  %v13524_v59 = vld [vmem:[#allocation7_spill] sm:$0xff] }
 0x77c   : > { %6916 = vmatmul.f32.gmra.mxu0 %v13516_v19  ;;  %7081 = vmatmul.f32.gmra.mxu1 %v13518_v30  ;;  %v13525_v19 = vand.u32 4294901760, %v11917_v45 }
 0x780   : > { %6789 = vmatmul.f32.gmra.mxu3 %v13519_v15  ;;  %v13529_v15 = vand.u32 4294901760, %v11942_v55 }
 0x781   : > { %v12106_v50 = vpop.f32.mrf.mxu0  ;;  %v12108_v5 = vpop.f32.mrf.mxu1 }
 0x782   : > { %13520 = vst [vmem:[#allocation93_spill] sm:$0xff] %v12108_v5  ;;  %6574 = vmatmul.f32.gmra.mxu2 %v11894_v31  ;;  %v13528_v31 = vld [vmem:[#allocation27_spill] sm:$0xff] }
 0x784   : > { %6920 = vmatmul.f32.gmra.mxu0 %v13518_v30  ;;  %7085 = vmatmul.f32.gmra.mxu1 %v13521_v32 }
 0x788   : > { %6795 = vmatmul.f32.gmra.mxu3 %v13522_v47 }
 0x789   : > { %v12115_v17 = vpop.f32.mrf.mxu0  ;;  %v12117_v49 = vpop.f32.mrf.mxu1 }
 0x78a   : > { %13523 = vst [vmem:[#allocation54_spill] sm:$0xff] %v12117_v49  ;;  %6579 = vmatmul.f32.gmra.mxu2 %v11917_v45  ;;  %v13532_v45 = vld [vmem:[#allocation78_spill] sm:$0xff] }
 0x78c   : > { %6924 = vmatmul.f32.gmra.mxu0 %v13521_v32  ;;  %7089 = vmatmul.f32.gmra.mxu1 %v13524_v59 }
 0x790   : > { %6801 = vmatmul.f32.gmra.mxu3 %v13525_v19 }
 0x791   : > { %v12124_v29 = vpop.f32.mrf.mxu0  ;;  %v12126_v30 = vpop.f32.mrf.mxu1 }
 0x792   : > { %13526 = vst [vmem:[#allocation100_spill] sm:$0xff] %v12124_v29  ;;  %6584 = vmatmul.f32.gmra.mxu2 %v11942_v55  ;;  %v13535_v55 = vld [vmem:[#allocation9_spill] sm:$0xff] }
 0x793   : > { %13527 = vst [vmem:[#allocation96_spill] sm:$0xff] %v12126_v30  ;;  %v12177_v30 = vpop.f32.mrf.mxu2 }
 0x794   : > { %6928 = vmatmul.f32.gmra.mxu0 %v13524_v59  ;;  %7093 = vmatmul.f32.gmra.mxu1 %v13528_v31 }
 0x798   : > { %6807 = vmatmul.f32.gmra.mxu3 %v13529_v15  ;;  %v13536_v15 = vand.u32 4294901760, %v11982_v0 }
 0x799   : > { %v12133_v47 = vpop.f32.mrf.mxu0  ;;  %v12135_v32 = vpop.f32.mrf.mxu1 }
 0x79a   : > { %13530 = vst [vmem:[#allocation14_spill] sm:$0xff] %v12133_v47  ;;  %6589 = vmatmul.f32.gmra.mxu2 %v11962_v48 }
 0x79b   : > { %13531 = vst [vmem:[#allocation49_spill] sm:$0xff] %v12135_v32 }
 0x79c   : > { %6932 = vmatmul.f32.gmra.mxu0 %v13528_v31  ;;  %7097 = vmatmul.f32.gmra.mxu1 %v13532_v45 }
 0x7a0   : > { %6813 = vmatmul.f32.gmra.mxu3 %v6149_v57 }
 0x7a1   : > { %v12142_v19 = vpop.f32.mrf.mxu0  ;;  %v12144_v59 = vpop.f32.mrf.mxu1 }
 0x7a2   : > { %13533 = vst [vmem:[#allocation36_spill] sm:$0xff] %v12142_v19  ;;  %6594 = vmatmul.f32.gmra.mxu2 %v11982_v0 }
 0x7a3   : > { %13534 = vst [vmem:[#allocation101_spill] sm:$0xff] %v12144_v59 }
 0x7a4   : > { %6936 = vmatmul.f32.gmra.mxu0 %v13532_v45  ;;  %7101 = vmatmul.f32.gmra.mxu1 %v13535_v55  ;;  %v13541_v45 = vld [vmem:[#allocation31_spill] sm:$0xff] }
 0x7a8   : > { %6819 = vmatmul.f32.gmra.mxu3 %v13536_v15  ;;  %v13543_v15 = vld [vmem:[#allocation81_spill] sm:$0xff] }
 0x7a9   : > { %v12151_v31 = vpop.f32.mrf.mxu0  ;;  %v12153_v32 = vpop.f32.mrf.mxu1 }
 0x7aa   : > { %13537 = vst [vmem:[#allocation104_spill] sm:$0xff] %v12151_v31 }
 0x7ab   : > { %13538 = vst [vmem:[#allocation48_spill] sm:$0xff] %v12153_v32 }
 0x7ac   : > { %6940 = vmatmul.f32.gmra.mxu0 %v13535_v55  ;;  %7105 = vmatmul.f32.gmra.mxu1 %v11615_v41 }
 0x7b1   : > { %v12157_v57 = vpop.f32.mrf.mxu0  ;;  %v12159_v48 = vpop.f32.mrf.mxu1 }
 0x7b2   : > { %13539 = vst [vmem:[#allocation19_spill] sm:$0xff] %v12157_v57 }
 0x7b3   : > { %13540 = vst [vmem:[#allocation21_spill] sm:$0xff] %v12159_v48 }
 0x7b4   : > { %6944 = vmatmul.f32.gmra.mxu0 %v11615_v41  ;;  %7109 = vmatmul.f32.gmra.mxu1 %v13541_v45  ;;  %v13544_v41 = vld [vmem:[#allocation11_spill] sm:$0xff] }
 0x7b9   : > { %v12163_v59 = vpop.f32.mrf.mxu0  ;;  %v7050_v0 = vpop.f32.mrf.mxu1 }
 0x7ba   : > { %13542 = vst [vmem:[#allocation52_spill] sm:$0xff] %v12163_v59 }
 0x7bc   : > { %6948 = vmatmul.f32.gmra.mxu0 %v13541_v45  ;;  %7113 = vmatmul.f32.gmra.mxu1 %v13543_v15 }
 0x7c1   : > { %v6889_v32 = vpop.f32.mrf.mxu0  ;;  %v7054_v55 = vpop.f32.mrf.mxu1 }
 0x7c2   : > { %v6890_v57 = vadd.f32 %v6889_v32, %v11984_v39  ;;  %v13545_v39 = vld [vmem:[#allocation34_spill] sm:$0xff]  ;;  %v12181_v32 = vpop.f32.mrf.mxu3 }
 0x7c4   : > { %v7051_v31 = vadd.f32 %v7050_v0, %v6890_v57  ;;  %6952 = vmatmul.f32.gmra.mxu0 %v13543_v15  ;;  %7117 = vmatmul.f32.gmra.mxu1 %v13544_v41 }
 0x7c6   : > { %v7177_v48 = vmax.f32 %v7051_v31, 0.0 }
 0x7c8   : > { %7209 = vst [vmem:[%s12173_s13] sm:$0xff] %v7177_v48 }
 0x7c9   : > { %v6893_v45 = vpop.f32.mrf.mxu0  ;;  %v7058_v59 = vpop.f32.mrf.mxu1 }
 0x7ca   : > { %v6894_v19 = vadd.f32 %v6893_v45, %v12001_v53  ;;  %v13546_v53 = vld [vmem:[#allocation84_spill] sm:$0xff]  ;;  %v12187_v45 = vpop.f32.mrf.mxu2 }
 0x7cc   : > { %v7055_v47 = vadd.f32 %v7054_v55, %v6894_v19  ;;  %6956 = vmatmul.f32.gmra.mxu0 %v13544_v41  ;;  %7121 = vmatmul.f32.gmra.mxu1 %v13545_v39  ;;  %v12189_v55 = vpop.f32.mrf.mxu3 }
 0x7ce   : > { %v7178_v31 = vmax.f32 %v7055_v47, 0.0 }
 0x7d0   : > { %7210 = vst [vmem:[%s12173_s13 + $0x8] sm:$0xff] %v7178_v31 }
 0x7d1   : > { %v6897_v57 = vpop.f32.mrf.mxu0  ;;  %v7062_v0 = vpop.f32.mrf.mxu1 }
 0x7d2   : > { %v6898_v48 = vadd.f32 %v6897_v57, %v12014_v42  ;;  %v13547_v42 = vld [vmem:[#allocation42_spill] sm:$0xff] }
 0x7d4   : > { %v7059_v15 = vadd.f32 %v7058_v59, %v6898_v48  ;;  %6960 = vmatmul.f32.gmra.mxu0 %v13545_v39  ;;  %7125 = vmatmul.f32.gmra.mxu1 %v13546_v53  ;;  %v12195_v39 = vpop.f32.mrf.mxu2 }
 0x7d6   : > { %v7179_v19 = vmax.f32 %v7059_v15, 0.0  ;;  %v12198_v15 = vpop.f32.mrf.mxu3 }
 0x7d8   : > { %7211 = vst [vmem:[%s12173_s13 + $0x10] sm:$0xff] %v7179_v19 }
 0x7d9   : > { %v6901_v41 = vpop.f32.mrf.mxu0  ;;  %v7066_v49 = vpop.f32.mrf.mxu1 }
 0x7da   : > { %v6902_v47 = vadd.f32 %v6901_v41, %v12028_v44  ;;  %v13548_v44 = vld [vmem:[#allocation35_spill] sm:$0xff] }
 0x7dc   : > { %v7063_v31 = vadd.f32 %v7062_v0, %v6902_v47  ;;  %6964 = vmatmul.f32.gmra.mxu0 %v13546_v53  ;;  %7129 = vmatmul.f32.gmra.mxu1 %v13547_v42  ;;  %v12204_v47 = vpop.f32.mrf.mxu2 }
 0x7de   : > { %v7180_v59 = vmax.f32 %v7063_v31, 0.0 }
 0x7e0   : > { %7212 = vst [vmem:[%s12173_s13 + $0x18] sm:$0xff] %v7180_v59  ;;  %v12207_v59 = vpop.f32.mrf.mxu3 }
 0x7e1   : > { %v6905_v57 = vpop.f32.mrf.mxu0  ;;  %v7070_v48 = vpop.f32.mrf.mxu1 }
 0x7e2   : > { %v6906_v19 = vadd.f32 %v6905_v57, %v12042_v26  ;;  %v13549_v26 = vld [vmem:[#allocation87_spill] sm:$0xff] }
 0x7e4   : > { %v7067_v29 = vadd.f32 %v7066_v49, %v6906_v19  ;;  %6968 = vmatmul.f32.gmra.mxu0 %v13547_v42  ;;  %7133 = vmatmul.f32.gmra.mxu1 %v13548_v44  ;;  %v12213_v19 = vpop.f32.mrf.mxu2 }
 0x7e6   : > { %v7181_v0 = vmax.f32 %v7067_v29, 0.0 }
 0x7e8   : > { %7213 = vst [vmem:[%s12173_s13 + $0x20] sm:$0xff] %v7181_v0 }
 0x7e9   : > { %v6909_v53 = vpop.f32.mrf.mxu0  ;;  %v7074_v41 = vpop.f32.mrf.mxu1 }
 0x7ea   : > { %v6910_v31 = vadd.f32 %v6909_v53, %v12056_v28  ;;  %v12217_v28 = vpop.f32.mrf.mxu3 }
 0x7ec   : > { %v7071_v5 = vadd.f32 %v7070_v48, %v6910_v31  ;;  %6972 = vmatmul.f32.gmra.mxu0 %v13548_v44  ;;  %7137 = vmatmul.f32.gmra.mxu1 %v13549_v26  ;;  %v5978_v44 = vadd.f32 %v11939_v23, %v11842_v52  ;;  %v5986_v52 = vadd.f32 %v11939_v23, %v11863_v22 }
 0x7ed   : > { %v5994_v22 = vadd.f32 %v11939_v23, %v11884_v46 }
 0x7ee   : > { %v7182_v49 = vmax.f32 %v7071_v5, 0.0 }
 0x7f0   : > { %7214 = vst [vmem:[%s12173_s13 + $0x28] sm:$0xff] %v7182_v49 }
 0x7f1   : > { %v6913_v42 = vpop.f32.mrf.mxu0  ;;  %v7078_v57 = vpop.f32.mrf.mxu1 }
 0x7f2   : > { %v6914_v29 = vadd.f32 %v6913_v42, %v12070_v27  ;;  %v13550_v27 = vld [vmem:[#allocation46_spill] sm:$0xff] }
 0x7f3   : > { %v6295_v49 = vadd.f32 %v13550_v27, %v5978_v44 }
 0x7f4   : > { %v7075_v0 = vadd.f32 %v7074_v41, %v6914_v29  ;;  %6976 = vmatmul.f32.gmra.mxu0 %v13549_v26  ;;  %7141 = vmatmul.f32.gmra.mxu1 %v11804_v9  ;;  %v12227_v26 = vpop.f32.mrf.mxu2 }
 0x7f5   : > { %v6481_v41 = vadd.f32 %v12177_v30, %v6295_v49 }
 0x7f6   : > { %v7183_v48 = vmax.f32 %v7075_v0, 0.0 }
 0x7f7   : > { %v6683_v0 = vadd.f32 %v12181_v32, %v6481_v41 }
 0x7f8   : > { %7215 = vst [vmem:[%s12173_s13 + $0x30] sm:$0xff] %v7183_v48  ;;  %v12232_v48 = vpop.f32.mrf.mxu3 }
 0x7f9   : > { %v6917_v5 = vpop.f32.mrf.mxu0  ;;  %v7082_v53 = vpop.f32.mrf.mxu1 }
 0x7fa   : > { %v6918_v31 = vadd.f32 %v6917_v5, %v12082_v6 }
 0x7fc   : > { %v7079_v42 = vadd.f32 %v7078_v57, %v6918_v31  ;;  %6980 = vmatmul.f32.gmra.mxu0 %v11804_v9  ;;  %7145 = vmatmul.f32.gmra.mxu1 %v11825_v11  ;;  %v13551_v9 = vld [vmem:[#allocation99_spill] sm:$0xff]  ;;  %v12242_v49 = vpop.f32.mrf.mxu2 }
 0x7fd   : > { %v6299_v5 = vadd.f32 %v13551_v9, %v5986_v52 }
 0x7fe   : > { %v7184_v29 = vmax.f32 %v7079_v42, 0.0 }
 0x7ff   : > { %v6486_v30 = vadd.f32 %v12187_v45, %v6299_v5 }
 0x800   : > { %7216 = vst [vmem:[%s12173_s13 + $0x38] sm:$0xff] %v7184_v29  ;;  %v12245_v29 = vpop.f32.mrf.mxu3 }
 0x801   : > { %v6921_v6 = vpop.f32.mrf.mxu0  ;;  %v7086_v57 = vpop.f32.mrf.mxu1  ;;  %v6689_v32 = vadd.f32 %v12189_v55, %v6486_v30  ;;  %v6002_v55 = vadd.f32 %v11939_v23, %v11907_v1  ;;  %v6010_v1 = vadd.f32 %v11939_v23, %v11927_v56  ;;  %v6018_v56 = vadd.f32 %v11939_v23, %v11954_v58 }
 0x802   : > { %v6922_v44 = vadd.f32 %v6921_v6, %v6683_v0  ;;  %v6026_v58 = vadd.f32 %v11939_v23, %v11974_v33  ;;  %v6034_v33 = vadd.f32 %v11939_v23, %v11996_v8  ;;  %v6042_v8 = vadd.f32 %v11939_v23, %v12009_v36 }
 0x804   : > { %v7083_v31 = vadd.f32 %v7082_v53, %v6922_v44  ;;  %6984 = vmatmul.f32.gmra.mxu0 %v11825_v11  ;;  %7149 = vmatmul.f32.gmra.mxu1 %v11846_v40  ;;  %v13552_v11 = vld [vmem:[#allocation90_spill] sm:$0xff]  ;;  %v6515_v5 = vpop.f32.mrf.mxu2 }
 0x805   : > { %v6303_v52 = vadd.f32 %v13552_v11, %v5994_v22 }
 0x806   : > { %v7185_v27 = vmax.f32 %v7083_v31, 0.0 }
 0x807   : > { %v6491_v46 = vadd.f32 %v12195_v39, %v6303_v52 }
 0x808   : > { %7217 = vst [vmem:[%s12173_s13 + $0x40] sm:$0xff] %v7185_v27  ;;  %v6724_v30 = vpop.f32.mrf.mxu3 }
 0x809   : > { %v6925_v42 = vpop.f32.mrf.mxu0  ;;  %v7090_v41 = vpop.f32.mrf.mxu1  ;;  %v6695_v6 = vadd.f32 %v12198_v15, %v6491_v46 }
 0x80a   : > { %v6926_v53 = vadd.f32 %v6925_v42, %v6689_v32 }
 0x80c   : > { %v7087_v0 = vadd.f32 %v7086_v57, %v6926_v53  ;;  %6988 = vmatmul.f32.gmra.mxu0 %v11846_v40  ;;  %7153 = vmatmul.f32.gmra.mxu1 %v11867_v18  ;;  %v6307_v57 = vadd.f32 %v11886_v10, %v6002_v55  ;;  %v13553_v10 = vld [vmem:[#allocation50_spill] sm:$0xff]  ;;  %v6315_v55 = vadd.f32 %v11929_v16, %v6018_v56 }
 0x80d   : > { %v6311_v53 = vadd.f32 %v13553_v10, %v6010_v1  ;;  %v6323_v10 = vadd.f32 %v11976_v20, %v6034_v33 }
 0x80e   : > { %v7186_v45 = vmax.f32 %v7087_v0, 0.0  ;;  %v6496_v39 = vadd.f32 %v12204_v47, %v6307_v57 }
 0x810   : > { %7218 = vst [vmem:[%s12173_s13 + $0x48] sm:$0xff] %v7186_v45  ;;  %v6701_v15 = vadd.f32 %v12207_v59, %v6496_v39  ;;  %v6730_v47 = vpop.f32.mrf.mxu3 }
 0x811   : > { %v6929_v44 = vpop.f32.mrf.mxu0  ;;  %v7094_v9 = vpop.f32.mrf.mxu1 }
 0x812   : > { %v6930_v31 = vadd.f32 %v6929_v44, %v6695_v6 }
 0x814   : > { %v7091_v40 = vadd.f32 %v7090_v41, %v6930_v31  ;;  %6992 = vmatmul.f32.gmra.mxu0 %v11867_v18  ;;  %7157 = vmatmul.f32.gmra.mxu1 %v11888_v43  ;;  %v6520_v41 = vpop.f32.mrf.mxu2  ;;  %v6501_v18 = vadd.f32 %v12213_v19, %v6311_v53 }
 0x816   : > { %v7187_v27 = vmax.f32 %v7091_v40, 0.0  ;;  %v6707_v59 = vadd.f32 %v12217_v28, %v6501_v18  ;;  %v13554_v40 = vld [vmem:[#allocation39_spill] sm:$0xff] }
 0x817   : > { %v6319_v39 = vadd.f32 %v13554_v40, %v6026_v58 }
 0x818   : > { %7219 = vst [vmem:[%s12173_s13 + $0x50] sm:$0xff] %v7187_v27 }
 0x819   : > { %v6933_v22 = vpop.f32.mrf.mxu0  ;;  %v7098_v32 = vpop.f32.mrf.mxu1 }
 0x81a   : > { %v6934_v42 = vadd.f32 %v6933_v22, %v6701_v15 }
 0x81c   : > { %v7095_v11 = vadd.f32 %v7094_v9, %v6934_v42  ;;  %6996 = vmatmul.f32.gmra.mxu0 %v11888_v43  ;;  %7161 = vmatmul.f32.gmra.mxu1 %v11911_v13  ;;  %v6506_v43 = vadd.f32 %v12227_v26, %v6315_v55  ;;  %v6525_v19 = vpop.f32.mrf.mxu2  ;;  %v6736_v9 = vpop.f32.mrf.mxu3  ;;  %v6511_v26 = vadd.f32 %v12242_v49, %v6319_v39 }
 0x81d   : > { %v6516_v49 = vadd.f32 %v6515_v5, %v6323_v10 }
 0x81e   : > { %v7188_v52 = vmax.f32 %v7095_v11, 0.0  ;;  %v6713_v28 = vadd.f32 %v12232_v48, %v6506_v43  ;;  %v6719_v48 = vadd.f32 %v12245_v29, %v6511_v26 }
 0x81f   : > { %v6725_v29 = vadd.f32 %v6724_v30, %v6516_v49 }
 0x820   : > { %7220 = vst [vmem:[%s12173_s13 + $0x58] sm:$0xff] %v7188_v52 }
 0x821   : > { %v6937_v0 = vpop.f32.mrf.mxu0  ;;  %v7102_v46 = vpop.f32.mrf.mxu1 }
 0x822   : > { %v6938_v45 = vadd.f32 %v6937_v0, %v6707_v59  ;;  %v6327_v59 = vadd.f32 %v11998_v35, %v6042_v8 }
 0x824   : > { %v7099_v6 = vadd.f32 %v7098_v32, %v6938_v45  ;;  %7000 = vmatmul.f32.gmra.mxu0 %v11911_v13  ;;  %7165 = vmatmul.f32.gmra.mxu1 %v11931_v3  ;;  %v6530_v1 = vpop.f32.mrf.mxu2  ;;  %v6742_v32 = vpop.f32.mrf.mxu3 }
 0x826   : > { %v7189_v44 = vmax.f32 %v7099_v6, 0.0 }
 0x828   : > { %7221 = vst [vmem:[%s12173_s13 + $0x60] sm:$0xff] %v7189_v44 }
 0x829   : > { %v6941_v31 = vpop.f32.mrf.mxu0  ;;  %v7106_v57 = vpop.f32.mrf.mxu1 }
 0x82a   : > { %v6942_v16 = vadd.f32 %v6941_v31, %v6713_v28 }
 0x82c   : > { %v7103_v13 = vadd.f32 %v7102_v46, %v6942_v16  ;;  %7004 = vmatmul.f32.gmra.mxu0 %v11931_v3  ;;  %7169 = vmatmul.f32.gmra.mxu1 %v11958_v37  ;;  %v6535_v52 = vpop.f32.mrf.mxu2  ;;  %v6748_v20 = vpop.f32.mrf.mxu3  ;;  %v6050_v46 = vadd.f32 %v11939_v23, %v12023_v34 }
 0x82e   : > { %v7190_v27 = vmax.f32 %v7103_v13, 0.0  ;;  %v6331_v6 = vadd.f32 %v12011_v62, %v6050_v46 }
 0x830   : > { %7222 = vst [vmem:[%s12173_s13 + $0x68] sm:$0xff] %v7190_v27  ;;  %v6526_v35 = vadd.f32 %v6525_v19, %v6331_v6  ;;  %v6066_v19 = vadd.f32 %v11939_v23, %v12051_v61 }
 0x831   : > { %v6945_v15 = vpop.f32.mrf.mxu0  ;;  %v7110_v22 = vpop.f32.mrf.mxu1 }
 0x832   : > { %v6946_v42 = vadd.f32 %v6945_v15, %v6719_v48  ;;  %v6339_v33 = vadd.f32 %v12039_v25, %v6066_v19 }
 0x834   : > { %v7107_v3 = vadd.f32 %v7106_v57, %v6946_v42  ;;  %7008 = vmatmul.f32.gmra.mxu0 %v11958_v37  ;;  %7173 = vmatmul.f32.gmra.mxu1 %v11978_v54  ;;  %v6521_v37 = vadd.f32 %v6520_v41, %v6327_v59  ;;  %v6540_v43 = vpop.f32.mrf.mxu2  ;;  %v6754_v58 = vpop.f32.mrf.mxu3  ;;  %v6737_v41 = vadd.f32 %v6736_v9, %v6526_v35 }
 0x835   : > { %v6536_v15 = vadd.f32 %v6535_v52, %v6339_v33  ;;  %v6098_v35 = vadd.f32 %v11939_v23, %v12097_v51 }
 0x836   : > { %v7191_v53 = vmax.f32 %v7107_v3, 0.0  ;;  %v6731_v45 = vadd.f32 %v6730_v47, %v6521_v37 }
 0x838   : > { %7223 = vst [vmem:[%s12173_s13 + $0x70] sm:$0xff] %v7191_v53 }
 0x839   : > { %v6949_v11 = vpop.f32.mrf.mxu0  ;;  %v7114_v18 = vpop.f32.mrf.mxu1 }
 0x83a   : > { %v6950_v56 = vadd.f32 %v6949_v11, %v6725_v29  ;;  %v6082_v29 = vadd.f32 %v11939_v23, %v12077_v7 }
 0x83c   : > { %v7111_v0 = vadd.f32 %v7110_v22, %v6950_v56  ;;  %7012 = vmatmul.f32.gmra.mxu0 %v11978_v54  ;;  %v6058_v54 = vadd.f32 %v11939_v23, %v12037_v4  ;;  %v6545_v39 = vpop.f32.mrf.mxu2  ;;  %v6760_v26 = vpop.f32.mrf.mxu3  ;;  %v6749_v22 = vadd.f32 %v6748_v20, %v6536_v15  ;;  %v6347_v59 = vadd.f32 %v12067_v14, %v6082_v29 }
 0x83e   : > { %v7192_v5 = vmax.f32 %v7111_v0, 0.0  ;;  %v6335_v57 = vadd.f32 %v12025_v2, %v6058_v54  ;;  %v6546_v37 = vadd.f32 %v6545_v39, %v6347_v59 }
 0x840   : > { %7224 = vst [vmem:[%s12173_s13 + $0x78] sm:$0xff] %v7192_v5  ;;  %v6531_v40 = vadd.f32 %v6530_v1, %v6335_v57  ;;  %v6074_v1 = vadd.f32 %v11939_v23, %v12065_v63  ;;  %v6090_v5 = vadd.f32 %v11939_v23, %v12088_v21  ;;  %v6761_v46 = vadd.f32 %v6760_v26, %v6546_v37 }
 0x841   : > { %v6953_v36 = vpop.f32.mrf.mxu0  ;;  %v7118_v30 = vpop.f32.mrf.mxu1  ;;  %v6106_v57 = vadd.f32 %v11939_v23, %v12106_v50 }
 0x842   : > { %v6954_v55 = vadd.f32 %v6953_v36, %v6731_v45  ;;  %v6743_v13 = vadd.f32 %v6742_v32, %v6531_v40  ;;  %v6343_v49 = vadd.f32 %v12053_v24, %v6074_v1 }
 0x843   : > { %v6359_v19 = vadd.f32 %v12099_v60, %v6106_v57 }
 0x844   : > { %v7115_v44 = vadd.f32 %v7114_v18, %v6954_v55  ;;  %v6550_v42 = vpop.f32.mrf.mxu2  ;;  %v6766_v32 = vpop.f32.mrf.mxu3  ;;  %v6541_v8 = vadd.f32 %v6540_v43, %v6343_v49 }
 0x846   : > { %v7193_v28 = vmax.f32 %v7115_v44, 0.0  ;;  %v6755_v11 = vadd.f32 %v6754_v58, %v6541_v8  ;;  %v13557_v8 = vld [vmem:[#allocation54_spill] sm:$0xff] }
 0x848   : > { %7225 = vst [vmem:[%s12173_s13 + $0x80] sm:$0xff] %v7193_v28 }
 0x849   : > { %v6957_v31 = vpop.f32.mrf.mxu0  ;;  %v7122_v34 = vpop.f32.mrf.mxu1 }
 0x84a   : > { %v6958_v47 = vadd.f32 %v6957_v31, %v6737_v41  ;;  %v6355_v41 = vadd.f32 %v12090_v12, %v6098_v35  ;;  %v13561_v35 = vld [vmem:[#allocation49_spill] sm:$0xff] }
 0x84c   : > { %v7119_v16 = vadd.f32 %v7118_v30, %v6958_v47  ;;  %v6555_v52 = vpop.f32.mrf.mxu2  ;;  %v6772_v20 = vpop.f32.mrf.mxu3  ;;  %v6351_v30 = vadd.f32 %v12079_v38, %v6090_v5 }
 0x84e   : > { %v7194_v62 = vmax.f32 %v7119_v16, 0.0  ;;  %v6551_v43 = vadd.f32 %v6550_v42, %v6351_v30 }
 0x850   : > { %7226 = vst [vmem:[%s12173_s13 + $0x88] sm:$0xff] %v7194_v62  ;;  %v6767_v58 = vadd.f32 %v6766_v32, %v6551_v43 }
 0x851   : > { %v6961_v27 = vpop.f32.mrf.mxu0  ;;  %v7126_v4 = vpop.f32.mrf.mxu1 }
 0x852   : > { %v6962_v9 = vadd.f32 %v6961_v27, %v6743_v13  ;;  %v6114_v27 = vadd.f32 %v11939_v23, %v12115_v17 }
 0x854   : > { %v7123_v48 = vadd.f32 %v7122_v34, %v6962_v9  ;;  %v6560_v55 = vpop.f32.mrf.mxu2  ;;  %v6778_v44 = vpop.f32.mrf.mxu3  ;;  %v6556_v34 = vadd.f32 %v6555_v52, %v6355_v41  ;;  %v13558_v52 = vld [vmem:[#allocation14_spill] sm:$0xff] }
 0x855   : > { %v6561_v26 = vadd.f32 %v6560_v55, %v6359_v19  ;;  %v13560_v55 = vld [vmem:[#allocation36_spill] sm:$0xff] }
 0x856   : > { %v7195_v2 = vmax.f32 %v7123_v48, 0.0  ;;  %v6773_v16 = vadd.f32 %v6772_v20, %v6556_v34  ;;  %v13562_v34 = vld [vmem:[#allocation104_spill] sm:$0xff] }
 0x858   : > { %7227 = vst [vmem:[%s12173_s13 + $0x90] sm:$0xff] %v7195_v2  ;;  %v13555_v2 = vld [vmem:[#allocation93_spill] sm:$0xff] }
 0x859   : > { %v6965_v10 = vpop.f32.mrf.mxu0  ;;  %v7130_v61 = vpop.f32.mrf.mxu1  ;;  %v6363_v1 = vadd.f32 %v13555_v2, %v6114_v27  ;;  %v13564_v27 = vld [vmem:[#allocation19_spill] sm:$0xff] }
 0x85a   : > { %v6966_v3 = vadd.f32 %v6965_v10, %v6749_v22  ;;  %v13556_v10 = vld [vmem:[#allocation100_spill] sm:$0xff] }
 0x85c   : > { %v7127_v53 = vadd.f32 %v7126_v4, %v6966_v3  ;;  %v6565_v47 = vpop.f32.mrf.mxu2  ;;  %v6784_v40 = vpop.f32.mrf.mxu3  ;;  %v6779_v4 = vadd.f32 %v6778_v44, %v6561_v26 }
 0x85d   : > { %v6566_v42 = vadd.f32 %v6565_v47, %v6363_v1  ;;  %v6146_v47 = vadd.f32 %v11939_v23, %v13562_v34 }
 0x85e   : > { %v7196_v25 = vmax.f32 %v7127_v53, 0.0 }
 0x85f   : > { %v6785_v32 = vadd.f32 %v6784_v40, %v6566_v42 }
 0x860   : > { %7228 = vst [vmem:[%s12173_s13 + $0x98] sm:$0xff] %v7196_v25 }
 0x861   : > { %v6969_v18 = vpop.f32.mrf.mxu0  ;;  %v7134_v63 = vpop.f32.mrf.mxu1 }
 0x862   : > { %v6970_v56 = vadd.f32 %v6969_v18, %v6755_v11 }
 0x864   : > { %v7131_v0 = vadd.f32 %v7130_v61, %v6970_v56  ;;  %v6570_v9 = vpop.f32.mrf.mxu2  ;;  %v6790_v15 = vpop.f32.mrf.mxu3  ;;  %v6122_v61 = vadd.f32 %v11939_v23, %v13556_v10  ;;  %v6130_v56 = vadd.f32 %v11939_v23, %v13558_v52 }
 0x866   : > { %v7197_v24 = vmax.f32 %v7131_v0, 0.0  ;;  %v6367_v25 = vadd.f32 %v13557_v8, %v6122_v61 }
 0x868   : > { %7229 = vst [vmem:[%s12173_s13 + $0xa0] sm:$0xff] %v7197_v24  ;;  %v6571_v18 = vadd.f32 %v6570_v9, %v6367_v25  ;;  %v13559_v24 = vld [vmem:[#allocation96_spill] sm:$0xff] }
 0x869   : > { %v6973_v45 = vpop.f32.mrf.mxu0  ;;  %v7138_v7 = vpop.f32.mrf.mxu1  ;;  %v6371_v5 = vadd.f32 %v13559_v24, %v6130_v56 }
 0x86a   : > { %v6974_v36 = vadd.f32 %v6973_v45, %v6761_v46  ;;  %v6791_v59 = vadd.f32 %v6790_v15, %v6571_v18  ;;  %v13565_v15 = vld [vmem:[#allocation48_spill] sm:$0xff] }
 0x86c   : > { %v7135_v6 = vadd.f32 %v7134_v63, %v6974_v36  ;;  %v6575_v53 = vpop.f32.mrf.mxu2  ;;  %v6796_v11 = vpop.f32.mrf.mxu3 }
 0x86e   : > { %v7198_v14 = vmax.f32 %v7135_v6, 0.0  ;;  %v6138_v6 = vadd.f32 %v11939_v23, %v13560_v55 }
 0x870   : > { %7230 = vst [vmem:[%s12173_s13 + $0xa8] sm:$0xff] %v7198_v14 }
 0x871   : > { %v6977_v28 = vpop.f32.mrf.mxu0  ;;  %v7142_v21 = vpop.f32.mrf.mxu1 }
 0x872   : > { %v6978_v54 = vadd.f32 %v6977_v28, %v6767_v58  ;;  %v6375_v58 = vadd.f32 %v13561_v35, %v6138_v6 }
 0x874   : > { %v7139_v31 = vadd.f32 %v7138_v7, %v6978_v54  ;;  %v6580_v45 = vpop.f32.mrf.mxu2  ;;  %v6576_v7 = vadd.f32 %v6575_v53, %v6371_v5  ;;  %v6802_v30 = vpop.f32.mrf.mxu3  ;;  %v13567_v53 = vld [vmem:[#allocation21_spill] sm:$0xff] }
 0x875   : > { %v6581_v54 = vadd.f32 %v6580_v45, %v6375_v58 }
 0x876   : > { %v7199_v38 = vmax.f32 %v7139_v31, 0.0  ;;  %v6797_v43 = vadd.f32 %v6796_v11, %v6576_v7 }
 0x878   : > { %7231 = vst [vmem:[%s12173_s13 + $0xb0] sm:$0xff] %v7199_v38  ;;  %v6803_v38 = vadd.f32 %v6802_v30, %v6581_v54 }
 0x879   : > { %v6981_v39 = vpop.f32.mrf.mxu0  ;;  %v7146_v51 = vpop.f32.mrf.mxu1 }
 0x87a   : > { %v6982_v62 = vadd.f32 %v6981_v39, %v6773_v16  ;;  %v13563_v39 = vld [vmem:[#allocation101_spill] sm:$0xff] }
 0x87c   : > { %v7143_v13 = vadd.f32 %v7142_v21, %v6982_v62  ;;  %v6585_v31 = vpop.f32.mrf.mxu2  ;;  %v6808_v57 = vpop.f32.mrf.mxu3 }
 0x87e   : > { %v7200_v12 = vmax.f32 %v7143_v13, 0.0 }
 0x880   : > { %7232 = vst [vmem:[%s12173_s13 + $0xb8] sm:$0xff] %v7200_v12  ;;  %v7409_v12 = vld [vmem:[%s12402_s10] ss:$0 sm:$0xff] }
 0x881   : > { %v6985_v33 = vpop.f32.mrf.mxu0  ;;  %v7150_v50 = vpop.f32.mrf.mxu1 }
 0x882   : > { %v6986_v48 = vadd.f32 %v6985_v33, %v6779_v4  ;;  %v6154_v4 = vadd.f32 %v7409_v12, %v13564_v27 }
 0x884   : > { %v7147_v22 = vadd.f32 %v7146_v51, %v6986_v48  ;;  %v6379_v51 = vadd.f32 %v13563_v39, %v6146_v47  ;;  %v6590_v23 = vpop.f32.mrf.mxu2  ;;  %v6814_v48 = vpop.f32.mrf.mxu3  ;;  %v6383_v2 = vadd.f32 %v13565_v15, %v6154_v4 }
 0x886   : > { %v7201_v60 = vmax.f32 %v7147_v22, 0.0  ;;  %v6586_v19 = vadd.f32 %v6585_v31, %v6379_v51  ;;  %v6591_v22 = vadd.f32 %v6590_v23, %v6383_v2 }
 0x888   : > { %7233 = vst [vmem:[%s12173_s13 + $0xc0] sm:$0xff] %v7201_v60  ;;  %v6809_v9 = vadd.f32 %v6808_v57, %v6586_v19  ;;  %v13566_v60 = vld [vmem:[#allocation52_spill] sm:$0xff]  ;;  %v6815_v61 = vadd.f32 %v6814_v48, %v6591_v22 }
 0x889   : > { %v6989_v3 = vpop.f32.mrf.mxu0  ;;  %v7154_v17 = vpop.f32.mrf.mxu1  ;;  %v6162_v10 = vadd.f32 %v7409_v12, %v13566_v60 }
 0x88a   : > { %v6990_v49 = vadd.f32 %v6989_v3, %v6785_v32 }
 0x88b   : > { %v6387_v8 = vadd.f32 %v13567_v53, %v6162_v10 }
 0x88c   : > { %v7151_v29 = vadd.f32 %v7150_v50, %v6990_v49  ;;  %v6595_v49 = vpop.f32.mrf.mxu2 }
 0x88d   : > { %v6596_v11 = vadd.f32 %v6595_v49, %v6387_v8 }
 0x88e   : > { %v7202_v63 = vmax.f32 %v7151_v29, 0.0  ;;  %v6820_v29 = vpop.f32.mrf.mxu3 }
 0x890   : > { %7234 = vst [vmem:[%s12173_s13 + $0xc8] sm:$0xff] %v7202_v63  ;;  %v6821_v63 = vadd.f32 %v6820_v29, %v6596_v11 }
 0x891   : > { %v6993_v20 = vpop.f32.mrf.mxu0  ;;  %v7158_v37 = vpop.f32.mrf.mxu1 }
 0x892   : > { %v6994_v0 = vadd.f32 %v6993_v20, %v6791_v59 }
 0x894   : > { %v7155_v46 = vadd.f32 %v7154_v17, %v6994_v0 }
 0x896   : > { %v7203_v36 = vmax.f32 %v7155_v46, 0.0 }
 0x898   : > { %7235 = vst [vmem:[%s12173_s13 + $0xd0] sm:$0xff] %v7203_v36 }
 0x899   : > { %v6997_v44 = vpop.f32.mrf.mxu0  ;;  %v7162_v21 = vpop.f32.mrf.mxu1 }
 0x89a   : > { %v6998_v14 = vadd.f32 %v6997_v44, %v6797_v43 }
 0x89c   : > { %v7159_v28 = vadd.f32 %v7158_v37, %v6998_v14 }
 0x89e   : > { %v7204_v41 = vmax.f32 %v7159_v28, 0.0 }
 0x8a0   : > { %7236 = vst [vmem:[%s12173_s13 + $0xd8] sm:$0xff] %v7204_v41 }
 0x8a1   : > { %v7001_v16 = vpop.f32.mrf.mxu0  ;;  %v7166_v26 = vpop.f32.mrf.mxu1 }
 0x8a2   : > { %v7002_v40 = vadd.f32 %v7001_v16, %v6803_v38 }
 0x8a4   : > { %v7163_v62 = vadd.f32 %v7162_v21, %v7002_v40 }
 0x8a6   : > { %v7205_v13 = vmax.f32 %v7163_v62, 0.0 }
 0x8a8   : > { %7237 = vst [vmem:[%s12173_s13 + $0xe0] sm:$0xff] %v7205_v13 }
 0x8a9   : > { %v7005_v33 = vpop.f32.mrf.mxu0  ;;  %v7170_v32 = vpop.f32.mrf.mxu1 }
 0x8aa   : > { %v7006_v50 = vadd.f32 %v7005_v33, %v6809_v9 }
 0x8ac   : > { %v7167_v1 = vadd.f32 %v7166_v26, %v7006_v50 }
 0x8ae   : > { %v7206_v42 = vmax.f32 %v7167_v1, 0.0 }
 0x8b0   : > { %7238 = vst [vmem:[%s12173_s13 + $0xe8] sm:$0xff] %v7206_v42 }
 0x8b1   : > { %v7009_v3 = vpop.f32.mrf.mxu0  ;;  %v7174_v59 = vpop.f32.mrf.mxu1 }
 0x8b2   : > { %v7010_v17 = vadd.f32 %v7009_v3, %v6815_v61 }
 0x8b4   : > { %v7171_v25 = vadd.f32 %v7170_v32, %v7010_v17 }
 0x8b6   : > { %v7207_v18 = vmax.f32 %v7171_v25, 0.0 }
 0x8b8   : > { %7239 = vst [vmem:[%s12173_s13 + $0xf0] sm:$0xff] %v7207_v18 }
 0x8b9   : > { %v7013_v52 = vpop.f32.mrf.mxu0 }
 0x8ba   : > { %v7014_v56 = vadd.f32 %v7013_v52, %v6821_v63 }
 0x8bc   : > { %v7175_v20 = vadd.f32 %v7174_v59, %v7014_v56 }
 0x8be   : > { %v7208_v0 = vmax.f32 %v7175_v20, 0.0 }
 0x8c0   : > { %7240 = vst [vmem:[%s12173_s13 + $0xf8] sm:$0xff] %v7208_v0 }
 0x8c1   : > { %7437 = shalt.err (!%p7434_p3)
}
 0x8c2   : > { %s7474_s30 = smov 128   ;;  %s7475_s13 = smov 8  }
 0x8c3   : > { %7362 = dma.vmem_to_hbm [thread:$0]  (%p7574_p5), %s7255_s24, 4096, %s7257_s12, %s7242_s21, %s7474_s30, %s7474_s30, %s7475_s13  }
 0x8c4 PF: > { %p7368_p4 = scmp.ge.s32.totalorder %s7472_s20, 2  ;;  %s7271_s22 = sand.u32 1, %s7460_s17  }
 0x8c5   : > { %s7272_s0 = scalar_lea.sflag [#allocation3], %s7271_s22 }
 0x8c6   : > { %p7365_p7 = pnand %p7368_p4, %p7578_p6 }
 0x8c8   : > { %p7366_p8 = pneg %p7365_p7 }
 0x8ca   : > { %7455 = dma.done.wait (%p7366_p8), %s7272_s0, 4096  }
 0x8cb   : > { %7457 = vsyncadd (%p7366_p8), %s7272_s0, 4294963200  ;;  %p21_p9 = scmp.ge.s32.totalorder %s7561_s23, 4   ;;  %s13568_s17 = smov %s7464_s18 }
 0x8cc   : > { %s13569_s18 = smov %s7468_s19  ;;  %s13570_s19 = smov %s7572_s26 }
 0x8cd   : > { %s13571_s20 = smov %s7561_s23  ;;  %23 = sbr.rel (!%p21_p9) target bundleno = 5 (0x5), region = 102 }
 0x8d2   :  { %7278 = vsyncpa [#allocation3], 1 }
 0x8d3   :  { %7280 = vsyncpa [#allocation3 + $0x1], 1 }

</bundles_post_ra>
